<compile_context>
chip_gen: v6e
topology: v6e:2x2x1
jax: 0.10.0
libtpu: 0.0.40
codegen_flags: <defaults>
</compile_context>

<pallas_src>
import functools

import jax
import jax.numpy as jnp
from jax.experimental import pallas as pl
from jax.experimental.pallas import tpu as pltpu


def _round_up(v, m):
    return ((v + m - 1) // m) * m


# -------------------------- GEMM + epilogue kernel --------------------------

def _gemm_kernel(x_ref, w_ref, b_ref, s_ref, t_ref, o_ref, *, relu):
    """out = maybe_relu( ((x @ w) + b) * s + t ); (s, t) fold eval-mode BatchNorm.
    x/w are bf16, accumulation + epilogue in f32, store in o_ref.dtype."""
    acc = jnp.dot(x_ref[...], w_ref[...], preferred_element_type=jnp.float32)
    acc = (acc + b_ref[...]) * s_ref[...] + t_ref[...]
    if relu:
        acc = jnp.maximum(acc, 0.0)
    o_ref[...] = acc.astype(o_ref.dtype)


def gemm_bias_scale(x, w, b, s, t, relu, *, out_dtype=jnp.float32,
                    pad_n=True, tile_m=1024):
    """(M, K) @ (K, N) + per-channel bias/scale/shift, tiled over M ("parallel").

    * K padded only to a sublane multiple of 8 (block covers the full K extent, so no
      128-lane K pad / DMA inflation for conv1's K=35).
    * pad_n=True  -> N padded to 128 lanes (dense vst), result sliced outside.
      pad_n=False -> true N emitted as the full-array dim (masked vst, but no
      pad-and-slice HBM round trip) -- used for the 32/64-channel conv layers.
      TODO(synk): benchmark masked vst (full-dim N) vs padded write per generation.
    * Operands cast to bf16, accumulation/epilogue in f32, stored as out_dtype.
    """
    M, K = x.shape
    N = w.shape[1]
    N_pad = _round_up(N, 128) if pad_n else N
    K_pad = _round_up(K, 8)
    tile = min(tile_m, _round_up(M, 8))
    M_pad = _round_up(M, tile)

    xb = x.astype(jnp.bfloat16)
    if (M_pad, K_pad) != (M, K):
        xb = jnp.pad(xb, ((0, M_pad - M), (0, K_pad - K)))
    wb = w.astype(jnp.bfloat16)
    if (K_pad, N_pad) != (K, N):
        wb = jnp.pad(wb, ((0, K_pad - K), (0, N_pad - N)))
    bp = jnp.pad(b.astype(jnp.float32), (0, N_pad - N)).reshape(1, N_pad)
    sp = jnp.pad(s.astype(jnp.float32), (0, N_pad - N)).reshape(1, N_pad)
    tp = jnp.pad(t.astype(jnp.float32), (0, N_pad - N)).reshape(1, N_pad)

    out = pl.pallas_call(
        functools.partial(_gemm_kernel, relu=relu),
        out_shape=jax.ShapeDtypeStruct((M_pad, N_pad), out_dtype),
        grid=(M_pad // tile,),
        in_specs=[
            pl.BlockSpec((tile, K_pad), lambda i: (i, 0)),
            pl.BlockSpec((K_pad, N_pad), lambda i: (0, 0)),
            pl.BlockSpec((1, N_pad), lambda i: (0, 0)),
            pl.BlockSpec((1, N_pad), lambda i: (0, 0)),
            pl.BlockSpec((1, N_pad), lambda i: (0, 0)),
        ],
        out_specs=pl.BlockSpec((tile, N_pad), lambda i: (i, 0)),
        compiler_params=pltpu.CompilerParams(dimension_semantics=("parallel",)),
    )(xb, wb, bp, sp, tp)
    if M_pad != M or N_pad != N:
        out = out[:M, :N]
    return out


# -------------------------- LSTM recurrence kernel --------------------------

def _lstm_chunk_kernel(gx_ref, whh_ref, o_ref, h_scr, c_scr):
    """LSTM recurrence over one T-chunk for one batch shard.

    gx_ref: (Tc, Bb, 4H) f32 = x @ W_ih + (b_ih + b_hh), precomputed by one big parallel
    GEMM outside; gate columns are pre-permuted to (i, f, o, g) so the serial path does a
    single sigmoid over one contiguous (Bb, 3H) slab and one tanh over (Bb, H).
    h0 = c0 = 0, initialized on the first time-chunk of each batch shard only.
    """
    @pl.when(pl.program_id(1) == 0)
    def _():
        h_scr[...] = jnp.zeros_like(h_scr)
        c_scr[...] = jnp.zeros_like(c_scr)

    H = whh_ref.shape[0]
    Tc = gx_ref.shape[0]

    # TODO(synk): make W_hh weight-stationary via pltpu.matmul_push_rhs /
    # matmul_acc_lhs / matmul_pop so the loop-invariant (H, 4H) RHS is pushed through
    # the MXU once per chunk instead of once per timestep (largest remaining LSTM win).
    def step(t, carry):
        # W_hh deliberately re-read from VMEM each step (no vreg hoist): the reload
        # hides under MXU latency and keeps ~32 vregs free for gate temps (no spills).
        gates = gx_ref[t] + jnp.dot(h_scr[...].astype(jnp.bfloat16), whh_ref[...],
                                    preferred_element_type=jnp.float32)   # (Bb, 4H) f32
        sig = jax.nn.sigmoid(gates[:, :3 * H])          # one EUP slab: i, f, o
        g_g = jnp.tanh(gates[:, 3 * H:])                # (Bb, H)
        c_new = sig[:, H:2 * H] * c_scr[...] + sig[:, :H] * g_g
        h_new = sig[:, 2 * H:3 * H] * jnp.tanh(c_new)
        c_scr[...] = c_new
        h_scr[...] = h_new
        o_ref[t] = h_new
        return carry

    jax.lax.fori_loop(0, Tc, step, 0, unroll=4)


def lstm_recurrence(gx, w_hh_bf16, t_chunk, n_bsplit):
    """gx: (T_pad, B_pad, 4H) f32 precomputed gates (i,f,o,g order); returns
    h: (T_pad, B_pad, H) f32.  Leading "parallel" axis shards the batch across the two
    v7x TensorCores when n_bsplit == 2 (each shard carries its own h/c scratch); the
    time-chunk axis is "arbitrary" (serial) with scratch persisting across chunks."""
    T_pad, B_pad, G = gx.shape
    H = G // 4
    B_blk = B_pad // n_bsplit
    return pl.pallas_call(
        _lstm_chunk_kernel,
        out_shape=jax.ShapeDtypeStruct((T_pad, B_pad, H), jnp.float32),
        grid=(n_bsplit, T_pad // t_chunk),
        in_specs=[
            pl.BlockSpec((t_chunk, B_blk, G), lambda b, i: (i, b, 0)),
            pl.BlockSpec((H, G), lambda b, i: (0, 0)),
        ],
        out_specs=pl.BlockSpec((t_chunk, B_blk, H), lambda b, i: (i, b, 0)),
        scratch_shapes=[pltpu.VMEM((B_blk, H), jnp.float32),
                        pltpu.VMEM((B_blk, H), jnp.float32)],
        compiler_params=pltpu.CompilerParams(
            dimension_semantics=("parallel", "arbitrary")),
    )(gx, w_hh_bf16)


# ------------------------------ FC head kernel ------------------------------

def _fc_kernel(x_ref, g_ref, be_ref, w1_ref, b1_ref, w2_ref, b2_ref,
               w3_ref, b3_ref, o_ref):
    """LayerNorm(128) -> Linear(128,128)+ReLU -> Linear(128,64 pad 128)+ReLU
    -> Linear(64,2 pad 128).  Dropout is identity in eval mode.  LN/bias/ReLU in f32,
    matmuls in bf16 with dense 128-lane tiles (fc2/fc3 zero-padded in the wrapper)."""
    x = x_ref[...]
    mean = jnp.mean(x, axis=-1, keepdims=True)
    var = jnp.mean(jnp.square(x - mean), axis=-1, keepdims=True)
    xn = (x - mean) * jax.lax.rsqrt(var + 1e-5)
    xn = xn * g_ref[...] + be_ref[...]
    h1 = jnp.maximum(
        jnp.dot(xn.astype(jnp.bfloat16), w1_ref[...],
                preferred_element_type=jnp.float32) + b1_ref[...], 0.0)
    h2 = jnp.maximum(
        jnp.dot(h1.astype(jnp.bfloat16), w2_ref[...],
                preferred_element_type=jnp.float32) + b2_ref[...], 0.0)
    o_ref[...] = (jnp.dot(h2.astype(jnp.bfloat16), w3_ref[...],
                          preferred_element_type=jnp.float32)
                  + b3_ref[...]).astype(o_ref.dtype)


def fc_head(x, p, tile_m=256):
    """x: (M, 128) f32; rows are independent, so time/batch ordering is irrelevant here.
    Returns (M, 2) f32 logits (lane-padded to 128 inside, sliced on the tiny result)."""
    M, Hd = x.shape
    tile = min(tile_m, _round_up(M, 8))
    M_pad = _round_up(M, tile)
    if M_pad != M:
        x = jnp.pad(x, ((0, M_pad - M), (0, 0)))
    NP = 128
    # zero-pad fc2 to 128 output lanes and fc3 rows/cols accordingly: padded h2 columns
    # are ReLU(0)=0 and the corresponding fc3 rows are 0, so the result is unchanged.
    w2 = jnp.pad(p['fc2_w'], ((0, 0), (0, NP - 64))).astype(jnp.bfloat16)
    b2 = jnp.pad(p['fc2_b'], (0, NP - 64)).reshape(1, NP)
    w3 = jnp.pad(p['fc3_w'], ((0, NP - 64), (0, NP - 2))).astype(jnp.bfloat16)
    b3 = jnp.pad(p['fc3_b'], (0, NP - 2)).reshape(1, NP)
    out = pl.pallas_call(
        _fc_kernel,
        out_shape=jax.ShapeDtypeStruct((M_pad, NP), jnp.float32),
        grid=(M_pad // tile,),
        in_specs=[
            pl.BlockSpec((tile, Hd), lambda i: (i, 0)),
            pl.BlockSpec((1, Hd), lambda i: (0, 0)),
            pl.BlockSpec((1, Hd), lambda i: (0, 0)),
            pl.BlockSpec((Hd, Hd), lambda i: (0, 0)),
            pl.BlockSpec((1, Hd), lambda i: (0, 0)),
            pl.BlockSpec((Hd, NP), lambda i: (0, 0)),
            pl.BlockSpec((1, NP), lambda i: (0, 0)),
            pl.BlockSpec((NP, NP), lambda i: (0, 0)),
            pl.BlockSpec((1, NP), lambda i: (0, 0)),
        ],
        out_specs=pl.BlockSpec((tile, NP), lambda i: (i, 0)),
        compiler_params=pltpu.CompilerParams(dimension_semantics=("parallel",)),
    )(x, p['ln_g'].reshape(1, Hd), p['ln_b'].reshape(1, Hd),
      p['fc1_w'].astype(jnp.bfloat16), p['fc1_b'].reshape(1, Hd),
      w2, b2, w3, b3)
    return out[:M, :2]


# ---------------- JAX glue (im2col / pooling / plumbing, NHWC) ----------------

def _im2col_nhwc(x, kh, kw, sh, sw, ph, pw):
    # TODO(synk): fuse im2col into the conv GEMM (kh*kw "arbitrary" grid axis with an
    # accumulator scratch) to kill the patch-expansion HBM traffic; kept as JAX glue.
    N, H, W, C = x.shape
    Ho = (H + 2 * ph - kh) // sh + 1
    Wo = (W + 2 * pw - kw) // sw + 1
    xp = jnp.pad(x, ((0, 0), (ph, ph), (pw, pw), (0, 0)))
    cols = []
    for i in range(kh):
        for j in range(kw):
            cols.append(xp[:, i:i + sh * (Ho - 1) + 1:sh,
                               j:j + sw * (Wo - 1) + 1:sw, :])    # (N, Ho, Wo, C)
    p = jnp.stack(cols, axis=3)                                   # (N, Ho, Wo, kh*kw, C)
    return p.reshape(N * Ho * Wo, kh * kw * C), Ho, Wo


def conv2d_nhwc(x, w, b, stride, padding, scale=None, shift=None, relu=True):
    # x: NHWC; w: (O, C, kh, kw) PyTorch layout.
    N = x.shape[0]
    O, C, kh, kw = w.shape
    patches, Ho, Wo = _im2col_nhwc(x, kh, kw, stride[0], stride[1], padding[0], padding[1])
    wf = w.transpose(2, 3, 1, 0).reshape(kh * kw * C, O)          # matches (i, j, c) order
    if scale is None:
        scale = jnp.ones((O,), jnp.float32)
    if shift is None:
        shift = jnp.zeros((O,), jnp.float32)
    # bf16 output (next stage casts to bf16 anyway), true channel count as the
    # full-array N dim -> no pad-and-slice HBM round trip for the 32/64-ch layers.
    y = gemm_bias_scale(patches, wf, b, scale, shift, relu,
                        out_dtype=jnp.bfloat16, pad_n=False)
    return y.reshape(N, Ho, Wo, O)                                # stays NHWC


def maxpool2x2_nhwc(x):
    # TODO(synk): 2x2/stride-2 max-pool kept as plain-JAX glue (tiny reshape+max reduce).
    N, H, W, C = x.shape
    Ho, Wo = H // 2, W // 2
    xc = x[:, :Ho * 2, :Wo * 2, :].reshape(N, Ho, 2, Wo, 2, C)
    return jnp.max(xc, axis=(2, 4))


def _permute_gates_ifgo_to_ifog(w):
    """Permute PyTorch LSTM gate columns (i, f, g, o) -> (i, f, o, g) so the kernel's
    sigmoid acts on one contiguous 3H slab and tanh on one H slab."""
    H4 = w.shape[-1]
    H = H4 // 4
    return jnp.concatenate(
        [w[..., :2 * H], w[..., 3 * H:4 * H], w[..., 2 * H:3 * H]], axis=-1)


def forward(params, x):
    """x: (B, T, 1, 112, 40) float32 -> (B, T, 2) float32."""
    B, T, C, H, W = x.shape
    xc = x.reshape(B * T, C, H, W).transpose(0, 2, 3, 1)          # NHWC once at boundary

    # Conv2d(1->32, (5,7), stride 3, pad 5) + ReLU
    y = conv2d_nhwc(xc, params['conv1_w'], params['conv1_b'], (3, 3), (5, 5), relu=True)
    # Conv2d(32->64, 3x3) + BatchNorm2d(64, eval) + ReLU (BN folded to per-channel s, t)
    s = params['bn_gamma'] * jax.lax.rsqrt(params['bn_var'] + 1e-5)
    t = params['bn_beta'] - s * params['bn_mean']
    y = conv2d_nhwc(y, params['conv2_w'], params['conv2_b'], (1, 1), (0, 0),
                    scale=s, shift=t, relu=True)
    y = maxpool2x2_nhwc(y)
    # Conv2d(64->128, 2x2, stride 2) + ReLU
    y = conv2d_nhwc(y, params['conv3_w'], params['conv3_b'], (2, 2), (0, 0), relu=True)
    y = maxpool2x2_nhwc(y)                                        # (B*T, 4, 1, 128) bf16

    # match PyTorch NCHW Flatten order (C, H, W) -> 512 features
    feat = y.transpose(0, 3, 1, 2).reshape(B * T, -1)             # (B*T, 512) bf16

    # --- 3-layer LSTM, hidden 128, time-major; batch padded to sublanes, T chunked ---
    h = feat.reshape(B, T, -1).transpose(1, 0, 2)                 # (T, B, 512)
    if B > 8:
        B_pad, n_bsplit = _round_up(B, 16), 2                     # v7x: 2-TC batch split
    else:
        B_pad, n_bsplit = _round_up(B, 8), 1
    t_chunk = T if T <= 64 else 64                                # bigger chunks, less T_pad
    T_pad = _round_up(T, t_chunk)
    h = jnp.pad(h, ((0, T_pad - T), (0, B_pad - B), (0, 0)))

    Hh = 128
    ones = jnp.ones((4 * Hh,), jnp.float32)
    zeros = jnp.zeros((4 * Hh,), jnp.float32)
    for l in range(3):
        In = h.shape[-1]
        w_ih = _permute_gates_ifgo_to_ifog(params[f'lstm_wih_{l}'])
        w_hh = _permute_gates_ifgo_to_ifog(params[f'lstm_whh_{l}'])
        bias = _permute_gates_ifgo_to_ifog(params[f'lstm_b_{l}'])
        # Hoisted input projection + combined bias: one big parallel GEMM over all steps.
        gx = gemm_bias_scale(h.reshape(T_pad * B_pad, In), w_ih, bias,
                             ones, zeros, relu=False, out_dtype=jnp.float32)
        gx = gx.reshape(T_pad, B_pad, 4 * Hh)
        h = lstm_recurrence(gx, w_hh.astype(jnp.bfloat16), t_chunk, n_bsplit)

    # Row-independent FC head runs directly on the padded time-major activations; the
    # [:T,:B] slice and (T,B)->(B,T) transpose happen on the tiny 2-wide logits.
    logits = fc_head(h.reshape(T_pad * B_pad, Hh), params)        # (T_pad*B_pad, 2)
    logits = logits.reshape(T_pad, B_pad, 2)[:T, :B].transpose(1, 0, 2)
    return logits


def init_params(key):
    keys = iter(jax.random.split(key, 40))

    def u(shape, scale):
        return jax.random.uniform(next(keys), shape, jnp.float32, -scale, scale)

    p = {}
    # conv stack
    p['conv1_w'] = u((32, 1, 5, 7), (1 * 5 * 7) ** -0.5)
    p['conv1_b'] = u((32,), (1 * 5 * 7) ** -0.5)
    p['conv2_w'] = u((64, 32, 3, 3), (32 * 3 * 3) ** -0.5)
    p['conv2_b'] = u((64,), (32 * 3 * 3) ** -0.5)
    p['bn_gamma'] = 1.0 + u((64,), 0.2)
    p['bn_beta'] = u((64,), 0.1)
    p['bn_mean'] = u((64,), 0.1)
    p['bn_var'] = 0.75 + jnp.abs(u((64,), 0.25))
    p['conv3_w'] = u((128, 64, 2, 2), (64 * 2 * 2) ** -0.5)
    p['conv3_b'] = u((128,), (64 * 2 * 2) ** -0.5)
    # LSTM: hidden 128, 3 layers, input_size 512 then 128 (PyTorch gate order i,f,g,o)
    Hh = 128
    sc = Hh ** -0.5
    for l in range(3):
        In = 512 if l == 0 else Hh
        p[f'lstm_wih_{l}'] = u((In, 4 * Hh), sc)      # transposed PyTorch weight_ih
        p[f'lstm_whh_{l}'] = u((Hh, 4 * Hh), sc)      # transposed PyTorch weight_hh
        p[f'lstm_b_{l}'] = u((4 * Hh,), sc)           # b_ih + b_hh combined
    # FC head
    p['ln_g'] = jnp.ones((Hh,), jnp.float32)
    p['ln_b'] = jnp.zeros((Hh,), jnp.float32)
    p['fc1_w'] = u((Hh, Hh), Hh ** -0.5)
    p['fc1_b'] = u((Hh,), Hh ** -0.5)
    p['fc2_w'] = u((Hh, 64), Hh ** -0.5)
    p['fc2_b'] = u((64,), Hh ** -0.5)
    p['fc3_w'] = u((64, 2), 64 ** -0.5)
    p['fc3_b'] = u((2,), 64 ** -0.5)
    return p


if __name__ == "__main__":
    # Small but architecture-consistent shapes: spatial must be (1, 112, 40) so the
    # conv stack flattens to 512 features (the LSTM's required input_size).
    B, T, C, H, W = 2, 4, 1, 112, 40
    x = jax.random.normal(jax.random.PRNGKey(0), (B, T, C, H, W), dtype=jnp.float32)
    params = init_params(jax.random.PRNGKey(1))

    fwd = jax.jit(forward)
    out = fwd(params, x)
    out = jax.block_until_ready(out)

    assert out.shape == (B, T, 2), out.shape
    assert out.dtype == jnp.float32
    assert bool(jnp.all(jnp.isfinite(out)))
    print("KERNEL_OK")
</pallas_src>

<mosaic_0001>
module attributes {stable_mosaic.version = 11 : i64} {
  func.func @_gemm_kernel(%arg0: i32, %arg1: memref<1024x40xbf16, #tpu.memory_space<vmem>>, %arg2: memref<40x32xbf16, #tpu.memory_space<vmem>>, %arg3: memref<1x32xf32, #tpu.memory_space<vmem>>, %arg4: memref<1x32xf32, #tpu.memory_space<vmem>>, %arg5: memref<1x32xf32, #tpu.memory_space<vmem>>, %arg6: memref<1024x32xbf16, #tpu.memory_space<vmem>>) attributes {dimension_semantics = [#tpu.dimension_semantics<parallel>], iteration_bounds = array<i64: 5>, scalar_prefetch = 0 : i64, scratch_operands = 0 : i64, tpu.core_type = #tpu.core_type<tc>, window_params = [{transform_indices = @transform_0, window_bounds = array<i64: 1024, 40>}, {pipeline_mode = #tpu.pipeline_mode<synchronous>, transform_indices = @transform_1, window_bounds = array<i64: 40, 32>}, {pipeline_mode = #tpu.pipeline_mode<synchronous>, transform_indices = @transform_2, window_bounds = array<i64: 1, 32>}, {pipeline_mode = #tpu.pipeline_mode<synchronous>, transform_indices = @transform_3, window_bounds = array<i64: 1, 32>}, {pipeline_mode = #tpu.pipeline_mode<synchronous>, transform_indices = @transform_4, window_bounds = array<i64: 1, 32>}, {transform_indices = @transform_5, window_bounds = array<i64: 1024, 32>}]} {
    %c0 = arith.constant 0 : index
    %c0_0 = arith.constant 0 : index
    %0 = vector.load %arg1[%c0, %c0_0] : memref<1024x40xbf16, #tpu.memory_space<vmem>>, vector<1024x40xbf16>
    %c0_1 = arith.constant 0 : index
    %c0_2 = arith.constant 0 : index
    %1 = vector.load %arg2[%c0_1, %c0_2] : memref<40x32xbf16, #tpu.memory_space<vmem>>, vector<40x32xbf16>
    %cst = arith.constant dense<0.000000e+00> : vector<1024x32xf32>
    %2 = tpu.matmul %0, %1, %cst {dimension_numbers = #tpu.dot_dimension_numbers<[1], [0], [0], [1], [0, 0, 1, 1], [], []>} : vector<1024x40xbf16>, vector<40x32xbf16>, vector<1024x32xf32> -> vector<1024x32xf32>
    %c0_3 = arith.constant 0 : index
    %c0_4 = arith.constant 0 : index
    %3 = vector.load %arg3[%c0_3, %c0_4] : memref<1x32xf32, #tpu.memory_space<vmem>>, vector<1x32xf32>
    %4 = vector.broadcast %3 : vector<1x32xf32> to vector<1024x32xf32>
    %5 = arith.addf %2, %4 : vector<1024x32xf32>
    %c0_5 = arith.constant 0 : index
    %c0_6 = arith.constant 0 : index
    %6 = vector.load %arg4[%c0_5, %c0_6] : memref<1x32xf32, #tpu.memory_space<vmem>>, vector<1x32xf32>
    %7 = vector.broadcast %6 : vector<1x32xf32> to vector<1024x32xf32>
    %8 = arith.mulf %5, %7 : vector<1024x32xf32>
    %c0_7 = arith.constant 0 : index
    %c0_8 = arith.constant 0 : index
    %9 = vector.load %arg5[%c0_7, %c0_8] : memref<1x32xf32, #tpu.memory_space<vmem>>, vector<1x32xf32>
    %10 = vector.broadcast %9 : vector<1x32xf32> to vector<1024x32xf32>
    %11 = arith.addf %8, %10 : vector<1024x32xf32>
    %cst_9 = arith.constant 0.000000e+00 : f32
    %12 = vector.broadcast %cst_9 : f32 to vector<1024x32xf32>
    %13 = arith.maximumf %11, %12 : vector<1024x32xf32>
    %14 = arith.truncf %13 : vector<1024x32xf32> to vector<1024x32xbf16>
    %c0_10 = arith.constant 0 : index
    %c0_11 = arith.constant 0 : index
    %15 = vector.load %arg6[%c0_10, %c0_11] : memref<1024x32xbf16, #tpu.memory_space<vmem>>, vector<1024x32xbf16>
    tpu.vector_store %arg6[%c0_10, %c0_11], %14 {strides = array<i32>} : memref<1024x32xbf16, #tpu.memory_space<vmem>>, vector<1024x32xbf16>,
    return
  }
  func.func @transform_0(%arg0: i32) -> (i32, i32) {
    %c0_i32 = arith.constant 0 : i32
    %c0_i32_0 = arith.constant 0 : i32
    return %arg0, %c0_i32 : i32, i32
  }
  func.func @transform_1(%arg0: i32) -> (i32, i32) {
    %c0_i32 = arith.constant 0 : i32
    %c0_i32_0 = arith.constant 0 : i32
    %c0_i32_1 = arith.constant 0 : i32
    return %c0_i32, %c0_i32_0 : i32, i32
  }
  func.func @transform_2(%arg0: i32) -> (i32, i32) {
    %c0_i32 = arith.constant 0 : i32
    %c0_i32_0 = arith.constant 0 : i32
    %c0_i32_1 = arith.constant 0 : i32
    return %c0_i32, %c0_i32_0 : i32, i32
  }
  func.func @transform_3(%arg0: i32) -> (i32, i32) {
    %c0_i32 = arith.constant 0 : i32
    %c0_i32_0 = arith.constant 0 : i32
    %c0_i32_1 = arith.constant 0 : i32
    return %c0_i32, %c0_i32_0 : i32, i32
  }
  func.func @transform_4(%arg0: i32) -> (i32, i32) {
    %c0_i32 = arith.constant 0 : i32
    %c0_i32_0 = arith.constant 0 : i32
    %c0_i32_1 = arith.constant 0 : i32
    return %c0_i32, %c0_i32_0 : i32, i32
  }
  func.func @transform_5(%arg0: i32) -> (i32, i32) {
    %c0_i32 = arith.constant 0 : i32
    %c0_i32_0 = arith.constant 0 : i32
    return %arg0, %c0_i32 : i32, i32
  }
}

module attributes {stable_mosaic.version = 11 : i64} {
  func.func @_gemm_kernel(%arg0: i32, %arg1: memref<1024x288xbf16, #tpu.memory_space<vmem>>, %arg2: memref<288x64xbf16, #tpu.memory_space<vmem>>, %arg3: memref<1x64xf32, #tpu.memory_space<vmem>>, %arg4: memref<1x64xf32, #tpu.memory_space<vmem>>, %arg5: memref<1x64xf32, #tpu.memory_space<vmem>>, %arg6: memref<1024x64xbf16, #tpu.memory_space<vmem>>) attributes {dimension_semantics = [#tpu.dimension_semantics<parallel>], iteration_bounds = array<i64: 4>, scalar_prefetch = 0 : i64, scratch_operands = 0 : i64, tpu.core_type = #tpu.core_type<tc>, window_params = [{transform_indices = @transform_0, window_bounds = array<i64: 1024, 288>}, {pipeline_mode = #tpu.pipeline_mode<synchronous>, transform_indices = @transform_1, window_bounds = array<i64: 288, 64>}, {pipeline_mode = #tpu.pipeline_mode<synchronous>, transform_indices = @transform_2, window_bounds = array<i64: 1, 64>}, {pipeline_mode = #tpu.pipeline_mode<synchronous>, transform_indices = @transform_3, window_bounds = array<i64: 1, 64>}, {pipeline_mode = #tpu.pipeline_mode<synchronous>, transform_indices = @transform_4, window_bounds = array<i64: 1, 64>}, {transform_indices = @transform_5, window_bounds = array<i64: 1024, 64>}]} {
    %c0 = arith.constant 0 : index
    %c0_0 = arith.constant 0 : index
    %0 = vector.load %arg1[%c0, %c0_0] : memref<1024x288xbf16, #tpu.memory_space<vmem>>, vector<1024x288xbf16>
    %c0_1 = arith.constant 0 : index
    %c0_2 = arith.constant 0 : index
    %1 = vector.load %arg2[%c0_1, %c0_2] : memref<288x64xbf16, #tpu.memory_space<vmem>>, vector<288x64xbf16>
    %cst = arith.constant dense<0.000000e+00> : vector<1024x64xf32>
    %2 = tpu.matmul %0, %1, %cst {dimension_numbers = #tpu.dot_dimension_numbers<[1], [0], [0], [1], [0, 0, 1, 1], [], []>} : vector<1024x288xbf16>, vector<288x64xbf16>, vector<1024x64xf32> -> vector<1024x64xf32>
    %c0_3 = arith.constant 0 : index
    %c0_4 = arith.constant 0 : index
    %3 = vector.load %arg3[%c0_3, %c0_4] : memref<1x64xf32, #tpu.memory_space<vmem>>, vector<1x64xf32>
    %4 = vector.broadcast %3 : vector<1x64xf32> to vector<1024x64xf32>
    %5 = arith.addf %2, %4 : vector<1024x64xf32>
    %c0_5 = arith.constant 0 : index
    %c0_6 = arith.constant 0 : index
    %6 = vector.load %arg4[%c0_5, %c0_6] : memref<1x64xf32, #tpu.memory_space<vmem>>, vector<1x64xf32>
    %7 = vector.broadcast %6 : vector<1x64xf32> to vector<1024x64xf32>
    %8 = arith.mulf %5, %7 : vector<1024x64xf32>
    %c0_7 = arith.constant 0 : index
    %c0_8 = arith.constant 0 : index
    %9 = vector.load %arg5[%c0_7, %c0_8] : memref<1x64xf32, #tpu.memory_space<vmem>>, vector<1x64xf32>
    %10 = vector.broadcast %9 : vector<1x64xf32> to vector<1024x64xf32>
    %11 = arith.addf %8, %10 : vector<1024x64xf32>
    %cst_9 = arith.constant 0.000000e+00 : f32
    %12 = vector.broadcast %cst_9 : f32 to vector<1024x64xf32>
    %13 = arith.maximumf %11, %12 : vector<1024x64xf32>
    %14 = arith.truncf %13 : vector<1024x64xf32> to vector<1024x64xbf16>
    %c0_10 = arith.constant 0 : index
    %c0_11 = arith.constant 0 : index
    %15 = vector.load %arg6[%c0_10, %c0_11] : memref<1024x64xbf16, #tpu.memory_space<vmem>>, vector<1024x64xbf16>
    tpu.vector_store %arg6[%c0_10, %c0_11], %14 {strides = array<i32>} : memref<1024x64xbf16, #tpu.memory_space<vmem>>, vector<1024x64xbf16>,
    return
  }
  func.func @transform_0(%arg0: i32) -> (i32, i32) {
    %c0_i32 = arith.constant 0 : i32
    %c0_i32_0 = arith.constant 0 : i32
    return %arg0, %c0_i32 : i32, i32
  }
  func.func @transform_1(%arg0: i32) -> (i32, i32) {
    %c0_i32 = arith.constant 0 : i32
    %c0_i32_0 = arith.constant 0 : i32
    %c0_i32_1 = arith.constant 0 : i32
    return %c0_i32, %c0_i32_0 : i32, i32
  }
  func.func @transform_2(%arg0: i32) -> (i32, i32) {
    %c0_i32 = arith.constant 0 : i32
    %c0_i32_0 = arith.constant 0 : i32
    %c0_i32_1 = arith.constant 0 : i32
    return %c0_i32, %c0_i32_0 : i32, i32
  }
  func.func @transform_3(%arg0: i32) -> (i32, i32) {
    %c0_i32 = arith.constant 0 : i32
    %c0_i32_0 = arith.constant 0 : i32
    %c0_i32_1 = arith.constant 0 : i32
    return %c0_i32, %c0_i32_0 : i32, i32
  }
  func.func @transform_4(%arg0: i32) -> (i32, i32) {
    %c0_i32 = arith.constant 0 : i32
    %c0_i32_0 = arith.constant 0 : i32
    %c0_i32_1 = arith.constant 0 : i32
    return %c0_i32, %c0_i32_0 : i32, i32
  }
  func.func @transform_5(%arg0: i32) -> (i32, i32) {
    %c0_i32 = arith.constant 0 : i32
    %c0_i32_0 = arith.constant 0 : i32
    return %arg0, %c0_i32 : i32, i32
  }
}

module attributes {stable_mosaic.version = 11 : i64} {
  func.func @_gemm_kernel(%arg0: i32, %arg1: memref<216x256xbf16, #tpu.memory_space<vmem>>, %arg2: memref<256x128xbf16, #tpu.memory_space<vmem>>, %arg3: memref<1x128xf32, #tpu.memory_space<vmem>>, %arg4: memref<1x128xf32, #tpu.memory_space<vmem>>, %arg5: memref<1x128xf32, #tpu.memory_space<vmem>>, %arg6: memref<216x128xbf16, #tpu.memory_space<vmem>>) attributes {dimension_semantics = [#tpu.dimension_semantics<parallel>], iteration_bounds = array<i64: 1>, scalar_prefetch = 0 : i64, scratch_operands = 0 : i64, tpu.core_type = #tpu.core_type<tc>, window_params = [{transform_indices = @transform_0, window_bounds = array<i64: 216, 256>}, {pipeline_mode = #tpu.pipeline_mode<synchronous>, transform_indices = @transform_1, window_bounds = array<i64: 256, 128>}, {pipeline_mode = #tpu.pipeline_mode<synchronous>, transform_indices = @transform_2, window_bounds = array<i64: 1, 128>}, {pipeline_mode = #tpu.pipeline_mode<synchronous>, transform_indices = @transform_3, window_bounds = array<i64: 1, 128>}, {pipeline_mode = #tpu.pipeline_mode<synchronous>, transform_indices = @transform_4, window_bounds = array<i64: 1, 128>}, {transform_indices = @transform_5, window_bounds = array<i64: 216, 128>}]} {
    %c0 = arith.constant 0 : index
    %c0_0 = arith.constant 0 : index
    %0 = vector.load %arg1[%c0, %c0_0] : memref<216x256xbf16, #tpu.memory_space<vmem>>, vector<216x256xbf16>
    %c0_1 = arith.constant 0 : index
    %c0_2 = arith.constant 0 : index
    %1 = vector.load %arg2[%c0_1, %c0_2] : memref<256x128xbf16, #tpu.memory_space<vmem>>, vector<256x128xbf16>
    %cst = arith.constant dense<0.000000e+00> : vector<216x128xf32>
    %2 = tpu.matmul %0, %1, %cst {dimension_numbers = #tpu.dot_dimension_numbers<[1], [0], [0], [1], [0, 0, 1, 1], [], []>} : vector<216x256xbf16>, vector<256x128xbf16>, vector<216x128xf32> -> vector<216x128xf32>
    %c0_3 = arith.constant 0 : index
    %c0_4 = arith.constant 0 : index
    %3 = vector.load %arg3[%c0_3, %c0_4] : memref<1x128xf32, #tpu.memory_space<vmem>>, vector<1x128xf32>
    %4 = vector.broadcast %3 : vector<1x128xf32> to vector<216x128xf32>
    %5 = arith.addf %2, %4 : vector<216x128xf32>
    %c0_5 = arith.constant 0 : index
    %c0_6 = arith.constant 0 : index
    %6 = vector.load %arg4[%c0_5, %c0_6] : memref<1x128xf32, #tpu.memory_space<vmem>>, vector<1x128xf32>
    %7 = vector.broadcast %6 : vector<1x128xf32> to vector<216x128xf32>
    %8 = arith.mulf %5, %7 : vector<216x128xf32>
    %c0_7 = arith.constant 0 : index
    %c0_8 = arith.constant 0 : index
    %9 = vector.load %arg5[%c0_7, %c0_8] : memref<1x128xf32, #tpu.memory_space<vmem>>, vector<1x128xf32>
    %10 = vector.broadcast %9 : vector<1x128xf32> to vector<216x128xf32>
    %11 = arith.addf %8, %10 : vector<216x128xf32>
    %cst_9 = arith.constant 0.000000e+00 : f32
    %12 = vector.broadcast %cst_9 : f32 to vector<216x128xf32>
    %13 = arith.maximumf %11, %12 : vector<216x128xf32>
    %14 = arith.truncf %13 : vector<216x128xf32> to vector<216x128xbf16>
    %c0_10 = arith.constant 0 : index
    %c0_11 = arith.constant 0 : index
    %15 = vector.load %arg6[%c0_10, %c0_11] : memref<216x128xbf16, #tpu.memory_space<vmem>>, vector<216x128xbf16>
    tpu.vector_store %arg6[%c0_10, %c0_11], %14 {strides = array<i32>} : memref<216x128xbf16, #tpu.memory_space<vmem>>, vector<216x128xbf16>,
    return
  }
  func.func @transform_0(%arg0: i32) -> (i32, i32) {
    %c0_i32 = arith.constant 0 : i32
    %c0_i32_0 = arith.constant 0 : i32
    return %arg0, %c0_i32 : i32, i32
  }
  func.func @transform_1(%arg0: i32) -> (i32, i32) {
    %c0_i32 = arith.constant 0 : i32
    %c0_i32_0 = arith.constant 0 : i32
    %c0_i32_1 = arith.constant 0 : i32
    return %c0_i32, %c0_i32_0 : i32, i32
  }
  func.func @transform_2(%arg0: i32) -> (i32, i32) {
    %c0_i32 = arith.constant 0 : i32
    %c0_i32_0 = arith.constant 0 : i32
    %c0_i32_1 = arith.constant 0 : i32
    return %c0_i32, %c0_i32_0 : i32, i32
  }
  func.func @transform_3(%arg0: i32) -> (i32, i32) {
    %c0_i32 = arith.constant 0 : i32
    %c0_i32_0 = arith.constant 0 : i32
    %c0_i32_1 = arith.constant 0 : i32
    return %c0_i32, %c0_i32_0 : i32, i32
  }
  func.func @transform_4(%arg0: i32) -> (i32, i32) {
    %c0_i32 = arith.constant 0 : i32
    %c0_i32_0 = arith.constant 0 : i32
    %c0_i32_1 = arith.constant 0 : i32
    return %c0_i32, %c0_i32_0 : i32, i32
  }
  func.func @transform_5(%arg0: i32) -> (i32, i32) {
    %c0_i32 = arith.constant 0 : i32
    %c0_i32_0 = arith.constant 0 : i32
    return %arg0, %c0_i32 : i32, i32
  }
}

module attributes {stable_mosaic.version = 11 : i64} {
  func.func @_gemm_kernel(%arg0: i32, %arg1: memref<32x512xbf16, #tpu.memory_space<vmem>>, %arg2: memref<512x512xbf16, #tpu.memory_space<vmem>>, %arg3: memref<1x512xf32, #tpu.memory_space<vmem>>, %arg4: memref<1x512xf32, #tpu.memory_space<vmem>>, %arg5: memref<1x512xf32, #tpu.memory_space<vmem>>, %arg6: memref<32x512xf32, #tpu.memory_space<vmem>>) attributes {dimension_semantics = [#tpu.dimension_semantics<parallel>], iteration_bounds = array<i64: 1>, scalar_prefetch = 0 : i64, scratch_operands = 0 : i64, tpu.core_type = #tpu.core_type<tc>, window_params = [{transform_indices = @transform_0, window_bounds = array<i64: 32, 512>}, {pipeline_mode = #tpu.pipeline_mode<synchronous>, transform_indices = @transform_1, window_bounds = array<i64: 512, 512>}, {pipeline_mode = #tpu.pipeline_mode<synchronous>, transform_indices = @transform_2, window_bounds = array<i64: 1, 512>}, {pipeline_mode = #tpu.pipeline_mode<synchronous>, transform_indices = @transform_3, window_bounds = array<i64: 1, 512>}, {pipeline_mode = #tpu.pipeline_mode<synchronous>, transform_indices = @transform_4, window_bounds = array<i64: 1, 512>}, {transform_indices = @transform_5, window_bounds = array<i64: 32, 512>}]} {
    %c0 = arith.constant 0 : index
    %c0_0 = arith.constant 0 : index
    %0 = vector.load %arg1[%c0, %c0_0] : memref<32x512xbf16, #tpu.memory_space<vmem>>, vector<32x512xbf16>
    %c0_1 = arith.constant 0 : index
    %c0_2 = arith.constant 0 : index
    %1 = vector.load %arg2[%c0_1, %c0_2] : memref<512x512xbf16, #tpu.memory_space<vmem>>, vector<512x512xbf16>
    %cst = arith.constant dense<0.000000e+00> : vector<32x512xf32>
    %2 = tpu.matmul %0, %1, %cst {dimension_numbers = #tpu.dot_dimension_numbers<[1], [0], [0], [1], [0, 0, 1, 1], [], []>} : vector<32x512xbf16>, vector<512x512xbf16>, vector<32x512xf32> -> vector<32x512xf32>
    %c0_3 = arith.constant 0 : index
    %c0_4 = arith.constant 0 : index
    %3 = vector.load %arg3[%c0_3, %c0_4] : memref<1x512xf32, #tpu.memory_space<vmem>>, vector<1x512xf32>
    %4 = vector.broadcast %3 : vector<1x512xf32> to vector<32x512xf32>
    %5 = arith.addf %2, %4 : vector<32x512xf32>
    %c0_5 = arith.constant 0 : index
    %c0_6 = arith.constant 0 : index
    %6 = vector.load %arg4[%c0_5, %c0_6] : memref<1x512xf32, #tpu.memory_space<vmem>>, vector<1x512xf32>
    %7 = vector.broadcast %6 : vector<1x512xf32> to vector<32x512xf32>
    %8 = arith.mulf %5, %7 : vector<32x512xf32>
    %c0_7 = arith.constant 0 : index
    %c0_8 = arith.constant 0 : index
    %9 = vector.load %arg5[%c0_7, %c0_8] : memref<1x512xf32, #tpu.memory_space<vmem>>, vector<1x512xf32>
    %10 = vector.broadcast %9 : vector<1x512xf32> to vector<32x512xf32>
    %11 = arith.addf %8, %10 : vector<32x512xf32>
    %c0_9 = arith.constant 0 : index
    %c0_10 = arith.constant 0 : index
    %12 = vector.load %arg6[%c0_9, %c0_10] : memref<32x512xf32, #tpu.memory_space<vmem>>, vector<32x512xf32>
    tpu.vector_store %arg6[%c0_9, %c0_10], %11 {strides = array<i32>} : memref<32x512xf32, #tpu.memory_space<vmem>>, vector<32x512xf32>,
    return
  }
  func.func @transform_0(%arg0: i32) -> (i32, i32) {
    %c0_i32 = arith.constant 0 : i32
    %c0_i32_0 = arith.constant 0 : i32
    return %arg0, %c0_i32 : i32, i32
  }
  func.func @transform_1(%arg0: i32) -> (i32, i32) {
    %c0_i32 = arith.constant 0 : i32
    %c0_i32_0 = arith.constant 0 : i32
    %c0_i32_1 = arith.constant 0 : i32
    return %c0_i32, %c0_i32_0 : i32, i32
  }
  func.func @transform_2(%arg0: i32) -> (i32, i32) {
    %c0_i32 = arith.constant 0 : i32
    %c0_i32_0 = arith.constant 0 : i32
    %c0_i32_1 = arith.constant 0 : i32
    return %c0_i32, %c0_i32_0 : i32, i32
  }
  func.func @transform_3(%arg0: i32) -> (i32, i32) {
    %c0_i32 = arith.constant 0 : i32
    %c0_i32_0 = arith.constant 0 : i32
    %c0_i32_1 = arith.constant 0 : i32
    return %c0_i32, %c0_i32_0 : i32, i32
  }
  func.func @transform_4(%arg0: i32) -> (i32, i32) {
    %c0_i32 = arith.constant 0 : i32
    %c0_i32_0 = arith.constant 0 : i32
    %c0_i32_1 = arith.constant 0 : i32
    return %c0_i32, %c0_i32_0 : i32, i32
  }
  func.func @transform_5(%arg0: i32) -> (i32, i32) {
    %c0_i32 = arith.constant 0 : i32
    %c0_i32_0 = arith.constant 0 : i32
    return %arg0, %c0_i32 : i32, i32
  }
}

module attributes {stable_mosaic.version = 11 : i64} {
  func.func @_lstm_chunk_kernel(%arg0: i32, %arg1: i32, %arg2: memref<4x8x512xf32, #tpu.memory_space<vmem>>, %arg3: memref<128x512xbf16, #tpu.memory_space<vmem>>, %arg4: memref<4x8x128xf32, #tpu.memory_space<vmem>>, %arg5: memref<8x128xf32, #tpu.memory_space<vmem>>, %arg6: memref<8x128xf32, #tpu.memory_space<vmem>>) attributes {dimension_semantics = [#tpu.dimension_semantics<parallel>, #tpu.dimension_semantics<arbitrary>], iteration_bounds = array<i64: 1, 1>, scalar_prefetch = 0 : i64, scratch_operands = 2 : i64, tpu.core_type = #tpu.core_type<tc>, window_params = [{transform_indices = @transform_0, window_bounds = array<i64: 4, 8, 512>}, {pipeline_mode = #tpu.pipeline_mode<synchronous>, transform_indices = @transform_1, window_bounds = array<i64: 128, 512>}, {transform_indices = @transform_2, window_bounds = array<i64: 4, 8, 128>}]} {
    %c0_i32 = arith.constant 0 : i32
    %0 = arith.cmpi eq, %arg1, %c0_i32 : i32
    %1 = arith.extui %0 : i1 to i32
    %c0_i32_0 = arith.constant 0 : i32
    %2 = arith.cmpi ne, %1, %c0_i32_0 : i32
    scf.if %2 {
      %cst_64 = arith.constant 0.000000e+00 : f32
      %127 = vector.broadcast %cst_64 : f32 to vector<8x128xf32>
      %c0_65 = arith.constant 0 : index
      %c0_66 = arith.constant 0 : index
      %128 = vector.load %arg5[%c0_65, %c0_66] : memref<8x128xf32, #tpu.memory_space<vmem>>, vector<8x128xf32>
      tpu.vector_store %arg5[%c0_65, %c0_66], %127 {strides = array<i32>} : memref<8x128xf32, #tpu.memory_space<vmem>>, vector<8x128xf32>,
      %cst_67 = arith.constant 0.000000e+00 : f32
      %129 = vector.broadcast %cst_67 : f32 to vector<8x128xf32>
      %c0_68 = arith.constant 0 : index
      %c0_69 = arith.constant 0 : index
      %130 = vector.load %arg6[%c0_68, %c0_69] : memref<8x128xf32, #tpu.memory_space<vmem>>, vector<8x128xf32>
      tpu.vector_store %arg6[%c0_68, %c0_69], %129 {strides = array<i32>} : memref<8x128xf32, #tpu.memory_space<vmem>>, vector<8x128xf32>,
    } else {
    }
    %c0_i32_1 = arith.constant 0 : i32
    %3 = arith.index_cast %c0_i32_1 : i32 to index
    %c0 = arith.constant 0 : index
    %c0_2 = arith.constant 0 : index
    %4 = vector.load %arg2[%3, %c0, %c0_2] : memref<4x8x512xf32, #tpu.memory_space<vmem>>, vector<1x8x512xf32>
    %5 = vector.shape_cast %4 : vector<1x8x512xf32> to vector<8x512xf32>
    %c0_3 = arith.constant 0 : index
    %c0_4 = arith.constant 0 : index
    %6 = vector.load %arg5[%c0_3, %c0_4] : memref<8x128xf32, #tpu.memory_space<vmem>>, vector<8x128xf32>
    %7 = arith.truncf %6 : vector<8x128xf32> to vector<8x128xbf16>
    %c0_5 = arith.constant 0 : index
    %c0_6 = arith.constant 0 : index
    %8 = vector.load %arg3[%c0_5, %c0_6] : memref<128x512xbf16, #tpu.memory_space<vmem>>, vector<128x512xbf16>
    %cst = arith.constant dense<0.000000e+00> : vector<8x512xf32>
    %9 = tpu.matmul %7, %8, %cst {dimension_numbers = #tpu.dot_dimension_numbers<[1], [0], [0], [1], [0, 0, 1, 1], [], []>} : vector<8x128xbf16>, vector<128x512xbf16>, vector<8x512xf32> -> vector<8x512xf32>
    %10 = arith.addf %5, %9 : vector<8x512xf32>
    %11 = vector.extract_strided_slice %10 {offsets = [0, 0], sizes = [8, 384], strides = [1, 1]} : vector<8x512xf32> to vector<8x384xf32>
    %12 = arith.negf %11 : vector<8x384xf32>
    %13 = math.exp %12 : vector<8x384xf32>
    %cst_7 = arith.constant 1.000000e+00 : f32
    %14 = vector.broadcast %cst_7 : f32 to vector<8x384xf32>
    %15 = arith.addf %14, %13 : vector<8x384xf32>
    %16 = arith.divf %14, %15 : vector<8x384xf32>
    %17 = vector.extract_strided_slice %10 {offsets = [0, 384], sizes = [8, 128], strides = [1, 1]} : vector<8x512xf32> to vector<8x128xf32>
    %18 = math.tanh %17 : vector<8x128xf32>
    %19 = vector.extract_strided_slice %16 {offsets = [0, 128], sizes = [8, 128], strides = [1, 1]} : vector<8x384xf32> to vector<8x128xf32>
    %c0_8 = arith.constant 0 : index
    %c0_9 = arith.constant 0 : index
    %20 = vector.load %arg6[%c0_8, %c0_9] : memref<8x128xf32, #tpu.memory_space<vmem>>, vector<8x128xf32>
    %21 = arith.mulf %19, %20 : vector<8x128xf32>
    %22 = vector.extract_strided_slice %16 {offsets = [0, 0], sizes = [8, 128], strides = [1, 1]} : vector<8x384xf32> to vector<8x128xf32>
    %23 = arith.mulf %22, %18 : vector<8x128xf32>
    %24 = arith.addf %21, %23 : vector<8x128xf32>
    %25 = vector.extract_strided_slice %16 {offsets = [0, 256], sizes = [8, 128], strides = [1, 1]} : vector<8x384xf32> to vector<8x128xf32>
    %26 = math.tanh %24 : vector<8x128xf32>
    %27 = arith.mulf %25, %26 : vector<8x128xf32>
    %c0_10 = arith.constant 0 : index
    %c0_11 = arith.constant 0 : index
    %28 = vector.load %arg6[%c0_10, %c0_11] : memref<8x128xf32, #tpu.memory_space<vmem>>, vector<8x128xf32>
    tpu.vector_store %arg6[%c0_10, %c0_11], %24 {strides = array<i32>} : memref<8x128xf32, #tpu.memory_space<vmem>>, vector<8x128xf32>,
    %c0_12 = arith.constant 0 : index
    %c0_13 = arith.constant 0 : index
    %29 = vector.load %arg5[%c0_12, %c0_13] : memref<8x128xf32, #tpu.memory_space<vmem>>, vector<8x128xf32>
    tpu.vector_store %arg5[%c0_12, %c0_13], %27 {strides = array<i32>} : memref<8x128xf32, #tpu.memory_space<vmem>>, vector<8x128xf32>,
    %30 = arith.index_cast %c0_i32_1 : i32 to index
    %c0_14 = arith.constant 0 : index
    %c0_15 = arith.constant 0 : index
    %31 = vector.load %arg4[%30, %c0_14, %c0_15] : memref<4x8x128xf32, #tpu.memory_space<vmem>>, vector<1x8x128xf32>
    %32 = vector.shape_cast %31 : vector<1x8x128xf32> to vector<8x128xf32>
    %33 = vector.shape_cast %27 : vector<8x128xf32> to vector<1x8x128xf32>
    tpu.vector_store %arg4[%30, %c0_14, %c0_15], %33 {strides = array<i32>} : memref<4x8x128xf32, #tpu.memory_space<vmem>>, vector<1x8x128xf32>,
    %c1_i32 = arith.constant 1 : i32
    %34 = arith.index_cast %c1_i32 : i32 to index
    %c0_16 = arith.constant 0 : index
    %c0_17 = arith.constant 0 : index
    %35 = vector.load %arg2[%34, %c0_16, %c0_17] : memref<4x8x512xf32, #tpu.memory_space<vmem>>, vector<1x8x512xf32>
    %36 = vector.shape_cast %35 : vector<1x8x512xf32> to vector<8x512xf32>
    %c0_18 = arith.constant 0 : index
    %c0_19 = arith.constant 0 : index
    %37 = vector.load %arg5[%c0_18, %c0_19] : memref<8x128xf32, #tpu.memory_space<vmem>>, vector<8x128xf32>
    %38 = arith.truncf %37 : vector<8x128xf32> to vector<8x128xbf16>
    %c0_20 = arith.constant 0 : index
    %c0_21 = arith.constant 0 : index
    %39 = vector.load %arg3[%c0_20, %c0_21] : memref<128x512xbf16, #tpu.memory_space<vmem>>, vector<128x512xbf16>
    %cst_22 = arith.constant dense<0.000000e+00> : vector<8x512xf32>
    %40 = tpu.matmul %38, %39, %cst_22 {dimension_numbers = #tpu.dot_dimension_numbers<[1], [0], [0], [1], [0, 0, 1, 1], [], []>} : vector<8x128xbf16>, vector<128x512xbf16>, vector<8x512xf32> -> vector<8x512xf32>
    %41 = arith.addf %36, %40 : vector<8x512xf32>
    %42 = vector.extract_strided_slice %41 {offsets = [0, 0], sizes = [8, 384], strides = [1, 1]} : vector<8x512xf32> to vector<8x384xf32>
    %43 = arith.negf %42 : vector<8x384xf32>
    %44 = math.exp %43 : vector<8x384xf32>
    %cst_23 = arith.constant 1.000000e+00 : f32
    %45 = vector.broadcast %cst_23 : f32 to vector<8x384xf32>
    %46 = arith.addf %45, %44 : vector<8x384xf32>
    %47 = arith.divf %45, %46 : vector<8x384xf32>
    %48 = vector.extract_strided_slice %41 {offsets = [0, 384], sizes = [8, 128], strides = [1, 1]} : vector<8x512xf32> to vector<8x128xf32>
    %49 = math.tanh %48 : vector<8x128xf32>
    %50 = vector.extract_strided_slice %47 {offsets = [0, 128], sizes = [8, 128], strides = [1, 1]} : vector<8x384xf32> to vector<8x128xf32>
    %c0_24 = arith.constant 0 : index
    %c0_25 = arith.constant 0 : index
    %51 = vector.load %arg6[%c0_24, %c0_25] : memref<8x128xf32, #tpu.memory_space<vmem>>, vector<8x128xf32>
    %52 = arith.mulf %50, %51 : vector<8x128xf32>
    %53 = vector.extract_strided_slice %47 {offsets = [0, 0], sizes = [8, 128], strides = [1, 1]} : vector<8x384xf32> to vector<8x128xf32>
    %54 = arith.mulf %53, %49 : vector<8x128xf32>
    %55 = arith.addf %52, %54 : vector<8x128xf32>
    %56 = vector.extract_strided_slice %47 {offsets = [0, 256], sizes = [8, 128], strides = [1, 1]} : vector<8x384xf32> to vector<8x128xf32>
    %57 = math.tanh %55 : vector<8x128xf32>
    %58 = arith.mulf %56, %57 : vector<8x128xf32>
    %c0_26 = arith.constant 0 : index
    %c0_27 = arith.constant 0 : index
    %59 = vector.load %arg6[%c0_26, %c0_27] : memref<8x128xf32, #tpu.memory_space<vmem>>, vector<8x128xf32>
    tpu.vector_store %arg6[%c0_26, %c0_27], %55 {strides = array<i32>} : memref<8x128xf32, #tpu.memory_space<vmem>>, vector<8x128xf32>,
    %c0_28 = arith.constant 0 : index
    %c0_29 = arith.constant 0 : index
    %60 = vector.load %arg5[%c0_28, %c0_29] : memref<8x128xf32, #tpu.memory_space<vmem>>, vector<8x128xf32>
    tpu.vector_store %arg5[%c0_28, %c0_29], %58 {strides = array<i32>} : memref<8x128xf32, #tpu.memory_space<vmem>>, vector<8x128xf32>,
    %61 = arith.index_cast %c1_i32 : i32 to index
    %c0_30 = arith.constant 0 : index
    %c0_31 = arith.constant 0 : index
    %62 = vector.load %arg4[%61, %c0_30, %c0_31] : memref<4x8x128xf32, #tpu.memory_space<vmem>>, vector<1x8x128xf32>
    %63 = vector.shape_cast %62 : vector<1x8x128xf32> to vector<8x128xf32>
    %64 = vector.shape_cast %58 : vector<8x128xf32> to vector<1x8x128xf32>
    tpu.vector_store %arg4[%61, %c0_30, %c0_31], %64 {strides = array<i32>} : memref<4x8x128xf32, #tpu.memory_space<vmem>>, vector<1x8x128xf32>,
    %c2_i32 = arith.constant 2 : i32
    %65 = arith.index_cast %c2_i32 : i32 to index
    %c0_32 = arith.constant 0 : index
    %c0_33 = arith.constant 0 : index
    %66 = vector.load %arg2[%65, %c0_32, %c0_33] : memref<4x8x512xf32, #tpu.memory_space<vmem>>, vector<1x8x512xf32>
    %67 = vector.shape_cast %66 : vector<1x8x512xf32> to vector<8x512xf32>
    %c0_34 = arith.constant 0 : index
    %c0_35 = arith.constant 0 : index
    %68 = vector.load %arg5[%c0_34, %c0_35] : memref<8x128xf32, #tpu.memory_space<vmem>>, vector<8x128xf32>
    %69 = arith.truncf %68 : vector<8x128xf32> to vector<8x128xbf16>
    %c0_36 = arith.constant 0 : index
    %c0_37 = arith.constant 0 : index
    %70 = vector.load %arg3[%c0_36, %c0_37] : memref<128x512xbf16, #tpu.memory_space<vmem>>, vector<128x512xbf16>
    %cst_38 = arith.constant dense<0.000000e+00> : vector<8x512xf32>
    %71 = tpu.matmul %69, %70, %cst_38 {dimension_numbers = #tpu.dot_dimension_numbers<[1], [0], [0], [1], [0, 0, 1, 1], [], []>} : vector<8x128xbf16>, vector<128x512xbf16>, vector<8x512xf32> -> vector<8x512xf32>
    %72 = arith.addf %67, %71 : vector<8x512xf32>
    %73 = vector.extract_strided_slice %72 {offsets = [0, 0], sizes = [8, 384], strides = [1, 1]} : vector<8x512xf32> to vector<8x384xf32>
    %74 = arith.negf %73 : vector<8x384xf32>
    %75 = math.exp %74 : vector<8x384xf32>
    %cst_39 = arith.constant 1.000000e+00 : f32
    %76 = vector.broadcast %cst_39 : f32 to vector<8x384xf32>
    %77 = arith.addf %76, %75 : vector<8x384xf32>
    %78 = arith.divf %76, %77 : vector<8x384xf32>
    %79 = vector.extract_strided_slice %72 {offsets = [0, 384], sizes = [8, 128], strides = [1, 1]} : vector<8x512xf32> to vector<8x128xf32>
    %80 = math.tanh %79 : vector<8x128xf32>
    %81 = vector.extract_strided_slice %78 {offsets = [0, 128], sizes = [8, 128], strides = [1, 1]} : vector<8x384xf32> to vector<8x128xf32>
    %c0_40 = arith.constant 0 : index
    %c0_41 = arith.constant 0 : index
    %82 = vector.load %arg6[%c0_40, %c0_41] : memref<8x128xf32, #tpu.memory_space<vmem>>, vector<8x128xf32>
    %83 = arith.mulf %81, %82 : vector<8x128xf32>
    %84 = vector.extract_strided_slice %78 {offsets = [0, 0], sizes = [8, 128], strides = [1, 1]} : vector<8x384xf32> to vector<8x128xf32>
    %85 = arith.mulf %84, %80 : vector<8x128xf32>
    %86 = arith.addf %83, %85 : vector<8x128xf32>
    %87 = vector.extract_strided_slice %78 {offsets = [0, 256], sizes = [8, 128], strides = [1, 1]} : vector<8x384xf32> to vector<8x128xf32>
    %88 = math.tanh %86 : vector<8x128xf32>
    %89 = arith.mulf %87, %88 : vector<8x128xf32>
    %c0_42 = arith.constant 0 : index
    %c0_43 = arith.constant 0 : index
    %90 = vector.load %arg6[%c0_42, %c0_43] : memref<8x128xf32, #tpu.memory_space<vmem>>, vector<8x128xf32>
    tpu.vector_store %arg6[%c0_42, %c0_43], %86 {strides = array<i32>} : memref<8x128xf32, #tpu.memory_space<vmem>>, vector<8x128xf32>,
    %c0_44 = arith.constant 0 : index
    %c0_45 = arith.constant 0 : index
    %91 = vector.load %arg5[%c0_44, %c0_45] : memref<8x128xf32, #tpu.memory_space<vmem>>, vector<8x128xf32>
    tpu.vector_store %arg5[%c0_44, %c0_45], %89 {strides = array<i32>} : memref<8x128xf32, #tpu.memory_space<vmem>>, vector<8x128xf32>,
    %92 = arith.index_cast %c2_i32 : i32 to index
    %c0_46 = arith.constant 0 : index
    %c0_47 = arith.constant 0 : index
    %93 = vector.load %arg4[%92, %c0_46, %c0_47] : memref<4x8x128xf32, #tpu.memory_space<vmem>>, vector<1x8x128xf32>
    %94 = vector.shape_cast %93 : vector<1x8x128xf32> to vector<8x128xf32>
    %95 = vector.shape_cast %89 : vector<8x128xf32> to vector<1x8x128xf32>
    tpu.vector_store %arg4[%92, %c0_46, %c0_47], %95 {strides = array<i32>} : memref<4x8x128xf32, #tpu.memory_space<vmem>>, vector<1x8x128xf32>,
    %c3_i32 = arith.constant 3 : i32
    %96 = arith.index_cast %c3_i32 : i32 to index
    %c0_48 = arith.constant 0 : index
    %c0_49 = arith.constant 0 : index
    %97 = vector.load %arg2[%96, %c0_48, %c0_49] : memref<4x8x512xf32, #tpu.memory_space<vmem>>, vector<1x8x512xf32>
    %98 = vector.shape_cast %97 : vector<1x8x512xf32> to vector<8x512xf32>
    %c0_50 = arith.constant 0 : index
    %c0_51 = arith.constant 0 : index
    %99 = vector.load %arg5[%c0_50, %c0_51] : memref<8x128xf32, #tpu.memory_space<vmem>>, vector<8x128xf32>
    %100 = arith.truncf %99 : vector<8x128xf32> to vector<8x128xbf16>
    %c0_52 = arith.constant 0 : index
    %c0_53 = arith.constant 0 : index
    %101 = vector.load %arg3[%c0_52, %c0_53] : memref<128x512xbf16, #tpu.memory_space<vmem>>, vector<128x512xbf16>
    %cst_54 = arith.constant dense<0.000000e+00> : vector<8x512xf32>
    %102 = tpu.matmul %100, %101, %cst_54 {dimension_numbers = #tpu.dot_dimension_numbers<[1], [0], [0], [1], [0, 0, 1, 1], [], []>} : vector<8x128xbf16>, vector<128x512xbf16>, vector<8x512xf32> -> vector<8x512xf32>
    %103 = arith.addf %98, %102 : vector<8x512xf32>
    %104 = vector.extract_strided_slice %103 {offsets = [0, 0], sizes = [8, 384], strides = [1, 1]} : vector<8x512xf32> to vector<8x384xf32>
    %105 = arith.negf %104 : vector<8x384xf32>
    %106 = math.exp %105 : vector<8x384xf32>
    %cst_55 = arith.constant 1.000000e+00 : f32
    %107 = vector.broadcast %cst_55 : f32 to vector<8x384xf32>
    %108 = arith.addf %107, %106 : vector<8x384xf32>
    %109 = arith.divf %107, %108 : vector<8x384xf32>
    %110 = vector.extract_strided_slice %103 {offsets = [0, 384], sizes = [8, 128], strides = [1, 1]} : vector<8x512xf32> to vector<8x128xf32>
    %111 = math.tanh %110 : vector<8x128xf32>
    %112 = vector.extract_strided_slice %109 {offsets = [0, 128], sizes = [8, 128], strides = [1, 1]} : vector<8x384xf32> to vector<8x128xf32>
    %c0_56 = arith.constant 0 : index
    %c0_57 = arith.constant 0 : index
    %113 = vector.load %arg6[%c0_56, %c0_57] : memref<8x128xf32, #tpu.memory_space<vmem>>, vector<8x128xf32>
    %114 = arith.mulf %112, %113 : vector<8x128xf32>
    %115 = vector.extract_strided_slice %109 {offsets = [0, 0], sizes = [8, 128], strides = [1, 1]} : vector<8x384xf32> to vector<8x128xf32>
    %116 = arith.mulf %115, %111 : vector<8x128xf32>
    %117 = arith.addf %114, %116 : vector<8x128xf32>
    %118 = vector.extract_strided_slice %109 {offsets = [0, 256], sizes = [8, 128], strides = [1, 1]} : vector<8x384xf32> to vector<8x128xf32>
    %119 = math.tanh %117 : vector<8x128xf32>
    %120 = arith.mulf %118, %119 : vector<8x128xf32>
    %c0_58 = arith.constant 0 : index
    %c0_59 = arith.constant 0 : index
    %121 = vector.load %arg6[%c0_58, %c0_59] : memref<8x128xf32, #tpu.memory_space<vmem>>, vector<8x128xf32>
    tpu.vector_store %arg6[%c0_58, %c0_59], %117 {strides = array<i32>} : memref<8x128xf32, #tpu.memory_space<vmem>>, vector<8x128xf32>,
    %c0_60 = arith.constant 0 : index
    %c0_61 = arith.constant 0 : index
    %122 = vector.load %arg5[%c0_60, %c0_61] : memref<8x128xf32, #tpu.memory_space<vmem>>, vector<8x128xf32>
    tpu.vector_store %arg5[%c0_60, %c0_61], %120 {strides = array<i32>} : memref<8x128xf32, #tpu.memory_space<vmem>>, vector<8x128xf32>,
    %123 = arith.index_cast %c3_i32 : i32 to index
    %c0_62 = arith.constant 0 : index
    %c0_63 = arith.constant 0 : index
    %124 = vector.load %arg4[%123, %c0_62, %c0_63] : memref<4x8x128xf32, #tpu.memory_space<vmem>>, vector<1x8x128xf32>
    %125 = vector.shape_cast %124 : vector<1x8x128xf32> to vector<8x128xf32>
    %126 = vector.shape_cast %120 : vector<8x128xf32> to vector<1x8x128xf32>
    tpu.vector_store %arg4[%123, %c0_62, %c0_63], %126 {strides = array<i32>} : memref<4x8x128xf32, #tpu.memory_space<vmem>>, vector<1x8x128xf32>,
    %c4_i32 = arith.constant 4 : i32
    return
  }
  func.func @transform_0(%arg0: i32, %arg1: i32) -> (i32, i32, i32) {
    %c0_i32 = arith.constant 0 : i32
    %c0_i32_0 = arith.constant 0 : i32
    return %arg1, %arg0, %c0_i32 : i32, i32, i32
  }
  func.func @transform_1(%arg0: i32, %arg1: i32) -> (i32, i32) {
    %c0_i32 = arith.constant 0 : i32
    %c0_i32_0 = arith.constant 0 : i32
    %c0_i32_1 = arith.constant 0 : i32
    return %c0_i32, %c0_i32_0 : i32, i32
  }
  func.func @transform_2(%arg0: i32, %arg1: i32) -> (i32, i32, i32) {
    %c0_i32 = arith.constant 0 : i32
    %c0_i32_0 = arith.constant 0 : i32
    return %arg1, %arg0, %c0_i32 : i32, i32, i32
  }
}

module attributes {stable_mosaic.version = 11 : i64} {
  func.func @_gemm_kernel(%arg0: i32, %arg1: memref<32x128xbf16, #tpu.memory_space<vmem>>, %arg2: memref<128x512xbf16, #tpu.memory_space<vmem>>, %arg3: memref<1x512xf32, #tpu.memory_space<vmem>>, %arg4: memref<1x512xf32, #tpu.memory_space<vmem>>, %arg5: memref<1x512xf32, #tpu.memory_space<vmem>>, %arg6: memref<32x512xf32, #tpu.memory_space<vmem>>) attributes {dimension_semantics = [#tpu.dimension_semantics<parallel>], iteration_bounds = array<i64: 1>, scalar_prefetch = 0 : i64, scratch_operands = 0 : i64, tpu.core_type = #tpu.core_type<tc>, window_params = [{transform_indices = @transform_0, window_bounds = array<i64: 32, 128>}, {pipeline_mode = #tpu.pipeline_mode<synchronous>, transform_indices = @transform_1, window_bounds = array<i64: 128, 512>}, {pipeline_mode = #tpu.pipeline_mode<synchronous>, transform_indices = @transform_2, window_bounds = array<i64: 1, 512>}, {pipeline_mode = #tpu.pipeline_mode<synchronous>, transform_indices = @transform_3, window_bounds = array<i64: 1, 512>}, {pipeline_mode = #tpu.pipeline_mode<synchronous>, transform_indices = @transform_4, window_bounds = array<i64: 1, 512>}, {transform_indices = @transform_5, window_bounds = array<i64: 32, 512>}]} {
    %c0 = arith.constant 0 : index
    %c0_0 = arith.constant 0 : index
    %0 = vector.load %arg1[%c0, %c0_0] : memref<32x128xbf16, #tpu.memory_space<vmem>>, vector<32x128xbf16>
    %c0_1 = arith.constant 0 : index
    %c0_2 = arith.constant 0 : index
    %1 = vector.load %arg2[%c0_1, %c0_2] : memref<128x512xbf16, #tpu.memory_space<vmem>>, vector<128x512xbf16>
    %cst = arith.constant dense<0.000000e+00> : vector<32x512xf32>
    %2 = tpu.matmul %0, %1, %cst {dimension_numbers = #tpu.dot_dimension_numbers<[1], [0], [0], [1], [0, 0, 1, 1], [], []>} : vector<32x128xbf16>, vector<128x512xbf16>, vector<32x512xf32> -> vector<32x512xf32>
    %c0_3 = arith.constant 0 : index
    %c0_4 = arith.constant 0 : index
    %3 = vector.load %arg3[%c0_3, %c0_4] : memref<1x512xf32, #tpu.memory_space<vmem>>, vector<1x512xf32>
    %4 = vector.broadcast %3 : vector<1x512xf32> to vector<32x512xf32>
    %5 = arith.addf %2, %4 : vector<32x512xf32>
    %c0_5 = arith.constant 0 : index
    %c0_6 = arith.constant 0 : index
    %6 = vector.load %arg4[%c0_5, %c0_6] : memref<1x512xf32, #tpu.memory_space<vmem>>, vector<1x512xf32>
    %7 = vector.broadcast %6 : vector<1x512xf32> to vector<32x512xf32>
    %8 = arith.mulf %5, %7 : vector<32x512xf32>
    %c0_7 = arith.constant 0 : index
    %c0_8 = arith.constant 0 : index
    %9 = vector.load %arg5[%c0_7, %c0_8] : memref<1x512xf32, #tpu.memory_space<vmem>>, vector<1x512xf32>
    %10 = vector.broadcast %9 : vector<1x512xf32> to vector<32x512xf32>
    %11 = arith.addf %8, %10 : vector<32x512xf32>
    %c0_9 = arith.constant 0 : index
    %c0_10 = arith.constant 0 : index
    %12 = vector.load %arg6[%c0_9, %c0_10] : memref<32x512xf32, #tpu.memory_space<vmem>>, vector<32x512xf32>
    tpu.vector_store %arg6[%c0_9, %c0_10], %11 {strides = array<i32>} : memref<32x512xf32, #tpu.memory_space<vmem>>, vector<32x512xf32>,
    return
  }
  func.func @transform_0(%arg0: i32) -> (i32, i32) {
    %c0_i32 = arith.constant 0 : i32
    %c0_i32_0 = arith.constant 0 : i32
    return %arg0, %c0_i32 : i32, i32
  }
  func.func @transform_1(%arg0: i32) -> (i32, i32) {
    %c0_i32 = arith.constant 0 : i32
    %c0_i32_0 = arith.constant 0 : i32
    %c0_i32_1 = arith.constant 0 : i32
    return %c0_i32, %c0_i32_0 : i32, i32
  }
  func.func @transform_2(%arg0: i32) -> (i32, i32) {
    %c0_i32 = arith.constant 0 : i32
    %c0_i32_0 = arith.constant 0 : i32
    %c0_i32_1 = arith.constant 0 : i32
    return %c0_i32, %c0_i32_0 : i32, i32
  }
  func.func @transform_3(%arg0: i32) -> (i32, i32) {
    %c0_i32 = arith.constant 0 : i32
    %c0_i32_0 = arith.constant 0 : i32
    %c0_i32_1 = arith.constant 0 : i32
    return %c0_i32, %c0_i32_0 : i32, i32
  }
  func.func @transform_4(%arg0: i32) -> (i32, i32) {
    %c0_i32 = arith.constant 0 : i32
    %c0_i32_0 = arith.constant 0 : i32
    %c0_i32_1 = arith.constant 0 : i32
    return %c0_i32, %c0_i32_0 : i32, i32
  }
  func.func @transform_5(%arg0: i32) -> (i32, i32) {
    %c0_i32 = arith.constant 0 : i32
    %c0_i32_0 = arith.constant 0 : i32
    return %arg0, %c0_i32 : i32, i32
  }
}

module attributes {stable_mosaic.version = 11 : i64} {
  func.func @_fc_kernel(%arg0: i32, %arg1: memref<32x128xf32, #tpu.memory_space<vmem>>, %arg2: memref<1x128xf32, #tpu.memory_space<vmem>>, %arg3: memref<1x128xf32, #tpu.memory_space<vmem>>, %arg4: memref<128x128xbf16, #tpu.memory_space<vmem>>, %arg5: memref<1x128xf32, #tpu.memory_space<vmem>>, %arg6: memref<128x128xbf16, #tpu.memory_space<vmem>>, %arg7: memref<1x128xf32, #tpu.memory_space<vmem>>, %arg8: memref<128x128xbf16, #tpu.memory_space<vmem>>, %arg9: memref<1x128xf32, #tpu.memory_space<vmem>>, %arg10: memref<32x128xf32, #tpu.memory_space<vmem>>) attributes {dimension_semantics = [#tpu.dimension_semantics<parallel>], iteration_bounds = array<i64: 1>, scalar_prefetch = 0 : i64, scratch_operands = 0 : i64, tpu.core_type = #tpu.core_type<tc>, window_params = [{transform_indices = @transform_0, window_bounds = array<i64: 32, 128>}, {pipeline_mode = #tpu.pipeline_mode<synchronous>, transform_indices = @transform_1, window_bounds = array<i64: 1, 128>}, {pipeline_mode = #tpu.pipeline_mode<synchronous>, transform_indices = @transform_2, window_bounds = array<i64: 1, 128>}, {pipeline_mode = #tpu.pipeline_mode<synchronous>, transform_indices = @transform_3, window_bounds = array<i64: 128, 128>}, {pipeline_mode = #tpu.pipeline_mode<synchronous>, transform_indices = @transform_4, window_bounds = array<i64: 1, 128>}, {pipeline_mode = #tpu.pipeline_mode<synchronous>, transform_indices = @transform_5, window_bounds = array<i64: 128, 128>}, {pipeline_mode = #tpu.pipeline_mode<synchronous>, transform_indices = @transform_6, window_bounds = array<i64: 1, 128>}, {pipeline_mode = #tpu.pipeline_mode<synchronous>, transform_indices = @transform_7, window_bounds = array<i64: 128, 128>}, {pipeline_mode = #tpu.pipeline_mode<synchronous>, transform_indices = @transform_8, window_bounds = array<i64: 1, 128>}, {transform_indices = @transform_9, window_bounds = array<i64: 32, 128>}]} {
    %c0 = arith.constant 0 : index
    %c0_0 = arith.constant 0 : index
    %0 = vector.load %arg1[%c0, %c0_0] : memref<32x128xf32, #tpu.memory_space<vmem>>, vector<32x128xf32>
    %cst = arith.constant dense<0.000000e+00> : vector<32xf32>
    %1 = vector.multi_reduction <add>, %0, %cst [1] : vector<32x128xf32> to vector<32xf32>
    %2 = vector.shape_cast %1 : vector<32xf32> to vector<32x1xf32>
    %cst_1 = arith.constant 1.280000e+02 : f32
    %3 = vector.broadcast %cst_1 : f32 to vector<32x1xf32>
    %4 = arith.divf %2, %3 : vector<32x1xf32>
    %5 = vector.broadcast %4 : vector<32x1xf32> to vector<32x128xf32>
    %6 = arith.subf %0, %5 : vector<32x128xf32>
    %7 = arith.mulf %6, %6 : vector<32x128xf32>
    %cst_2 = arith.constant dense<0.000000e+00> : vector<32xf32>
    %8 = vector.multi_reduction <add>, %7, %cst_2 [1] : vector<32x128xf32> to vector<32xf32>
    %9 = vector.shape_cast %8 : vector<32xf32> to vector<32x1xf32>
    %cst_3 = arith.constant 1.280000e+02 : f32
    %10 = vector.broadcast %cst_3 : f32 to vector<32x1xf32>
    %11 = arith.divf %9, %10 : vector<32x1xf32>
    %12 = vector.broadcast %4 : vector<32x1xf32> to vector<32x128xf32>
    %13 = arith.subf %0, %12 : vector<32x128xf32>
    %cst_4 = arith.constant 9.99999974E-6 : f32
    %14 = vector.broadcast %cst_4 : f32 to vector<32x1xf32>
    %15 = arith.addf %11, %14 : vector<32x1xf32>
    %16 = math.rsqrt %15 : vector<32x1xf32>
    %17 = vector.broadcast %16 : vector<32x1xf32> to vector<32x128xf32>
    %18 = arith.mulf %13, %17 : vector<32x128xf32>
    %c0_5 = arith.constant 0 : index
    %c0_6 = arith.constant 0 : index
    %19 = vector.load %arg2[%c0_5, %c0_6] : memref<1x128xf32, #tpu.memory_space<vmem>>, vector<1x128xf32>
    %20 = vector.broadcast %19 : vector<1x128xf32> to vector<32x128xf32>
    %21 = arith.mulf %18, %20 : vector<32x128xf32>
    %c0_7 = arith.constant 0 : index
    %c0_8 = arith.constant 0 : index
    %22 = vector.load %arg3[%c0_7, %c0_8] : memref<1x128xf32, #tpu.memory_space<vmem>>, vector<1x128xf32>
    %23 = vector.broadcast %22 : vector<1x128xf32> to vector<32x128xf32>
    %24 = arith.addf %21, %23 : vector<32x128xf32>
    %25 = arith.truncf %24 : vector<32x128xf32> to vector<32x128xbf16>
    %c0_9 = arith.constant 0 : index
    %c0_10 = arith.constant 0 : index
    %26 = vector.load %arg4[%c0_9, %c0_10] : memref<128x128xbf16, #tpu.memory_space<vmem>>, vector<128x128xbf16>
    %cst_11 = arith.constant dense<0.000000e+00> : vector<32x128xf32>
    %27 = tpu.matmul %25, %26, %cst_11 {dimension_numbers = #tpu.dot_dimension_numbers<[1], [0], [0], [1], [0, 0, 1, 1], [], []>} : vector<32x128xbf16>, vector<128x128xbf16>, vector<32x128xf32> -> vector<32x128xf32>
    %c0_12 = arith.constant 0 : index
    %c0_13 = arith.constant 0 : index
    %28 = vector.load %arg5[%c0_12, %c0_13] : memref<1x128xf32, #tpu.memory_space<vmem>>, vector<1x128xf32>
    %29 = vector.broadcast %28 : vector<1x128xf32> to vector<32x128xf32>
    %30 = arith.addf %27, %29 : vector<32x128xf32>
    %cst_14 = arith.constant 0.000000e+00 : f32
    %31 = vector.broadcast %cst_14 : f32 to vector<32x128xf32>
    %32 = arith.maximumf %30, %31 : vector<32x128xf32>
    %33 = arith.truncf %32 : vector<32x128xf32> to vector<32x128xbf16>
    %c0_15 = arith.constant 0 : index
    %c0_16 = arith.constant 0 : index
    %34 = vector.load %arg6[%c0_15, %c0_16] : memref<128x128xbf16, #tpu.memory_space<vmem>>, vector<128x128xbf16>
    %cst_17 = arith.constant dense<0.000000e+00> : vector<32x128xf32>
    %35 = tpu.matmul %33, %34, %cst_17 {dimension_numbers = #tpu.dot_dimension_numbers<[1], [0], [0], [1], [0, 0, 1, 1], [], []>} : vector<32x128xbf16>, vector<128x128xbf16>, vector<32x128xf32> -> vector<32x128xf32>
    %c0_18 = arith.constant 0 : index
    %c0_19 = arith.constant 0 : index
    %36 = vector.load %arg7[%c0_18, %c0_19] : memref<1x128xf32, #tpu.memory_space<vmem>>, vector<1x128xf32>
    %37 = vector.broadcast %36 : vector<1x128xf32> to vector<32x128xf32>
    %38 = arith.addf %35, %37 : vector<32x128xf32>
    %cst_20 = arith.constant 0.000000e+00 : f32
    %39 = vector.broadcast %cst_20 : f32 to vector<32x128xf32>
    %40 = arith.maximumf %38, %39 : vector<32x128xf32>
    %41 = arith.truncf %40 : vector<32x128xf32> to vector<32x128xbf16>
    %c0_21 = arith.constant 0 : index
    %c0_22 = arith.constant 0 : index
    %42 = vector.load %arg8[%c0_21, %c0_22] : memref<128x128xbf16, #tpu.memory_space<vmem>>, vector<128x128xbf16>
    %cst_23 = arith.constant dense<0.000000e+00> : vector<32x128xf32>
    %43 = tpu.matmul %41, %42, %cst_23 {dimension_numbers = #tpu.dot_dimension_numbers<[1], [0], [0], [1], [0, 0, 1, 1], [], []>} : vector<32x128xbf16>, vector<128x128xbf16>, vector<32x128xf32> -> vector<32x128xf32>
    %c0_24 = arith.constant 0 : index
    %c0_25 = arith.constant 0 : index
    %44 = vector.load %arg9[%c0_24, %c0_25] : memref<1x128xf32, #tpu.memory_space<vmem>>, vector<1x128xf32>
    %45 = vector.broadcast %44 : vector<1x128xf32> to vector<32x128xf32>
    %46 = arith.addf %43, %45 : vector<32x128xf32>
    %c0_26 = arith.constant 0 : index
    %c0_27 = arith.constant 0 : index
    %47 = vector.load %arg10[%c0_26, %c0_27] : memref<32x128xf32, #tpu.memory_space<vmem>>, vector<32x128xf32>
    tpu.vector_store %arg10[%c0_26, %c0_27], %46 {strides = array<i32>} : memref<32x128xf32, #tpu.memory_space<vmem>>, vector<32x128xf32>,
    return
  }
  func.func @transform_0(%arg0: i32) -> (i32, i32) {
    %c0_i32 = arith.constant 0 : i32
    %c0_i32_0 = arith.constant 0 : i32
    return %arg0, %c0_i32 : i32, i32
  }
  func.func @transform_1(%arg0: i32) -> (i32, i32) {
    %c0_i32 = arith.constant 0 : i32
    %c0_i32_0 = arith.constant 0 : i32
    %c0_i32_1 = arith.constant 0 : i32
    return %c0_i32, %c0_i32_0 : i32, i32
  }
  func.func @transform_2(%arg0: i32) -> (i32, i32) {
    %c0_i32 = arith.constant 0 : i32
    %c0_i32_0 = arith.constant 0 : i32
    %c0_i32_1 = arith.constant 0 : i32
    return %c0_i32, %c0_i32_0 : i32, i32
  }
  func.func @transform_3(%arg0: i32) -> (i32, i32) {
    %c0_i32 = arith.constant 0 : i32
    %c0_i32_0 = arith.constant 0 : i32
    %c0_i32_1 = arith.constant 0 : i32
    return %c0_i32, %c0_i32_0 : i32, i32
  }
  func.func @transform_4(%arg0: i32) -> (i32, i32) {
    %c0_i32 = arith.constant 0 : i32
    %c0_i32_0 = arith.constant 0 : i32
    %c0_i32_1 = arith.constant 0 : i32
    return %c0_i32, %c0_i32_0 : i32, i32
  }
  func.func @transform_5(%arg0: i32) -> (i32, i32) {
    %c0_i32 = arith.constant 0 : i32
    %c0_i32_0 = arith.constant 0 : i32
    %c0_i32_1 = arith.constant 0 : i32
    return %c0_i32, %c0_i32_0 : i32, i32
  }
  func.func @transform_6(%arg0: i32) -> (i32, i32) {
    %c0_i32 = arith.constant 0 : i32
    %c0_i32_0 = arith.constant 0 : i32
    %c0_i32_1 = arith.constant 0 : i32
    return %c0_i32, %c0_i32_0 : i32, i32
  }
  func.func @transform_7(%arg0: i32) -> (i32, i32) {
    %c0_i32 = arith.constant 0 : i32
    %c0_i32_0 = arith.constant 0 : i32
    %c0_i32_1 = arith.constant 0 : i32
    return %c0_i32, %c0_i32_0 : i32, i32
  }
  func.func @transform_8(%arg0: i32) -> (i32, i32) {
    %c0_i32 = arith.constant 0 : i32
    %c0_i32_0 = arith.constant 0 : i32
    %c0_i32_1 = arith.constant 0 : i32
    return %c0_i32, %c0_i32_0 : i32, i32
  }
  func.func @transform_9(%arg0: i32) -> (i32, i32) {
    %c0_i32 = arith.constant 0 : i32
    %c0_i32_0 = arith.constant 0 : i32
    return %arg0, %c0_i32 : i32, i32
  }
}

</mosaic_0001>

<bundles_post_ra>
// kernel: forward.10
= control target key start
LH: loop header
LB: loop body
LE: loop exit
PB: predicated region body
PF: predicated region fallthrough
CT: control target
= control target key end

     0   :  { %s3267_s18 = smov 0   ;;  %s4324_s0 = inlined_call_operand.vmem [shape: bf16[5120,40], index: 0, kind: input, shape index: {}]   ;;  %s4325_s1 = inlined_call_operand.vmem [shape: bf16[40,32], index: 1, kind: input, shape index: {}]   ;;  %s4326_s2 = inlined_call_operand.vmem [shape: f32[1,32], index: 2, kind: input, shape index: {}]   ;;  %s4327_s3 = inlined_call_operand.vmem [shape: f32[1,32], index: 3, kind: input, shape index: {}]   ;;  %s4328_s4 = inlined_call_operand.vmem [shape: f32[1,32], index: 4, kind: input, shape index: {}]   ;;  %s4329_s5 = inlined_call_operand.vmem [shape: bf16[5120,32], index: 5, kind: output, shape index: {}]  }
   0x1 LB: > { %s2541_s19 = sadd.s32 4294967295, %s3235_s18   ;;  %p2545_p0 = scmp.ge.s32.totalorder %s3235_s18, 1  ;;  %s3235_s18 = sphi %s3267_s18, %s15_s18  }
   0x2   : > { %p188_p1 = scmp.lt.s32.totalorder %s3235_s18, 6 }
   0x4   : > { %p189_p2 = pnand %p2545_p0, %p188_p1 }
   0x5   : > { %s2546_s24 = sshll.u32 (!%p189_p2), %s2541_s19, 7 }
   0x6   : > { %192 = sbr.rel (%p189_p2) target bundleno = 400 (0x190), region = 40  ;;  %p217_p3 = scmp.lt.s32.totalorder (!%p189_p2), %s2546_s24, 639 }
   0xb   : > { %v3159_v0 = vld [vmem:[%s4325_s1 + $0x10] ss:$0 sps:$4 sm:$0xff]   ;;  %vm897_vm0 = vcmask 1043456   ;;  %v3160_v1 = vld [vmem:[%s4325_s1 + $0x8] sm:$0xff]   ;;  %v3161_v3 = vld [vmem:[%s4325_s1] sm:$0xff]   ;;  %s4331_s24 = smov (!%p217_p3, %s2546_s24), 639 }
   0xc   : > { %3149 = vmatprep.subr.msk.bf16.mxu0 %vm897_vm0, %v3159_v0  ;;  %3150 = vmatprep.subr.msk.bf16.mxu1 %vm897_vm0, %v3159_v0  ;;  %v899_v2 = vsel %vm897_vm0, %v3159_v0, 0  ;;  %s2547_s27 = sshll.u32 %s4331_s24, 2  ;;  %vm704_vm1 = vcmask 326656   ;;  %vm2356_vm2 = vcmask 257024  }
   0xd   : > { %3010 = vmatpush3.bf16.msra.mxu0 %v899_v2  ;;  %3146 = vmatpush3.bf16.msra.mxu1 %v899_v2  ;;  %s3292_s30 = scalar_lea.vmem %s4324_s0, %s2547_s27  ;;  %s3456_s14 = scalar_lea.vmem %s4329_s5, %s2547_s27 }
   0xe   : > { %3011 = vmatprep.subr.bf16.mxu0 %v3160_v1  ;;  %3144 = vmatprep.subr.bf16.mxu1 %v3160_v1  ;;  %v3162_v4 = vld [vmem:[%s3292_s30] sm:$0xff]   ;;  %v3164_v6 = vld [vmem:[%s3292_s30 + $0x8] sm:$0xff]   ;;  %v3166_v8 = vld [vmem:[%s3292_s30 + $0x10] sm:$0xff]  }
   0xf   : > { %v3163_v5 = vld [vmem:[%s3292_s30 + $0x100] sm:$0xff]   ;;  %3015 = vmatprep.mubr.msk.bf16.mxu0 %vm704_vm1, %v3162_v4  ;;  %v3165_v7 = vld [vmem:[%s3292_s30 + $0x108] sm:$0xff]   ;;  %v3167_v9 = vld [vmem:[%s3292_s30 + $0x110] sm:$0xff]  }
  0x10   : > { %3079 = vmatprep.mubr.msk.bf16.mxu1 %vm704_vm1, %v3163_v5  ;;  %v3168_v10 = vld [vmem:[%s3292_s30 + $0x18] sm:$0xff]   ;;  %v3170_v12 = vld [vmem:[%s3292_s30 + $0x20] sm:$0xff]   ;;  %v3172_v14 = vld [vmem:[%s3292_s30 + $0x28] sm:$0xff]  }
  0x11   : > { %3012 = vmatpush3.bf16.msra.mxu0 %v3160_v1  ;;  %3147 = vmatpush3.bf16.msra.mxu1 %v3160_v1  ;;  %v3169_v11 = vld [vmem:[%s3292_s30 + $0x118] sm:$0xff]   ;;  %v3171_v13 = vld [vmem:[%s3292_s30 + $0x120] sm:$0xff]   ;;  %v3173_v15 = vld [vmem:[%s3292_s30 + $0x128] sm:$0xff]  }
  0x12   : > { %3013 = vmatprep.subr.bf16.mxu0 %v3161_v3  ;;  %3145 = vmatprep.subr.bf16.mxu1 %v3161_v3  ;;  %v3174_v16 = vld [vmem:[%s3292_s30 + $0x30] sm:$0xff]   ;;  %v3176_v18 = vld [vmem:[%s3292_s30 + $0x38] sm:$0xff]   ;;  %v3178_v20 = vld [vmem:[%s3292_s30 + $0x40] sm:$0xff]  }
  0x13   : > { %v3175_v17 = vld [vmem:[%s3292_s30 + $0x130] sm:$0xff]   ;;  %v3177_v19 = vld [vmem:[%s3292_s30 + $0x138] sm:$0xff]   ;;  %v3179_v21 = vld [vmem:[%s3292_s30 + $0x140] sm:$0xff]  }
  0x14   : > { %v3180_v22 = vld [vmem:[%s3292_s30 + $0x48] sm:$0xff]   ;;  %v3182_v24 = vld [vmem:[%s3292_s30 + $0x50] sm:$0xff]   ;;  %v3184_v26 = vld [vmem:[%s3292_s30 + $0x58] sm:$0xff]  }
  0x15   : > { %3014 = vmatpush3.bf16.msra.mxu0 %v3161_v3  ;;  %3148 = vmatpush3.bf16.msra.mxu1 %v3161_v3  ;;  %v3181_v23 = vld [vmem:[%s3292_s30 + $0x148] sm:$0xff]   ;;  %v3183_v25 = vld [vmem:[%s3292_s30 + $0x150] sm:$0xff]   ;;  %v3185_v27 = vld [vmem:[%s3292_s30 + $0x158] sm:$0xff]  }
  0x16   : > { %v3186_v28 = vld [vmem:[%s3292_s30 + $0x60] sm:$0xff]   ;;  %v3188_v30 = vld [vmem:[%s3292_s30 + $0x68] sm:$0xff]   ;;  %v3190_v32 = vld [vmem:[%s3292_s30 + $0x70] sm:$0xff]  }
  0x17   : > { %v3187_v29 = vld [vmem:[%s3292_s30 + $0x160] sm:$0xff]   ;;  %v3189_v31 = vld [vmem:[%s3292_s30 + $0x168] sm:$0xff]   ;;  %v3191_v33 = vld [vmem:[%s3292_s30 + $0x170] sm:$0xff]  }
  0x18   : > { %3016 = vmatmul.mubr.msk.bf16.vlgmr.msra.gmra.mxu0 %vm704_vm1, %v3164_v6  ;;  %3080 = vmatmul.mubr.msk.bf16.vlgmr.msra.gmra.mxu1 %vm704_vm1, %v3165_v7  ;;  %v3192_v34 = vld [vmem:[%s3292_s30 + $0x78] sm:$0xff]   ;;  %v3194_v36 = vld [vmem:[%s3292_s30 + $0x80] sm:$0xff]   ;;  %v3196_v38 = vld [vmem:[%s3292_s30 + $0x88] sm:$0xff]  }
  0x19   : > { %3019 = vmatprep.mubr.msk.bf16.mxu0 %vm704_vm1, %v3166_v8  ;;  %3083 = vmatprep.mubr.msk.bf16.mxu1 %vm704_vm1, %v3167_v9  ;;  %v3193_v35 = vld [vmem:[%s3292_s30 + $0x178] sm:$0xff]   ;;  %v3195_v37 = vld [vmem:[%s3292_s30 + $0x180] sm:$0xff]   ;;  %v3197_v39 = vld [vmem:[%s3292_s30 + $0x188] sm:$0xff]  }
  0x1a   : > { %v3198_v40 = vld [vmem:[%s3292_s30 + $0x90] sm:$0xff]   ;;  %v3200_v42 = vld [vmem:[%s3292_s30 + $0x98] sm:$0xff]   ;;  %v3202_v44 = vld [vmem:[%s3292_s30 + $0xa0] sm:$0xff]  }
  0x1b   : > { %v3199_v41 = vld [vmem:[%s3292_s30 + $0x190] sm:$0xff]   ;;  %v3201_v43 = vld [vmem:[%s3292_s30 + $0x198] sm:$0xff]   ;;  %v3203_v45 = vld [vmem:[%s3292_s30 + $0x1a0] sm:$0xff]  }
  0x1c   : > { %v3204_v46 = vld [vmem:[%s3292_s30 + $0xa8] sm:$0xff]   ;;  %v3206_v48 = vld [vmem:[%s3292_s30 + $0xb0] sm:$0xff]   ;;  %v3208_v50 = vld [vmem:[%s3292_s30 + $0xb8] sm:$0xff]  }
  0x1d   : > { %v3205_v47 = vld [vmem:[%s3292_s30 + $0x1a8] sm:$0xff]   ;;  %v3207_v49 = vld [vmem:[%s3292_s30 + $0x1b0] sm:$0xff]   ;;  %v3209_v51 = vld [vmem:[%s3292_s30 + $0x1b8] sm:$0xff]  }
  0x1e   : > { %v3210_v52 = vld [vmem:[%s3292_s30 + $0xc0] sm:$0xff]   ;;  %v3212_v54 = vld [vmem:[%s3292_s30 + $0xc8] sm:$0xff]   ;;  %v3214_v56 = vld [vmem:[%s3292_s30 + $0xd0] sm:$0xff]  }
  0x1f   : > { %v3211_v53 = vld [vmem:[%s3292_s30 + $0x1c0] sm:$0xff]   ;;  %v3213_v55 = vld [vmem:[%s3292_s30 + $0x1c8] sm:$0xff]   ;;  %v3215_v57 = vld [vmem:[%s3292_s30 + $0x1d0] sm:$0xff]  }
  0x20   : > { %3020 = vmatmul.mubr.msk.bf16.gmra.mxu0 %vm704_vm1, %v3168_v10  ;;  %3084 = vmatmul.mubr.msk.bf16.gmra.mxu1 %vm704_vm1, %v3169_v11  ;;  %v3216_v58 = vld [vmem:[%s3292_s30 + $0xd8] sm:$0xff]   ;;  %v3218_v60 = vld [vmem:[%s3292_s30 + $0xe0] sm:$0xff]   ;;  %v3220_v62 = vld [vmem:[%s3292_s30 + $0xe8] sm:$0xff]  }
  0x21   : > { %3023 = vmatprep.mubr.msk.bf16.mxu0 %vm704_vm1, %v3170_v12  ;;  %3087 = vmatprep.mubr.msk.bf16.mxu1 %vm704_vm1, %v3171_v13  ;;  %v3217_v59 = vld [vmem:[%s3292_s30 + $0x1d8] sm:$0xff]   ;;  %v3219_v61 = vld [vmem:[%s3292_s30 + $0x1e0] sm:$0xff]   ;;  %v3221_v63 = vld [vmem:[%s3292_s30 + $0x1e8] sm:$0xff]  }
  0x22   : > { %v3222_v0 = vld [vmem:[%s3292_s30 + $0xf0] sm:$0xff]   ;;  %v3224_v2 = vld [vmem:[%s3292_s30 + $0xf8] sm:$0xff]   ;;  %v3425_v4 = vld [vmem:[%s4326_s2] ss:$0 sm:$0xff] }
  0x23   : > { %v3223_v1 = vld [vmem:[%s3292_s30 + $0x1f0] sm:$0xff]   ;;  %v3225_v3 = vld [vmem:[%s3292_s30 + $0x1f8] sm:$0xff]   ;;  %v3430_v6 = vld [vmem:[%s4327_s3] ss:$0 sm:$0xff] }
  0x24   : > { %v3437_v10 = vld [vmem:[%s4328_s4] ss:$0 sm:$0xff] }
  0x28   : > { %3024 = vmatmul.mubr.msk.bf16.gmra.mxu0 %vm704_vm1, %v3172_v14  ;;  %3088 = vmatmul.mubr.msk.bf16.gmra.mxu1 %vm704_vm1, %v3173_v15 }
  0x29   : > { %3027 = vmatprep.mubr.msk.bf16.mxu0 %vm704_vm1, %v3174_v16  ;;  %3091 = vmatprep.mubr.msk.bf16.mxu1 %vm704_vm1, %v3175_v17 }
  0x30   : > { %3028 = vmatmul.mubr.msk.bf16.gmra.mxu0 %vm704_vm1, %v3176_v18  ;;  %3092 = vmatmul.mubr.msk.bf16.gmra.mxu1 %vm704_vm1, %v3177_v19 }
  0x31   : > { %3031 = vmatprep.mubr.msk.bf16.mxu0 %vm704_vm1, %v3178_v20  ;;  %3095 = vmatprep.mubr.msk.bf16.mxu1 %vm704_vm1, %v3179_v21 }
  0x38   : > { %3032 = vmatmul.mubr.msk.bf16.gmra.mxu0 %vm704_vm1, %v3180_v22  ;;  %3096 = vmatmul.mubr.msk.bf16.gmra.mxu1 %vm704_vm1, %v3181_v23 }
  0x39   : > { %3035 = vmatprep.mubr.msk.bf16.mxu0 %vm704_vm1, %v3182_v24  ;;  %3099 = vmatprep.mubr.msk.bf16.mxu1 %vm704_vm1, %v3183_v25 }
  0x40   : > { %3036 = vmatmul.mubr.msk.bf16.gmra.mxu0 %vm704_vm1, %v3184_v26  ;;  %3100 = vmatmul.mubr.msk.bf16.gmra.mxu1 %vm704_vm1, %v3185_v27 }
  0x41   : > { %3039 = vmatprep.mubr.msk.bf16.mxu0 %vm704_vm1, %v3186_v28  ;;  %3103 = vmatprep.mubr.msk.bf16.mxu1 %vm704_vm1, %v3187_v29 }
  0x48   : > { %3040 = vmatmul.mubr.msk.bf16.gmra.mxu0 %vm704_vm1, %v3188_v30  ;;  %3104 = vmatmul.mubr.msk.bf16.gmra.mxu1 %vm704_vm1, %v3189_v31 }
  0x49   : > { %3043 = vmatprep.mubr.msk.bf16.mxu0 %vm704_vm1, %v3190_v32  ;;  %3107 = vmatprep.mubr.msk.bf16.mxu1 %vm704_vm1, %v3191_v33 }
  0x50   : > { %3044 = vmatmul.mubr.msk.bf16.gmra.mxu0 %vm704_vm1, %v3192_v34  ;;  %3108 = vmatmul.mubr.msk.bf16.gmra.mxu1 %vm704_vm1, %v3193_v35 }
  0x51   : > { %3047 = vmatprep.mubr.msk.bf16.mxu0 %vm704_vm1, %v3194_v36  ;;  %3111 = vmatprep.mubr.msk.bf16.mxu1 %vm704_vm1, %v3195_v37 }
  0x58   : > { %3048 = vmatmul.mubr.msk.bf16.gmra.mxu0 %vm704_vm1, %v3196_v38  ;;  %3112 = vmatmul.mubr.msk.bf16.gmra.mxu1 %vm704_vm1, %v3197_v39 }
  0x59   : > { %3051 = vmatprep.mubr.msk.bf16.mxu0 %vm704_vm1, %v3198_v40  ;;  %3115 = vmatprep.mubr.msk.bf16.mxu1 %vm704_vm1, %v3199_v41 }
  0x60   : > { %3052 = vmatmul.mubr.msk.bf16.gmra.mxu0 %vm704_vm1, %v3200_v42  ;;  %3116 = vmatmul.mubr.msk.bf16.gmra.mxu1 %vm704_vm1, %v3201_v43 }
  0x61   : > { %3055 = vmatprep.mubr.msk.bf16.mxu0 %vm704_vm1, %v3202_v44  ;;  %3119 = vmatprep.mubr.msk.bf16.mxu1 %vm704_vm1, %v3203_v45 }
  0x68   : > { %3056 = vmatmul.mubr.msk.bf16.gmra.mxu0 %vm704_vm1, %v3204_v46  ;;  %3120 = vmatmul.mubr.msk.bf16.gmra.mxu1 %vm704_vm1, %v3205_v47 }
  0x69   : > { %3059 = vmatprep.mubr.msk.bf16.mxu0 %vm704_vm1, %v3206_v48  ;;  %3123 = vmatprep.mubr.msk.bf16.mxu1 %vm704_vm1, %v3207_v49 }
  0x70   : > { %3060 = vmatmul.mubr.msk.bf16.gmra.mxu0 %vm704_vm1, %v3208_v50  ;;  %3124 = vmatmul.mubr.msk.bf16.gmra.mxu1 %vm704_vm1, %v3209_v51 }
  0x71   : > { %3063 = vmatprep.mubr.msk.bf16.mxu0 %vm704_vm1, %v3210_v52  ;;  %3127 = vmatprep.mubr.msk.bf16.mxu1 %vm704_vm1, %v3211_v53 }
  0x78   : > { %3064 = vmatmul.mubr.msk.bf16.gmra.mxu0 %vm704_vm1, %v3212_v54  ;;  %3128 = vmatmul.mubr.msk.bf16.gmra.mxu1 %vm704_vm1, %v3213_v55 }
  0x79   : > { %3067 = vmatprep.mubr.msk.bf16.mxu0 %vm704_vm1, %v3214_v56  ;;  %3131 = vmatprep.mubr.msk.bf16.mxu1 %vm704_vm1, %v3215_v57 }
  0x80   : > { %3068 = vmatmul.mubr.msk.bf16.gmra.mxu0 %vm704_vm1, %v3216_v58  ;;  %3132 = vmatmul.mubr.msk.bf16.gmra.mxu1 %vm704_vm1, %v3217_v59 }
  0x81   : > { %3071 = vmatprep.mubr.msk.bf16.mxu0 %vm704_vm1, %v3218_v60  ;;  %3135 = vmatprep.mubr.msk.bf16.mxu1 %vm704_vm1, %v3219_v61 }
  0x88   : > { %3072 = vmatmul.mubr.msk.bf16.gmra.mxu0 %vm704_vm1, %v3220_v62  ;;  %3136 = vmatmul.mubr.msk.bf16.gmra.mxu1 %vm704_vm1, %v3221_v63 }
  0x89   : > { %3075 = vmatprep.mubr.msk.bf16.mxu0 %vm704_vm1, %v3222_v0  ;;  %3139 = vmatprep.mubr.msk.bf16.mxu1 %vm704_vm1, %v3223_v1 }
  0x90   : > { %3076 = vmatmul.mubr.msk.bf16.gmra.mxu0 %vm704_vm1, %v3224_v2  ;;  %3140 = vmatmul.mubr.msk.bf16.gmra.mxu1 %vm704_vm1, %v3225_v3 }
  0xd8   : > { %v3017_v5 = vpop.f32.mrf.mxu0  ;;  %v3081_v7 = vpop.f32.mrf.mxu1 }
  0xd9   : > { %v944_v8 = vadd.f32 %v3017_v5, %v3425_v4  ;;  %v1200_v9 = vadd.f32 %v3081_v7, %v3425_v4 }
  0xda   : > { %v935_v11 = vpop.f32.mrf.mxu0  ;;  %v1191_v12 = vpop.f32.mrf.mxu1 }
  0xdb   : > { %v1455_v13 = vmul.f32 %v3430_v6, %v944_v8  ;;  %v1519_v14 = vmul.f32 %v3430_v6, %v1200_v9  ;;  %v936_v15 = vadd.f32 %v3425_v4, %v935_v11  ;;  %v1192_v16 = vadd.f32 %v3425_v4, %v1191_v12 }
  0xdc   : > { %v3018_v17 = vpop.f32.mrf.mxu0  ;;  %v3082_v18 = vpop.f32.mrf.mxu1 }
  0xdd   : > { %v1590_v19 = vadd.f32 %v3437_v10, %v1455_v13  ;;  %v1654_v20 = vadd.f32 %v3437_v10, %v1519_v14  ;;  %v1453_v21 = vmul.f32 %v3430_v6, %v936_v15  ;;  %v1517_v22 = vmul.f32 %v3430_v6, %v1192_v16 }
  0xde   : > { %v947_v23 = vadd.f32 %v3018_v17, %v3425_v4  ;;  %v1203_v24 = vadd.f32 %v3082_v18, %v3425_v4  ;;  %v938_v25 = vpop.f32.mrf.mxu0  ;;  %v1194_v26 = vpop.f32.mrf.mxu1 }
  0xdf   : > { %v1718_v27 = vmax.f32 %v1590_v19, 0.0  ;;  %v1782_v28 = vmax.f32 %v1654_v20, 0.0  ;;  %v1588_v29 = vadd.f32 %v3437_v10, %v1453_v21  ;;  %v1652_v30 = vadd.f32 %v3437_v10, %v1517_v22 }
  0xe0   : > { %v1456_v31 = vmul.f32 %v3430_v6, %v947_v23  ;;  %v1520_v32 = vmul.f32 %v3430_v6, %v1203_v24  ;;  %v939_v33 = vadd.f32 %v3425_v4, %v938_v25  ;;  %v1195_v34 = vadd.f32 %v3425_v4, %v1194_v26  ;;  %v3021_v35 = vpop.f32.mrf.mxu0  ;;  %v3085_v36 = vpop.f32.mrf.mxu1 }
  0xe1   : > { %v2816_v37 = vpack.c.bf16 %v1718_v27, %v1718_v27  ;;  %v2880_v38 = vpack.c.bf16 %v1782_v28, %v1782_v28  ;;  %v1716_v39 = vmax.f32 %v1588_v29, 0.0  ;;  %v1780_v40 = vmax.f32 %v1652_v30, 0.0 }
  0xe2   : > { %v1591_v41 = vadd.f32 %v3437_v10, %v1456_v31  ;;  %v1655_v42 = vadd.f32 %v3437_v10, %v1520_v32  ;;  %v1454_v43 = vmul.f32 %v3430_v6, %v939_v33  ;;  %v1518_v44 = vmul.f32 %v3430_v6, %v1195_v34  ;;  %v951_v45 = vpop.f32.mrf.mxu0  ;;  %v1207_v46 = vpop.f32.mrf.mxu1 }
  0xe3   : > { %2359 = vst.msk [vmem:[%s3456_s14 + $0x8] sm:$0xf] %vm2356_vm2, %v2816_v37  ;;  %2423 = vst.msk [vmem:[%s3456_s14 + $0x108] sm:$0xf] %vm2356_vm2, %v2880_v38  ;;  %v2814_v47 = vpack.c.bf16 %v1716_v39, %v1716_v39  ;;  %v2878_v48 = vpack.c.bf16 %v1780_v40, %v1780_v40  ;;  %v960_v49 = vadd.f32 %v3021_v35, %v3425_v4 }
  0xe4   : > { %v1216_v50 = vadd.f32 %v3085_v36, %v3425_v4  ;;  %v1719_v51 = vmax.f32 %v1591_v41, 0.0  ;;  %v1783_v52 = vmax.f32 %v1655_v42, 0.0  ;;  %v1589_v53 = vadd.f32 %v3437_v10, %v1454_v43  ;;  %v3022_v55 = vpop.f32.mrf.mxu0  ;;  %v3086_v56 = vpop.f32.mrf.mxu1 }
  0xe5   : > { %v1653_v54 = vadd.f32 %v3437_v10, %v1518_v44  ;;  %2357 = vst.msk [vmem:[%s3456_s14] sm:$0xf] %vm2356_vm2, %v2814_v47  ;;  %2421 = vst.msk [vmem:[%s3456_s14 + $0x100] sm:$0xf] %vm2356_vm2, %v2878_v48  ;;  %v1459_v57 = vmul.f32 %v3430_v6, %v960_v49  ;;  %v952_v59 = vadd.f32 %v3425_v4, %v951_v45 }
  0xe6   : > { %v1523_v58 = vmul.f32 %v3430_v6, %v1216_v50  ;;  %v1208_v60 = vadd.f32 %v3425_v4, %v1207_v46  ;;  %v2817_v61 = vpack.c.bf16 %v1719_v51, %v1719_v51  ;;  %v2881_v62 = vpack.c.bf16 %v1783_v52, %v1783_v52  ;;  %v954_v1 = vpop.f32.mrf.mxu0  ;;  %v1210_v2 = vpop.f32.mrf.mxu1 }
  0xe7   : > { %v1717_v63 = vmax.f32 %v1589_v53, 0.0  ;;  %v1781_v0 = vmax.f32 %v1653_v54, 0.0  ;;  %v1594_v3 = vadd.f32 %v3437_v10, %v1459_v57  ;;  %v1457_v7 = vmul.f32 %v3430_v6, %v952_v59 }
  0xe8   : > { %v1658_v5 = vadd.f32 %v3437_v10, %v1523_v58  ;;  %v1521_v8 = vmul.f32 %v3430_v6, %v1208_v60  ;;  %2360 = vst.msk [vmem:[%s3456_s14 + $0xc] sm:$0xf] %vm2356_vm2, %v2817_v61  ;;  %2424 = vst.msk [vmem:[%s3456_s14 + $0x10c] sm:$0xf] %vm2356_vm2, %v2881_v62  ;;  %v963_v12 = vadd.f32 %v3022_v55, %v3425_v4  ;;  %v3025_v14 = vpop.f32.mrf.mxu0  ;;  %v3089_v15 = vpop.f32.mrf.mxu1 }
  0xe9   : > { %v2815_v9 = vpack.c.bf16 %v1717_v63, %v1717_v63  ;;  %v2879_v11 = vpack.c.bf16 %v1781_v0, %v1781_v0  ;;  %v1219_v13 = vadd.f32 %v3086_v56, %v3425_v4  ;;  %v1722_v16 = vmax.f32 %v1594_v3, 0.0 }
  0xea   : > { %v1786_v17 = vmax.f32 %v1658_v5, 0.0  ;;  %v1592_v18 = vadd.f32 %v3437_v10, %v1457_v7  ;;  %v1656_v19 = vadd.f32 %v3437_v10, %v1521_v8  ;;  %v1460_v20 = vmul.f32 %v3430_v6, %v963_v12  ;;  %v967_v24 = vpop.f32.mrf.mxu0  ;;  %v1223_v25 = vpop.f32.mrf.mxu1 }
  0xeb   : > { %2358 = vst.msk [vmem:[%s3456_s14 + $0x4] sm:$0xf] %vm2356_vm2, %v2815_v9  ;;  %2422 = vst.msk [vmem:[%s3456_s14 + $0x104] sm:$0xf] %vm2356_vm2, %v2879_v11  ;;  %v1524_v21 = vmul.f32 %v3430_v6, %v1219_v13  ;;  %v955_v22 = vadd.f32 %v3425_v4, %v954_v1  ;;  %v1211_v23 = vadd.f32 %v3425_v4, %v1210_v2 }
  0xec   : > { %v2820_v26 = vpack.c.bf16 %v1722_v16, %v1722_v16  ;;  %v2884_v27 = vpack.c.bf16 %v1786_v17, %v1786_v17  ;;  %v1720_v28 = vmax.f32 %v1592_v18, 0.0  ;;  %v1784_v29 = vmax.f32 %v1656_v19, 0.0  ;;  %v3026_v34 = vpop.f32.mrf.mxu0  ;;  %v3090_v35 = vpop.f32.mrf.mxu1 }
  0xed   : > { %v1595_v30 = vadd.f32 %v3437_v10, %v1460_v20  ;;  %v1659_v31 = vadd.f32 %v3437_v10, %v1524_v21  ;;  %v1458_v32 = vmul.f32 %v3430_v6, %v955_v22  ;;  %v1522_v33 = vmul.f32 %v3430_v6, %v1211_v23 }
  0xee   : > { %2363 = vst.msk [vmem:[%s3456_s14 + $0x18] sm:$0xf] %vm2356_vm2, %v2820_v26  ;;  %2427 = vst.msk [vmem:[%s3456_s14 + $0x118] sm:$0xf] %vm2356_vm2, %v2884_v27  ;;  %v2818_v36 = vpack.c.bf16 %v1720_v28, %v1720_v28  ;;  %v2882_v37 = vpack.c.bf16 %v1784_v29, %v1784_v29  ;;  %v976_v38 = vadd.f32 %v3025_v14, %v3425_v4  ;;  %v970_v44 = vpop.f32.mrf.mxu0  ;;  %v1226_v45 = vpop.f32.mrf.mxu1 }
  0xef   : > { %v1232_v39 = vadd.f32 %v3089_v15, %v3425_v4  ;;  %v1723_v40 = vmax.f32 %v1595_v30, 0.0  ;;  %v1787_v41 = vmax.f32 %v1659_v31, 0.0  ;;  %v1593_v42 = vadd.f32 %v3437_v10, %v1458_v32 }
  0xf0   : > { %v1657_v43 = vadd.f32 %v3437_v10, %v1522_v33  ;;  %2361 = vst.msk [vmem:[%s3456_s14 + $0x10] sm:$0xf] %vm2356_vm2, %v2818_v36  ;;  %2425 = vst.msk [vmem:[%s3456_s14 + $0x110] sm:$0xf] %vm2356_vm2, %v2882_v37  ;;  %v1463_v46 = vmul.f32 %v3430_v6, %v976_v38  ;;  %v968_v48 = vadd.f32 %v3425_v4, %v967_v24  ;;  %v3029_v54 = vpop.f32.mrf.mxu0  ;;  %v3093_v55 = vpop.f32.mrf.mxu1 }
  0xf1   : > { %v1527_v47 = vmul.f32 %v3430_v6, %v1232_v39  ;;  %v1224_v49 = vadd.f32 %v3425_v4, %v1223_v25  ;;  %v2821_v50 = vpack.c.bf16 %v1723_v40, %v1723_v40  ;;  %v2885_v51 = vpack.c.bf16 %v1787_v41, %v1787_v41 }
  0xf2   : > { %v1721_v52 = vmax.f32 %v1593_v42, 0.0  ;;  %v1785_v53 = vmax.f32 %v1657_v43, 0.0  ;;  %v1598_v56 = vadd.f32 %v3437_v10, %v1463_v46  ;;  %v1461_v58 = vmul.f32 %v3430_v6, %v968_v48  ;;  %v983_v0 = vpop.f32.mrf.mxu0  ;;  %v1239_v1 = vpop.f32.mrf.mxu1 }
  0xf3   : > { %v1662_v57 = vadd.f32 %v3437_v10, %v1527_v47  ;;  %v1525_v59 = vmul.f32 %v3430_v6, %v1224_v49  ;;  %2364 = vst.msk [vmem:[%s3456_s14 + $0x1c] sm:$0xf] %vm2356_vm2, %v2821_v50  ;;  %2428 = vst.msk [vmem:[%s3456_s14 + $0x11c] sm:$0xf] %vm2356_vm2, %v2885_v51  ;;  %v979_v62 = vadd.f32 %v3026_v34, %v3425_v4 }
  0xf4   : > { %v2819_v60 = vpack.c.bf16 %v1721_v52, %v1721_v52  ;;  %v2883_v61 = vpack.c.bf16 %v1785_v53, %v1785_v53  ;;  %v1235_v63 = vadd.f32 %v3090_v35, %v3425_v4  ;;  %v1726_v2 = vmax.f32 %v1598_v56, 0.0  ;;  %v3030_v13 = vpop.f32.mrf.mxu0  ;;  %v3094_v14 = vpop.f32.mrf.mxu1 }
  0xf5   : > { %v1790_v3 = vmax.f32 %v1662_v57, 0.0  ;;  %v1596_v5 = vadd.f32 %v3437_v10, %v1461_v58  ;;  %v1660_v7 = vadd.f32 %v3437_v10, %v1525_v59  ;;  %v1464_v8 = vmul.f32 %v3430_v6, %v979_v62 }
  0xf6   : > { %2362 = vst.msk [vmem:[%s3456_s14 + $0x14] sm:$0xf] %vm2356_vm2, %v2819_v60  ;;  %2426 = vst.msk [vmem:[%s3456_s14 + $0x114] sm:$0xf] %vm2356_vm2, %v2883_v61  ;;  %v1528_v9 = vmul.f32 %v3430_v6, %v1235_v63  ;;  %v971_v11 = vadd.f32 %v3425_v4, %v970_v44  ;;  %v1227_v12 = vadd.f32 %v3425_v4, %v1226_v45  ;;  %v986_v23 = vpop.f32.mrf.mxu0  ;;  %v1242_v24 = vpop.f32.mrf.mxu1 }
  0xf7   : > { %v2824_v15 = vpack.c.bf16 %v1726_v2, %v1726_v2  ;;  %v2888_v16 = vpack.c.bf16 %v1790_v3, %v1790_v3  ;;  %v1724_v17 = vmax.f32 %v1596_v5, 0.0  ;;  %v1788_v18 = vmax.f32 %v1660_v7, 0.0 }
  0xf8   : > { %v1599_v19 = vadd.f32 %v3437_v10, %v1464_v8  ;;  %v1663_v20 = vadd.f32 %v3437_v10, %v1528_v9  ;;  %v1462_v21 = vmul.f32 %v3430_v6, %v971_v11  ;;  %v1526_v22 = vmul.f32 %v3430_v6, %v1227_v12  ;;  %v3033_v33 = vpop.f32.mrf.mxu0  ;;  %v3097_v34 = vpop.f32.mrf.mxu1 }
  0xf9   : > { %2367 = vst.msk [vmem:[%s3456_s14 + $0x28] sm:$0xf] %vm2356_vm2, %v2824_v15  ;;  %2431 = vst.msk [vmem:[%s3456_s14 + $0x128] sm:$0xf] %vm2356_vm2, %v2888_v16  ;;  %v2822_v25 = vpack.c.bf16 %v1724_v17, %v1724_v17  ;;  %v2886_v26 = vpack.c.bf16 %v1788_v18, %v1788_v18  ;;  %v992_v27 = vadd.f32 %v3029_v54, %v3425_v4 }
  0xfa   : > { %v1248_v28 = vadd.f32 %v3093_v55, %v3425_v4  ;;  %v1727_v29 = vmax.f32 %v1599_v19, 0.0  ;;  %v1791_v30 = vmax.f32 %v1663_v20, 0.0  ;;  %v1597_v31 = vadd.f32 %v3437_v10, %v1462_v21  ;;  %v999_v43 = vpop.f32.mrf.mxu0  ;;  %v1255_v44 = vpop.f32.mrf.mxu1 }
  0xfb   : > { %v1661_v32 = vadd.f32 %v3437_v10, %v1526_v22  ;;  %2365 = vst.msk [vmem:[%s3456_s14 + $0x20] sm:$0xf] %vm2356_vm2, %v2822_v25  ;;  %2429 = vst.msk [vmem:[%s3456_s14 + $0x120] sm:$0xf] %vm2356_vm2, %v2886_v26  ;;  %v1467_v35 = vmul.f32 %v3430_v6, %v992_v27  ;;  %v984_v37 = vadd.f32 %v3425_v4, %v983_v0 }
  0xfc   : > { %v1531_v36 = vmul.f32 %v3430_v6, %v1248_v28  ;;  %v1240_v38 = vadd.f32 %v3425_v4, %v1239_v1  ;;  %v2825_v39 = vpack.c.bf16 %v1727_v29, %v1727_v29  ;;  %v2889_v40 = vpack.c.bf16 %v1791_v30, %v1791_v30  ;;  %v3034_v53 = vpop.f32.mrf.mxu0  ;;  %v3098_v54 = vpop.f32.mrf.mxu1 }
  0xfd   : > { %v1725_v41 = vmax.f32 %v1597_v31, 0.0  ;;  %v1789_v42 = vmax.f32 %v1661_v32, 0.0  ;;  %v1602_v45 = vadd.f32 %v3437_v10, %v1467_v35  ;;  %v1465_v47 = vmul.f32 %v3430_v6, %v984_v37 }
  0xfe   : > { %v1666_v46 = vadd.f32 %v3437_v10, %v1531_v36  ;;  %v1529_v48 = vmul.f32 %v3430_v6, %v1240_v38  ;;  %2368 = vst.msk [vmem:[%s3456_s14 + $0x2c] sm:$0xf] %vm2356_vm2, %v2825_v39  ;;  %2432 = vst.msk [vmem:[%s3456_s14 + $0x12c] sm:$0xf] %vm2356_vm2, %v2889_v40  ;;  %v995_v51 = vadd.f32 %v3030_v13, %v3425_v4  ;;  %v1002_v63 = vpop.f32.mrf.mxu0  ;;  %v1258_v0 = vpop.f32.mrf.mxu1 }
  0xff   : > { %v2823_v49 = vpack.c.bf16 %v1725_v41, %v1725_v41  ;;  %v2887_v50 = vpack.c.bf16 %v1789_v42, %v1789_v42  ;;  %v1251_v52 = vadd.f32 %v3094_v14, %v3425_v4  ;;  %v1730_v55 = vmax.f32 %v1602_v45, 0.0 }
 0x100   : > { %v1794_v56 = vmax.f32 %v1666_v46, 0.0  ;;  %v1600_v57 = vadd.f32 %v3437_v10, %v1465_v47  ;;  %v1664_v58 = vadd.f32 %v3437_v10, %v1529_v48  ;;  %v1468_v59 = vmul.f32 %v3430_v6, %v995_v51  ;;  %v3586_v12 = vpop.f32.mrf.mxu0  ;;  %v3588_v13 = vpop.f32.mrf.mxu1 }
 0x101   : > { %2366 = vst.msk [vmem:[%s3456_s14 + $0x24] sm:$0xf] %vm2356_vm2, %v2823_v49  ;;  %2430 = vst.msk [vmem:[%s3456_s14 + $0x124] sm:$0xf] %vm2356_vm2, %v2887_v50  ;;  %v1532_v60 = vmul.f32 %v3430_v6, %v1251_v52  ;;  %v987_v61 = vadd.f32 %v3425_v4, %v986_v23  ;;  %v1243_v62 = vadd.f32 %v3425_v4, %v1242_v24 }
 0x102   : > { %v2828_v1 = vpack.c.bf16 %v1730_v55, %v1730_v55  ;;  %v2892_v2 = vpack.c.bf16 %v1794_v56, %v1794_v56  ;;  %v1728_v3 = vmax.f32 %v1600_v57, 0.0  ;;  %v1792_v5 = vmax.f32 %v1664_v58, 0.0  ;;  %v3598_v22 = vpop.f32.mrf.mxu0  ;;  %v3600_v23 = vpop.f32.mrf.mxu1 }
 0x103   : > { %v1603_v7 = vadd.f32 %v3437_v10, %v1468_v59  ;;  %v1667_v8 = vadd.f32 %v3437_v10, %v1532_v60  ;;  %v1466_v9 = vmul.f32 %v3430_v6, %v987_v61  ;;  %v1530_v11 = vmul.f32 %v3430_v6, %v1243_v62 }
 0x104   : > { %2371 = vst.msk [vmem:[%s3456_s14 + $0x38] sm:$0xf] %vm2356_vm2, %v2828_v1  ;;  %2435 = vst.msk [vmem:[%s3456_s14 + $0x138] sm:$0xf] %vm2356_vm2, %v2892_v2  ;;  %v2826_v14 = vpack.c.bf16 %v1728_v3, %v1728_v3  ;;  %v2890_v15 = vpack.c.bf16 %v1792_v5, %v1792_v5  ;;  %v1008_v16 = vadd.f32 %v3033_v33, %v3425_v4  ;;  %v3610_v32 = vpop.f32.mrf.mxu0  ;;  %v3612_v33 = vpop.f32.mrf.mxu1 }
 0x105   : > { %v1264_v17 = vadd.f32 %v3097_v34, %v3425_v4  ;;  %v1731_v18 = vmax.f32 %v1603_v7, 0.0  ;;  %v1795_v19 = vmax.f32 %v1667_v8, 0.0  ;;  %v1601_v20 = vadd.f32 %v3437_v10, %v1466_v9 }
 0x106   : > { %v1665_v21 = vadd.f32 %v3437_v10, %v1530_v11  ;;  %2369 = vst.msk [vmem:[%s3456_s14 + $0x30] sm:$0xf] %vm2356_vm2, %v2826_v14  ;;  %2433 = vst.msk [vmem:[%s3456_s14 + $0x130] sm:$0xf] %vm2356_vm2, %v2890_v15  ;;  %v1471_v24 = vmul.f32 %v3430_v6, %v1008_v16  ;;  %v1000_v26 = vadd.f32 %v3425_v4, %v999_v43  ;;  %v3624_v42 = vpop.f32.mrf.mxu0  ;;  %v3626_v43 = vpop.f32.mrf.mxu1 }
 0x107   : > { %v1535_v25 = vmul.f32 %v3430_v6, %v1264_v17  ;;  %v1256_v27 = vadd.f32 %v3425_v4, %v1255_v44  ;;  %v2829_v28 = vpack.c.bf16 %v1731_v18, %v1731_v18  ;;  %v2893_v29 = vpack.c.bf16 %v1795_v19, %v1795_v19 }
 0x108   : > { %v1729_v30 = vmax.f32 %v1601_v20, 0.0  ;;  %v1793_v31 = vmax.f32 %v1665_v21, 0.0  ;;  %v1606_v34 = vadd.f32 %v3437_v10, %v1471_v24  ;;  %v1469_v36 = vmul.f32 %v3430_v6, %v1000_v26  ;;  %v3638_v52 = vpop.f32.mrf.mxu0 }
 0x109   : > { %v1670_v35 = vadd.f32 %v3437_v10, %v1535_v25  ;;  %v1533_v37 = vmul.f32 %v3430_v6, %v1256_v27  ;;  %2372 = vst.msk [vmem:[%s3456_s14 + $0x3c] sm:$0xf] %vm2356_vm2, %v2829_v28  ;;  %2436 = vst.msk [vmem:[%s3456_s14 + $0x13c] sm:$0xf] %vm2356_vm2, %v2893_v29  ;;  %v1011_v40 = vadd.f32 %v3034_v53, %v3425_v4  ;;  %v3640_v53 = vpop.f32.mrf.mxu1 }
 0x10a   : > { %v2827_v38 = vpack.c.bf16 %v1729_v30, %v1729_v30  ;;  %v2891_v39 = vpack.c.bf16 %v1793_v31, %v1793_v31  ;;  %v1267_v41 = vadd.f32 %v3098_v54, %v3425_v4  ;;  %v1734_v44 = vmax.f32 %v1606_v34, 0.0  ;;  %v3646_v62 = vpop.f32.mrf.mxu0 }
 0x10b   : > { %v1798_v45 = vmax.f32 %v1670_v35, 0.0  ;;  %v1604_v46 = vadd.f32 %v3437_v10, %v1469_v36  ;;  %v1668_v47 = vadd.f32 %v3437_v10, %v1533_v37  ;;  %v1472_v48 = vmul.f32 %v3430_v6, %v1011_v40 }
 0x10c   : > { %2370 = vst.msk [vmem:[%s3456_s14 + $0x34] sm:$0xf] %vm2356_vm2, %v2827_v38  ;;  %2434 = vst.msk [vmem:[%s3456_s14 + $0x134] sm:$0xf] %vm2356_vm2, %v2891_v39  ;;  %v1536_v49 = vmul.f32 %v3430_v6, %v1267_v41  ;;  %v1003_v50 = vadd.f32 %v3425_v4, %v1002_v63  ;;  %v1259_v51 = vadd.f32 %v3425_v4, %v1258_v0  ;;  %v3648_v63 = vpop.f32.mrf.mxu1  ;;  %v3660_v11 = vpop.f32.mrf.mxu0 }
 0x10d   : > { %v2832_v54 = vpack.c.bf16 %v1734_v44, %v1734_v44  ;;  %v2896_v55 = vpack.c.bf16 %v1798_v45, %v1798_v45  ;;  %v1732_v56 = vmax.f32 %v1604_v46, 0.0  ;;  %v1796_v57 = vmax.f32 %v1668_v47, 0.0 }
 0x10e   : > { %v1607_v58 = vadd.f32 %v3437_v10, %v1472_v48  ;;  %v1671_v59 = vadd.f32 %v3437_v10, %v1536_v49  ;;  %v1470_v60 = vmul.f32 %v3430_v6, %v1003_v50  ;;  %v1534_v61 = vmul.f32 %v3430_v6, %v1259_v51  ;;  %v3662_v14 = vpop.f32.mrf.mxu1  ;;  %v3674_v21 = vpop.f32.mrf.mxu0 }
 0x10f   : > { %2375 = vst.msk [vmem:[%s3456_s14 + $0x48] sm:$0xf] %vm2356_vm2, %v2832_v54  ;;  %2439 = vst.msk [vmem:[%s3456_s14 + $0x148] sm:$0xf] %vm2356_vm2, %v2896_v55  ;;  %v2830_v0 = vpack.c.bf16 %v1732_v56, %v1732_v56  ;;  %v2894_v1 = vpack.c.bf16 %v1796_v57, %v1796_v57  ;;  %v1024_v2 = vadd.f32 %v3586_v12, %v3425_v4 }
 0x110   : > { %v1280_v3 = vadd.f32 %v3588_v13, %v3425_v4  ;;  %v1735_v5 = vmax.f32 %v1607_v58, 0.0  ;;  %v1799_v7 = vmax.f32 %v1671_v59, 0.0  ;;  %v1605_v8 = vadd.f32 %v3437_v10, %v1470_v60  ;;  %v3676_v24 = vpop.f32.mrf.mxu1  ;;  %v3690_v31 = vpop.f32.mrf.mxu0 }
 0x111   : > { %v1669_v9 = vadd.f32 %v3437_v10, %v1534_v61  ;;  %2373 = vst.msk [vmem:[%s3456_s14 + $0x40] sm:$0xf] %vm2356_vm2, %v2830_v0  ;;  %2437 = vst.msk [vmem:[%s3456_s14 + $0x140] sm:$0xf] %vm2356_vm2, %v2894_v1  ;;  %v1475_v12 = vmul.f32 %v3430_v6, %v1024_v2  ;;  %v1016_v15 = vadd.f32 %v3425_v4, %v3598_v22 }
 0x112   : > { %v1539_v13 = vmul.f32 %v3430_v6, %v1280_v3  ;;  %v1272_v16 = vadd.f32 %v3425_v4, %v3600_v23  ;;  %v2833_v17 = vpack.c.bf16 %v1735_v5, %v1735_v5  ;;  %v2897_v18 = vpack.c.bf16 %v1799_v7, %v1799_v7  ;;  %v3692_v34 = vpop.f32.mrf.mxu1  ;;  %v3706_v41 = vpop.f32.mrf.mxu0 }
 0x113   : > { %v1733_v19 = vmax.f32 %v1605_v8, 0.0  ;;  %v1797_v20 = vmax.f32 %v1669_v9, 0.0  ;;  %v1610_v25 = vadd.f32 %v3437_v10, %v1475_v12  ;;  %v1473_v27 = vmul.f32 %v3430_v6, %v1016_v15 }
 0x114   : > { %v1674_v26 = vadd.f32 %v3437_v10, %v1539_v13  ;;  %v1537_v22 = vmul.f32 %v3430_v6, %v1272_v16  ;;  %2376 = vst.msk [vmem:[%s3456_s14 + $0x4c] sm:$0xf] %vm2356_vm2, %v2833_v17  ;;  %2440 = vst.msk [vmem:[%s3456_s14 + $0x14c] sm:$0xf] %vm2356_vm2, %v2897_v18  ;;  %v1027_v29 = vadd.f32 %v3610_v32, %v3425_v4  ;;  %v3708_v44 = vpop.f32.mrf.mxu1  ;;  %v3714_v54 = vpop.f32.mrf.mxu0 }
 0x115   : > { %v2831_v23 = vpack.c.bf16 %v1733_v19, %v1733_v19  ;;  %v2895_v28 = vpack.c.bf16 %v1797_v20, %v1797_v20  ;;  %v1283_v30 = vadd.f32 %v3612_v33, %v3425_v4  ;;  %v1738_v35 = vmax.f32 %v1610_v25, 0.0 }
 0x116   : > { %v1802_v36 = vmax.f32 %v1674_v26, 0.0  ;;  %v1608_v37 = vadd.f32 %v3437_v10, %v1473_v27  ;;  %v1672_v38 = vadd.f32 %v3437_v10, %v1537_v22  ;;  %v1476_v39 = vmul.f32 %v3430_v6, %v1027_v29  ;;  %v3728_v1 = vpop.f32.mrf.mxu0 }
 0x117   : > { %2374 = vst.msk [vmem:[%s3456_s14 + $0x44] sm:$0xf] %vm2356_vm2, %v2831_v23  ;;  %2438 = vst.msk [vmem:[%s3456_s14 + $0x144] sm:$0xf] %vm2356_vm2, %v2895_v28  ;;  %v1540_v32 = vmul.f32 %v3430_v6, %v1283_v30  ;;  %v1019_v33 = vadd.f32 %v3425_v4, %v3624_v42  ;;  %v1275_v40 = vadd.f32 %v3425_v4, %v3626_v43  ;;  %v3716_v43 = vpop.f32.mrf.mxu1 }
 0x118   : > { %v2836_v45 = vpack.c.bf16 %v1738_v35, %v1738_v35  ;;  %v2900_v46 = vpack.c.bf16 %v1802_v36, %v1802_v36  ;;  %v1736_v47 = vmax.f32 %v1608_v37, 0.0  ;;  %v1800_v48 = vmax.f32 %v1672_v38, 0.0  ;;  %v3742_v13 = vpop.f32.mrf.mxu0 }
 0x119   : > { %v1611_v49 = vadd.f32 %v3437_v10, %v1476_v39  ;;  %v1675_v50 = vadd.f32 %v3437_v10, %v1540_v32  ;;  %v1474_v51 = vmul.f32 %v3430_v6, %v1019_v33  ;;  %v1538_v42 = vmul.f32 %v3430_v6, %v1275_v40  ;;  %v3730_v2 = vpop.f32.mrf.mxu1 }
 0x11a   : > { %2379 = vst.msk [vmem:[%s3456_s14 + $0x58] sm:$0xf] %vm2356_vm2, %v2836_v45  ;;  %2443 = vst.msk [vmem:[%s3456_s14 + $0x158] sm:$0xf] %vm2356_vm2, %v2900_v46  ;;  %v2834_v55 = vpack.c.bf16 %v1736_v47, %v1736_v47  ;;  %v2898_v56 = vpack.c.bf16 %v1800_v48, %v1800_v48  ;;  %v1040_v57 = vadd.f32 %v3638_v52, %v3425_v4  ;;  %v3758_v26 = vpop.f32.mrf.mxu0 }
 0x11b   : > { %v1296_v58 = vadd.f32 %v3640_v53, %v3425_v4  ;;  %v1739_v59 = vmax.f32 %v1611_v49, 0.0  ;;  %v1803_v60 = vmax.f32 %v1675_v50, 0.0  ;;  %v1609_v61 = vadd.f32 %v3437_v10, %v1474_v51  ;;  %v3744_v15 = vpop.f32.mrf.mxu1 }
 0x11c   : > { %v1673_v0 = vadd.f32 %v3437_v10, %v1538_v42  ;;  %2377 = vst.msk [vmem:[%s3456_s14 + $0x50] sm:$0xf] %vm2356_vm2, %v2834_v55  ;;  %2441 = vst.msk [vmem:[%s3456_s14 + $0x150] sm:$0xf] %vm2356_vm2, %v2898_v56  ;;  %v1479_v52 = vmul.f32 %v3430_v6, %v1040_v57  ;;  %v1032_v3 = vadd.f32 %v3425_v4, %v3646_v62  ;;  %v3774_v36 = vpop.f32.mrf.mxu0 }
 0x11d   : > { %v1543_v53 = vmul.f32 %v3430_v6, %v1296_v58  ;;  %v1288_v5 = vadd.f32 %v3425_v4, %v3648_v63  ;;  %v2837_v7 = vpack.c.bf16 %v1739_v59, %v1739_v59  ;;  %v2901_v8 = vpack.c.bf16 %v1803_v60, %v1803_v60  ;;  %v3760_v27 = vpop.f32.mrf.mxu1 }
 0x11e   : > { %v1737_v9 = vmax.f32 %v1609_v61, 0.0  ;;  %v1801_v12 = vmax.f32 %v1673_v0, 0.0  ;;  %v1614_v16 = vadd.f32 %v3437_v10, %v1479_v52  ;;  %v1477_v18 = vmul.f32 %v3430_v6, %v1032_v3  ;;  %v3782_v47 = vpop.f32.mrf.mxu0 }
 0x11f   : > { %v1678_v17 = vadd.f32 %v3437_v10, %v1543_v53  ;;  %v1541_v62 = vmul.f32 %v3430_v6, %v1288_v5  ;;  %2380 = vst.msk [vmem:[%s3456_s14 + $0x5c] sm:$0xf] %vm2356_vm2, %v2837_v7  ;;  %2444 = vst.msk [vmem:[%s3456_s14 + $0x15c] sm:$0xf] %vm2356_vm2, %v2901_v8  ;;  %v1043_v20 = vadd.f32 %v3660_v11, %v3425_v4  ;;  %v3776_v37 = vpop.f32.mrf.mxu1 }
 0x120   : > { %v2835_v63 = vpack.c.bf16 %v1737_v9, %v1737_v9  ;;  %v2899_v19 = vpack.c.bf16 %v1801_v12, %v1801_v12  ;;  %v1299_v25 = vadd.f32 %v3662_v14, %v3425_v4  ;;  %v1742_v22 = vmax.f32 %v1614_v16, 0.0  ;;  %v3796_v58 = vpop.f32.mrf.mxu0 }
 0x121   : > { %v1806_v23 = vmax.f32 %v1678_v17, 0.0  ;;  %v1612_v28 = vadd.f32 %v3437_v10, %v1477_v18  ;;  %v1676_v29 = vadd.f32 %v3437_v10, %v1541_v62  ;;  %v1480_v30 = vmul.f32 %v3430_v6, %v1043_v20 }
 0x122   : > { %2378 = vst.msk [vmem:[%s3456_s14 + $0x54] sm:$0xf] %vm2356_vm2, %v2835_v63  ;;  %2442 = vst.msk [vmem:[%s3456_s14 + $0x154] sm:$0xf] %vm2356_vm2, %v2899_v19  ;;  %v1544_v11 = vmul.f32 %v3430_v6, %v1299_v25  ;;  %v1035_v14 = vadd.f32 %v3425_v4, %v3674_v21  ;;  %v1291_v35 = vadd.f32 %v3425_v4, %v3676_v24  ;;  %v3784_v24 = vpop.f32.mrf.mxu1  ;;  %v3810_v5 = vpop.f32.mrf.mxu0 }
 0x123   : > { %v2840_v38 = vpack.c.bf16 %v1742_v22, %v1742_v22  ;;  %v2904_v39 = vpack.c.bf16 %v1806_v23, %v1806_v23  ;;  %v1740_v32 = vmax.f32 %v1612_v28, 0.0  ;;  %v1804_v33 = vmax.f32 %v1676_v29, 0.0 }
 0x124   : > { %v1615_v40 = vadd.f32 %v3437_v10, %v1480_v30  ;;  %v1679_v45 = vadd.f32 %v3437_v10, %v1544_v11  ;;  %v1478_v46 = vmul.f32 %v3430_v6, %v1035_v14  ;;  %v1542_v21 = vmul.f32 %v3430_v6, %v1291_v35  ;;  %v3798_v59 = vpop.f32.mrf.mxu1  ;;  %v3826_v62 = vpop.f32.mrf.mxu0 }
 0x125   : > { %2383 = vst.msk [vmem:[%s3456_s14 + $0x68] sm:$0xf] %vm2356_vm2, %v2840_v38  ;;  %2447 = vst.msk [vmem:[%s3456_s14 + $0x168] sm:$0xf] %vm2356_vm2, %v2904_v39  ;;  %v2838_v48 = vpack.c.bf16 %v1740_v32, %v1740_v32  ;;  %v2902_v49 = vpack.c.bf16 %v1804_v33, %v1804_v33  ;;  %v1056_v50 = vadd.f32 %v3690_v31, %v3425_v4 }
 0x126   : > { %v1312_v51 = vadd.f32 %v3692_v34, %v3425_v4  ;;  %v1743_v42 = vmax.f32 %v1615_v40, 0.0  ;;  %v1807_v55 = vmax.f32 %v1679_v45, 0.0  ;;  %v1613_v56 = vadd.f32 %v3437_v10, %v1478_v46  ;;  %v3812_v7 = vpop.f32.mrf.mxu1  ;;  %v3842_v29 = vpop.f32.mrf.mxu0 }
 0x127   : > { %v1677_v57 = vadd.f32 %v3437_v10, %v1542_v21  ;;  %2381 = vst.msk [vmem:[%s3456_s14 + $0x60] sm:$0xf] %vm2356_vm2, %v2838_v48  ;;  %2445 = vst.msk [vmem:[%s3456_s14 + $0x160] sm:$0xf] %vm2356_vm2, %v2902_v49  ;;  %v1483_v31 = vmul.f32 %v3430_v6, %v1056_v50  ;;  %v1048_v60 = vadd.f32 %v3425_v4, %v3706_v41 }
 0x128   : > { %v1547_v34 = vmul.f32 %v3430_v6, %v1312_v51  ;;  %v1304_v61 = vadd.f32 %v3425_v4, %v3708_v44  ;;  %v2841_v0 = vpack.c.bf16 %v1743_v42, %v1743_v42  ;;  %v2905_v52 = vpack.c.bf16 %v1807_v55, %v1807_v55  ;;  %v3828_v63 = vpop.f32.mrf.mxu1  ;;  %v3850_v40 = vpop.f32.mrf.mxu0 }
 0x129   : > { %v1741_v53 = vmax.f32 %v1613_v56, 0.0  ;;  %v1805_v3 = vmax.f32 %v1677_v57, 0.0  ;;  %v1618_v8 = vadd.f32 %v3437_v10, %v1483_v31  ;;  %v1481_v12 = vmul.f32 %v3430_v6, %v1048_v60 }
 0x12a   : > { %v1682_v9 = vadd.f32 %v3437_v10, %v1547_v34  ;;  %v1545_v41 = vmul.f32 %v3430_v6, %v1304_v61  ;;  %2384 = vst.msk [vmem:[%s3456_s14 + $0x6c] sm:$0xf] %vm2356_vm2, %v2841_v0  ;;  %2448 = vst.msk [vmem:[%s3456_s14 + $0x16c] sm:$0xf] %vm2356_vm2, %v2905_v52  ;;  %v1059_v17 = vadd.f32 %v3714_v54, %v3425_v4  ;;  %v3844_v30 = vpop.f32.mrf.mxu1  ;;  %v3864_v55 = vpop.f32.mrf.mxu0 }
 0x12b   : > { %v2839_v44 = vpack.c.bf16 %v1741_v53, %v1741_v53  ;;  %v2903_v16 = vpack.c.bf16 %v1805_v3, %v1805_v3  ;;  %v1315_v18 = vadd.f32 %v3716_v43, %v3425_v4  ;;  %v1746_v19 = vmax.f32 %v1618_v8, 0.0 }
 0x12c   : > { %v1810_v20 = vmax.f32 %v1682_v9, 0.0  ;;  %v1616_v25 = vadd.f32 %v3437_v10, %v1481_v12  ;;  %v1680_v22 = vadd.f32 %v3437_v10, %v1545_v41  ;;  %v1484_v23 = vmul.f32 %v3430_v6, %v1059_v17  ;;  %v3878_v52 = vpop.f32.mrf.mxu0 }
 0x12d   : > { %2382 = vst.msk [vmem:[%s3456_s14 + $0x64] sm:$0xf] %vm2356_vm2, %v2839_v44  ;;  %2446 = vst.msk [vmem:[%s3456_s14 + $0x164] sm:$0xf] %vm2356_vm2, %v2903_v16  ;;  %v1548_v54 = vmul.f32 %v3430_v6, %v1315_v18  ;;  %v1051_v43 = vadd.f32 %v3425_v4, %v3728_v1  ;;  %v1307_v28 = vadd.f32 %v3425_v4, %v3730_v2  ;;  %v3852_v2 = vpop.f32.mrf.mxu1 }
 0x12e   : > { %v2844_v11 = vpack.c.bf16 %v1746_v19, %v1746_v19  ;;  %v2908_v14 = vpack.c.bf16 %v1810_v20, %v1810_v20  ;;  %v1744_v35 = vmax.f32 %v1616_v25, 0.0  ;;  %v1808_v38 = vmax.f32 %v1680_v22, 0.0  ;;  %v3894_v16 = vpop.f32.mrf.mxu0 }
 0x12f   : > { %v1619_v39 = vadd.f32 %v3437_v10, %v1484_v23  ;;  %v1683_v32 = vadd.f32 %v3437_v10, %v1548_v54  ;;  %v1482_v33 = vmul.f32 %v3430_v6, %v1051_v43  ;;  %v1546_v1 = vmul.f32 %v3430_v6, %v1307_v28  ;;  %v3866_v56 = vpop.f32.mrf.mxu1 }
 0x130   : > { %2387 = vst.msk [vmem:[%s3456_s14 + $0x78] sm:$0xf] %vm2356_vm2, %v2844_v11  ;;  %2451 = vst.msk [vmem:[%s3456_s14 + $0x178] sm:$0xf] %vm2356_vm2, %v2908_v14  ;;  %v2842_v45 = vpack.c.bf16 %v1744_v35, %v1744_v35  ;;  %v2906_v46 = vpack.c.bf16 %v1808_v38, %v1808_v38  ;;  %v1072_v21 = vadd.f32 %v3742_v13, %v3425_v4  ;;  %v3910_v54 = vpop.f32.mrf.mxu0 }
 0x131   : > { %v1328_v48 = vadd.f32 %v3744_v15, %v3425_v4  ;;  %v1747_v49 = vmax.f32 %v1619_v39, 0.0  ;;  %v1811_v50 = vmax.f32 %v1683_v32, 0.0  ;;  %v1617_v51 = vadd.f32 %v3437_v10, %v1482_v33  ;;  %v3880_v53 = vpop.f32.mrf.mxu1 }
 0x132   : > { %v1681_v42 = vadd.f32 %v3437_v10, %v1546_v1  ;;  %2385 = vst.msk [vmem:[%s3456_s14 + $0x70] sm:$0xf] %vm2356_vm2, %v2842_v45  ;;  %2449 = vst.msk [vmem:[%s3456_s14 + $0x170] sm:$0xf] %vm2356_vm2, %v2906_v46  ;;  %v1487_v13 = vmul.f32 %v3430_v6, %v1072_v21  ;;  %v1064_v57 = vadd.f32 %v3425_v4, %v3758_v26  ;;  %v3929_v45 = vld [vmem:[%s4326_s2] ss:$0 sm:$0xff] }
 0x133   : > { %v1551_v15 = vmul.f32 %v3430_v6, %v1328_v48  ;;  %v1320_v31 = vadd.f32 %v3425_v4, %v3760_v27  ;;  %v2845_v34 = vpack.c.bf16 %v1747_v49, %v1747_v49  ;;  %v2909_v60 = vpack.c.bf16 %v1811_v50, %v1811_v50  ;;  %v3896_v17 = vpop.f32.mrf.mxu1  ;;  %v3939_v50 = vld [vmem:[%s4328_s4] ss:$0 sm:$0xff] }
 0x134   : > { %v1745_v61 = vmax.f32 %v1617_v51, 0.0  ;;  %v1809_v0 = vmax.f32 %v1681_v42, 0.0  ;;  %v1622_v3 = vadd.f32 %v3437_v10, %v1487_v13  ;;  %v1485_v9 = vmul.f32 %v3430_v6, %v1064_v57 }
 0x135   : > { %v1686_v8 = vadd.f32 %v3437_v10, %v1551_v15  ;;  %v1549_v26 = vmul.f32 %v3430_v6, %v1320_v31  ;;  %2388 = vst.msk [vmem:[%s3456_s14 + $0x7c] sm:$0xf] %vm2356_vm2, %v2845_v34  ;;  %2452 = vst.msk [vmem:[%s3456_s14 + $0x17c] sm:$0xf] %vm2356_vm2, %v2909_v60  ;;  %v1075_v41 = vadd.f32 %v3774_v36, %v3425_v4  ;;  %v3912_v43 = vpop.f32.mrf.mxu1 }
 0x136   : > { %v2843_v27 = vpack.c.bf16 %v1745_v61, %v1745_v61  ;;  %v2907_v12 = vpack.c.bf16 %v1809_v0, %v1809_v0  ;;  %v1331_v44 = vadd.f32 %v3776_v37, %v3425_v4  ;;  %v1750_v18 = vmax.f32 %v1622_v3, 0.0 }
 0x137   : > { %v1814_v19 = vmax.f32 %v1686_v8, 0.0  ;;  %v1620_v20 = vadd.f32 %v3437_v10, %v1485_v9  ;;  %v1684_v25 = vadd.f32 %v3437_v10, %v1549_v26  ;;  %v1488_v22 = vmul.f32 %v3430_v6, %v1075_v41 }
 0x138   : > { %2386 = vst.msk [vmem:[%s3456_s14 + $0x74] sm:$0xf] %vm2356_vm2, %v2843_v27  ;;  %2450 = vst.msk [vmem:[%s3456_s14 + $0x174] sm:$0xf] %vm2356_vm2, %v2907_v12  ;;  %v1552_v36 = vmul.f32 %v3430_v6, %v1331_v44  ;;  %v1067_v37 = vadd.f32 %v3425_v4, %v3782_v47  ;;  %v1323_v23 = vadd.f32 %v3425_v4, %v3784_v24  ;;  %v3918_v47 = vpop.f32.mrf.mxu0  ;;  %v3920_v4 = vpop.f32.mrf.mxu1 }
 0x139   : > { %v2848_v28 = vpack.c.bf16 %v1750_v18, %v1750_v18  ;;  %v2912_v11 = vpack.c.bf16 %v1814_v19, %v1814_v19  ;;  %v1748_v14 = vmax.f32 %v1620_v20, 0.0  ;;  %v1812_v35 = vmax.f32 %v1684_v25, 0.0 }
 0x13a   : > { %v1623_v38 = vadd.f32 %v3437_v10, %v1488_v22  ;;  %v1687_v39 = vadd.f32 %v3437_v10, %v1552_v36  ;;  %v1486_v32 = vmul.f32 %v3430_v6, %v1067_v37  ;;  %v1550_v33 = vmul.f32 %v3430_v6, %v1323_v23  ;;  %v3942_v42 = vpop.f32.mrf.mxu0  ;;  %v3944_v13 = vpop.f32.mrf.mxu1 }
 0x13b   : > { %2391 = vst.msk [vmem:[%s3456_s14 + $0x88] sm:$0xf] %vm2356_vm2, %v2848_v28  ;;  %2455 = vst.msk [vmem:[%s3456_s14 + $0x188] sm:$0xf] %vm2356_vm2, %v2912_v11  ;;  %v2846_v24 = vpack.c.bf16 %v1748_v14, %v1748_v14  ;;  %v2910_v1 = vpack.c.bf16 %v1812_v35, %v1812_v35  ;;  %v1088_v6 = vadd.f32 %v3929_v45, %v3796_v58 }
 0x13c   : > { %v1344_v46 = vadd.f32 %v3929_v45, %v3798_v59  ;;  %v1751_v21 = vmax.f32 %v1623_v38, 0.0  ;;  %v1815_v48 = vmax.f32 %v1687_v39, 0.0  ;;  %v1621_v49 = vadd.f32 %v3437_v10, %v1486_v32  ;;  %v3953_v10 = vld [vmem:[%s4327_s3] ss:$0 sm:$0xff]  ;;  %v3961_v0 = vpop.f32.mrf.mxu0  ;;  %v3963_v3 = vpop.f32.mrf.mxu1 }
 0x13d   : > { %v1685_v51 = vadd.f32 %v3939_v50, %v1550_v33  ;;  %2389 = vst.msk [vmem:[%s3456_s14 + $0x80] sm:$0xf] %vm2356_vm2, %v2846_v24  ;;  %2453 = vst.msk [vmem:[%s3456_s14 + $0x180] sm:$0xf] %vm2356_vm2, %v2910_v1  ;;  %v1491_v58 = vmul.f32 %v3953_v10, %v1088_v6  ;;  %v1080_v15 = vadd.f32 %v3929_v45, %v3810_v5 }
 0x13e   : > { %v1555_v59 = vmul.f32 %v3953_v10, %v1344_v46  ;;  %v1336_v57 = vadd.f32 %v3929_v45, %v3812_v7  ;;  %v2849_v31 = vpack.c.bf16 %v1751_v21, %v1751_v21  ;;  %v2913_v34 = vpack.c.bf16 %v1815_v48, %v1815_v48  ;;  %v3977_v44 = vpop.f32.mrf.mxu0  ;;  %v3979_v18 = vpop.f32.mrf.mxu1 }
 0x13f   : > { %v1749_v60 = vmax.f32 %v1621_v49, 0.0  ;;  %v1813_v61 = vmax.f32 %v1685_v51, 0.0  ;;  %v1626_v8 = vadd.f32 %v3939_v50, %v1491_v58  ;;  %v1489_v26 = vmul.f32 %v3953_v10, %v1080_v15 }
 0x140   : > { %v1690_v9 = vadd.f32 %v3939_v50, %v1555_v59  ;;  %v1553_v5 = vmul.f32 %v3953_v10, %v1336_v57  ;;  %2392 = vst.msk [vmem:[%s3456_s14 + $0x8c] sm:$0xf] %vm2356_vm2, %v2849_v31  ;;  %2456 = vst.msk [vmem:[%s3456_s14 + $0x18c] sm:$0xf] %vm2356_vm2, %v2913_v34  ;;  %v1091_v12 = vadd.f32 %v3929_v45, %v3826_v62  ;;  %v3993_v35 = vpop.f32.mrf.mxu0  ;;  %v3995_v38 = vpop.f32.mrf.mxu1 }
 0x141   : > { %v2847_v7 = vpack.c.bf16 %v1749_v60, %v1749_v60  ;;  %v2911_v27 = vpack.c.bf16 %v1813_v61, %v1813_v61  ;;  %v1347_v41 = vadd.f32 %v3929_v45, %v3828_v63  ;;  %v1754_v19 = vmax.f32 %v1626_v8, 0.0 }
 0x142   : > { %v1818_v20 = vmax.f32 %v1690_v9, 0.0  ;;  %v1624_v25 = vadd.f32 %v3939_v50, %v1489_v26  ;;  %v1688_v22 = vadd.f32 %v3939_v50, %v1553_v5  ;;  %v1492_v62 = vmul.f32 %v3953_v10, %v1091_v12  ;;  %v4021_v59 = vpop.f32.mrf.mxu0  ;;  %v4023_v15 = vpop.f32.mrf.mxu1 }
 0x143   : > { %2390 = vst.msk [vmem:[%s3456_s14 + $0x84] sm:$0xf] %vm2356_vm2, %v2847_v7  ;;  %2454 = vst.msk [vmem:[%s3456_s14 + $0x184] sm:$0xf] %vm2356_vm2, %v2911_v27  ;;  %v1556_v63 = vmul.f32 %v3953_v10, %v1347_v41  ;;  %v1083_v36 = vadd.f32 %v3929_v45, %v3842_v29  ;;  %v1339_v37 = vadd.f32 %v3929_v45, %v3844_v30 }
 0x144   : > { %v2852_v23 = vpack.c.bf16 %v1754_v19, %v1754_v19  ;;  %v2916_v28 = vpack.c.bf16 %v1818_v20, %v1818_v20  ;;  %v1752_v11 = vmax.f32 %v1624_v25, 0.0  ;;  %v1816_v14 = vmax.f32 %v1688_v22, 0.0  ;;  %v4039_v20 = vpop.f32.mrf.mxu0  ;;  %v4041_v25 = vpop.f32.mrf.mxu1 }
 0x145   : > { %v1627_v39 = vadd.f32 %v3939_v50, %v1492_v62  ;;  %v1691_v32 = vadd.f32 %v3939_v50, %v1556_v63  ;;  %v1490_v33 = vmul.f32 %v3953_v10, %v1083_v36  ;;  %v1554_v29 = vmul.f32 %v3953_v10, %v1339_v37 }
 0x146   : > { %2395 = vst.msk [vmem:[%s3456_s14 + $0x98] sm:$0xf] %vm2356_vm2, %v2852_v23  ;;  %2459 = vst.msk [vmem:[%s3456_s14 + $0x198] sm:$0xf] %vm2356_vm2, %v2916_v28  ;;  %v2850_v30 = vpack.c.bf16 %v1752_v11, %v1752_v11  ;;  %v2914_v24 = vpack.c.bf16 %v1816_v14, %v1816_v14  ;;  %v1104_v1 = vadd.f32 %v3929_v45, %v3850_v40 }
 0x147   : > { %v1360_v6 = vadd.f32 %v3929_v45, %v3852_v2  ;;  %v1755_v46 = vmax.f32 %v1627_v39, 0.0  ;;  %v1819_v21 = vmax.f32 %v1691_v32, 0.0  ;;  %v1625_v48 = vadd.f32 %v3939_v50, %v1490_v33 }
 0x148   : > { %v1689_v49 = vadd.f32 %v3939_v50, %v1554_v29  ;;  %2393 = vst.msk [vmem:[%s3456_s14 + $0x90] sm:$0xf] %vm2356_vm2, %v2850_v30  ;;  %2457 = vst.msk [vmem:[%s3456_s14 + $0x190] sm:$0xf] %vm2356_vm2, %v2914_v24  ;;  %v1495_v51 = vmul.f32 %v3953_v10, %v1104_v1  ;;  %v1096_v40 = vadd.f32 %v3929_v45, %v3864_v55  ;;  %v4065_v29 = vpop.f32.mrf.mxu0  ;;  %v4067_v30 = vpop.f32.mrf.mxu1 }
 0x149   : > { %v1559_v58 = vmul.f32 %v3953_v10, %v1360_v6  ;;  %v1352_v2 = vadd.f32 %v3929_v45, %v3866_v56  ;;  %v2853_v57 = vpack.c.bf16 %v1755_v46, %v1755_v46  ;;  %v2917_v31 = vpack.c.bf16 %v1819_v21, %v1819_v21 }
 0x14a   : > { %v1753_v34 = vmax.f32 %v1625_v48, 0.0  ;;  %v1817_v60 = vmax.f32 %v1689_v49, 0.0  ;;  %v1630_v61 = vadd.f32 %v3939_v50, %v1495_v51  ;;  %v1493_v9 = vmul.f32 %v3953_v10, %v1096_v40 }
 0x14b   : > { %v1694_v8 = vadd.f32 %v3939_v50, %v1559_v58  ;;  %v1557_v55 = vmul.f32 %v3953_v10, %v1352_v2  ;;  %2396 = vst.msk [vmem:[%s3456_s14 + $0x9c] sm:$0xf] %vm2356_vm2, %v2853_v57  ;;  %2460 = vst.msk [vmem:[%s3456_s14 + $0x19c] sm:$0xf] %vm2356_vm2, %v2917_v31  ;;  %v1107_v5 = vadd.f32 %v3929_v45, %v3878_v52 }
 0x14c   : > { %v2851_v56 = vpack.c.bf16 %v1753_v34, %v1753_v34  ;;  %v2915_v26 = vpack.c.bf16 %v1817_v60, %v1817_v60  ;;  %v1363_v7 = vadd.f32 %v3929_v45, %v3880_v53  ;;  %v1758_v27 = vmax.f32 %v1630_v61, 0.0  ;;  %v4085_v60 = vpop.f32.mrf.mxu0 }
 0x14d   : > { %v1822_v12 = vmax.f32 %v1694_v8, 0.0  ;;  %v1628_v41 = vadd.f32 %v3939_v50, %v1493_v9  ;;  %v1692_v19 = vadd.f32 %v3939_v50, %v1557_v55  ;;  %v1496_v52 = vmul.f32 %v3953_v10, %v1107_v5 }
 0x14e   : > { %2394 = vst.msk [vmem:[%s3456_s14 + $0x94] sm:$0xf] %vm2356_vm2, %v2851_v56  ;;  %2458 = vst.msk [vmem:[%s3456_s14 + $0x194] sm:$0xf] %vm2356_vm2, %v2915_v26  ;;  %v1560_v53 = vmul.f32 %v3953_v10, %v1363_v7  ;;  %v1099_v22 = vadd.f32 %v3929_v45, %v3894_v16  ;;  %v1355_v62 = vadd.f32 %v3929_v45, %v3896_v17 }
 0x14f   : > { %v2856_v63 = vpack.c.bf16 %v1758_v27, %v1758_v27  ;;  %v2920_v36 = vpack.c.bf16 %v1822_v12, %v1822_v12  ;;  %v1756_v37 = vmax.f32 %v1628_v41, 0.0  ;;  %v1820_v23 = vmax.f32 %v1692_v19, 0.0 }
 0x150   : > { %v1631_v28 = vadd.f32 %v3939_v50, %v1496_v52  ;;  %v1695_v11 = vadd.f32 %v3939_v50, %v1560_v53  ;;  %v1494_v14 = vmul.f32 %v3953_v10, %v1099_v22  ;;  %v1558_v39 = vmul.f32 %v3953_v10, %v1355_v62  ;;  %v4109_v53 = vpop.f32.mrf.mxu0 }
 0x151   : > { %2399 = vst.msk [vmem:[%s3456_s14 + $0xa8] sm:$0xf] %vm2356_vm2, %v2856_v63  ;;  %2463 = vst.msk [vmem:[%s3456_s14 + $0x1a8] sm:$0xf] %vm2356_vm2, %v2920_v36  ;;  %v2854_v16 = vpack.c.bf16 %v1756_v37, %v1756_v37  ;;  %v2918_v17 = vpack.c.bf16 %v1820_v23, %v1820_v23  ;;  %v1120_v32 = vadd.f32 %v3929_v45, %v3910_v54 }
 0x152   : > { %v1376_v33 = vadd.f32 %v3929_v45, %v3912_v43  ;;  %v1759_v24 = vmax.f32 %v1631_v28, 0.0  ;;  %v1823_v1 = vmax.f32 %v1695_v11, 0.0  ;;  %v1629_v6 = vadd.f32 %v3939_v50, %v1494_v14 }
 0x153   : > { %v1693_v46 = vadd.f32 %v3939_v50, %v1558_v39  ;;  %2397 = vst.msk [vmem:[%s3456_s14 + $0xa0] sm:$0xf] %vm2356_vm2, %v2854_v16  ;;  %2461 = vst.msk [vmem:[%s3456_s14 + $0x1a0] sm:$0xf] %vm2356_vm2, %v2918_v17  ;;  %v1499_v54 = vmul.f32 %v3953_v10, %v1120_v32  ;;  %v1112_v21 = vadd.f32 %v3929_v45, %v3918_v47  ;;  %v4087_v47 = vpop.f32.mrf.mxu1 }
 0x154   : > { %v1563_v43 = vmul.f32 %v3953_v10, %v1376_v33  ;;  %v1368_v48 = vadd.f32 %v3929_v45, %v3920_v4  ;;  %v2857_v49 = vpack.c.bf16 %v1759_v24, %v1759_v24  ;;  %v2921_v51 = vpack.c.bf16 %v1823_v1, %v1823_v1  ;;  %v4137_v33 = vpop.f32.mrf.mxu0 }
 0x155   : > { %v1757_v58 = vmax.f32 %v1629_v6, 0.0  ;;  %v1821_v40 = vmax.f32 %v1693_v46, 0.0  ;;  %v1634_v2 = vadd.f32 %v3939_v50, %v1499_v54  ;;  %v1497_v31 = vmul.f32 %v3953_v10, %v1112_v21  ;;  %v4111_v22 = vpop.f32.mrf.mxu1 }
 0x156   : > { %v1698_v57 = vadd.f32 %v3939_v50, %v1563_v43  ;;  %v1561_v34 = vmul.f32 %v3953_v10, %v1368_v48  ;;  %2400 = vst.msk [vmem:[%s3456_s14 + $0xac] sm:$0xf] %vm2356_vm2, %v2857_v49  ;;  %2464 = vst.msk [vmem:[%s3456_s14 + $0x1ac] sm:$0xf] %vm2356_vm2, %v2921_v51  ;;  %v1123_v8 = vadd.f32 %v3929_v45, %v3942_v42 }
 0x157   : > { %v2855_v4 = vpack.c.bf16 %v1757_v58, %v1757_v58  ;;  %v2919_v61 = vpack.c.bf16 %v1821_v40, %v1821_v40  ;;  %v1379_v9 = vadd.f32 %v3929_v45, %v3944_v13  ;;  %v1762_v55 = vmax.f32 %v1634_v2, 0.0  ;;  %v4139_v24 = vpop.f32.mrf.mxu1 }
 0x158   : > { %v1826_v56 = vmax.f32 %v1698_v57, 0.0  ;;  %v1632_v26 = vadd.f32 %v3939_v50, %v1497_v31  ;;  %v1696_v5 = vadd.f32 %v3939_v50, %v1561_v34  ;;  %v1500_v7 = vmul.f32 %v3953_v10, %v1123_v8  ;;  %v4155_v34 = vpop.f32.mrf.mxu0 }
 0x159   : > { %2398 = vst.msk [vmem:[%s3456_s14 + $0xa4] sm:$0xf] %vm2356_vm2, %v2855_v4  ;;  %2462 = vst.msk [vmem:[%s3456_s14 + $0x1a4] sm:$0xf] %vm2356_vm2, %v2919_v61  ;;  %v1564_v27 = vmul.f32 %v3953_v10, %v1379_v9  ;;  %v1115_v42 = vadd.f32 %v3929_v45, %v3961_v0  ;;  %v1371_v13 = vadd.f32 %v3929_v45, %v3963_v3  ;;  %v4157_v4 = vpop.f32.mrf.mxu1 }
 0x15a   : > { %v2860_v12 = vpack.c.bf16 %v1762_v55, %v1762_v55  ;;  %v2924_v41 = vpack.c.bf16 %v1826_v56, %v1826_v56  ;;  %v1760_v19 = vmax.f32 %v1632_v26, 0.0  ;;  %v1824_v52 = vmax.f32 %v1696_v5, 0.0 }
 0x15b   : > { %v1635_v62 = vadd.f32 %v3939_v50, %v1500_v7  ;;  %v1699_v63 = vadd.f32 %v3939_v50, %v1564_v27  ;;  %v1498_v36 = vmul.f32 %v3953_v10, %v1115_v42  ;;  %v1562_v0 = vmul.f32 %v3953_v10, %v1371_v13 }
 0x15c   : > { %2403 = vst.msk [vmem:[%s3456_s14 + $0xb8] sm:$0xf] %vm2356_vm2, %v2860_v12  ;;  %2467 = vst.msk [vmem:[%s3456_s14 + $0x1b8] sm:$0xf] %vm2356_vm2, %v2924_v41  ;;  %v2858_v3 = vpack.c.bf16 %v1760_v19, %v1760_v19  ;;  %v2922_v37 = vpack.c.bf16 %v1824_v52, %v1824_v52  ;;  %v1136_v23 = vadd.f32 %v3929_v45, %v3977_v44  ;;  %v1159_v41 = vpop.f32.mrf.mxu0  ;;  %v1415_v19 = vpop.f32.mrf.mxu1 }
 0x15d   : > { %v1392_v28 = vadd.f32 %v3929_v45, %v3979_v18  ;;  %v1763_v11 = vmax.f32 %v1635_v62, 0.0  ;;  %v1827_v14 = vmax.f32 %v1699_v63, 0.0  ;;  %v1633_v39 = vadd.f32 %v3939_v50, %v1498_v36 }
 0x15e   : > { %v1697_v16 = vadd.f32 %v3939_v50, %v1562_v0  ;;  %2401 = vst.msk [vmem:[%s3456_s14 + $0xb0] sm:$0xf] %vm2356_vm2, %v2858_v3  ;;  %2465 = vst.msk [vmem:[%s3456_s14 + $0x1b0] sm:$0xf] %vm2356_vm2, %v2922_v37  ;;  %v1503_v17 = vmul.f32 %v3953_v10, %v1136_v23  ;;  %v1128_v44 = vadd.f32 %v3929_v45, %v3993_v35 }
 0x15f   : > { %v1567_v32 = vmul.f32 %v3953_v10, %v1392_v28  ;;  %v1384_v18 = vadd.f32 %v3929_v45, %v3995_v38  ;;  %v2861_v1 = vpack.c.bf16 %v1763_v11, %v1763_v11  ;;  %v2925_v6 = vpack.c.bf16 %v1827_v14, %v1827_v14 }
 0x160   : > { %v1761_v46 = vmax.f32 %v1633_v39, 0.0  ;;  %v1825_v54 = vmax.f32 %v1697_v16, 0.0  ;;  %v1638_v43 = vadd.f32 %v3939_v50, %v1503_v17  ;;  %v1501_v48 = vmul.f32 %v3953_v10, %v1128_v44  ;;  %v3138_v44 = vpop.f32.mrf.mxu1 }
 0x161   : > { %v1702_v21 = vadd.f32 %v3939_v50, %v1567_v32  ;;  %v1565_v35 = vmul.f32 %v3953_v10, %v1384_v18  ;;  %2404 = vst.msk [vmem:[%s3456_s14 + $0xbc] sm:$0xf] %vm2356_vm2, %v2861_v1  ;;  %2468 = vst.msk [vmem:[%s3456_s14 + $0x1bc] sm:$0xf] %vm2356_vm2, %v2925_v6  ;;  %v1139_v51 = vadd.f32 %v3929_v45, %v4021_v59  ;;  %v3074_v32 = vpop.f32.mrf.mxu0 }
 0x162   : > { %v2859_v38 = vpack.c.bf16 %v1761_v46, %v1761_v46  ;;  %v2923_v49 = vpack.c.bf16 %v1825_v54, %v1825_v54  ;;  %v1395_v58 = vadd.f32 %v3929_v45, %v4023_v15  ;;  %v1766_v40 = vmax.f32 %v1638_v43, 0.0 }
 0x163   : > { %v1830_v2 = vmax.f32 %v1702_v21, 0.0  ;;  %v1636_v57 = vadd.f32 %v3939_v50, %v1501_v48  ;;  %v1700_v31 = vadd.f32 %v3939_v50, %v1565_v35  ;;  %v1504_v59 = vmul.f32 %v3953_v10, %v1139_v51 }
 0x164   : > { %2402 = vst.msk [vmem:[%s3456_s14 + $0xb4] sm:$0xf] %vm2356_vm2, %v2859_v38  ;;  %2466 = vst.msk [vmem:[%s3456_s14 + $0x1b4] sm:$0xf] %vm2356_vm2, %v2923_v49  ;;  %v1568_v15 = vmul.f32 %v3953_v10, %v1395_v58  ;;  %v1131_v61 = vadd.f32 %v3929_v45, %v4039_v20  ;;  %v1387_v8 = vadd.f32 %v3929_v45, %v4041_v25  ;;  %v1162_v58 = vpop.f32.mrf.mxu0 }
 0x165   : > { %v2864_v9 = vpack.c.bf16 %v1766_v40, %v1766_v40  ;;  %v2928_v55 = vpack.c.bf16 %v1830_v2, %v1830_v2  ;;  %v1764_v56 = vmax.f32 %v1636_v57, 0.0  ;;  %v1828_v26 = vmax.f32 %v1700_v31, 0.0  ;;  %v1418_v40 = vpop.f32.mrf.mxu1 }
 0x166   : > { %v1639_v5 = vadd.f32 %v3939_v50, %v1504_v59  ;;  %v1703_v7 = vadd.f32 %v3939_v50, %v1568_v15  ;;  %v1502_v27 = vmul.f32 %v3953_v10, %v1131_v61  ;;  %v1566_v42 = vmul.f32 %v3953_v10, %v1387_v8 }
 0x167   : > { %2407 = vst.msk [vmem:[%s3456_s14 + $0xc8] sm:$0xf] %vm2356_vm2, %v2864_v9  ;;  %2471 = vst.msk [vmem:[%s3456_s14 + $0x1c8] sm:$0xf] %vm2356_vm2, %v2928_v55  ;;  %v2862_v20 = vpack.c.bf16 %v1764_v56, %v1764_v56  ;;  %v2926_v25 = vpack.c.bf16 %v1828_v26, %v1828_v26  ;;  %v1152_v13 = vadd.f32 %v3929_v45, %v4065_v29 }
 0x168   : > { %v1408_v12 = vadd.f32 %v3929_v45, %v4067_v30  ;;  %v1767_v52 = vmax.f32 %v1639_v5, 0.0  ;;  %v1831_v62 = vmax.f32 %v1703_v7, 0.0  ;;  %v1637_v63 = vadd.f32 %v3939_v50, %v1502_v27  ;;  %v3077_v7 = vpop.f32.mrf.mxu0  ;;  %v3141_v27 = vpop.f32.mrf.mxu1 }
 0x169   : > { %v1701_v36 = vadd.f32 %v3939_v50, %v1566_v42  ;;  %2405 = vst.msk [vmem:[%s3456_s14 + $0xc0] sm:$0xf] %vm2356_vm2, %v2862_v20  ;;  %2469 = vst.msk [vmem:[%s3456_s14 + $0x1c0] sm:$0xf] %vm2356_vm2, %v2926_v25  ;;  %v1507_v0 = vmul.f32 %v3953_v10, %v1152_v13  ;;  %v1144_v30 = vadd.f32 %v3929_v45, %v4085_v60 }
 0x16a   : > { %v1571_v29 = vmul.f32 %v3953_v10, %v1408_v12  ;;  %v1400_v3 = vadd.f32 %v3929_v45, %v4087_v47  ;;  %v2865_v37 = vpack.c.bf16 %v1767_v52, %v1767_v52  ;;  %v2929_v23 = vpack.c.bf16 %v1831_v62, %v1831_v62 }
 0x16b   : > { %v1765_v28 = vmax.f32 %v1637_v63, 0.0  ;;  %v1829_v11 = vmax.f32 %v1701_v36, 0.0  ;;  %v1642_v14 = vadd.f32 %v3939_v50, %v1507_v0  ;;  %v1505_v16 = vmul.f32 %v3953_v10, %v1144_v30 }
 0x16c   : > { %v1706_v39 = vadd.f32 %v3939_v50, %v1571_v29  ;;  %v1569_v17 = vmul.f32 %v3953_v10, %v1400_v3  ;;  %2408 = vst.msk [vmem:[%s3456_s14 + $0xcc] sm:$0xf] %vm2356_vm2, %v2865_v37  ;;  %2472 = vst.msk [vmem:[%s3456_s14 + $0x1cc] sm:$0xf] %vm2356_vm2, %v2929_v23  ;;  %v1155_v18 = vadd.f32 %v3929_v45, %v4109_v53  ;;  %v1175_v23 = vpop.f32.mrf.mxu0 }
 0x16d   : > { %v2863_v60 = vpack.c.bf16 %v1765_v28, %v1765_v28  ;;  %v2927_v47 = vpack.c.bf16 %v1829_v11, %v1829_v11  ;;  %v1411_v1 = vadd.f32 %v3929_v45, %v4111_v22  ;;  %v1770_v6 = vmax.f32 %v1642_v14, 0.0  ;;  %v1431_v28 = vpop.f32.mrf.mxu1 }
 0x16e   : > { %v1834_v46 = vmax.f32 %v1706_v39, 0.0  ;;  %v1640_v54 = vadd.f32 %v3939_v50, %v1505_v16  ;;  %v1704_v43 = vadd.f32 %v3939_v50, %v1569_v17  ;;  %v1508_v21 = vmul.f32 %v3953_v10, %v1155_v18 }
 0x16f   : > { %2406 = vst.msk [vmem:[%s3456_s14 + $0xc4] sm:$0xf] %vm2356_vm2, %v2863_v60  ;;  %2470 = vst.msk [vmem:[%s3456_s14 + $0x1c4] sm:$0xf] %vm2356_vm2, %v2927_v47  ;;  %v1572_v48 = vmul.f32 %v3953_v10, %v1411_v1  ;;  %v1147_v53 = vadd.f32 %v3929_v45, %v4137_v33  ;;  %v1403_v22 = vadd.f32 %v3929_v45, %v4139_v24 }
 0x170   : > { %v2868_v35 = vpack.c.bf16 %v1770_v6, %v1770_v6  ;;  %v2932_v38 = vpack.c.bf16 %v1834_v46, %v1834_v46  ;;  %v1768_v49 = vmax.f32 %v1640_v54, 0.0  ;;  %v1832_v51 = vmax.f32 %v1704_v43, 0.0 }
 0x171   : > { %v1643_v2 = vadd.f32 %v3939_v50, %v1508_v21  ;;  %v1707_v57 = vadd.f32 %v3939_v50, %v1572_v48  ;;  %v1506_v31 = vmul.f32 %v3953_v10, %v1147_v53  ;;  %v1570_v59 = vmul.f32 %v3953_v10, %v1403_v22  ;;  %v3078_v48 = vpop.f32.mrf.mxu0  ;;  %v3142_v53 = vpop.f32.mrf.mxu1 }
 0x172   : > { %2411 = vst.msk [vmem:[%s3456_s14 + $0xd8] sm:$0xf] %vm2356_vm2, %v2868_v35  ;;  %2475 = vst.msk [vmem:[%s3456_s14 + $0x1d8] sm:$0xf] %vm2356_vm2, %v2932_v38  ;;  %v2866_v33 = vpack.c.bf16 %v1768_v49, %v1768_v49  ;;  %v2930_v24 = vpack.c.bf16 %v1832_v51, %v1832_v51  ;;  %v1168_v15 = vadd.f32 %v3929_v45, %v4155_v34 }
 0x173   : > { %v1424_v61 = vadd.f32 %v3929_v45, %v4157_v4  ;;  %v1771_v8 = vmax.f32 %v1643_v2, 0.0  ;;  %v1835_v9 = vmax.f32 %v1707_v57, 0.0  ;;  %v1641_v55 = vadd.f32 %v3939_v50, %v1506_v31 }
 0x174   : > { %v1705_v56 = vadd.f32 %v3939_v50, %v1570_v59  ;;  %2409 = vst.msk [vmem:[%s3456_s14 + $0xd0] sm:$0xf] %vm2356_vm2, %v2866_v33  ;;  %2473 = vst.msk [vmem:[%s3456_s14 + $0x1d0] sm:$0xf] %vm2356_vm2, %v2930_v24  ;;  %v1511_v26 = vmul.f32 %v3953_v10, %v1168_v15  ;;  %v1160_v34 = vadd.f32 %v3929_v45, %v1159_v41 }
 0x175   : > { %v1575_v5 = vmul.f32 %v3953_v10, %v1424_v61  ;;  %v1416_v4 = vadd.f32 %v3929_v45, %v1415_v19  ;;  %v2869_v42 = vpack.c.bf16 %v1771_v8, %v1771_v8  ;;  %v2933_v20 = vpack.c.bf16 %v1835_v9, %v1835_v9  ;;  %v1178_v9 = vpop.f32.mrf.mxu0 }
 0x176   : > { %v1769_v25 = vmax.f32 %v1641_v55, 0.0  ;;  %v1833_v13 = vmax.f32 %v1705_v56, 0.0  ;;  %v1646_v12 = vadd.f32 %v3939_v50, %v1511_v26  ;;  %v1509_v62 = vmul.f32 %v3953_v10, %v1160_v34  ;;  %v1434_v55 = vpop.f32.mrf.mxu1 }
 0x177   : > { %v1710_v52 = vadd.f32 %v3939_v50, %v1575_v5  ;;  %v1573_v63 = vmul.f32 %v3953_v10, %v1416_v4  ;;  %2412 = vst.msk [vmem:[%s3456_s14 + $0xdc] sm:$0xf] %vm2356_vm2, %v2869_v42  ;;  %2476 = vst.msk [vmem:[%s3456_s14 + $0x1dc] sm:$0xf] %vm2356_vm2, %v2933_v20  ;;  %v1171_v36 = vadd.f32 %v3929_v45, %v3074_v32 }
 0x178   : > { %v2867_v41 = vpack.c.bf16 %v1769_v25, %v1769_v25  ;;  %v2931_v19 = vpack.c.bf16 %v1833_v13, %v1833_v13  ;;  %v1427_v0 = vadd.f32 %v3929_v45, %v3138_v44  ;;  %v1774_v29 = vmax.f32 %v1646_v12, 0.0 }
 0x179   : > { %v1838_v30 = vmax.f32 %v1710_v52, 0.0  ;;  %v1644_v3 = vadd.f32 %v3939_v50, %v1509_v62  ;;  %v1708_v37 = vadd.f32 %v3939_v50, %v1573_v63  ;;  %v1512_v11 = vmul.f32 %v3953_v10, %v1171_v36 }
 0x17a   : > { %2410 = vst.msk [vmem:[%s3456_s14 + $0xd4] sm:$0xf] %vm2356_vm2, %v2867_v41  ;;  %2474 = vst.msk [vmem:[%s3456_s14 + $0x1d4] sm:$0xf] %vm2356_vm2, %v2931_v19  ;;  %v1576_v14 = vmul.f32 %v3953_v10, %v1427_v0  ;;  %v1163_v39 = vadd.f32 %v3929_v45, %v1162_v58  ;;  %v1419_v16 = vadd.f32 %v3929_v45, %v1418_v40 }
 0x17b   : > { %v2872_v17 = vpack.c.bf16 %v1774_v29, %v1774_v29  ;;  %v2936_v32 = vpack.c.bf16 %v1838_v30, %v1838_v30  ;;  %v1772_v44 = vmax.f32 %v1644_v3, 0.0  ;;  %v1836_v60 = vmax.f32 %v1708_v37, 0.0 }
 0x17c   : > { %v1647_v47 = vadd.f32 %v3939_v50, %v1512_v11  ;;  %v1711_v18 = vadd.f32 %v3939_v50, %v1576_v14  ;;  %v1510_v1 = vmul.f32 %v3953_v10, %v1163_v39  ;;  %v1574_v6 = vmul.f32 %v3953_v10, %v1419_v16 }
 0x17d   : > { %2415 = vst.msk [vmem:[%s3456_s14 + $0xe8] sm:$0xf] %vm2356_vm2, %v2872_v17  ;;  %2479 = vst.msk [vmem:[%s3456_s14 + $0x1e8] sm:$0xf] %vm2356_vm2, %v2936_v32  ;;  %v2870_v46 = vpack.c.bf16 %v1772_v44, %v1772_v44  ;;  %v2934_v54 = vpack.c.bf16 %v1836_v60, %v1836_v60  ;;  %v1184_v43 = vadd.f32 %v3929_v45, %v3077_v7 }
 0x17e   : > { %v1440_v21 = vadd.f32 %v3929_v45, %v3141_v27  ;;  %v1775_v22 = vmax.f32 %v1647_v47, 0.0  ;;  %v1839_v35 = vmax.f32 %v1711_v18, 0.0  ;;  %v1645_v38 = vadd.f32 %v3939_v50, %v1510_v1 }
 0x17f   : > { %v1709_v49 = vadd.f32 %v3939_v50, %v1574_v6  ;;  %2413 = vst.msk [vmem:[%s3456_s14 + $0xe0] sm:$0xf] %vm2356_vm2, %v2870_v46  ;;  %2477 = vst.msk [vmem:[%s3456_s14 + $0x1e0] sm:$0xf] %vm2356_vm2, %v2934_v54  ;;  %v1515_v51 = vmul.f32 %v3953_v10, %v1184_v43  ;;  %v1176_v40 = vadd.f32 %v3929_v45, %v1175_v23 }
 0x180   : > { %v1579_v58 = vmul.f32 %v3953_v10, %v1440_v21  ;;  %v1432_v2 = vadd.f32 %v3929_v45, %v1431_v28  ;;  %v2873_v57 = vpack.c.bf16 %v1775_v22, %v1775_v22  ;;  %v2937_v31 = vpack.c.bf16 %v1839_v35, %v1839_v35 }
 0x181   : > { %v1773_v59 = vmax.f32 %v1645_v38, 0.0  ;;  %v1837_v33 = vmax.f32 %v1709_v49, 0.0  ;;  %v1650_v24 = vadd.f32 %v3939_v50, %v1515_v51  ;;  %v1513_v61 = vmul.f32 %v3953_v10, %v1176_v40 }
 0x182   : > { %v1714_v15 = vadd.f32 %v3939_v50, %v1579_v58  ;;  %v1577_v8 = vmul.f32 %v3953_v10, %v1432_v2  ;;  %2416 = vst.msk [vmem:[%s3456_s14 + $0xec] sm:$0xf] %vm2356_vm2, %v2873_v57  ;;  %2480 = vst.msk [vmem:[%s3456_s14 + $0x1ec] sm:$0xf] %vm2356_vm2, %v2937_v31  ;;  %v1187_v5 = vadd.f32 %v3929_v45, %v3078_v48 }
 0x183   : > { %v2871_v56 = vpack.c.bf16 %v1773_v59, %v1773_v59  ;;  %v2935_v26 = vpack.c.bf16 %v1837_v33, %v1837_v33  ;;  %v1443_v34 = vadd.f32 %v3929_v45, %v3142_v53  ;;  %v1778_v4 = vmax.f32 %v1650_v24, 0.0 }
 0x184   : > { %v1842_v7 = vmax.f32 %v1714_v15, 0.0  ;;  %v1648_v27 = vadd.f32 %v3939_v50, %v1513_v61  ;;  %v1712_v42 = vadd.f32 %v3939_v50, %v1577_v8  ;;  %v1516_v20 = vmul.f32 %v3953_v10, %v1187_v5 }
 0x185   : > { %2414 = vst.msk [vmem:[%s3456_s14 + $0xe4] sm:$0xf] %vm2356_vm2, %v2871_v56  ;;  %2478 = vst.msk [vmem:[%s3456_s14 + $0x1e4] sm:$0xf] %vm2356_vm2, %v2935_v26  ;;  %v1580_v25 = vmul.f32 %v3953_v10, %v1443_v34  ;;  %v1179_v13 = vadd.f32 %v3929_v45, %v1178_v9  ;;  %v1435_v12 = vadd.f32 %v3929_v45, %v1434_v55 }
 0x186   : > { %v2876_v52 = vpack.c.bf16 %v1778_v4, %v1778_v4  ;;  %v2940_v62 = vpack.c.bf16 %v1842_v7, %v1842_v7  ;;  %v1776_v63 = vmax.f32 %v1648_v27, 0.0  ;;  %v1840_v41 = vmax.f32 %v1712_v42, 0.0 }
 0x187   : > { %v1651_v19 = vadd.f32 %v3939_v50, %v1516_v20  ;;  %v1715_v36 = vadd.f32 %v3939_v50, %v1580_v25  ;;  %v1514_v0 = vmul.f32 %v3953_v10, %v1179_v13  ;;  %v1578_v29 = vmul.f32 %v3953_v10, %v1435_v12 }
 0x188   : > { %2419 = vst.msk [vmem:[%s3456_s14 + $0xf8] sm:$0xf] %vm2356_vm2, %v2876_v52  ;;  %2483 = vst.msk [vmem:[%s3456_s14 + $0x1f8] sm:$0xf] %vm2356_vm2, %v2940_v62  ;;  %v2874_v45 = vpack.c.bf16 %v1776_v63, %v1776_v63  ;;  %v2938_v30 = vpack.c.bf16 %v1840_v41, %v1840_v41 }
 0x189   : > { %v1779_v3 = vmax.f32 %v1651_v19, 0.0  ;;  %v1843_v37 = vmax.f32 %v1715_v36, 0.0  ;;  %v1649_v23 = vadd.f32 %v3939_v50, %v1514_v0  ;;  %v1713_v28 = vadd.f32 %v3939_v50, %v1578_v29 }
 0x18a   : > { %2417 = vst.msk [vmem:[%s3456_s14 + $0xf0] sm:$0xf] %vm2356_vm2, %v2874_v45  ;;  %2481 = vst.msk [vmem:[%s3456_s14 + $0x1f0] sm:$0xf] %vm2356_vm2, %v2938_v30 }
 0x18b   : > { %v2877_v10 = vpack.c.bf16 %v1779_v3, %v1779_v3  ;;  %v2941_v11 = vpack.c.bf16 %v1843_v37, %v1843_v37  ;;  %v1777_v14 = vmax.f32 %v1649_v23, 0.0  ;;  %v1841_v39 = vmax.f32 %v1713_v28, 0.0 }
 0x18d   : > { %2420 = vst.msk [vmem:[%s3456_s14 + $0xfc] sm:$0xf] %vm2356_vm2, %v2877_v10  ;;  %2484 = vst.msk [vmem:[%s3456_s14 + $0x1fc] sm:$0xf] %vm2356_vm2, %v2941_v11  ;;  %v2875_v16 = vpack.c.bf16 %v1777_v14, %v1777_v14  ;;  %v2939_v17 = vpack.c.bf16 %v1841_v39, %v1841_v39 }
 0x18f   : > { %2418 = vst.msk [vmem:[%s3456_s14 + $0xf4] sm:$0xf] %vm2356_vm2, %v2875_v16  ;;  %2482 = vst.msk [vmem:[%s3456_s14 + $0x1f4] sm:$0xf] %vm2356_vm2, %v2939_v17 }
 0x190 PF: > { %s15_s18 = sadd.s32 1, %s3235_s18  }
 0x191   : > { %p12_p4 = scmp.ge.s32.totalorder %s15_s18, 7  }
 0x193   :  { %14 = sbr.rel (!%p12_p4) target bundleno = 1 (0x1), region = 70 }

// kernel: forward.11
= control target key start
LH: loop header
LB: loop body
LE: loop exit
PB: predicated region body
PF: predicated region fallthrough
CT: control target
= control target key end

     0   :  { %s5080_s18 = smov 0   ;;  %s6561_s0 = inlined_call_operand.vmem [shape: bf16[4096,288], index: 0, kind: input, shape index: {}]   ;;  %s6562_s1 = inlined_call_operand.vmem [shape: bf16[288,64], index: 1, kind: input, shape index: {}]   ;;  %s6563_s2 = inlined_call_operand.vmem [shape: f32[1,64], index: 2, kind: input, shape index: {}]   ;;  %s6564_s3 = inlined_call_operand.vmem [shape: f32[1,64], index: 3, kind: input, shape index: {}]   ;;  %s6565_s4 = inlined_call_operand.vmem [shape: f32[1,64], index: 4, kind: input, shape index: {}]   ;;  %s6566_s5 = inlined_call_operand.vmem [shape: bf16[4096,64], index: 5, kind: output, shape index: {}]  }
   0x1 LB: > { %s3977_s19 = sadd.s32 4294967295, %s5047_s18   ;;  %p3981_p0 = scmp.ge.s32.totalorder %s5047_s18, 1  ;;  %s5047_s18 = sphi %s5080_s18, %s15_s18  }
   0x2   : > { %p189_p1 = scmp.lt.s32.totalorder %s5047_s18, 5 }
   0x4   : > { %p190_p2 = pnand %p3981_p0, %p189_p1 }
   0x6   : > { %193 = sbr.rel (%p190_p2) target bundleno = 663 (0x297), region = 40 }
   0xb   : > { %v4761_v0 = vld [vmem:[%s6562_s1 + $0x38] sm:$0xff]   ;;  %v5049_v1 = vmov 0   ;;  %s3982_s22 = sshll.u32 %s3977_s19, 7  ;;  %v4762_v2 = vld [vmem:[%s6562_s1 + $0x30] sm:$0xff]   ;;  %v4763_v3 = vld [vmem:[%s6562_s1 + $0x28] sm:$0xff]   ;;  %vm1599_vm0 = vcmask 261120  }
   0xc   : > { %1792 = vmatprep.subr.bf16.mxu0 %v5049_v1  ;;  %4719 = vmatprep.subr.bf16.mxu1 %v5049_v1  ;;  %p219_p3 = scmp.lt.s32.totalorder %s3982_s22, 511  ;;  %v4764_v4 = vld [vmem:[%s6562_s1 + $0x20] sm:$0xff]   ;;  %v4765_v5 = vld [vmem:[%s6562_s1 + $0x18] sm:$0xff]   ;;  %v4766_v7 = vld [vmem:[%s6562_s1 + $0x10] sm:$0xff]   ;;  %vm3792_vm1 = vcmask 519168  }
   0xd   : > { %1793 = vmatpush1.bf16.msra.mxu0 %v4761_v0  ;;  %4735 = vmatpush1.bf16.msra.mxu1 %v4761_v0  ;;  %v4767_v9 = vld [vmem:[%s6562_s1 + $0x8] sm:$0xff]   ;;  %v4768_v10 = vld [vmem:[%s6562_s1] sm:$0xff]   ;;  %v4769_v11 = vld [vmem:[%s6562_s1 + $0x78] sm:$0xff]  }
   0xe   : > { %1794 = vmatprep.subr.bf16.mxu0 %v5049_v1  ;;  %4720 = vmatprep.subr.bf16.mxu1 %v5049_v1  ;;  %s6612_s22 = smov (!%p219_p3, %s3982_s22), 511  ;;  %v4770_v12 = vld [vmem:[%s6562_s1 + $0x70] sm:$0xff]   ;;  %v4771_v13 = vld [vmem:[%s6562_s1 + $0x68] sm:$0xff]   ;;  %v4772_v14 = vld [vmem:[%s6562_s1 + $0x60] sm:$0xff]  }
   0xf   : > { %s4751_s29 = smul.u32 12, %s6612_s22  ;;  %v4773_v15 = vld [vmem:[%s6562_s1 + $0x58] sm:$0xff]   ;;  %v4774_v16 = vld [vmem:[%s6562_s1 + $0x50] sm:$0xff]   ;;  %v4775_v17 = vld [vmem:[%s6562_s1 + $0x48] sm:$0xff]   ;;  %s3985_s21 = sshll.u32 %s6612_s22, 2 }
  0x10   : > { %v4776_v18 = vld [vmem:[%s6562_s1 + $0x40] sm:$0xff]   ;;  %v4783_v19 = vld [vmem:[%s6562_s1 + $0x88] sm:$0xff]   ;;  %s5571_s24 = scalar_lea.vmem %s6566_s5, %s3985_s21 }
  0x11   : > { %1795 = vmatpush1.bf16.msra.mxu0 %v4762_v2  ;;  %4736 = vmatpush1.bf16.msra.mxu1 %v4762_v2  ;;  %s5117_s9 = scalar_lea.vmem %s6561_s0, %s4751_s29  ;;  %v4832_v24 = vld [vmem:[%s6562_s1 + $0x80] sm:$0xff]  }
  0x12   : > { %1796 = vmatprep.subr.bf16.mxu0 %v5049_v1  ;;  %4721 = vmatprep.subr.bf16.mxu1 %v5049_v1  ;;  %v4779_v6 = vld [vmem:[%s5117_s9 + $0x4] ss:$12 sps:$4 sm:$0xff]   ;;  %v4777_v20 = vld [vmem:[%s5117_s9] ss:$12 sps:$4 sm:$0xff]   ;;  %v4784_v22 = vld [vmem:[%s5117_s9 + $0x1c] ss:$12 sps:$4 sm:$0xff]  }
  0x13   : > { %v4782_v8 = vld [vmem:[%s5117_s9 + $0x484] ss:$12 sps:$4 sm:$0xff]   ;;  %1824 = vmatprep.mubr.bf16.mxu0 %v4779_v6  ;;  %v4780_v21 = vld [vmem:[%s5117_s9 + $0x480] ss:$12 sps:$4 sm:$0xff]   ;;  %v4786_v23 = vld [vmem:[%s5117_s9 + $0x49c] ss:$12 sps:$4 sm:$0xff]  }
  0x14   : > { %2208 = vmatprep.mubr.bf16.mxu1 %v4782_v8  ;;  %v4788_v25 = vld [vmem:[%s5117_s9 + $0x18] ss:$12 sps:$4 sm:$0xff]   ;;  %v4790_v27 = vld [vmem:[%s5117_s9 + $0x34] ss:$12 sps:$4 sm:$0xff]   ;;  %v4794_v29 = vld [vmem:[%s5117_s9 + $0x30] ss:$12 sps:$4 sm:$0xff]  }
  0x15   : > { %1797 = vmatpush1.bf16.msra.mxu0 %v4763_v3  ;;  %4737 = vmatpush1.bf16.msra.mxu1 %v4763_v3  ;;  %v4789_v26 = vld [vmem:[%s5117_s9 + $0x498] ss:$12 sps:$4 sm:$0xff]   ;;  %v4792_v28 = vld [vmem:[%s5117_s9 + $0x4b4] ss:$12 sps:$4 sm:$0xff]   ;;  %v4795_v30 = vld [vmem:[%s5117_s9 + $0x4b0] ss:$12 sps:$4 sm:$0xff]  }
  0x16   : > { %1798 = vmatprep.subr.bf16.mxu0 %v5049_v1  ;;  %4722 = vmatprep.subr.bf16.mxu1 %v5049_v1  ;;  %v4796_v31 = vld [vmem:[%s5117_s9 + $0x4c] ss:$12 sps:$4 sm:$0xff]   ;;  %v4800_v33 = vld [vmem:[%s5117_s9 + $0x48] ss:$12 sps:$4 sm:$0xff]   ;;  %v4802_v35 = vld [vmem:[%s5117_s9 + $0x64] ss:$12 sps:$4 sm:$0xff]  }
  0x17   : > { %v4798_v32 = vld [vmem:[%s5117_s9 + $0x4cc] ss:$12 sps:$4 sm:$0xff]   ;;  %v4801_v34 = vld [vmem:[%s5117_s9 + $0x4c8] ss:$12 sps:$4 sm:$0xff]   ;;  %v4804_v36 = vld [vmem:[%s5117_s9 + $0x4e4] ss:$12 sps:$4 sm:$0xff]  }
  0x18   : > { %v4806_v37 = vld [vmem:[%s5117_s9 + $0x60] ss:$12 sps:$4 sm:$0xff]   ;;  %v4808_v39 = vld [vmem:[%s5117_s9 + $0x7c] ss:$12 sps:$4 sm:$0xff]   ;;  %v4812_v41 = vld [vmem:[%s5117_s9 + $0x78] ss:$12 sps:$4 sm:$0xff]  }
  0x19   : > { %1799 = vmatpush1.bf16.msra.mxu0 %v4764_v4  ;;  %4738 = vmatpush1.bf16.msra.mxu1 %v4764_v4  ;;  %v4807_v38 = vld [vmem:[%s5117_s9 + $0x4e0] ss:$12 sps:$4 sm:$0xff]   ;;  %v4810_v40 = vld [vmem:[%s5117_s9 + $0x4fc] ss:$12 sps:$4 sm:$0xff]   ;;  %v4813_v42 = vld [vmem:[%s5117_s9 + $0x4f8] ss:$12 sps:$4 sm:$0xff]  }
  0x1a   : > { %1800 = vmatprep.subr.bf16.mxu0 %v5049_v1  ;;  %4723 = vmatprep.subr.bf16.mxu1 %v5049_v1  ;;  %v4814_v43 = vld [vmem:[%s5117_s9 + $0x94] ss:$12 sps:$4 sm:$0xff]   ;;  %v4818_v45 = vld [vmem:[%s5117_s9 + $0x90] ss:$12 sps:$4 sm:$0xff]   ;;  %v4820_v47 = vld [vmem:[%s5117_s9 + $0xac] ss:$12 sps:$4 sm:$0xff]  }
  0x1b   : > { %v4816_v44 = vld [vmem:[%s5117_s9 + $0x514] ss:$12 sps:$4 sm:$0xff]   ;;  %v4819_v46 = vld [vmem:[%s5117_s9 + $0x510] ss:$12 sps:$4 sm:$0xff]   ;;  %v4822_v48 = vld [vmem:[%s5117_s9 + $0x52c] ss:$12 sps:$4 sm:$0xff]  }
  0x1c   : > { %v4824_v49 = vld [vmem:[%s5117_s9 + $0xa8] ss:$12 sps:$4 sm:$0xff]   ;;  %v4826_v51 = vld [vmem:[%s5117_s9 + $0xc4] ss:$12 sps:$4 sm:$0xff]   ;;  %v4830_v53 = vld [vmem:[%s5117_s9 + $0xc0] ss:$12 sps:$4 sm:$0xff]  }
  0x1d   : > { %1801 = vmatpush1.bf16.msra.mxu0 %v4765_v5  ;;  %4739 = vmatpush1.bf16.msra.mxu1 %v4765_v5  ;;  %v4825_v50 = vld [vmem:[%s5117_s9 + $0x528] ss:$12 sps:$4 sm:$0xff]   ;;  %v4828_v52 = vld [vmem:[%s5117_s9 + $0x544] ss:$12 sps:$4 sm:$0xff]   ;;  %v4831_v54 = vld [vmem:[%s5117_s9 + $0x540] ss:$12 sps:$4 sm:$0xff]  }
  0x1e   : > { %1802 = vmatprep.subr.bf16.mxu0 %v5049_v1  ;;  %4724 = vmatprep.subr.bf16.mxu1 %v5049_v1  ;;  %v4833_v55 = vld [vmem:[%s5117_s9 + $0xdc] ss:$12 sps:$4 sm:$0xff]   ;;  %v4837_v57 = vld [vmem:[%s5117_s9 + $0xd8] ss:$12 sps:$4 sm:$0xff]   ;;  %v4839_v59 = vld [vmem:[%s5117_s9 + $0xf4] ss:$12 sps:$4 sm:$0xff]  }
  0x1f   : > { %v4835_v56 = vld [vmem:[%s5117_s9 + $0x55c] ss:$12 sps:$4 sm:$0xff]   ;;  %v4838_v58 = vld [vmem:[%s5117_s9 + $0x558] ss:$12 sps:$4 sm:$0xff]   ;;  %v4841_v60 = vld [vmem:[%s5117_s9 + $0x574] ss:$12 sps:$4 sm:$0xff]  }
  0x20   : > { %v4843_v61 = vld [vmem:[%s5117_s9 + $0xf0] ss:$12 sps:$4 sm:$0xff]   ;;  %v4845_v63 = vld [vmem:[%s5117_s9 + $0x10c] ss:$12 sps:$4 sm:$0xff]   ;;  %v4850_v2 = vld [vmem:[%s5117_s9 + $0x588] ss:$12 sps:$4 sm:$0xff]  }
  0x21   : > { %1803 = vmatpush1.bf16.msra.mxu0 %v4766_v7  ;;  %4740 = vmatpush1.bf16.msra.mxu1 %v4766_v7  ;;  %v4844_v62 = vld [vmem:[%s5117_s9 + $0x570] ss:$12 sps:$4 sm:$0xff]   ;;  %v4847_v0 = vld [vmem:[%s5117_s9 + $0x58c] ss:$12 sps:$4 sm:$0xff]  }
  0x22   : > { %1804 = vmatprep.subr.bf16.mxu0 %v5049_v1  ;;  %4725 = vmatprep.subr.bf16.mxu1 %v5049_v1  ;;  %v4851_v3 = vld [vmem:[%s5117_s9 + $0x124] ss:$12 sps:$4 sm:$0xff]   ;;  %v4855_v5 = vld [vmem:[%s5117_s9 + $0x120] ss:$12 sps:$4 sm:$0xff]   ;;  %v4857_v7 = vld [vmem:[%s5117_s9 + $0x13c] ss:$12 sps:$4 sm:$0xff]  }
  0x23   : > { %v4853_v4 = vld [vmem:[%s5117_s9 + $0x5a4] ss:$12 sps:$4 sm:$0xff]   ;;  %v4856_v6 = vld [vmem:[%s5117_s9 + $0x5a0] ss:$12 sps:$4 sm:$0xff]   ;;  %v4859_v8 = vld [vmem:[%s5117_s9 + $0x5bc] ss:$12 sps:$4 sm:$0xff]  }
  0x25   : > { %1805 = vmatpush1.bf16.msra.mxu0 %v4767_v9  ;;  %4741 = vmatpush1.bf16.msra.mxu1 %v4767_v9  ;;  %v4861_v9 = vld [vmem:[%s5117_s9 + $0x138] ss:$12 sps:$4 sm:$0xff]  }
  0x26   : > { %1806 = vmatprep.subr.bf16.mxu0 %v5049_v1  ;;  %4726 = vmatprep.subr.bf16.mxu1 %v5049_v1 }
  0x29   : > { %1807 = vmatpush1.bf16.msra.mxu0 %v4768_v10  ;;  %4742 = vmatpush1.bf16.msra.mxu1 %v4768_v10  ;;  %v4862_v10 = vld [vmem:[%s5117_s9 + $0x5b8] ss:$12 sps:$4 sm:$0xff]  }
  0x2a   : > { %1808 = vmatprep.subr.bf16.mxu0 %v5049_v1  ;;  %4727 = vmatprep.subr.bf16.mxu1 %v5049_v1 }
  0x2d   : > { %1809 = vmatpush2.bf16.msra.mxu0 %v4769_v11  ;;  %4743 = vmatpush2.bf16.msra.mxu1 %v4769_v11  ;;  %v4863_v11 = vld [vmem:[%s5117_s9 + $0x154] ss:$12 sps:$4 sm:$0xff]  }
  0x2e   : > { %1810 = vmatprep.subr.bf16.mxu0 %v5049_v1  ;;  %4728 = vmatprep.subr.bf16.mxu1 %v5049_v1 }
  0x31   : > { %1811 = vmatpush2.bf16.msra.mxu0 %v4770_v12  ;;  %4744 = vmatpush2.bf16.msra.mxu1 %v4770_v12  ;;  %v4865_v12 = vld [vmem:[%s5117_s9 + $0x5d4] ss:$12 sps:$4 sm:$0xff]  }
  0x32   : > { %1812 = vmatprep.subr.bf16.mxu0 %v5049_v1  ;;  %4729 = vmatprep.subr.bf16.mxu1 %v5049_v1 }
  0x35   : > { %1813 = vmatpush2.bf16.msra.mxu0 %v4771_v13  ;;  %4745 = vmatpush2.bf16.msra.mxu1 %v4771_v13  ;;  %v4867_v13 = vld [vmem:[%s5117_s9 + $0x150] ss:$12 sps:$4 sm:$0xff]  }
  0x36   : > { %1814 = vmatprep.subr.bf16.mxu0 %v5049_v1  ;;  %4730 = vmatprep.subr.bf16.mxu1 %v5049_v1 }
  0x39   : > { %1815 = vmatpush2.bf16.msra.mxu0 %v4772_v14  ;;  %4746 = vmatpush2.bf16.msra.mxu1 %v4772_v14  ;;  %v4868_v14 = vld [vmem:[%s5117_s9 + $0x5d0] ss:$12 sps:$4 sm:$0xff]  }
  0x3a   : > { %1816 = vmatprep.subr.bf16.mxu0 %v5049_v1  ;;  %4731 = vmatprep.subr.bf16.mxu1 %v5049_v1 }
  0x3d   : > { %1817 = vmatpush2.bf16.msra.mxu0 %v4773_v15  ;;  %4747 = vmatpush2.bf16.msra.mxu1 %v4773_v15  ;;  %v4869_v15 = vld [vmem:[%s5117_s9 + $0x16c] ss:$12 sps:$4 sm:$0xff]  }
  0x3e   : > { %1818 = vmatprep.subr.bf16.mxu0 %v5049_v1  ;;  %4732 = vmatprep.subr.bf16.mxu1 %v5049_v1 }
  0x41   : > { %1819 = vmatpush2.bf16.msra.mxu0 %v4774_v16  ;;  %4748 = vmatpush2.bf16.msra.mxu1 %v4774_v16  ;;  %v4871_v16 = vld [vmem:[%s5117_s9 + $0x5ec] ss:$12 sps:$4 sm:$0xff]  }
  0x42   : > { %1820 = vmatprep.subr.bf16.mxu0 %v5049_v1  ;;  %4733 = vmatprep.subr.bf16.mxu1 %v5049_v1 }
  0x45   : > { %1821 = vmatpush2.bf16.msra.mxu0 %v4775_v17  ;;  %4749 = vmatpush2.bf16.msra.mxu1 %v4775_v17  ;;  %v4873_v17 = vld [vmem:[%s5117_s9 + $0x168] ss:$12 sps:$4 sm:$0xff]  }
  0x46   : > { %1822 = vmatprep.subr.bf16.mxu0 %v5049_v1  ;;  %4734 = vmatprep.subr.bf16.mxu1 %v5049_v1  ;;  %v4849_v1 = vld [vmem:[%s5117_s9 + $0x108] ss:$12 sps:$4 sm:$0xff]  }
  0x49   : > { %1823 = vmatpush2.bf16.msra.mxu0 %v4776_v18  ;;  %4750 = vmatpush2.bf16.msra.mxu1 %v4776_v18  ;;  %v4874_v18 = vld [vmem:[%s5117_s9 + $0x5e8] ss:$12 sps:$4 sm:$0xff]  }
  0x4a   : > { %4587 = vmatprep.subr.bf16.mxu1 %v4783_v19 }
  0x4c   : > { %1825 = vmatmul.mubr.bf16.vlgmr.msra.gmra.mxu0 %v4777_v20  ;;  %2209 = vmatmul.mubr.bf16.vlgmr.msra.gmra.mxu1 %v4780_v21  ;;  %v4877_v20 = vld [vmem:[%s5117_s9 + $0x8] ss:$12 sps:$4 sm:$0xff]   ;;  %v4878_v21 = vld [vmem:[%s5117_s9 + $0x180] ss:$12 sps:$4 sm:$0xff]  }
  0x4d   : > { %4588 = vmatpush3.bf16.msra.mxu1 %v4783_v19  ;;  %1832 = vmatprep.mubr.bf16.mxu0 %v4784_v22  ;;  %v4875_v19 = vld [vmem:[%s5117_s9 + $0x184] ss:$12 sps:$4 sm:$0xff]   ;;  %v4879_v22 = vld [vmem:[%s5117_s9 + $0x20] ss:$12 sps:$4 sm:$0xff]  }
  0x4e   : > { %2216 = vmatprep.mubr.bf16.mxu1 %v4786_v23  ;;  %4589 = vmatprep.subr.bf16.mxu1 %v4832_v24  ;;  %v4880_v23 = vld [vmem:[%s5117_s9 + $0x19c] ss:$12 sps:$4 sm:$0xff]  }
  0x51   : > { %4590 = vmatpush3.bf16.msra.mxu1 %v4832_v24  ;;  %v4882_v24 = vld [vmem:[%s5117_s9 + $0x38] ss:$12 sps:$4 sm:$0xff]  }
  0x54   : > { %1833 = vmatmul.mubr.bf16.gmra.mxu0 %v4788_v25  ;;  %2217 = vmatmul.mubr.bf16.gmra.mxu1 %v4789_v26  ;;  %v4883_v25 = vld [vmem:[%s5117_s9 + $0x198] ss:$12 sps:$4 sm:$0xff]   ;;  %v4884_v26 = vld [vmem:[%s5117_s9 + $0x50] ss:$12 sps:$4 sm:$0xff]  }
  0x55   : > { %1840 = vmatprep.mubr.bf16.mxu0 %v4790_v27  ;;  %2224 = vmatprep.mubr.bf16.mxu1 %v4792_v28  ;;  %v4885_v27 = vld [vmem:[%s5117_s9 + $0x1b4] ss:$12 sps:$4 sm:$0xff]  }
  0x56   : > { %v4887_v28 = vld [vmem:[%s5117_s9 + $0x68] ss:$12 sps:$4 sm:$0xff]  }
  0x5c   : > { %1841 = vmatmul.mubr.bf16.gmra.mxu0 %v4794_v29  ;;  %2225 = vmatmul.mubr.bf16.gmra.mxu1 %v4795_v30  ;;  %v4888_v29 = vld [vmem:[%s5117_s9 + $0x1b0] ss:$12 sps:$4 sm:$0xff]   ;;  %v4889_v30 = vld [vmem:[%s5117_s9 + $0x80] ss:$12 sps:$4 sm:$0xff]  }
  0x5d   : > { %1848 = vmatprep.mubr.bf16.mxu0 %v4796_v31  ;;  %2232 = vmatprep.mubr.bf16.mxu1 %v4798_v32  ;;  %v4890_v31 = vld [vmem:[%s5117_s9 + $0x1cc] ss:$12 sps:$4 sm:$0xff]  }
  0x5e   : > { %v4892_v32 = vld [vmem:[%s5117_s9 + $0x98] ss:$12 sps:$4 sm:$0xff]  }
  0x64   : > { %1849 = vmatmul.mubr.bf16.gmra.mxu0 %v4800_v33  ;;  %2233 = vmatmul.mubr.bf16.gmra.mxu1 %v4801_v34  ;;  %v4893_v33 = vld [vmem:[%s5117_s9 + $0x1c8] ss:$12 sps:$4 sm:$0xff]   ;;  %v4894_v34 = vld [vmem:[%s5117_s9 + $0xb0] ss:$12 sps:$4 sm:$0xff]  }
  0x65   : > { %1856 = vmatprep.mubr.bf16.mxu0 %v4802_v35  ;;  %2240 = vmatprep.mubr.bf16.mxu1 %v4804_v36  ;;  %v4895_v35 = vld [vmem:[%s5117_s9 + $0x1e4] ss:$12 sps:$4 sm:$0xff]   ;;  %v4897_v36 = vld [vmem:[%s5117_s9 + $0xc8] ss:$12 sps:$4 sm:$0xff]  }
  0x6c   : > { %1857 = vmatmul.mubr.bf16.gmra.mxu0 %v4806_v37  ;;  %2241 = vmatmul.mubr.bf16.gmra.mxu1 %v4807_v38  ;;  %v4898_v37 = vld [vmem:[%s5117_s9 + $0x1e0] ss:$12 sps:$4 sm:$0xff]  }
  0x6d   : > { %1864 = vmatprep.mubr.bf16.mxu0 %v4808_v39  ;;  %2248 = vmatprep.mubr.bf16.mxu1 %v4810_v40  ;;  %v4899_v38 = vld [vmem:[%s5117_s9 + $0xe0] ss:$12 sps:$4 sm:$0xff]   ;;  %v4900_v39 = vld [vmem:[%s5117_s9 + $0x1fc] ss:$12 sps:$4 sm:$0xff]   ;;  %v4902_v40 = vld [vmem:[%s5117_s9 + $0xf8] ss:$12 sps:$4 sm:$0xff]  }
  0x74   : > { %1865 = vmatmul.mubr.bf16.gmra.mxu0 %v4812_v41  ;;  %2249 = vmatmul.mubr.bf16.gmra.mxu1 %v4813_v42  ;;  %v4903_v41 = vld [vmem:[%s5117_s9 + $0x1f8] ss:$12 sps:$4 sm:$0xff]   ;;  %v4904_v42 = vld [vmem:[%s5117_s9 + $0x110] ss:$12 sps:$4 sm:$0xff]  }
  0x75   : > { %1872 = vmatprep.mubr.bf16.mxu0 %v4814_v43  ;;  %2256 = vmatprep.mubr.bf16.mxu1 %v4816_v44  ;;  %v4905_v43 = vld [vmem:[%s5117_s9 + $0x214] ss:$12 sps:$4 sm:$0xff]  }
  0x76   : > { %v4907_v44 = vld [vmem:[%s5117_s9 + $0x128] ss:$12 sps:$4 sm:$0xff]  }
  0x7c   : > { %1873 = vmatmul.mubr.bf16.gmra.mxu0 %v4818_v45  ;;  %2257 = vmatmul.mubr.bf16.gmra.mxu1 %v4819_v46  ;;  %v4908_v45 = vld [vmem:[%s5117_s9 + $0x210] ss:$12 sps:$4 sm:$0xff]   ;;  %v4909_v46 = vld [vmem:[%s5117_s9 + $0x140] ss:$12 sps:$4 sm:$0xff]  }
  0x7d   : > { %1880 = vmatprep.mubr.bf16.mxu0 %v4820_v47  ;;  %2264 = vmatprep.mubr.bf16.mxu1 %v4822_v48  ;;  %v4910_v47 = vld [vmem:[%s5117_s9 + $0x22c] ss:$12 sps:$4 sm:$0xff]  }
  0x7e   : > { %v4912_v48 = vld [vmem:[%s5117_s9 + $0x158] ss:$12 sps:$4 sm:$0xff]  }
  0x84   : > { %1881 = vmatmul.mubr.bf16.gmra.mxu0 %v4824_v49  ;;  %2265 = vmatmul.mubr.bf16.gmra.mxu1 %v4825_v50  ;;  %v4913_v49 = vld [vmem:[%s5117_s9 + $0x228] ss:$12 sps:$4 sm:$0xff]   ;;  %v4914_v50 = vld [vmem:[%s5117_s9 + $0x170] ss:$12 sps:$4 sm:$0xff]  }
  0x85   : > { %1888 = vmatprep.mubr.bf16.mxu0 %v4826_v51  ;;  %2272 = vmatprep.mubr.bf16.mxu1 %v4828_v52  ;;  %v4915_v51 = vld [vmem:[%s5117_s9 + $0x244] ss:$12 sps:$4 sm:$0xff]   ;;  %v4917_v52 = vld [vmem:[%s5117_s9 + $0x188] ss:$12 sps:$4 sm:$0xff]  }
  0x8c   : > { %1889 = vmatmul.mubr.bf16.gmra.mxu0 %v4830_v53  ;;  %2273 = vmatmul.mubr.bf16.gmra.mxu1 %v4831_v54  ;;  %v4918_v53 = vld [vmem:[%s5117_s9 + $0x240] ss:$12 sps:$4 sm:$0xff]  }
  0x8d   : > { %1896 = vmatprep.mubr.bf16.mxu0 %v4833_v55  ;;  %2280 = vmatprep.mubr.bf16.mxu1 %v4835_v56  ;;  %v4919_v54 = vld [vmem:[%s5117_s9 + $0x1a0] ss:$12 sps:$4 sm:$0xff]   ;;  %v4920_v55 = vld [vmem:[%s5117_s9 + $0x25c] ss:$12 sps:$4 sm:$0xff]   ;;  %v4922_v56 = vld [vmem:[%s5117_s9 + $0x1b8] ss:$12 sps:$4 sm:$0xff]  }
  0x94   : > { %1897 = vmatmul.mubr.bf16.gmra.mxu0 %v4837_v57  ;;  %2281 = vmatmul.mubr.bf16.gmra.mxu1 %v4838_v58 }
  0x95   : > { %1904 = vmatprep.mubr.bf16.mxu0 %v4839_v59  ;;  %2288 = vmatprep.mubr.bf16.mxu1 %v4841_v60 }
  0x9c   : > { %1905 = vmatmul.mubr.bf16.gmra.mxu0 %v4843_v61  ;;  %2289 = vmatmul.mubr.bf16.gmra.mxu1 %v4844_v62 }
  0x9d   : > { %1912 = vmatprep.mubr.bf16.mxu0 %v4845_v63  ;;  %2296 = vmatprep.mubr.bf16.mxu1 %v4847_v0  ;;  %v4923_v63 = vld [vmem:[%s5117_s9 + $0x258] ss:$12 sps:$4 sm:$0xff]   ;;  %v4924_v0 = vld [vmem:[%s5117_s9 + $0x1d0] ss:$12 sps:$4 sm:$0xff]  }
  0xa4   : > { %1913 = vmatmul.mubr.bf16.gmra.mxu0 %v4849_v1  ;;  %2297 = vmatmul.mubr.bf16.gmra.mxu1 %v4850_v2  ;;  %v4925_v1 = vld [vmem:[%s5117_s9 + $0x274] ss:$12 sps:$4 sm:$0xff]  }
  0xa5   : > { %1920 = vmatprep.mubr.bf16.mxu0 %v4851_v3  ;;  %2304 = vmatprep.mubr.bf16.mxu1 %v4853_v4  ;;  %v4927_v2 = vld [vmem:[%s5117_s9 + $0x1e8] ss:$12 sps:$4 sm:$0xff]  }
  0xac   : > { %1921 = vmatmul.mubr.bf16.gmra.mxu0 %v4855_v5  ;;  %2305 = vmatmul.mubr.bf16.gmra.mxu1 %v4856_v6 }
  0xad   : > { %1928 = vmatprep.mubr.bf16.mxu0 %v4857_v7  ;;  %2312 = vmatprep.mubr.bf16.mxu1 %v4859_v8 }
  0xb4   : > { %1929 = vmatmul.mubr.bf16.gmra.mxu0 %v4861_v9  ;;  %2313 = vmatmul.mubr.bf16.gmra.mxu1 %v4862_v10 }
  0xb5   : > { %1936 = vmatprep.mubr.bf16.mxu0 %v4863_v11  ;;  %2320 = vmatprep.mubr.bf16.mxu1 %v4865_v12  ;;  %v4928_v11 = vld [vmem:[%s5117_s9 + $0x270] ss:$12 sps:$4 sm:$0xff]   ;;  %v4929_v12 = vld [vmem:[%s5117_s9 + $0x200] ss:$12 sps:$4 sm:$0xff]  }
  0xbc   : > { %1937 = vmatmul.mubr.bf16.gmra.mxu0 %v4867_v13  ;;  %2321 = vmatmul.mubr.bf16.gmra.mxu1 %v4868_v14  ;;  %v4930_v13 = vld [vmem:[%s5117_s9 + $0x28c] ss:$12 sps:$4 sm:$0xff]  }
  0xbd   : > { %1944 = vmatprep.mubr.bf16.mxu0 %v4869_v15  ;;  %2328 = vmatprep.mubr.bf16.mxu1 %v4871_v16  ;;  %v4932_v14 = vld [vmem:[%s5117_s9 + $0x218] ss:$12 sps:$4 sm:$0xff]  }
  0xc4   : > { %1945 = vmatmul.mubr.bf16.gmra.mxu0 %v4873_v17  ;;  %2329 = vmatmul.mubr.bf16.gmra.mxu1 %v4874_v18 }
  0xc5   : > { %1952 = vmatprep.mubr.bf16.mxu0 %v4875_v19  ;;  %4591 = vmatprep.mubr.msk.bf16.mxu1 %vm1599_vm0, %v4877_v20 }
  0xcc   : > { %1953 = vmatmul.mubr.bf16.gmra.mxu0 %v4878_v21  ;;  %4592 = vmatmul.mubr.msk.bf16.vlgmr.msra.gmra.mxu1 %vm1599_vm0, %v4879_v22 }
  0xcd   : > { %1960 = vmatprep.mubr.bf16.mxu0 %v4880_v23  ;;  %4595 = vmatprep.mubr.msk.bf16.mxu1 %vm1599_vm0, %v4882_v24  ;;  %v4933_v23 = vld [vmem:[%s5117_s9 + $0x288] ss:$12 sps:$4 sm:$0xff]   ;;  %v4934_v24 = vld [vmem:[%s5117_s9 + $0x230] ss:$12 sps:$4 sm:$0xff]  }
  0xd4   : > { %1961 = vmatmul.mubr.bf16.gmra.mxu0 %v4883_v25  ;;  %4596 = vmatmul.mubr.msk.bf16.gmra.mxu1 %vm1599_vm0, %v4884_v26  ;;  %v4937_v25 = vld [vmem:[%s5117_s9 + $0x2a4] ss:$12 sps:$4 sm:$0xff]   ;;  %v4938_v26 = vld [vmem:[%s5117_s9 + $0x248] ss:$12 sps:$4 sm:$0xff]  }
  0xd5   : > { %1968 = vmatprep.mubr.bf16.mxu0 %v4885_v27  ;;  %4599 = vmatprep.mubr.msk.bf16.mxu1 %vm1599_vm0, %v4887_v28 }
  0xdc   : > { %1969 = vmatmul.mubr.bf16.gmra.mxu0 %v4888_v29  ;;  %4600 = vmatmul.mubr.msk.bf16.gmra.mxu1 %vm1599_vm0, %v4889_v30 }
  0xdd   : > { %1976 = vmatprep.mubr.bf16.mxu0 %v4890_v31  ;;  %4603 = vmatprep.mubr.msk.bf16.mxu1 %vm1599_vm0, %v4892_v32 }
  0xe4   : > { %1977 = vmatmul.mubr.bf16.gmra.mxu0 %v4893_v33  ;;  %4604 = vmatmul.mubr.msk.bf16.gmra.mxu1 %vm1599_vm0, %v4894_v34 }
  0xe5   : > { %1984 = vmatprep.mubr.bf16.mxu0 %v4895_v35  ;;  %4607 = vmatprep.mubr.msk.bf16.mxu1 %vm1599_vm0, %v4897_v36  ;;  %v4935_v35 = vld [vmem:[%s5117_s9 + $0x2a0] ss:$12 sps:$4 sm:$0xff]  }
  0xe6   : > { %v4939_v36 = vld [vmem:[%s5117_s9 + $0x260] ss:$12 sps:$4 sm:$0xff]  }
  0xec   : > { %1985 = vmatmul.mubr.bf16.gmra.mxu0 %v4898_v37  ;;  %4608 = vmatmul.mubr.msk.bf16.gmra.mxu1 %vm1599_vm0, %v4899_v38  ;;  %v4942_v37 = vld [vmem:[%s5117_s9 + $0x2bc] ss:$12 sps:$4 sm:$0xff]   ;;  %v4943_v38 = vld [vmem:[%s5117_s9 + $0x278] ss:$12 sps:$4 sm:$0xff]  }
  0xed   : > { %1992 = vmatprep.mubr.bf16.mxu0 %v4900_v39  ;;  %4611 = vmatprep.mubr.msk.bf16.mxu1 %vm1599_vm0, %v4902_v40 }
  0xf4   : > { %1993 = vmatmul.mubr.bf16.gmra.mxu0 %v4903_v41  ;;  %4612 = vmatmul.mubr.msk.bf16.gmra.mxu1 %vm1599_vm0, %v4904_v42 }
  0xf5   : > { %2000 = vmatprep.mubr.bf16.mxu0 %v4905_v43  ;;  %4615 = vmatprep.mubr.msk.bf16.mxu1 %vm1599_vm0, %v4907_v44 }
  0xfc   : > { %2001 = vmatmul.mubr.bf16.gmra.mxu0 %v4908_v45  ;;  %4616 = vmatmul.mubr.msk.bf16.gmra.mxu1 %vm1599_vm0, %v4909_v46 }
  0xfd   : > { %2008 = vmatprep.mubr.bf16.mxu0 %v4910_v47  ;;  %4619 = vmatprep.mubr.msk.bf16.mxu1 %vm1599_vm0, %v4912_v48  ;;  %v4940_v47 = vld [vmem:[%s5117_s9 + $0x2b8] ss:$12 sps:$4 sm:$0xff]   ;;  %v4944_v48 = vld [vmem:[%s5117_s9 + $0x290] ss:$12 sps:$4 sm:$0xff]  }
 0x104   : > { %2009 = vmatmul.mubr.bf16.gmra.mxu0 %v4913_v49  ;;  %4620 = vmatmul.mubr.msk.bf16.gmra.mxu1 %vm1599_vm0, %v4914_v50  ;;  %v4947_v49 = vld [vmem:[%s5117_s9 + $0x2d4] ss:$12 sps:$4 sm:$0xff]  }
 0x105   : > { %2016 = vmatprep.mubr.bf16.mxu0 %v4915_v51  ;;  %4623 = vmatprep.mubr.msk.bf16.mxu1 %vm1599_vm0, %v4917_v52  ;;  %v4948_v50 = vld [vmem:[%s5117_s9 + $0x2a8] ss:$12 sps:$4 sm:$0xff]  }
 0x10c   : > { %v5301_v57 = vpop.f32.mrf.mxu0  ;;  %2017 = vmatmul.mubr.bf16.gmra.mxu0 %v4918_v53  ;;  %v5303_v58 = vpop.f32.mrf.mxu1  ;;  %4624 = vmatmul.mubr.msk.bf16.gmra.mxu1 %vm1599_vm0, %v4919_v54 }
 0x10d   : > { %2024 = vmatprep.mubr.bf16.mxu0 %v4920_v55  ;;  %4627 = vmatprep.mubr.msk.bf16.mxu1 %vm1599_vm0, %v4922_v56 }
 0x10e   : > { %v1828_v59 = vpop.f32.mrf.mxu0  ;;  %v2212_v60 = vpop.f32.mrf.mxu1 }
 0x110   : > { %v5307_v61 = vpop.f32.mrf.mxu0  ;;  %v5309_v62 = vpop.f32.mrf.mxu1 }
 0x112   : > { %v1831_v3 = vpop.f32.mrf.mxu0  ;;  %v2215_v4 = vpop.f32.mrf.mxu1 }
 0x114   : > { %v5315_v5 = vpop.f32.mrf.mxu0  ;;  %2025 = vmatmul.mubr.bf16.gmra.mxu0 %v4923_v63  ;;  %v5317_v6 = vpop.f32.mrf.mxu1  ;;  %4628 = vmatmul.mubr.msk.bf16.gmra.mxu1 %vm1599_vm0, %v4924_v0  ;;  %v4945_v63 = vld [vmem:[%s5117_s9 + $0x2d0] ss:$12 sps:$4 sm:$0xff]   ;;  %v4949_v0 = vld [vmem:[%s5117_s9 + $0x2c0] ss:$12 sps:$4 sm:$0xff]  }
 0x115   : > { %2032 = vmatprep.mubr.bf16.mxu0 %v4925_v1  ;;  %4631 = vmatprep.mubr.msk.bf16.mxu1 %vm1599_vm0, %v4927_v2  ;;  %v4952_v1 = vld [vmem:[%s5117_s9 + $0x2ec] ss:$12 sps:$4 sm:$0xff]  }
 0x116   : > { %v1836_v7 = vpop.f32.mrf.mxu0  ;;  %v2220_v8 = vpop.f32.mrf.mxu1  ;;  %v4953_v2 = vld [vmem:[%s5117_s9 + $0x2d8] ss:$12 sps:$4 sm:$0xff]  }
 0x118   : > { %v5321_v9 = vpop.f32.mrf.mxu0  ;;  %v5323_v10 = vpop.f32.mrf.mxu1 }
 0x11a   : > { %v1839_v15 = vpop.f32.mrf.mxu0  ;;  %v2223_v16 = vpop.f32.mrf.mxu1 }
 0x11b   : > { %v4950_v15 = vld [vmem:[%s5117_s9 + $0x2e8] ss:$12 sps:$4 sm:$0xff]   ;;  %v4954_v16 = vld [vmem:[%s5117_s9 + $0x2f0] ss:$12 sps:$4 sm:$0xff]  }
 0x11c   : > { %v5329_v17 = vpop.f32.mrf.mxu0  ;;  %2033 = vmatmul.mubr.bf16.gmra.mxu0 %v4928_v11  ;;  %v5331_v18 = vpop.f32.mrf.mxu1  ;;  %4632 = vmatmul.mubr.msk.bf16.gmra.mxu1 %vm1599_vm0, %v4929_v12 }
 0x11d   : > { %2040 = vmatprep.mubr.bf16.mxu0 %v4930_v13  ;;  %4635 = vmatprep.mubr.msk.bf16.mxu1 %vm1599_vm0, %v4932_v14 }
 0x11e   : > { %v1844_v19 = vpop.f32.mrf.mxu0  ;;  %v2228_v20 = vpop.f32.mrf.mxu1 }
 0x11f   : > { %v4957_v19 = vld [vmem:[%s5117_s9 + $0x304] ss:$12 sps:$4 sm:$0xff]   ;;  %v4958_v20 = vld [vmem:[%s5117_s9 + $0x308] ss:$12 sps:$4 sm:$0xff]  }
 0x120   : > { %v5335_v21 = vpop.f32.mrf.mxu0  ;;  %v5337_v22 = vpop.f32.mrf.mxu1 }
 0x122   : > { %v1847_v27 = vpop.f32.mrf.mxu0  ;;  %v2231_v28 = vpop.f32.mrf.mxu1 }
 0x124   : > { %v5343_v29 = vpop.f32.mrf.mxu0  ;;  %2041 = vmatmul.mubr.bf16.gmra.mxu0 %v4933_v23  ;;  %v5345_v30 = vpop.f32.mrf.mxu1  ;;  %4636 = vmatmul.mubr.msk.bf16.gmra.mxu1 %vm1599_vm0, %v4934_v24 }
 0x125   : > { %2048 = vmatprep.mubr.bf16.mxu0 %v4937_v25  ;;  %4639 = vmatprep.mubr.msk.bf16.mxu1 %vm1599_vm0, %v4938_v26 }
 0x126   : > { %v1852_v31 = vpop.f32.mrf.mxu0  ;;  %v2236_v32 = vpop.f32.mrf.mxu1 }
 0x128   : > { %v5349_v33 = vpop.f32.mrf.mxu0  ;;  %v5351_v34 = vpop.f32.mrf.mxu1 }
 0x12a   : > { %v1855_v39 = vpop.f32.mrf.mxu0  ;;  %v2239_v40 = vpop.f32.mrf.mxu1 }
 0x12c   : > { %v5357_v41 = vpop.f32.mrf.mxu0  ;;  %2049 = vmatmul.mubr.bf16.gmra.mxu0 %v4935_v35  ;;  %v5359_v42 = vpop.f32.mrf.mxu1  ;;  %4640 = vmatmul.mubr.msk.bf16.gmra.mxu1 %vm1599_vm0, %v4939_v36  ;;  %v4955_v35 = vld [vmem:[%s5117_s9 + $0x300] ss:$12 sps:$4 sm:$0xff]  }
 0x12d   : > { %2056 = vmatprep.mubr.bf16.mxu0 %v4942_v37  ;;  %4643 = vmatprep.mubr.msk.bf16.mxu1 %vm1599_vm0, %v4943_v38  ;;  %v4959_v36 = vld [vmem:[%s5117_s9 + $0x320] ss:$12 sps:$4 sm:$0xff]   ;;  %v4962_v37 = vld [vmem:[%s5117_s9 + $0x31c] ss:$12 sps:$4 sm:$0xff]   ;;  %v4963_v38 = vld [vmem:[%s5117_s9 + $0x338] ss:$12 sps:$4 sm:$0xff]  }
 0x12e   : > { %v1860_v43 = vpop.f32.mrf.mxu0  ;;  %v2244_v44 = vpop.f32.mrf.mxu1 }
 0x130   : > { %v5363_v45 = vpop.f32.mrf.mxu0  ;;  %v5365_v46 = vpop.f32.mrf.mxu1 }
 0x132   : > { %v1863_v51 = vpop.f32.mrf.mxu0  ;;  %v2247_v52 = vpop.f32.mrf.mxu1 }
 0x133   : > { %v4960_v51 = vld [vmem:[%s5117_s9 + $0x318] ss:$12 sps:$4 sm:$0xff]   ;;  %v4964_v52 = vld [vmem:[%s5117_s9 + $0x350] ss:$12 sps:$4 sm:$0xff]  }
 0x134   : > { %v5371_v53 = vpop.f32.mrf.mxu0  ;;  %2057 = vmatmul.mubr.bf16.gmra.mxu0 %v4940_v47  ;;  %v5373_v54 = vpop.f32.mrf.mxu1  ;;  %4644 = vmatmul.mubr.msk.bf16.gmra.mxu1 %vm1599_vm0, %v4944_v48 }
 0x135   : > { %2064 = vmatprep.mubr.bf16.mxu0 %v4947_v49  ;;  %4647 = vmatprep.mubr.msk.bf16.mxu1 %vm1599_vm0, %v4948_v50 }
 0x136   : > { %v1868_v55 = vpop.f32.mrf.mxu0  ;;  %v2252_v56 = vpop.f32.mrf.mxu1 }
 0x137   : > { %v4967_v55 = vld [vmem:[%s5117_s9 + $0x334] ss:$12 sps:$4 sm:$0xff]  }
 0x138   : > { %v5377_v59 = vpop.f32.mrf.mxu0  ;;  %v5379_v60 = vpop.f32.mrf.mxu1  ;;  %v4968_v56 = vld [vmem:[%s5117_s9 + $0x368] ss:$12 sps:$4 sm:$0xff]  }
 0x139   : > { %6567 = vst [vmem:[#allocation2_spill] sm:$0xff] %v5379_v60 }
 0x13a   : > { %v1871_v3 = vpop.f32.mrf.mxu0  ;;  %v2255_v4 = vpop.f32.mrf.mxu1 }
 0x13c   : > { %v5385_v7 = vpop.f32.mrf.mxu0  ;;  %2065 = vmatmul.mubr.bf16.gmra.mxu0 %v4945_v63  ;;  %v5387_v8 = vpop.f32.mrf.mxu1  ;;  %4648 = vmatmul.mubr.msk.bf16.gmra.mxu1 %vm1599_vm0, %v4949_v0 }
 0x13d   : > { %6568 = vst [vmem:[#allocation3_spill] sm:$0xff] %v5387_v8  ;;  %2072 = vmatprep.mubr.bf16.mxu0 %v4952_v1  ;;  %4651 = vmatprep.mubr.msk.bf16.mxu1 %vm1599_vm0, %v4953_v2 }
 0x13e   : > { %v1876_v11 = vpop.f32.mrf.mxu0  ;;  %v2260_v12 = vpop.f32.mrf.mxu1 }
 0x140   : > { %v5391_v13 = vpop.f32.mrf.mxu0  ;;  %v5393_v14 = vpop.f32.mrf.mxu1 }
 0x141   : > { %6569 = vst [vmem:[#allocation4_spill] sm:$0xff] %v5393_v14 }
 0x142   : > { %v1879_v23 = vpop.f32.mrf.mxu0  ;;  %v2263_v24 = vpop.f32.mrf.mxu1 }
 0x144   : > { %v5399_v25 = vpop.f32.mrf.mxu0  ;;  %2073 = vmatmul.mubr.bf16.gmra.mxu0 %v4950_v15  ;;  %v5401_v26 = vpop.f32.mrf.mxu1  ;;  %4652 = vmatmul.mubr.msk.bf16.gmra.mxu1 %vm1599_vm0, %v4954_v16  ;;  %v4965_v15 = vld [vmem:[%s5117_s9 + $0x330] ss:$12 sps:$4 sm:$0xff]   ;;  %v4969_v16 = vld [vmem:[%s5117_s9 + $0x380] ss:$12 sps:$4 sm:$0xff]  }
 0x145   : > { %6570 = vst [vmem:[#allocation5_spill] sm:$0xff] %v5401_v26  ;;  %2080 = vmatprep.mubr.bf16.mxu0 %v4957_v19  ;;  %4655 = vmatprep.mubr.msk.bf16.mxu1 %vm1599_vm0, %v4958_v20  ;;  %v4972_v19 = vld [vmem:[%s5117_s9 + $0x34c] ss:$12 sps:$4 sm:$0xff]   ;;  %v5008_v26 = vld [vmem:[%s5117_s9 + $0x4e8] ss:$12 sps:$4 sm:$0xff]  }
 0x146   : > { %v1884_v27 = vpop.f32.mrf.mxu0  ;;  %v2268_v28 = vpop.f32.mrf.mxu1  ;;  %v4973_v20 = vld [vmem:[%s5117_s9 + $0x398] ss:$12 sps:$4 sm:$0xff]  }
 0x148   : > { %v5405_v31 = vpop.f32.mrf.mxu0  ;;  %v5407_v32 = vpop.f32.mrf.mxu1 }
 0x149   : > { %6571 = vst [vmem:[#allocation6_spill] sm:$0xff] %v5407_v32  ;;  %v5007_v32 = vld [vmem:[%s5117_s9 + $0x3f4] ss:$12 sps:$4 sm:$0xff]  }
 0x14a   : > { %v1887_v39 = vpop.f32.mrf.mxu0  ;;  %v2271_v40 = vpop.f32.mrf.mxu1 }
 0x14b   : > { %v4970_v39 = vld [vmem:[%s5117_s9 + $0x348] ss:$12 sps:$4 sm:$0xff]   ;;  %v4974_v40 = vld [vmem:[%s5117_s9 + $0x3b0] ss:$12 sps:$4 sm:$0xff]  }
 0x14c   : > { %v5413_v43 = vpop.f32.mrf.mxu0  ;;  %2081 = vmatmul.mubr.bf16.gmra.mxu0 %v4955_v35  ;;  %v5415_v44 = vpop.f32.mrf.mxu1  ;;  %4656 = vmatmul.mubr.msk.bf16.gmra.mxu1 %vm1599_vm0, %v4959_v36 }
 0x14d   : > { %6572 = vst [vmem:[#allocation7_spill] sm:$0xff] %v5415_v44  ;;  %2088 = vmatprep.mubr.bf16.mxu0 %v4962_v37  ;;  %4659 = vmatprep.mubr.msk.bf16.mxu1 %vm1599_vm0, %v4963_v38 }
 0x14e   : > { %v1892_v47 = vpop.f32.mrf.mxu0  ;;  %v2276_v48 = vpop.f32.mrf.mxu1 }
 0x14f   : > { %v4977_v47 = vld [vmem:[%s5117_s9 + $0x364] ss:$12 sps:$4 sm:$0xff]   ;;  %v4978_v48 = vld [vmem:[%s5117_s9 + $0x3c8] ss:$12 sps:$4 sm:$0xff]  }
 0x150   : > { %v5419_v49 = vpop.f32.mrf.mxu0  ;;  %v5421_v50 = vpop.f32.mrf.mxu1 }
 0x151   : > { %6573 = vst [vmem:[#allocation8_spill] sm:$0xff] %v5421_v50 }
 0x152   : > { %v1895_v63 = vpop.f32.mrf.mxu0  ;;  %v2279_v0 = vpop.f32.mrf.mxu1 }
 0x154   : > { %v5427_v1 = vpop.f32.mrf.mxu0  ;;  %2089 = vmatmul.mubr.bf16.gmra.mxu0 %v4960_v51  ;;  %v5429_v2 = vpop.f32.mrf.mxu1  ;;  %4660 = vmatmul.mubr.msk.bf16.gmra.mxu1 %vm1599_vm0, %v4964_v52 }
 0x155   : > { %6574 = vst [vmem:[#allocation9_spill] sm:$0xff] %v5429_v2  ;;  %2096 = vmatprep.mubr.bf16.mxu0 %v4967_v55  ;;  %4663 = vmatprep.mubr.msk.bf16.mxu1 %vm1599_vm0, %v4968_v56 }
 0x156   : > { %v1900_v3 = vpop.f32.mrf.mxu0  ;;  %v2284_v4 = vpop.f32.mrf.mxu1 }
 0x158   : > { %v5433_v11 = vpop.f32.mrf.mxu0  ;;  %v5435_v12 = vpop.f32.mrf.mxu1 }
 0x159   : > { %6575 = vst [vmem:[#allocation10_spill] sm:$0xff] %v5435_v12 }
 0x15a   : > { %v1903_v23 = vpop.f32.mrf.mxu0  ;;  %v2287_v24 = vpop.f32.mrf.mxu1 }
 0x15c   : > { %v5441_v27 = vpop.f32.mrf.mxu0  ;;  %2097 = vmatmul.mubr.bf16.gmra.mxu0 %v4965_v15  ;;  %v5443_v28 = vpop.f32.mrf.mxu1  ;;  %4664 = vmatmul.mubr.msk.bf16.gmra.mxu1 %vm1599_vm0, %v4969_v16  ;;  %v4975_v15 = vld [vmem:[%s5117_s9 + $0x360] ss:$12 sps:$4 sm:$0xff]  }
 0x15d   : > { %6576 = vst [vmem:[#allocation11_spill] sm:$0xff] %v5443_v28  ;;  %2104 = vmatprep.mubr.bf16.mxu0 %v4972_v19  ;;  %4667 = vmatprep.mubr.msk.bf16.mxu1 %vm1599_vm0, %v4973_v20  ;;  %v4979_v16 = vld [vmem:[%s5117_s9 + $0x3e0] ss:$12 sps:$4 sm:$0xff]   ;;  %v4982_v19 = vld [vmem:[%s5117_s9 + $0x37c] ss:$12 sps:$4 sm:$0xff]  }
 0x15e   : > { %v1908_v35 = vpop.f32.mrf.mxu0  ;;  %v2292_v36 = vpop.f32.mrf.mxu1  ;;  %v4983_v20 = vld [vmem:[%s5117_s9 + $0x3f8] ss:$12 sps:$4 sm:$0xff]   ;;  %v4999_v28 = vld [vmem:[%s5117_s9 + $0x4a0] ss:$12 sps:$4 sm:$0xff]  }
 0x160   : > { %v5447_v37 = vpop.f32.mrf.mxu0  ;;  %v5449_v38 = vpop.f32.mrf.mxu1 }
 0x161   : > { %6577 = vst [vmem:[#allocation12_spill] sm:$0xff] %v5449_v38  ;;  %v4995_v38 = vld [vmem:[%s5117_s9 + $0x3c0] ss:$12 sps:$4 sm:$0xff]  }
 0x162   : > { %v1911_v51 = vpop.f32.mrf.mxu0  ;;  %v2295_v52 = vpop.f32.mrf.mxu1 }
 0x163   : > { %v4980_v51 = vld [vmem:[%s5117_s9 + $0x378] ss:$12 sps:$4 sm:$0xff]   ;;  %v4984_v52 = vld [vmem:[%s5117_s9 + $0x410] ss:$12 sps:$4 sm:$0xff]  }
 0x164   : > { %v5455_v55 = vpop.f32.mrf.mxu0  ;;  %2105 = vmatmul.mubr.bf16.gmra.mxu0 %v4970_v39  ;;  %v5457_v56 = vpop.f32.mrf.mxu1  ;;  %4668 = vmatmul.mubr.msk.bf16.gmra.mxu1 %vm1599_vm0, %v4974_v40 }
 0x165   : > { %6578 = vst [vmem:[#allocation13_spill] sm:$0xff] %v5457_v56  ;;  %2112 = vmatprep.mubr.bf16.mxu0 %v4977_v47  ;;  %4671 = vmatprep.mubr.msk.bf16.mxu1 %vm1599_vm0, %v4978_v48 }
 0x166   : > { %v1916_v63 = vpop.f32.mrf.mxu0  ;;  %v2300_v0 = vpop.f32.mrf.mxu1 }
 0x167   : > { %v4987_v63 = vld [vmem:[%s5117_s9 + $0x394] ss:$12 sps:$4 sm:$0xff]  }
 0x168   : > { %v5461_v3 = vpop.f32.mrf.mxu0  ;;  %v5463_v4 = vpop.f32.mrf.mxu1  ;;  %v4988_v0 = vld [vmem:[%s5117_s9 + $0x428] ss:$12 sps:$4 sm:$0xff]  }
 0x169   : > { %6579 = vst [vmem:[#allocation14_spill] sm:$0xff] %v5463_v4  ;;  %v4990_v4 = vld [vmem:[%s5117_s9 + $0x3a8] ss:$12 sps:$4 sm:$0xff]  }
 0x16a   : > { %v1919_v23 = vpop.f32.mrf.mxu0  ;;  %v2303_v24 = vpop.f32.mrf.mxu1 }
 0x16c   : > { %v5469_v35 = vpop.f32.mrf.mxu0  ;;  %2113 = vmatmul.mubr.bf16.gmra.mxu0 %v4975_v15  ;;  %v5471_v36 = vpop.f32.mrf.mxu1  ;;  %4672 = vmatmul.mubr.msk.bf16.gmra.mxu1 %vm1599_vm0, %v4979_v16 }
 0x16d   : > { %6580 = vst [vmem:[#allocation15_spill] sm:$0xff] %v5471_v36  ;;  %2120 = vmatprep.mubr.bf16.mxu0 %v4982_v19  ;;  %4675 = vmatprep.mubr.msk.bf16.mxu1 %vm1599_vm0, %v4983_v20 }
 0x16e   : > { %v1924_v39 = vpop.f32.mrf.mxu0  ;;  %v2308_v40 = vpop.f32.mrf.mxu1 }
 0x170   : > { %v5475_v47 = vpop.f32.mrf.mxu0  ;;  %v5477_v48 = vpop.f32.mrf.mxu1 }
 0x171   : > { %6581 = vst [vmem:[#allocation16_spill] sm:$0xff] %v5477_v48  ;;  %v4985_v48 = vld [vmem:[%s5117_s9 + $0x390] ss:$12 sps:$4 sm:$0xff]  }
 0x172   : > { %v1927_v15 = vpop.f32.mrf.mxu0  ;;  %v2311_v23 = vpop.f32.mrf.mxu1 }
 0x173   : > { %v4989_v15 = vld [vmem:[%s5117_s9 + $0x440] ss:$12 sps:$4 sm:$0xff]  }
 0x174   : > { %v5483_v16 = vpop.f32.mrf.mxu0  ;;  %2121 = vmatmul.mubr.bf16.gmra.mxu0 %v4980_v51  ;;  %v5485_v19 = vpop.f32.mrf.mxu1  ;;  %4676 = vmatmul.mubr.msk.bf16.gmra.mxu1 %vm1599_vm0, %v4984_v52  ;;  %v4992_v23 = vld [vmem:[%s5117_s9 + $0x3ac] ss:$12 sps:$4 sm:$0xff]  }
 0x175   : > { %6582 = vst [vmem:[#allocation17_spill] sm:$0xff] %v5485_v19  ;;  %2128 = vmatprep.mubr.bf16.mxu0 %v4987_v63  ;;  %4679 = vmatprep.mubr.msk.bf16.mxu1 %vm1599_vm0, %v4988_v0  ;;  %v4993_v51 = vld [vmem:[%s5117_s9 + $0x458] ss:$12 sps:$4 sm:$0xff]  }
 0x176   : > { %v1932_v20 = vpop.f32.mrf.mxu0  ;;  %v2316_v24 = vpop.f32.mrf.mxu1 }
 0x178   : > { %v5489_v39 = vpop.f32.mrf.mxu0  ;;  %v5491_v40 = vpop.f32.mrf.mxu1 }
 0x179   : > { %6583 = vst [vmem:[#allocation18_spill] sm:$0xff] %v5491_v40 }
 0x17a   : > { %v1935_v19 = vpop.f32.mrf.mxu0  ;;  %v2319_v36 = vpop.f32.mrf.mxu1 }
 0x17b   : > { %v4994_v19 = vld [vmem:[%s5117_s9 + $0x470] ss:$12 sps:$4 sm:$0xff]  }
 0x17c   : > { %v5497_v52 = vpop.f32.mrf.mxu0  ;;  %2129 = vmatmul.mubr.bf16.gmra.mxu0 %v4985_v48  ;;  %v5499_v63 = vpop.f32.mrf.mxu1  ;;  %4680 = vmatmul.mubr.msk.bf16.gmra.mxu1 %vm1599_vm0, %v4989_v15  ;;  %v4997_v36 = vld [vmem:[%s5117_s9 + $0x3c4] ss:$12 sps:$4 sm:$0xff]   ;;  %v4998_v48 = vld [vmem:[%s5117_s9 + $0x488] ss:$12 sps:$4 sm:$0xff]  }
 0x17d   : > { %6584 = vst [vmem:[#allocation19_spill] sm:$0xff] %v5499_v63  ;;  %2136 = vmatprep.mubr.bf16.mxu0 %v4992_v23  ;;  %4683 = vmatprep.mubr.msk.bf16.mxu1 %vm1599_vm0, %v4993_v51 }
 0x17e   : > { %v1940_v0 = vpop.f32.mrf.mxu0  ;;  %v2324_v20 = vpop.f32.mrf.mxu1 }
 0x180   : > { %v5503_v24 = vpop.f32.mrf.mxu0  ;;  %v5505_v40 = vpop.f32.mrf.mxu1 }
 0x181   : > { %6585 = vst [vmem:[#allocation20_spill] sm:$0xff] %v5505_v40 }
 0x182   : > { %v1943_v63 = vpop.f32.mrf.mxu0  ;;  %v2327_v56 = vpop.f32.mrf.mxu1 }
 0x183   : > { %v5002_v63 = vld [vmem:[%s5117_s9 + $0x3dc] ss:$12 sps:$4 sm:$0xff]   ;;  %v5003_v56 = vld [vmem:[%s5117_s9 + $0x4b8] ss:$12 sps:$4 sm:$0xff]  }
 0x184   : > { %v5511_v15 = vpop.f32.mrf.mxu0  ;;  %2137 = vmatmul.mubr.bf16.gmra.mxu0 %v4990_v4  ;;  %v5513_v23 = vpop.f32.mrf.mxu1  ;;  %4684 = vmatmul.mubr.msk.bf16.gmra.mxu1 %vm1599_vm0, %v4994_v19  ;;  %v5528_v4 = vld [vmem:[%s6563_s2] ss:$0 sm:$0xff] }
 0x185   : > { %6586 = vst [vmem:[#allocation21_spill] sm:$0xff] %v5513_v23  ;;  %2144 = vmatprep.mubr.bf16.mxu0 %v4997_v36  ;;  %4687 = vmatprep.mubr.msk.bf16.mxu1 %vm1599_vm0, %v4998_v48  ;;  %v1835_v36 = vadd.f32 %v5528_v4, %v5315_v5  ;;  %v5546_v5 = vld [vmem:[%s6565_s4] ss:$0 sm:$0xff]  ;;  %v1843_v60 = vadd.f32 %v5528_v4, %v5329_v17 }
 0x186   : > { %v1948_v51 = vpop.f32.mrf.mxu0  ;;  %v2332_v0 = vpop.f32.mrf.mxu1 }
 0x187   : > { %v5537_v0 = vld [vmem:[%s6564_s3] ss:$0 sm:$0xff] }
 0x188   : > { %v5517_v20 = vpop.f32.mrf.mxu0  ;;  %v5519_v40 = vpop.f32.mrf.mxu1 }
 0x189   : > { %6587 = vst [vmem:[#allocation22_spill] sm:$0xff] %v5519_v40 }
 0x18a   : > { %v1951_v23 = vpop.f32.mrf.mxu0  ;;  %v2335_v19 = vpop.f32.mrf.mxu1 }
 0x18b   : > { %v1827_v23 = vadd.f32 %v5528_v4, %v5301_v57 }
 0x18c   : > { %v5532_v48 = vpop.f32.mrf.mxu0  ;;  %2145 = vmatmul.mubr.bf16.gmra.mxu0 %v4995_v38  ;;  %v4593_v51 = vpop.f32.mrf.mxu1  ;;  %4688 = vmatmul.mubr.msk.bf16.gmra.mxu1 %vm1599_vm0, %v4999_v28  ;;  %v1838_v28 = vadd.f32 %v5528_v4, %v5321_v9 }
 0x18d   : > { %v2380_v19 = vadd.f32 %v4593_v51, %v1835_v36  ;;  %2152 = vmatprep.mubr.bf16.mxu0 %v5002_v63  ;;  %4691 = vmatprep.mubr.msk.bf16.mxu1 %vm1599_vm0, %v5003_v56  ;;  %v5000_v36 = vld [vmem:[%s5117_s9 + $0x3d8] ss:$12 sps:$4 sm:$0xff]   ;;  %v5004_v56 = vld [vmem:[%s5117_s9 + $0x4d0] ss:$12 sps:$4 sm:$0xff]   ;;  %v1830_v51 = vadd.f32 %v5528_v4, %v5307_v61  ;;  %v1851_v61 = vadd.f32 %v5528_v4, %v5343_v29 }
 0x18e   : > { %v1956_v38 = vpop.f32.mrf.mxu0  ;;  %v2371_v40 = vpop.f32.mrf.mxu1 }
 0x18f   : > { %v2891_v12 = vmul.f32 %v5537_v0, %v2380_v19  ;;  %v2372_v2 = vadd.f32 %v2371_v40, %v1827_v23 }
 0x190   : > { %v5551_v57 = vpop.f32.mrf.mxu0  ;;  %v4594_v63 = vpop.f32.mrf.mxu1 }
 0x191   : > { %v3026_v50 = vadd.f32 %v5546_v5, %v2891_v12  ;;  %v2889_v38 = vmul.f32 %v5537_v0, %v2372_v2  ;;  %v2383_v44 = vadd.f32 %v4594_v63, %v1838_v28 }
 0x192   : > { %v1959_v9 = vpop.f32.mrf.mxu0  ;;  %v2374_v14 = vpop.f32.mrf.mxu1 }
 0x193   : > { %v3154_v19 = vmax.f32 %v3026_v50, 0.0  ;;  %v3024_v40 = vadd.f32 %v5546_v5, %v2889_v38  ;;  %v2892_v23 = vmul.f32 %v5537_v0, %v2383_v44  ;;  %v2375_v8 = vadd.f32 %v2374_v14, %v1830_v51 }
 0x194   : > { %v5573_v2 = vpop.f32.mrf.mxu0  ;;  %2153 = vmatmul.mubr.bf16.gmra.mxu0 %v5000_v36  ;;  %v4597_v50 = vpop.f32.mrf.mxu1  ;;  %4692 = vmatmul.mubr.msk.bf16.gmra.mxu1 %vm1599_vm0, %v5004_v56 }
 0x195   : > { %v4395_v14 = vpack.c.bf16 %v3154_v19, %v3154_v19  ;;  %v3152_v44 = vmax.f32 %v3024_v40, 0.0  ;;  %v3027_v17 = vadd.f32 %v5546_v5, %v2892_v23  ;;  %v2890_v29 = vmul.f32 %v5537_v0, %v2375_v8  ;;  %2160 = vmatprep.mubr.bf16.mxu0 %v5007_v32  ;;  %4695 = vmatprep.mubr.msk.bf16.mxu1 %vm1599_vm0, %v5008_v26  ;;  %v5005_v19 = vld [vmem:[%s5117_s9 + $0x3f0] ss:$12 sps:$4 sm:$0xff]   ;;  %v5009_v40 = vld [vmem:[%s5117_s9 + $0x500] ss:$12 sps:$4 sm:$0xff]  }
 0x196   : > { %v2396_v12 = vadd.f32 %v4597_v50, %v1851_v61  ;;  %v1964_v28 = vpop.f32.mrf.mxu0  ;;  %v2387_v63 = vpop.f32.mrf.mxu1  ;;  %v1854_v8 = vadd.f32 %v5528_v4, %v5349_v33  ;;  %v1846_v23 = vadd.f32 %v5528_v4, %v5335_v21 }
 0x197   : > { %3795 = vst.msk [vmem:[%s5571_s24 + $0x8] sm:$0xf] %vm3792_vm1, %v4395_v14  ;;  %v4393_v36 = vpack.c.bf16 %v3152_v44, %v3152_v44  ;;  %v3155_v56 = vmax.f32 %v3027_v17, 0.0  ;;  %v3025_v51 = vadd.f32 %v5546_v5, %v2890_v29  ;;  %v2388_v38 = vadd.f32 %v2387_v63, %v1843_v60  ;;  %v5012_v14 = vld [vmem:[%s5117_s9 + $0x40c] ss:$12 sps:$4 sm:$0xff]  }
 0x198   : > { %v2895_v32 = vmul.f32 %v5537_v0, %v2396_v12  ;;  %v5585_v9 = vpop.f32.mrf.mxu0  ;;  %v4598_v26 = vpop.f32.mrf.mxu1  ;;  %v5013_v44 = vld [vmem:[%s5117_s9 + $0x518] ss:$12 sps:$4 sm:$0xff]   ;;  %v1867_v28 = vadd.f32 %v5528_v4, %v5371_v53 }
 0x199   : > { %3793 = vst.msk [vmem:[%s5571_s24] sm:$0xf] %vm3792_vm1, %v4393_v36  ;;  %v4396_v61 = vpack.c.bf16 %v3155_v56, %v3155_v56  ;;  %v3153_v50 = vmax.f32 %v3025_v51, 0.0  ;;  %v2893_v60 = vmul.f32 %v5537_v0, %v2388_v38  ;;  %v2399_v17 = vadd.f32 %v4598_v26, %v1854_v8 }
 0x19a   : > { %v3030_v33 = vadd.f32 %v5546_v5, %v2895_v32  ;;  %v1967_v29 = vpop.f32.mrf.mxu0  ;;  %v2390_v12 = vpop.f32.mrf.mxu1  ;;  %v1859_v8 = vadd.f32 %v5528_v4, %v5357_v41 }
 0x19b   : > { %3796 = vst.msk [vmem:[%s5571_s24 + $0xc] sm:$0xf] %vm3792_vm1, %v4396_v61  ;;  %v4394_v21 = vpack.c.bf16 %v3153_v50, %v3153_v50  ;;  %v3028_v63 = vadd.f32 %v5546_v5, %v2893_v60  ;;  %v2391_v36 = vadd.f32 %v2390_v12, %v1846_v23  ;;  %v2896_v51 = vmul.f32 %v5537_v0, %v2399_v17 }
 0x19c   : > { %v3158_v56 = vmax.f32 %v3030_v33, 0.0  ;;  %v5603_v38 = vpop.f32.mrf.mxu0  ;;  %2161 = vmatmul.mubr.bf16.gmra.mxu0 %v5005_v19  ;;  %v4601_v32 = vpop.f32.mrf.mxu1  ;;  %4696 = vmatmul.mubr.msk.bf16.gmra.mxu1 %vm1599_vm0, %v5009_v40 }
 0x19d   : > { %3794 = vst.msk [vmem:[%s5571_s24 + $0x4] sm:$0xf] %vm3792_vm1, %v4394_v21  ;;  %v3156_v53 = vmax.f32 %v3028_v63, 0.0  ;;  %v2894_v26 = vmul.f32 %v5537_v0, %v2391_v36  ;;  %v2412_v61 = vadd.f32 %v4601_v32, %v1867_v28  ;;  %2168 = vmatprep.mubr.bf16.mxu0 %v5012_v14  ;;  %4699 = vmatprep.mubr.msk.bf16.mxu1 %vm1599_vm0, %v5013_v44  ;;  %v5010_v28 = vld [vmem:[%s5117_s9 + $0x408] ss:$12 sps:$4 sm:$0xff]  }
 0x19e   : > { %v4399_v23 = vpack.c.bf16 %v3158_v56, %v3158_v56  ;;  %v3031_v19 = vadd.f32 %v5546_v5, %v2896_v51  ;;  %v1972_v40 = vpop.f32.mrf.mxu0  ;;  %v2403_v50 = vpop.f32.mrf.mxu1  ;;  %v1870_v14 = vadd.f32 %v5528_v4, %v5377_v59  ;;  %v5014_v21 = vld [vmem:[%s5117_s9 + $0x530] ss:$12 sps:$4 sm:$0xff]   ;;  %v1862_v63 = vadd.f32 %v5528_v4, %v5363_v45  ;;  %v5018_v32 = vld [vmem:[%s5117_s9 + $0x548] ss:$12 sps:$4 sm:$0xff]  }
 0x19f   : > { %v4397_v60 = vpack.c.bf16 %v3156_v53, %v3156_v53  ;;  %v3029_v41 = vadd.f32 %v5546_v5, %v2894_v26  ;;  %v2899_v33 = vmul.f32 %v5537_v0, %v2412_v61  ;;  %v2404_v17 = vadd.f32 %v2403_v50, %v1859_v8  ;;  %v5017_v59 = vld [vmem:[%s5117_s9 + $0x424] ss:$12 sps:$4 sm:$0xff]  }
 0x1a0   : > { %3799 = vst.msk [vmem:[%s5571_s24 + $0x18] sm:$0xf] %vm3792_vm1, %v4399_v23  ;;  %v3159_v44 = vmax.f32 %v3031_v19, 0.0  ;;  %v5619_v29 = vpop.f32.mrf.mxu0  ;;  %v4602_v12 = vpop.f32.mrf.mxu1  ;;  %v1883_v50 = vadd.f32 %v5528_v4, %v5399_v25 }
 0x1a1   : > { %3797 = vst.msk [vmem:[%s5571_s24 + $0x10] sm:$0xf] %vm3792_vm1, %v4397_v60  ;;  %v3157_v36 = vmax.f32 %v3029_v41, 0.0  ;;  %v3034_v56 = vadd.f32 %v5546_v5, %v2899_v33  ;;  %v2897_v51 = vmul.f32 %v5537_v0, %v2404_v17  ;;  %v2415_v53 = vadd.f32 %v4602_v12, %v1870_v14 }
 0x1a2   : > { %v4400_v8 = vpack.c.bf16 %v3159_v44, %v3159_v44  ;;  %v1975_v26 = vpop.f32.mrf.mxu0  ;;  %v2406_v61 = vpop.f32.mrf.mxu1  ;;  %v1875_v17 = vadd.f32 %v5528_v4, %v5385_v7  ;;  %v1886_v7 = vadd.f32 %v5528_v4, %v5405_v31 }
 0x1a3   : > { %v4398_v23 = vpack.c.bf16 %v3157_v36, %v3157_v36  ;;  %v3162_v19 = vmax.f32 %v3034_v56, 0.0  ;;  %v3032_v40 = vadd.f32 %v5546_v5, %v2897_v51  ;;  %v2407_v45 = vadd.f32 %v2406_v61, %v1862_v63  ;;  %v5015_v26 = vld [vmem:[%s5117_s9 + $0x420] ss:$12 sps:$4 sm:$0xff]  }
 0x1a4   : > { %3800 = vst.msk [vmem:[%s5571_s24 + $0x1c] sm:$0xf] %vm3792_vm1, %v4400_v8  ;;  %v2900_v60 = vmul.f32 %v5537_v0, %v2415_v53  ;;  %v5637_v41 = vpop.f32.mrf.mxu0  ;;  %2169 = vmatmul.mubr.bf16.gmra.mxu0 %v5010_v28  ;;  %v4605_v33 = vpop.f32.mrf.mxu1  ;;  %4700 = vmatmul.mubr.msk.bf16.gmra.mxu1 %vm1599_vm0, %v5014_v21  ;;  %v5019_v61 = vld [vmem:[%s5117_s9 + $0x560] ss:$12 sps:$4 sm:$0xff]  }
 0x1a5   : > { %3798 = vst.msk [vmem:[%s5571_s24 + $0x14] sm:$0xf] %vm3792_vm1, %v4398_v23  ;;  %v4403_v14 = vpack.c.bf16 %v3162_v19, %v3162_v19  ;;  %v3160_v44 = vmax.f32 %v3032_v40, 0.0  ;;  %v2898_v25 = vmul.f32 %v5537_v0, %v2407_v45  ;;  %2176 = vmatprep.mubr.bf16.mxu0 %v5017_v59  ;;  %4703 = vmatprep.mubr.msk.bf16.mxu1 %vm1599_vm0, %v5018_v32  ;;  %v5022_v45 = vld [vmem:[%s5117_s9 + $0x43c] ss:$12 sps:$4 sm:$0xff]  }
 0x1a6   : > { %v3035_v12 = vadd.f32 %v5546_v5, %v2900_v60  ;;  %v2428_v28 = vadd.f32 %v4605_v33, %v1883_v50  ;;  %v1980_v63 = vpop.f32.mrf.mxu0  ;;  %v2419_v21 = vpop.f32.mrf.mxu1  ;;  %v1878_v23 = vadd.f32 %v5528_v4, %v5391_v13  ;;  %v5023_v50 = vld [vmem:[%s5117_s9 + $0x578] ss:$12 sps:$4 sm:$0xff]  }
 0x1a7   : > { %3803 = vst.msk [vmem:[%s5571_s24 + $0x28] sm:$0xf] %vm3792_vm1, %v4403_v14  ;;  %v4401_v36 = vpack.c.bf16 %v3160_v44, %v3160_v44  ;;  %v3033_v56 = vadd.f32 %v5546_v5, %v2898_v25  ;;  %v2420_v51 = vadd.f32 %v2419_v21, %v1875_v17 }
 0x1a8   : > { %v3163_v59 = vmax.f32 %v3035_v12, 0.0  ;;  %v2903_v32 = vmul.f32 %v5537_v0, %v2428_v28  ;;  %v5653_v8 = vpop.f32.mrf.mxu0  ;;  %v4606_v53 = vpop.f32.mrf.mxu1  ;;  %v1899_v28 = vadd.f32 %v5528_v4, %v5427_v1 }
 0x1a9   : > { %3801 = vst.msk [vmem:[%s5571_s24 + $0x20] sm:$0xf] %vm3792_vm1, %v4401_v36  ;;  %v3161_v31 = vmax.f32 %v3033_v56, 0.0  ;;  %v2901_v19 = vmul.f32 %v5537_v0, %v2420_v51  ;;  %v2431_v40 = vadd.f32 %v4606_v53, %v1886_v7  ;;  %v1891_v36 = vadd.f32 %v5528_v4, %v5413_v43 }
 0x1aa   : > { %v4404_v60 = vpack.c.bf16 %v3163_v59, %v3163_v59  ;;  %v3038_v33 = vadd.f32 %v5546_v5, %v2903_v32  ;;  %v1983_v17 = vpop.f32.mrf.mxu0  ;;  %v2422_v14 = vpop.f32.mrf.mxu1 }
 0x1ab   : > { %v4402_v44 = vpack.c.bf16 %v3161_v31, %v3161_v31  ;;  %v3036_v25 = vadd.f32 %v5546_v5, %v2901_v19  ;;  %v2904_v13 = vmul.f32 %v5537_v0, %v2431_v40  ;;  %v2423_v12 = vadd.f32 %v2422_v14, %v1878_v23 }
 0x1ac   : > { %3804 = vst.msk [vmem:[%s5571_s24 + $0x2c] sm:$0xf] %vm3792_vm1, %v4404_v60  ;;  %v3166_v63 = vmax.f32 %v3038_v33, 0.0  ;;  %v5671_v21 = vpop.f32.mrf.mxu0  ;;  %2177 = vmatmul.mubr.bf16.gmra.mxu0 %v5015_v26  ;;  %v4609_v7 = vpop.f32.mrf.mxu1  ;;  %4704 = vmatmul.mubr.msk.bf16.gmra.mxu1 %vm1599_vm0, %v5019_v61  ;;  %v1902_v19 = vadd.f32 %v5528_v4, %v5433_v11  ;;  %v5020_v60 = vld [vmem:[%s5117_s9 + $0x438] ss:$12 sps:$4 sm:$0xff]   ;;  %v1894_v17 = vadd.f32 %v5528_v4, %v5419_v49 }
 0x1ad   : > { %3802 = vst.msk [vmem:[%s5571_s24 + $0x24] sm:$0xf] %vm3792_vm1, %v4402_v44  ;;  %v3164_v56 = vmax.f32 %v3036_v25, 0.0  ;;  %v3039_v51 = vadd.f32 %v5546_v5, %v2904_v13  ;;  %v2902_v1 = vmul.f32 %v5537_v0, %v2423_v12  ;;  %2184 = vmatprep.mubr.bf16.mxu0 %v5022_v45  ;;  %4707 = vmatprep.mubr.msk.bf16.mxu1 %vm1599_vm0, %v5023_v50  ;;  %v5024_v33 = vld [vmem:[%s5117_s9 + $0x590] ss:$12 sps:$4 sm:$0xff]  }
 0x1ae   : > { %v4407_v59 = vpack.c.bf16 %v3166_v63, %v3166_v63  ;;  %v2444_v32 = vadd.f32 %v4609_v7, %v1899_v28  ;;  %v1988_v53 = vpop.f32.mrf.mxu0  ;;  %v2435_v26 = vpop.f32.mrf.mxu1  ;;  %v5027_v11 = vld [vmem:[%s5117_s9 + $0x454] ss:$12 sps:$4 sm:$0xff]  }
 0x1af   : > { %v4405_v61 = vpack.c.bf16 %v3164_v56, %v3164_v56  ;;  %v3167_v43 = vmax.f32 %v3039_v51, 0.0  ;;  %v3037_v23 = vadd.f32 %v5546_v5, %v2902_v1  ;;  %v2436_v31 = vadd.f32 %v2435_v26, %v1891_v36  ;;  %v5028_v13 = vld [vmem:[%s5117_s9 + $0x5a8] ss:$12 sps:$4 sm:$0xff]  }
 0x1b0   : > { %3807 = vst.msk [vmem:[%s5571_s24 + $0x38] sm:$0xf] %vm3792_vm1, %v4407_v59  ;;  %v2907_v40 = vmul.f32 %v5537_v0, %v2444_v32  ;;  %v5687_v45 = vpop.f32.mrf.mxu0  ;;  %v4610_v50 = vpop.f32.mrf.mxu1  ;;  %v1915_v36 = vadd.f32 %v5528_v4, %v5455_v55  ;;  %v1907_v26 = vadd.f32 %v5528_v4, %v5441_v27 }
 0x1b1   : > { %3805 = vst.msk [vmem:[%s5571_s24 + $0x30] sm:$0xf] %vm3792_vm1, %v4405_v61  ;;  %v4408_v14 = vpack.c.bf16 %v3167_v43, %v3167_v43  ;;  %v3165_v44 = vmax.f32 %v3037_v23, 0.0  ;;  %v2905_v25 = vmul.f32 %v5537_v0, %v2436_v31  ;;  %v2447_v28 = vadd.f32 %v4610_v50, %v1902_v19 }
 0x1b2   : > { %v3042_v12 = vadd.f32 %v5546_v5, %v2907_v40  ;;  %v1991_v63 = vpop.f32.mrf.mxu0  ;;  %v2438_v7 = vpop.f32.mrf.mxu1 }
 0x1b3   : > { %3808 = vst.msk [vmem:[%s5571_s24 + $0x3c] sm:$0xf] %vm3792_vm1, %v4408_v14  ;;  %v4406_v49 = vpack.c.bf16 %v3165_v44, %v3165_v44  ;;  %v3040_v56 = vadd.f32 %v5546_v5, %v2905_v25  ;;  %v2439_v51 = vadd.f32 %v2438_v7, %v1894_v17  ;;  %v2908_v59 = vmul.f32 %v5537_v0, %v2447_v28 }
 0x1b4   : > { %v3170_v1 = vmax.f32 %v3042_v12, 0.0  ;;  %v5705_v32 = vpop.f32.mrf.mxu0  ;;  %2185 = vmatmul.mubr.bf16.gmra.mxu0 %v5020_v60  ;;  %v4613_v53 = vpop.f32.mrf.mxu1  ;;  %4708 = vmatmul.mubr.msk.bf16.gmra.mxu1 %vm1599_vm0, %v5024_v33  ;;  %v1918_v17 = vadd.f32 %v5528_v4, %v5461_v3  ;;  %v1910_v12 = vadd.f32 %v5528_v4, %v5447_v37  ;;  %v5032_v3 = vld [vmem:[%s5117_s9 + $0x46c] ss:$12 sps:$4 sm:$0xff]  }
 0x1b5   : > { %3806 = vst.msk [vmem:[%s5571_s24 + $0x34] sm:$0xf] %vm3792_vm1, %v4406_v49  ;;  %v3168_v55 = vmax.f32 %v3040_v56, 0.0  ;;  %v2906_v61 = vmul.f32 %v5537_v0, %v2439_v51  ;;  %v2460_v43 = vadd.f32 %v4613_v53, %v1915_v36  ;;  %2192 = vmatprep.mubr.bf16.mxu0 %v5027_v11  ;;  %4711 = vmatprep.mubr.msk.bf16.mxu1 %vm1599_vm0, %v5028_v13  ;;  %v5025_v11 = vld [vmem:[%s5117_s9 + $0x450] ss:$12 sps:$4 sm:$0xff]  }
 0x1b6   : > { %v4411_v23 = vpack.c.bf16 %v3170_v1, %v3170_v1  ;;  %v3043_v31 = vadd.f32 %v5546_v5, %v2908_v59  ;;  %v1996_v19 = vpop.f32.mrf.mxu0  ;;  %v2451_v40 = vpop.f32.mrf.mxu1  ;;  %v5029_v13 = vld [vmem:[%s5117_s9 + $0x5c0] ss:$12 sps:$4 sm:$0xff]   ;;  %v5033_v36 = vld [vmem:[%s5117_s9 + $0x5d8] ss:$12 sps:$4 sm:$0xff]  }
 0x1b7   : > { %v4409_v50 = vpack.c.bf16 %v3168_v55, %v3168_v55  ;;  %v3041_v27 = vadd.f32 %v5546_v5, %v2906_v61  ;;  %v2911_v60 = vmul.f32 %v5537_v0, %v2460_v43  ;;  %v2452_v33 = vadd.f32 %v2451_v40, %v1907_v26 }
 0x1b8   : > { %3811 = vst.msk [vmem:[%s5571_s24 + $0x48] sm:$0xf] %vm3792_vm1, %v4411_v23  ;;  %v3171_v14 = vmax.f32 %v3043_v31, 0.0  ;;  %v5721_v44 = vpop.f32.mrf.mxu0  ;;  %v4614_v25 = vpop.f32.mrf.mxu1  ;;  %v1931_v55 = vadd.f32 %v5528_v4, %v5483_v16  ;;  %v1923_v31 = vadd.f32 %v5528_v4, %v5469_v35  ;;  %v1934_v35 = vadd.f32 %v5528_v4, %v5489_v39 }
 0x1b9   : > { %3809 = vst.msk [vmem:[%s5571_s24 + $0x40] sm:$0xf] %vm3792_vm1, %v4409_v50  ;;  %v3169_v28 = vmax.f32 %v3041_v27, 0.0  ;;  %v3046_v63 = vadd.f32 %v5546_v5, %v2911_v60  ;;  %v2909_v7 = vmul.f32 %v5537_v0, %v2452_v33  ;;  %v2463_v56 = vadd.f32 %v4614_v25, %v1918_v17 }
 0x1ba   : > { %v4412_v49 = vpack.c.bf16 %v3171_v14, %v3171_v14  ;;  %v1999_v51 = vpop.f32.mrf.mxu0  ;;  %v2454_v1 = vpop.f32.mrf.mxu1 }
 0x1bb   : > { %v4410_v59 = vpack.c.bf16 %v3169_v28, %v3169_v28  ;;  %v3174_v53 = vmax.f32 %v3046_v63, 0.0  ;;  %v3044_v26 = vadd.f32 %v5546_v5, %v2909_v7  ;;  %v2455_v37 = vadd.f32 %v2454_v1, %v1910_v12  ;;  %v5030_v63 = vld [vmem:[%s5117_s9 + $0x468] ss:$12 sps:$4 sm:$0xff]   ;;  %v5034_v7 = vld [vmem:[%s5117_s9 + $0x5f0] ss:$12 sps:$4 sm:$0xff]  }
 0x1bc   : > { %3812 = vst.msk [vmem:[%s5571_s24 + $0x4c] sm:$0xf] %vm3792_vm1, %v4412_v49  ;;  %v2912_v61 = vmul.f32 %v5537_v0, %v2463_v56  ;;  %v5739_v43 = vpop.f32.mrf.mxu0  ;;  %2193 = vmatmul.mubr.bf16.gmra.mxu0 %v5025_v11  ;;  %v4617_v23 = vpop.f32.mrf.mxu1  ;;  %4712 = vmatmul.mubr.msk.bf16.gmra.mxu1 %vm1599_vm0, %v5029_v13 }
 0x1bd   : > { %3810 = vst.msk [vmem:[%s5571_s24 + $0x44] sm:$0xf] %vm3792_vm1, %v4410_v59  ;;  %v4415_v19 = vpack.c.bf16 %v3174_v53, %v3174_v53  ;;  %v3172_v40 = vmax.f32 %v3044_v26, 0.0  ;;  %v2910_v16 = vmul.f32 %v5537_v0, %v2455_v37  ;;  %2200 = vmatprep.mubr.bf16.mxu0 %v5032_v3  ;;  %4715 = vmatprep.mubr.msk.bf16.mxu1 %vm1599_vm0, %v5033_v36 }
 0x1be   : > { %v3047_v50 = vadd.f32 %v5546_v5, %v2912_v61  ;;  %v2476_v27 = vadd.f32 %v4617_v23, %v1931_v55  ;;  %v2004_v60 = vpop.f32.mrf.mxu0  ;;  %v2467_v33 = vpop.f32.mrf.mxu1  ;;  %v1926_v3 = vadd.f32 %v5528_v4, %v5475_v47  ;;  %v1947_v47 = vadd.f32 %v5528_v4, %v5511_v15 }
 0x1bf   : > { %3815 = vst.msk [vmem:[%s5571_s24 + $0x58] sm:$0xf] %vm3792_vm1, %v4415_v19  ;;  %v4413_v17 = vpack.c.bf16 %v3172_v40, %v3172_v40  ;;  %v3045_v14 = vadd.f32 %v5546_v5, %v2910_v16  ;;  %v2468_v25 = vadd.f32 %v2467_v33, %v1923_v31  ;;  %v1939_v19 = vadd.f32 %v5528_v4, %v5497_v52 }
 0x1c0   : > { %v3175_v11 = vmax.f32 %v3047_v50, 0.0  ;;  %v2915_v13 = vmul.f32 %v5537_v0, %v2476_v27  ;;  %v5755_v12 = vpop.f32.mrf.mxu0  ;;  %v4618_v28 = vpop.f32.mrf.mxu1  ;;  %v1950_v52 = vadd.f32 %v5528_v4, %v5517_v20 }
 0x1c1   : > { %3813 = vst.msk [vmem:[%s5571_s24 + $0x50] sm:$0xf] %vm3792_vm1, %v4413_v17  ;;  %v3173_v39 = vmax.f32 %v3045_v14, 0.0  ;;  %v2913_v36 = vmul.f32 %v5537_v0, %v2468_v25  ;;  %v2479_v49 = vadd.f32 %v4618_v28, %v1934_v35 }
 0x1c2   : > { %v4416_v56 = vpack.c.bf16 %v3175_v11, %v3175_v11  ;;  %v3050_v51 = vadd.f32 %v5546_v5, %v2915_v13  ;;  %v2007_v1 = vpop.f32.mrf.mxu0  ;;  %v2470_v59 = vpop.f32.mrf.mxu1 }
 0x1c3   : > { %v4414_v53 = vpack.c.bf16 %v3173_v39, %v3173_v39  ;;  %v3048_v26 = vadd.f32 %v5546_v5, %v2913_v36  ;;  %v2916_v37 = vmul.f32 %v5537_v0, %v2479_v49  ;;  %v2471_v55 = vadd.f32 %v2470_v59, %v1926_v3 }
 0x1c4   : > { %3816 = vst.msk [vmem:[%s5571_s24 + $0x5c] sm:$0xf] %vm3792_vm1, %v4416_v56  ;;  %v3178_v61 = vmax.f32 %v3050_v51, 0.0  ;;  %v5771_v23 = vpop.f32.mrf.mxu0  ;;  %2201 = vmatmul.mubr.bf16.gmra.mxu0 %v5030_v63  ;;  %v4621_v31 = vpop.f32.mrf.mxu1  ;;  %4716 = vmatmul.mubr.msk.bf16.gmra.mxu1 %vm1599_vm0, %v5034_v7  ;;  %v1942_v63 = vadd.f32 %v5528_v4, %v5503_v24  ;;  %v1963_v51 = vadd.f32 %v5528_v4, %v5573_v2 }
 0x1c5   : > { %3814 = vst.msk [vmem:[%s5571_s24 + $0x54] sm:$0xf] %vm3792_vm1, %v4414_v53  ;;  %v3176_v40 = vmax.f32 %v3048_v26, 0.0  ;;  %v3051_v16 = vadd.f32 %v5546_v5, %v2916_v37  ;;  %v2914_v15 = vmul.f32 %v5537_v0, %v2471_v55  ;;  %v2492_v27 = vadd.f32 %v4621_v31, %v1947_v47 }
 0x1c6   : > { %v4419_v50 = vpack.c.bf16 %v3178_v61, %v3178_v61  ;;  %v2012_v60 = vpop.f32.mrf.mxu0  ;;  %v2483_v33 = vpop.f32.mrf.mxu1  ;;  %v1955_v47 = vadd.f32 %v5528_v4, %v5532_v48  ;;  %v1966_v48 = vadd.f32 %v5528_v4, %v5585_v9 }
 0x1c7   : > { %v4417_v35 = vpack.c.bf16 %v3176_v40, %v3176_v40  ;;  %v3179_v17 = vmax.f32 %v3051_v16, 0.0  ;;  %v3049_v14 = vadd.f32 %v5546_v5, %v2914_v15  ;;  %v2484_v25 = vadd.f32 %v2483_v33, %v1939_v19 }
 0x1c8   : > { %3819 = vst.msk [vmem:[%s5571_s24 + $0x68] sm:$0xf] %vm3792_vm1, %v4419_v50  ;;  %v2919_v11 = vmul.f32 %v5537_v0, %v2492_v27  ;;  %v5786_v13 = vpop.f32.mrf.mxu0  ;;  %v4622_v28 = vpop.f32.mrf.mxu1 }
 0x1c9   : > { %3817 = vst.msk [vmem:[%s5571_s24 + $0x60] sm:$0xf] %vm3792_vm1, %v4417_v35  ;;  %v4420_v7 = vpack.c.bf16 %v3179_v17, %v3179_v17  ;;  %v3177_v3 = vmax.f32 %v3049_v14, 0.0  ;;  %v2917_v39 = vmul.f32 %v5537_v0, %v2484_v25  ;;  %v2495_v20 = vadd.f32 %v4622_v28, %v1950_v52 }
 0x1ca   : > { %v3054_v36 = vadd.f32 %v5546_v5, %v2919_v11  ;;  %v2015_v49 = vpop.f32.mrf.mxu0  ;;  %v2486_v56 = vpop.f32.mrf.mxu1  ;;  %v1958_v25 = vadd.f32 %v5528_v4, %v5551_v57  ;;  %v1979_v57 = vadd.f32 %v5528_v4, %v5637_v41 }
 0x1cb   : > { %3820 = vst.msk [vmem:[%s5571_s24 + $0x6c] sm:$0xf] %vm3792_vm1, %v4420_v7  ;;  %v4418_v1 = vpack.c.bf16 %v3177_v3, %v3177_v3  ;;  %v3052_v24 = vadd.f32 %v5546_v5, %v2917_v39  ;;  %v2487_v59 = vadd.f32 %v2486_v56, %v1942_v63  ;;  %v2920_v26 = vmul.f32 %v5537_v0, %v2495_v20 }
 0x1cc   : > { %v3182_v53 = vmax.f32 %v3054_v36, 0.0  ;;  %v5800_v37 = vpop.f32.mrf.mxu0  ;;  %v4625_v55 = vpop.f32.mrf.mxu1 }
 0x1cd   : > { %3818 = vst.msk [vmem:[%s5571_s24 + $0x64] sm:$0xf] %vm3792_vm1, %v4418_v1  ;;  %v3180_v61 = vmax.f32 %v3052_v24, 0.0  ;;  %v2918_v2 = vmul.f32 %v5537_v0, %v2487_v59  ;;  %v2508_v31 = vadd.f32 %v4625_v55, %v1963_v51  ;;  %v3055_v40 = vadd.f32 %v5546_v5, %v2920_v26 }
 0x1ce   : > { %v4423_v19 = vpack.c.bf16 %v3182_v53, %v3182_v53  ;;  %v2020_v16 = vpop.f32.mrf.mxu0  ;;  %v2499_v15 = vpop.f32.mrf.mxu1  ;;  %v1971_v24 = vadd.f32 %v5528_v4, %v5603_v38 }
 0x1cf   : > { %v4421_v50 = vpack.c.bf16 %v3180_v61, %v3180_v61  ;;  %v3053_v27 = vadd.f32 %v5546_v5, %v2918_v2  ;;  %v2923_v60 = vmul.f32 %v5537_v0, %v2508_v31  ;;  %v2500_v33 = vadd.f32 %v2499_v15, %v1955_v47 }
 0x1d0   : > { %3823 = vst.msk [vmem:[%s5571_s24 + $0x78] sm:$0xf] %vm3792_vm1, %v4423_v19  ;;  %v3183_v35 = vmax.f32 %v3055_v40, 0.0  ;;  %v5814_v17 = vpop.f32.mrf.mxu0  ;;  %v4626_v14 = vpop.f32.mrf.mxu1  ;;  %v1982_v2 = vadd.f32 %v5528_v4, %v5653_v8 }
 0x1d1   : > { %3821 = vst.msk [vmem:[%s5571_s24 + $0x70] sm:$0xf] %vm3792_vm1, %v4421_v50  ;;  %v3181_v52 = vmax.f32 %v3053_v27, 0.0  ;;  %v3058_v11 = vadd.f32 %v5546_v5, %v2923_v60  ;;  %v2921_v28 = vmul.f32 %v5537_v0, %v2500_v33  ;;  %v2511_v9 = vadd.f32 %v4626_v14, %v1966_v48 }
 0x1d2   : > { %v4424_v63 = vpack.c.bf16 %v3183_v35, %v3183_v35  ;;  %v2023_v7 = vpop.f32.mrf.mxu0  ;;  %v2502_v3 = vpop.f32.mrf.mxu1  ;;  %v1974_v27 = vadd.f32 %v5528_v4, %v5619_v29  ;;  %v1995_v29 = vadd.f32 %v5528_v4, %v5705_v32 }
 0x1d3   : > { %v4422_v39 = vpack.c.bf16 %v3181_v52, %v3181_v52  ;;  %v3186_v36 = vmax.f32 %v3058_v11, 0.0  ;;  %v3056_v20 = vadd.f32 %v5546_v5, %v2921_v28  ;;  %v2503_v49 = vadd.f32 %v2502_v3, %v1958_v25 }
 0x1d4   : > { %3824 = vst.msk [vmem:[%s5571_s24 + $0x7c] sm:$0xf] %vm3792_vm1, %v4424_v63  ;;  %v2924_v56 = vmul.f32 %v5537_v0, %v2511_v9  ;;  %v5828_v51 = vpop.f32.mrf.mxu0  ;;  %v4629_v1 = vpop.f32.mrf.mxu1 }
 0x1d5   : > { %3822 = vst.msk [vmem:[%s5571_s24 + $0x74] sm:$0xf] %vm3792_vm1, %v4422_v39  ;;  %v4427_v59 = vpack.c.bf16 %v3186_v36, %v3186_v36  ;;  %v3184_v53 = vmax.f32 %v3056_v20, 0.0  ;;  %v2922_v26 = vmul.f32 %v5537_v0, %v2503_v49  ;;  %v2524_v41 = vadd.f32 %v4629_v1, %v1979_v57 }
 0x1d6   : > { %v3059_v55 = vadd.f32 %v5546_v5, %v2924_v56  ;;  %v2028_v47 = vpop.f32.mrf.mxu0  ;;  %v2515_v61 = vpop.f32.mrf.mxu1  ;;  %v1987_v39 = vadd.f32 %v5528_v4, %v5671_v21  ;;  %v1998_v21 = vadd.f32 %v5528_v4, %v5721_v44 }
 0x1d7   : > { %3827 = vst.msk [vmem:[%s5571_s24 + $0x88] sm:$0xf] %vm3792_vm1, %v4427_v59  ;;  %v4425_v31 = vpack.c.bf16 %v3184_v53, %v3184_v53  ;;  %v3057_v38 = vadd.f32 %v5546_v5, %v2922_v26  ;;  %v2516_v19 = vadd.f32 %v2515_v61, %v1971_v24  ;;  %v2927_v16 = vmul.f32 %v5537_v0, %v2524_v41 }
 0x1d8   : > { %v3187_v40 = vmax.f32 %v3059_v55, 0.0  ;;  %v5842_v15 = vpop.f32.mrf.mxu0  ;;  %v4630_v50 = vpop.f32.mrf.mxu1  ;;  %v1990_v61 = vadd.f32 %v5528_v4, %v5687_v45 }
 0x1d9   : > { %3825 = vst.msk [vmem:[%s5571_s24 + $0x80] sm:$0xf] %vm3792_vm1, %v4425_v31  ;;  %v3185_v60 = vmax.f32 %v3057_v38, 0.0  ;;  %v2925_v8 = vmul.f32 %v5537_v0, %v2516_v19  ;;  %v2527_v33 = vadd.f32 %v4630_v50, %v1982_v2  ;;  %v3062_v35 = vadd.f32 %v5546_v5, %v2927_v16 }
 0x1da   : > { %v4428_v48 = vpack.c.bf16 %v3187_v40, %v3187_v40  ;;  %v2031_v14 = vpop.f32.mrf.mxu0  ;;  %v2518_v25 = vpop.f32.mrf.mxu1  ;;  %v2011_v50 = vadd.f32 %v5528_v4, %v5771_v23 }
 0x1db   : > { %v4426_v52 = vpack.c.bf16 %v3185_v60, %v3185_v60  ;;  %v3060_v11 = vadd.f32 %v5546_v5, %v2925_v8  ;;  %v2928_v28 = vmul.f32 %v5537_v0, %v2527_v33  ;;  %v2519_v63 = vadd.f32 %v2518_v25, %v1974_v27 }
 0x1dc   : > { %3828 = vst.msk [vmem:[%s5571_s24 + $0x8c] sm:$0xf] %vm3792_vm1, %v4428_v48  ;;  %v3190_v9 = vmax.f32 %v3062_v35, 0.0  ;;  %v5856_v7 = vpop.f32.mrf.mxu0  ;;  %v4633_v3 = vpop.f32.mrf.mxu1  ;;  %v2003_v14 = vadd.f32 %v5528_v4, %v5739_v43  ;;  %v2014_v43 = vadd.f32 %v5528_v4, %v5786_v13 }
 0x1dd   : > { %3826 = vst.msk [vmem:[%s5571_s24 + $0x84] sm:$0xf] %vm3792_vm1, %v4426_v52  ;;  %v3188_v36 = vmax.f32 %v3060_v11, 0.0  ;;  %v3063_v20 = vadd.f32 %v5546_v5, %v2928_v28  ;;  %v2926_v49 = vmul.f32 %v5537_v0, %v2519_v63  ;;  %v2540_v32 = vadd.f32 %v4633_v3, %v1995_v29 }
 0x1de   : > { %v4431_v57 = vpack.c.bf16 %v3190_v9, %v3190_v9  ;;  %v2036_v56 = vpop.f32.mrf.mxu0  ;;  %v2531_v1 = vpop.f32.mrf.mxu1 }
 0x1df   : > { %v4429_v24 = vpack.c.bf16 %v3188_v36, %v3188_v36  ;;  %v3191_v59 = vmax.f32 %v3063_v20, 0.0  ;;  %v3061_v53 = vadd.f32 %v5546_v5, %v2926_v49  ;;  %v2532_v26 = vadd.f32 %v2531_v1, %v1987_v39 }
 0x1e0   : > { %3831 = vst.msk [vmem:[%s5571_s24 + $0x98] sm:$0xf] %vm3792_vm1, %v4431_v57  ;;  %v2931_v55 = vmul.f32 %v5537_v0, %v2540_v32  ;;  %v5870_v41 = vpop.f32.mrf.mxu0  ;;  %v4634_v47 = vpop.f32.mrf.mxu1  ;;  %v2006_v32 = vadd.f32 %v5528_v4, %v5755_v12  ;;  %v2027_v12 = vadd.f32 %v5528_v4, %v5828_v51 }
 0x1e1   : > { %3829 = vst.msk [vmem:[%s5571_s24 + $0x90] sm:$0xf] %vm3792_vm1, %v4429_v24  ;;  %v4432_v2 = vpack.c.bf16 %v3191_v59, %v3191_v59  ;;  %v3189_v31 = vmax.f32 %v3061_v53, 0.0  ;;  %v2929_v38 = vmul.f32 %v5537_v0, %v2532_v26  ;;  %v2543_v44 = vadd.f32 %v4634_v47, %v1998_v21 }
 0x1e2   : > { %v3066_v19 = vadd.f32 %v5546_v5, %v2931_v55  ;;  %v2039_v40 = vpop.f32.mrf.mxu0  ;;  %v2534_v16 = vpop.f32.mrf.mxu1 }
 0x1e3   : > { %3832 = vst.msk [vmem:[%s5571_s24 + $0x9c] sm:$0xf] %vm3792_vm1, %v4432_v2  ;;  %v4430_v27 = vpack.c.bf16 %v3189_v31, %v3189_v31  ;;  %v3064_v45 = vadd.f32 %v5546_v5, %v2929_v38  ;;  %v2535_v60 = vadd.f32 %v2534_v16, %v1990_v61  ;;  %v2932_v33 = vmul.f32 %v5537_v0, %v2543_v44 }
 0x1e4   : > { %v3194_v8 = vmax.f32 %v3066_v19, 0.0  ;;  %v5884_v48 = vpop.f32.mrf.mxu0  ;;  %v4637_v35 = vpop.f32.mrf.mxu1  ;;  %v2019_v19 = vadd.f32 %v5528_v4, %v5800_v37 }
 0x1e5   : > { %3830 = vst.msk [vmem:[%s5571_s24 + $0x94] sm:$0xf] %vm3792_vm1, %v4430_v27  ;;  %v3192_v25 = vmax.f32 %v3064_v45, 0.0  ;;  %v2930_v23 = vmul.f32 %v5537_v0, %v2535_v60  ;;  %v2556_v52 = vadd.f32 %v4637_v35, %v2011_v50  ;;  %v3067_v28 = vadd.f32 %v5546_v5, %v2932_v33 }
 0x1e6   : > { %v4435_v11 = vpack.c.bf16 %v3194_v8, %v3194_v8  ;;  %v2044_v63 = vpop.f32.mrf.mxu0  ;;  %v2547_v29 = vpop.f32.mrf.mxu1  ;;  %v2030_v60 = vadd.f32 %v5528_v4, %v5842_v15 }
 0x1e7   : > { %v4433_v9 = vpack.c.bf16 %v3192_v25, %v3192_v25  ;;  %v3065_v3 = vadd.f32 %v5546_v5, %v2930_v23  ;;  %v2935_v39 = vmul.f32 %v5537_v0, %v2556_v52  ;;  %v2548_v36 = vadd.f32 %v2547_v29, %v2003_v14 }
 0x1e8   : > { %3835 = vst.msk [vmem:[%s5571_s24 + $0xa8] sm:$0xf] %vm3792_vm1, %v4435_v11  ;;  %v3195_v20 = vmax.f32 %v3067_v28, 0.0  ;;  %v5898_v49 = vpop.f32.mrf.mxu0  ;;  %v4638_v57 = vpop.f32.mrf.mxu1  ;;  %v2022_v52 = vadd.f32 %v5528_v4, %v5814_v17  ;;  %v5939_v4 = vld [vmem:[%s6563_s2] ss:$0 sm:$0xff] }
 0x1e9   : > { %3833 = vst.msk [vmem:[%s5571_s24 + $0xa0] sm:$0xf] %vm3792_vm1, %v4433_v9  ;;  %v3193_v56 = vmax.f32 %v3065_v3, 0.0  ;;  %v3070_v1 = vadd.f32 %v5546_v5, %v2935_v39  ;;  %v2933_v24 = vmul.f32 %v5537_v0, %v2548_v36  ;;  %v2559_v13 = vadd.f32 %v4638_v57, %v2014_v43 }
 0x1ea   : > { %v4436_v59 = vpack.c.bf16 %v3195_v20, %v3195_v20  ;;  %v2047_v53 = vpop.f32.mrf.mxu0  ;;  %v2550_v26 = vpop.f32.mrf.mxu1  ;;  %v2043_v17 = vadd.f32 %v5939_v4, %v5884_v48 }
 0x1eb   : > { %v4434_v21 = vpack.c.bf16 %v3193_v56, %v3193_v56  ;;  %v3198_v55 = vmax.f32 %v3070_v1, 0.0  ;;  %v3068_v47 = vadd.f32 %v5546_v5, %v2933_v24  ;;  %v2551_v61 = vadd.f32 %v2550_v26, %v2006_v32 }
 0x1ec   : > { %3836 = vst.msk [vmem:[%s5571_s24 + $0xac] sm:$0xf] %vm3792_vm1, %v4436_v59  ;;  %v2936_v2 = vmul.f32 %v5537_v0, %v2559_v13  ;;  %v5912_v31 = vpop.f32.mrf.mxu0  ;;  %v4641_v38 = vpop.f32.mrf.mxu1  ;;  %v2035_v1 = vadd.f32 %v5939_v4, %v5856_v7  ;;  %v5953_v59 = vld [vmem:[%s6564_s3] ss:$0 sm:$0xff] }
 0x1ed   : > { %3834 = vst.msk [vmem:[%s5571_s24 + $0xa4] sm:$0xf] %vm3792_vm1, %v4434_v21  ;;  %v4439_v44 = vpack.c.bf16 %v3198_v55, %v3198_v55  ;;  %v3196_v40 = vmax.f32 %v3068_v47, 0.0  ;;  %v2934_v16 = vmul.f32 %v5537_v0, %v2551_v61  ;;  %v2572_v51 = vadd.f32 %v4641_v38, %v2027_v12  ;;  %v5959_v47 = vld [vmem:[%s6565_s4] ss:$0 sm:$0xff] }
 0x1ee   : > { %v3071_v50 = vadd.f32 %v5546_v5, %v2936_v2  ;;  %v2052_v27 = vpop.f32.mrf.mxu0  ;;  %v2563_v45 = vpop.f32.mrf.mxu1  ;;  %v2046_v12 = vadd.f32 %v5939_v4, %v5898_v49 }
 0x1ef   : > { %3839 = vst.msk [vmem:[%s5571_s24 + $0xb8] sm:$0xf] %vm3792_vm1, %v4439_v44  ;;  %v4437_v8 = vpack.c.bf16 %v3196_v40, %v3196_v40  ;;  %v3069_v37 = vadd.f32 %v5546_v5, %v2934_v16  ;;  %v2564_v33 = vadd.f32 %v2563_v45, %v2019_v19  ;;  %v2939_v14 = vmul.f32 %v5537_v0, %v2572_v51 }
 0x1f0   : > { %v3199_v35 = vmax.f32 %v3071_v50, 0.0  ;;  %v5926_v25 = vpop.f32.mrf.mxu0  ;;  %v4642_v23 = vpop.f32.mrf.mxu1  ;;  %v2038_v44 = vadd.f32 %v5939_v4, %v5870_v41 }
 0x1f1   : > { %3837 = vst.msk [vmem:[%s5571_s24 + $0xb0] sm:$0xf] %vm3792_vm1, %v4437_v8  ;;  %v3197_v11 = vmax.f32 %v3069_v37, 0.0  ;;  %v2937_v15 = vmul.f32 %v5537_v0, %v2564_v33  ;;  %v2575_v28 = vadd.f32 %v4642_v23, %v2030_v60  ;;  %v3074_v29 = vadd.f32 %v5546_v5, %v2939_v14 }
 0x1f2   : > { %v4440_v63 = vpack.c.bf16 %v3199_v35, %v3199_v35  ;;  %v2055_v9 = vpop.f32.mrf.mxu0  ;;  %v2566_v3 = vpop.f32.mrf.mxu1 }
 0x1f3   : > { %v4438_v39 = vpack.c.bf16 %v3197_v11, %v3197_v11  ;;  %v3072_v36 = vadd.f32 %v5546_v5, %v2937_v15  ;;  %v2940_v43 = vmul.f32 %v5537_v0, %v2575_v28  ;;  %v2567_v20 = vadd.f32 %v2566_v3, %v2022_v52 }
 0x1f4   : > { %3840 = vst.msk [vmem:[%s5571_s24 + $0xbc] sm:$0xf] %vm3792_vm1, %v4440_v63  ;;  %v3202_v57 = vmax.f32 %v3074_v29, 0.0  ;;  %v2058_v32 = vpop.f32.mrf.mxu0  ;;  %v4645_v56 = vpop.f32.mrf.mxu1  ;;  %v2051_v52 = vadd.f32 %v5939_v4, %v5912_v31 }
 0x1f5   : > { %3838 = vst.msk [vmem:[%s5571_s24 + $0xb4] sm:$0xf] %vm3792_vm1, %v4438_v39  ;;  %v3200_v0 = vmax.f32 %v3072_v36, 0.0  ;;  %v3075_v24 = vadd.f32 %v5546_v5, %v2940_v43  ;;  %v2938_v48 = vmul.f32 %v5953_v59, %v2567_v20  ;;  %v2588_v53 = vadd.f32 %v4645_v56, %v2043_v17 }
 0x1f6   : > { %v4443_v13 = vpack.c.bf16 %v3202_v57, %v3202_v57  ;;  %v2060_v26 = vpop.f32.mrf.mxu0  ;;  %v2579_v21 = vpop.f32.mrf.mxu1  ;;  %v2059_v8 = vadd.f32 %v5939_v4, %v2058_v32  ;;  %v2054_v56 = vadd.f32 %v5939_v4, %v5926_v25 }
 0x1f7   : > { %v4441_v55 = vpack.c.bf16 %v3200_v0, %v3200_v0  ;;  %v3203_v7 = vmax.f32 %v3075_v24, 0.0  ;;  %v3073_v5 = vadd.f32 %v5959_v47, %v2938_v48  ;;  %v2580_v61 = vadd.f32 %v2579_v21, %v2035_v1 }
 0x1f8   : > { %3843 = vst.msk [vmem:[%s5571_s24 + $0xc8] sm:$0xf] %vm3792_vm1, %v4443_v13  ;;  %v2943_v2 = vmul.f32 %v5953_v59, %v2588_v53  ;;  %v2061_v38 = vpop.f32.mrf.mxu0  ;;  %v4646_v19 = vpop.f32.mrf.mxu1 }
 0x1f9   : > { %3841 = vst.msk [vmem:[%s5571_s24 + $0xc0] sm:$0xf] %vm3792_vm1, %v4441_v55  ;;  %v4444_v40 = vpack.c.bf16 %v3203_v7, %v3203_v7  ;;  %v3201_v16 = vmax.f32 %v3073_v5, 0.0  ;;  %v2941_v50 = vmul.f32 %v5953_v59, %v2580_v61  ;;  %v2591_v27 = vadd.f32 %v4646_v19, %v2046_v12 }
 0x1fa   : > { %v3078_v51 = vadd.f32 %v5959_v47, %v2943_v2  ;;  %v2063_v49 = vpop.f32.mrf.mxu0  ;;  %v2582_v45 = vpop.f32.mrf.mxu1  ;;  %v2062_v31 = vadd.f32 %v5939_v4, %v2061_v38 }
 0x1fb   : > { %3844 = vst.msk [vmem:[%s5571_s24 + $0xcc] sm:$0xf] %vm3792_vm1, %v4444_v40  ;;  %v4442_v60 = vpack.c.bf16 %v3201_v16, %v3201_v16  ;;  %v3076_v37 = vadd.f32 %v5959_v47, %v2941_v50  ;;  %v2583_v41 = vadd.f32 %v2582_v45, %v2038_v44  ;;  %v2944_v35 = vmul.f32 %v5953_v59, %v2591_v27 }
 0x1fc   : > { %v3206_v33 = vmax.f32 %v3078_v51, 0.0  ;;  %v2066_v14 = vpop.f32.mrf.mxu0  ;;  %v4649_v23 = vpop.f32.mrf.mxu1 }
 0x1fd   : > { %3842 = vst.msk [vmem:[%s5571_s24 + $0xc4] sm:$0xf] %vm3792_vm1, %v4442_v60  ;;  %v3204_v11 = vmax.f32 %v3076_v37, 0.0  ;;  %v2942_v15 = vmul.f32 %v5953_v59, %v2583_v41  ;;  %v2604_v28 = vadd.f32 %v4649_v23, %v2059_v8  ;;  %v3079_v29 = vadd.f32 %v5959_v47, %v2944_v35 }
 0x1fe   : > { %v4447_v63 = vpack.c.bf16 %v3206_v33, %v3206_v33  ;;  %v2068_v9 = vpop.f32.mrf.mxu0  ;;  %v2595_v3 = vpop.f32.mrf.mxu1  ;;  %v2067_v25 = vadd.f32 %v5939_v4, %v2066_v14 }
 0x1ff   : > { %v4445_v39 = vpack.c.bf16 %v3204_v11, %v3204_v11  ;;  %v3077_v36 = vadd.f32 %v5959_v47, %v2942_v15  ;;  %v2947_v43 = vmul.f32 %v5953_v59, %v2604_v28  ;;  %v2596_v20 = vadd.f32 %v2595_v3, %v2051_v52 }
 0x200   : > { %3847 = vst.msk [vmem:[%s5571_s24 + $0xd8] sm:$0xf] %vm3792_vm1, %v4447_v63  ;;  %v3207_v17 = vmax.f32 %v3079_v29, 0.0  ;;  %v2069_v57 = vpop.f32.mrf.mxu0  ;;  %v4650_v32 = vpop.f32.mrf.mxu1 }
 0x201   : > { %3845 = vst.msk [vmem:[%s5571_s24 + $0xd0] sm:$0xf] %vm3792_vm1, %v4445_v39  ;;  %v3205_v1 = vmax.f32 %v3077_v36, 0.0  ;;  %v3082_v0 = vadd.f32 %v5959_v47, %v2947_v43  ;;  %v2945_v24 = vmul.f32 %v5953_v59, %v2596_v20  ;;  %v2607_v13 = vadd.f32 %v4650_v32, %v2062_v31 }
 0x202   : > { %v4448_v48 = vpack.c.bf16 %v3207_v17, %v3207_v17  ;;  %v2071_v53 = vpop.f32.mrf.mxu0  ;;  %v2598_v26 = vpop.f32.mrf.mxu1  ;;  %v2070_v52 = vadd.f32 %v5939_v4, %v2069_v57 }
 0x203   : > { %v4446_v21 = vpack.c.bf16 %v3205_v1, %v3205_v1  ;;  %v3210_v55 = vmax.f32 %v3082_v0, 0.0  ;;  %v3080_v7 = vadd.f32 %v5959_v47, %v2945_v24  ;;  %v2599_v5 = vadd.f32 %v2598_v26, %v2054_v56 }
 0x204   : > { %3848 = vst.msk [vmem:[%s5571_s24 + $0xdc] sm:$0xf] %vm3792_vm1, %v4448_v48  ;;  %v2948_v61 = vmul.f32 %v5953_v59, %v2607_v13  ;;  %v2074_v12 = vpop.f32.mrf.mxu0  ;;  %v4653_v2 = vpop.f32.mrf.mxu1 }
 0x205   : > { %3846 = vst.msk [vmem:[%s5571_s24 + $0xd4] sm:$0xf] %vm3792_vm1, %v4446_v21  ;;  %v4451_v38 = vpack.c.bf16 %v3210_v55, %v3210_v55  ;;  %v3208_v19 = vmax.f32 %v3080_v7, 0.0  ;;  %v2946_v44 = vmul.f32 %v5953_v59, %v2599_v5  ;;  %v2075_v40 = vadd.f32 %v5939_v4, %v2074_v12 }
 0x206   : > { %v3083_v16 = vadd.f32 %v5959_v47, %v2948_v61  ;;  %v2076_v50 = vpop.f32.mrf.mxu0  ;;  %v2611_v51 = vpop.f32.mrf.mxu1 }
 0x207   : > { %3851 = vst.msk [vmem:[%s5571_s24 + $0xe8] sm:$0xf] %vm3792_vm1, %v4451_v38  ;;  %v4449_v27 = vpack.c.bf16 %v3208_v19, %v3208_v19  ;;  %v3081_v49 = vadd.f32 %v5959_v47, %v2946_v44  ;;  %v2620_v45 = vadd.f32 %v4653_v2, %v2075_v40  ;;  %v2612_v60 = vadd.f32 %v2611_v51, %v2067_v25 }
 0x208   : > { %v3211_v8 = vmax.f32 %v3083_v16, 0.0  ;;  %v2077_v37 = vpop.f32.mrf.mxu0  ;;  %v4654_v41 = vpop.f32.mrf.mxu1 }
 0x209   : > { %3849 = vst.msk [vmem:[%s5571_s24 + $0xe0] sm:$0xf] %vm3792_vm1, %v4449_v27  ;;  %v3209_v33 = vmax.f32 %v3081_v49, 0.0  ;;  %v2951_v35 = vmul.f32 %v5953_v59, %v2620_v45  ;;  %v2949_v14 = vmul.f32 %v5953_v59, %v2612_v60  ;;  %v2078_v23 = vadd.f32 %v5939_v4, %v2077_v37 }
 0x20a   : > { %v4452_v11 = vpack.c.bf16 %v3211_v8, %v3211_v8  ;;  %v2079_v15 = vpop.f32.mrf.mxu0  ;;  %v2614_v28 = vpop.f32.mrf.mxu1 }
 0x20b   : > { %v4450_v63 = vpack.c.bf16 %v3209_v33, %v3209_v33  ;;  %v3086_v29 = vadd.f32 %v5959_v47, %v2951_v35  ;;  %v3084_v9 = vadd.f32 %v5959_v47, %v2949_v14  ;;  %v2623_v3 = vadd.f32 %v4654_v41, %v2078_v23 }
 0x20c   : > { %3852 = vst.msk [vmem:[%s5571_s24 + $0xec] sm:$0xf] %vm3792_vm1, %v4452_v11  ;;  %v2615_v39 = vadd.f32 %v2614_v28, %v2070_v52  ;;  %v2082_v36 = vpop.f32.mrf.mxu0  ;;  %v4657_v43 = vpop.f32.mrf.mxu1 }
 0x20d   : > { %3850 = vst.msk [vmem:[%s5571_s24 + $0xe4] sm:$0xf] %vm3792_vm1, %v4450_v63  ;;  %v3214_v20 = vmax.f32 %v3086_v29, 0.0  ;;  %v3212_v31 = vmax.f32 %v3084_v9, 0.0  ;;  %v2952_v17 = vmul.f32 %v5953_v59, %v2623_v3  ;;  %v2083_v57 = vadd.f32 %v5939_v4, %v2082_v36 }
 0x20e   : > { %v2950_v32 = vmul.f32 %v5953_v59, %v2615_v39  ;;  %v2084_v56 = vpop.f32.mrf.mxu0  ;;  %v2627_v1 = vpop.f32.mrf.mxu1 }
 0x20f   : > { %v4455_v0 = vpack.c.bf16 %v3214_v20, %v3214_v20  ;;  %v4453_v24 = vpack.c.bf16 %v3212_v31, %v3212_v31  ;;  %v3087_v48 = vadd.f32 %v5959_v47, %v2952_v17  ;;  %v2628_v13 = vadd.f32 %v2627_v1, %v2083_v57 }
 0x210   : > { %v3085_v53 = vadd.f32 %v5959_v47, %v2950_v32  ;;  %v2085_v26 = vpop.f32.mrf.mxu0  ;;  %v4658_v21 = vpop.f32.mrf.mxu1 }
 0x211   : > { %3855 = vst.msk [vmem:[%s5571_s24 + $0xf8] sm:$0xf] %vm3792_vm1, %v4455_v0  ;;  %3853 = vst.msk [vmem:[%s5571_s24 + $0xf0] sm:$0xf] %vm3792_vm1, %v4453_v24  ;;  %v3215_v55 = vmax.f32 %v3087_v48, 0.0  ;;  %v2953_v7 = vmul.f32 %v5953_v59, %v2628_v13  ;;  %v2086_v5 = vadd.f32 %v5939_v4, %v2085_v26 }
 0x212   : > { %v3213_v25 = vmax.f32 %v3085_v53, 0.0  ;;  %v2087_v61 = vpop.f32.mrf.mxu0  ;;  %v2630_v12 = vpop.f32.mrf.mxu1 }
 0x213   : > { %v4456_v2 = vpack.c.bf16 %v3215_v55, %v3215_v55  ;;  %v3088_v38 = vadd.f32 %v5959_v47, %v2953_v7  ;;  %v2631_v19 = vadd.f32 %v2630_v12, %v2086_v5 }
 0x214   : > { %v4454_v44 = vpack.c.bf16 %v3213_v25, %v3213_v25  ;;  %v2090_v40 = vpop.f32.mrf.mxu0  ;;  %v4661_v16 = vpop.f32.mrf.mxu1 }
 0x215   : > { %3856 = vst.msk [vmem:[%s5571_s24 + $0xfc] sm:$0xf] %vm3792_vm1, %v4456_v2  ;;  %v3216_v50 = vmax.f32 %v3088_v38, 0.0  ;;  %v2954_v51 = vmul.f32 %v5953_v59, %v2631_v19  ;;  %v2091_v27 = vadd.f32 %v5939_v4, %v2090_v40 }
 0x216   : > { %3854 = vst.msk [vmem:[%s5571_s24 + $0xf4] sm:$0xf] %vm3792_vm1, %v4454_v44  ;;  %v2092_v49 = vpop.f32.mrf.mxu0  ;;  %v2643_v45 = vpop.f32.mrf.mxu1 }
 0x217   : > { %v4457_v60 = vpack.c.bf16 %v3216_v50, %v3216_v50  ;;  %v3089_v8 = vadd.f32 %v5959_v47, %v2954_v51  ;;  %v2636_v37 = vadd.f32 %v4657_v43, %v2091_v27 }
 0x218   : > { %v2093_v41 = vpop.f32.mrf.mxu0  ;;  %v4662_v33 = vpop.f32.mrf.mxu1 }
 0x219   : > { %3857 = vst.msk [vmem:[%s5571_s24 + $0x100] sm:$0xf] %vm3792_vm1, %v4457_v60  ;;  %v3217_v35 = vmax.f32 %v3089_v8, 0.0  ;;  %v2955_v14 = vmul.f32 %v5953_v59, %v2636_v37  ;;  %v2094_v23 = vadd.f32 %v5939_v4, %v2093_v41 }
 0x21a   : > { %v2095_v52 = vpop.f32.mrf.mxu0  ;;  %v2646_v11 = vpop.f32.mrf.mxu1 }
 0x21b   : > { %v4458_v15 = vpack.c.bf16 %v3217_v35, %v3217_v35  ;;  %v3090_v28 = vadd.f32 %v5959_v47, %v2955_v14  ;;  %v2639_v63 = vadd.f32 %v4658_v21, %v2094_v23 }
 0x21c   : > { %v2098_v29 = vpop.f32.mrf.mxu0  ;;  %v6044_v9 = vpop.f32.mrf.mxu1 }
 0x21d   : > { %3858 = vst.msk [vmem:[%s5571_s24 + $0x104] sm:$0xf] %vm3792_vm1, %v4458_v15  ;;  %v3218_v3 = vmax.f32 %v3090_v28, 0.0  ;;  %v2956_v39 = vmul.f32 %v5953_v59, %v2639_v63  ;;  %v2099_v36 = vadd.f32 %v5939_v4, %v2098_v29 }
 0x21e   : > { %v2100_v43 = vpop.f32.mrf.mxu0  ;;  %v2659_v20 = vpop.f32.mrf.mxu1 }
 0x21f   : > { %v4459_v31 = vpack.c.bf16 %v3218_v3, %v3218_v3  ;;  %v3091_v17 = vadd.f32 %v5959_v47, %v2956_v39  ;;  %v2644_v57 = vadd.f32 %v2643_v45, %v2099_v36 }
 0x220   : > { %v2101_v32 = vpop.f32.mrf.mxu0  ;;  %v6051_v56 = vpop.f32.mrf.mxu1 }
 0x221   : > { %3859 = vst.msk [vmem:[%s5571_s24 + $0x108] sm:$0xf] %vm3792_vm1, %v4459_v31  ;;  %v3219_v1 = vmax.f32 %v3091_v17, 0.0  ;;  %v2957_v0 = vmul.f32 %v5953_v59, %v2644_v57  ;;  %v2102_v24 = vadd.f32 %v5939_v4, %v2101_v32 }
 0x222   : > { %v2103_v48 = vpop.f32.mrf.mxu0  ;;  %v2662_v13 = vpop.f32.mrf.mxu1 }
 0x223   : > { %v4460_v53 = vpack.c.bf16 %v3219_v1, %v3219_v1  ;;  %v3092_v26 = vadd.f32 %v5959_v47, %v2957_v0  ;;  %v2647_v21 = vadd.f32 %v2646_v11, %v2102_v24 }
 0x224   : > { %v2106_v55 = vpop.f32.mrf.mxu0  ;;  %v6058_v7 = vpop.f32.mrf.mxu1 }
 0x225   : > { %3860 = vst.msk [vmem:[%s5571_s24 + $0x10c] sm:$0xf] %vm3792_vm1, %v4460_v53  ;;  %v3220_v5 = vmax.f32 %v3092_v26, 0.0  ;;  %v2958_v25 = vmul.f32 %v5953_v59, %v2647_v21  ;;  %v2107_v61 = vadd.f32 %v5939_v4, %v2106_v55 }
 0x226   : > { %v2108_v12 = vpop.f32.mrf.mxu0  ;;  %v6064_v2 = vpop.f32.mrf.mxu1 }
 0x227   : > { %v4461_v38 = vpack.c.bf16 %v3220_v5, %v3220_v5  ;;  %v3093_v19 = vadd.f32 %v5959_v47, %v2958_v25  ;;  %v2652_v44 = vadd.f32 %v4661_v16, %v2107_v61 }
 0x228   : > { %v2109_v40 = vpop.f32.mrf.mxu0  ;;  %v6067_v50 = vpop.f32.mrf.mxu1 }
 0x229   : > { %3861 = vst.msk [vmem:[%s5571_s24 + $0x110] sm:$0xf] %vm3792_vm1, %v4461_v38  ;;  %v3221_v51 = vmax.f32 %v3093_v19, 0.0  ;;  %v2959_v27 = vmul.f32 %v5953_v59, %v2652_v44  ;;  %v2110_v49 = vadd.f32 %v5939_v4, %v2109_v40 }
 0x22a   : > { %v2111_v45 = vpop.f32.mrf.mxu0  ;;  %v6073_v60 = vpop.f32.mrf.mxu1 }
 0x22b   : > { %v4462_v8 = vpack.c.bf16 %v3221_v51, %v3221_v51  ;;  %v3094_v37 = vadd.f32 %v5959_v47, %v2959_v27  ;;  %v2655_v41 = vadd.f32 %v4662_v33, %v2110_v49 }
 0x22c   : > { %v2114_v35 = vpop.f32.mrf.mxu0  ;;  %v6076_v16 = vpop.f32.mrf.mxu1 }
 0x22d   : > { %3862 = vst.msk [vmem:[%s5571_s24 + $0x114] sm:$0xf] %vm3792_vm1, %v4462_v8  ;;  %v3222_v14 = vmax.f32 %v3094_v37, 0.0  ;;  %v2960_v23 = vmul.f32 %v5953_v59, %v2655_v41  ;;  %v2115_v52 = vadd.f32 %v5939_v4, %v2114_v35 }
 0x22e   : > { %v2116_v11 = vpop.f32.mrf.mxu0  ;;  %v6082_v15 = vpop.f32.mrf.mxu1 }
 0x22f   : > { %v4463_v28 = vpack.c.bf16 %v3222_v14, %v3222_v14  ;;  %v3095_v63 = vadd.f32 %v5959_v47, %v2960_v23  ;;  %v2660_v29 = vadd.f32 %v2659_v20, %v2115_v52 }
 0x230   : > { %v2117_v3 = vpop.f32.mrf.mxu0  ;;  %v6085_v33 = vpop.f32.mrf.mxu1 }
 0x231   : > { %3863 = vst.msk [vmem:[%s5571_s24 + $0x118] sm:$0xf] %vm3792_vm1, %v4463_v28  ;;  %v3223_v39 = vmax.f32 %v3095_v63, 0.0  ;;  %v2961_v36 = vmul.f32 %v5953_v59, %v2660_v29  ;;  %v2118_v43 = vadd.f32 %v5939_v4, %v2117_v3 }
 0x232   : > { %v2119_v31 = vpop.f32.mrf.mxu0  ;;  %v6091_v17 = vpop.f32.mrf.mxu1 }
 0x233   : > { %v4464_v57 = vpack.c.bf16 %v3223_v39, %v3223_v39  ;;  %v3096_v32 = vadd.f32 %v5959_v47, %v2961_v36  ;;  %v2663_v1 = vadd.f32 %v2662_v13, %v2118_v43 }
 0x234   : > { %v2122_v0 = vpop.f32.mrf.mxu0  ;;  %v6094_v20 = vpop.f32.mrf.mxu1 }
 0x235   : > { %3864 = vst.msk [vmem:[%s5571_s24 + $0x11c] sm:$0xf] %vm3792_vm1, %v4464_v57  ;;  %v3224_v24 = vmax.f32 %v3096_v32, 0.0  ;;  %v2962_v48 = vmul.f32 %v5953_v59, %v2663_v1  ;;  %v2123_v53 = vadd.f32 %v5939_v4, %v2122_v0  ;;  %v6140_v32 = vadd.f32 %v5939_v4, %v5309_v62 }
 0x236   : > { %v2124_v26 = vpop.f32.mrf.mxu0  ;;  %v6100_v21 = vpop.f32.mrf.mxu1  ;;  %v6156_v62 = vadd.f32 %v5939_v4, %v5331_v18 }
 0x237   : > { %v4465_v55 = vpack.c.bf16 %v3224_v24, %v3224_v24  ;;  %v3097_v5 = vadd.f32 %v5959_v47, %v2962_v48  ;;  %v2668_v25 = vadd.f32 %v6044_v9, %v2123_v53  ;;  %v2219_v24 = vadd.f32 %v5939_v4, %v5317_v6 }
 0x238   : > { %v2125_v13 = vpop.f32.mrf.mxu0  ;;  %v6104_v61 = vpop.f32.mrf.mxu1  ;;  %v6160_v26 = vadd.f32 %v5939_v4, %v5337_v22  ;;  %v6164_v6 = vadd.f32 %v5939_v4, %v5345_v30  ;;  %v6176_v22 = vadd.f32 %v5939_v4, %v5359_v42  ;;  %v6180_v30 = vadd.f32 %v5939_v4, %v5365_v46 }
 0x239   : > { %3865 = vst.msk [vmem:[%s5571_s24 + $0x120] sm:$0xf] %vm3792_vm1, %v4465_v55  ;;  %v3225_v12 = vmax.f32 %v3097_v5, 0.0  ;;  %v2963_v38 = vmul.f32 %v5953_v59, %v2668_v25  ;;  %v2126_v19 = vadd.f32 %v5939_v4, %v2125_v13 }
 0x23a   : > { %v2127_v44 = vpop.f32.mrf.mxu0  ;;  %v6110_v40 = vpop.f32.mrf.mxu1 }
 0x23b   : > { %v4466_v51 = vpack.c.bf16 %v3225_v12, %v3225_v12  ;;  %v3098_v27 = vadd.f32 %v5959_v47, %v2963_v38  ;;  %v2671_v49 = vadd.f32 %v6051_v56, %v2126_v19  ;;  %v6184_v12 = vadd.f32 %v5939_v4, %v5373_v54  ;;  %v6588_v38 = vld [vmem:[#allocation2_spill] sm:$0xff]  ;;  %v6590_v54 = vld [vmem:[#allocation4_spill] sm:$0xff] }
 0x23c   : > { %v2130_v9 = vpop.f32.mrf.mxu0  ;;  %v6114_v45 = vpop.f32.mrf.mxu1 }
 0x23d   : > { %3866 = vst.msk [vmem:[%s5571_s24 + $0x124] sm:$0xf] %vm3792_vm1, %v4466_v51  ;;  %v3226_v8 = vmax.f32 %v3098_v27, 0.0  ;;  %v2964_v37 = vmul.f32 %v5953_v59, %v2671_v49  ;;  %v2131_v41 = vadd.f32 %v5939_v4, %v2130_v9  ;;  %v6202_v49 = vadd.f32 %v5939_v4, %v6590_v54  ;;  %v6591_v9 = vld [vmem:[#allocation5_spill] sm:$0xff]  ;;  %v6601_v54 = vld [vmem:[#allocation15_spill] sm:$0xff] }
 0x23e   : > { %v2132_v35 = vpop.f32.mrf.mxu0  ;;  %v6120_v14 = vpop.f32.mrf.mxu1 }
 0x23f   : > { %v4467_v23 = vpack.c.bf16 %v3226_v8, %v3226_v8  ;;  %v3099_v52 = vadd.f32 %v5959_v47, %v2964_v37  ;;  %v2676_v11 = vadd.f32 %v6064_v2, %v2131_v41  ;;  %v6136_v2 = vadd.f32 %v5939_v4, %v5303_v58  ;;  %v6592_v37 = vld [vmem:[#allocation6_spill] sm:$0xff]  ;;  %v6593_v35 = vld [vmem:[#allocation7_spill] sm:$0xff] }
 0x240   : > { %v2133_v28 = vpop.f32.mrf.mxu0  ;;  %v6124_v56 = vpop.f32.mrf.mxu1  ;;  %v6152_v58 = vadd.f32 %v5939_v4, %v5323_v10  ;;  %v6170_v10 = vadd.f32 %v5939_v4, %v5351_v34  ;;  %v6188_v34 = vadd.f32 %v5939_v4, %v6588_v38  ;;  %v6206_v8 = vadd.f32 %v5939_v4, %v6591_v9 }
 0x241   : > { %3867 = vst.msk [vmem:[%s5571_s24 + $0x128] sm:$0xf] %vm3792_vm1, %v4467_v23  ;;  %v3227_v63 = vmax.f32 %v3099_v52, 0.0  ;;  %v2965_v29 = vmul.f32 %v5953_v59, %v2676_v11  ;;  %v2134_v3 = vadd.f32 %v5939_v4, %v2133_v28  ;;  %v6210_v41 = vadd.f32 %v5939_v4, %v6592_v37  ;;  %v6594_v28 = vld [vmem:[#allocation8_spill] sm:$0xff] }
 0x242   : > { %v2135_v39 = vpop.f32.mrf.mxu0  ;;  %v6130_v36 = vpop.f32.mrf.mxu1  ;;  %v6214_v23 = vadd.f32 %v5939_v4, %v6593_v35  ;;  %v6254_v9 = vadd.f32 %v5939_v4, %v6601_v54  ;;  %v6602_v37 = vld [vmem:[#allocation16_spill] sm:$0xff] }
 0x243   : > { %v4468_v43 = vpack.c.bf16 %v3227_v63, %v3227_v63  ;;  %v3100_v31 = vadd.f32 %v5959_v47, %v2965_v29  ;;  %v2679_v57 = vadd.f32 %v6073_v60, %v2134_v3  ;;  %v6220_v63 = vadd.f32 %v5939_v4, %v6594_v28  ;;  %v6606_v54 = vld [vmem:[#allocation20_spill] sm:$0xff] }
 0x244   : > { %v2138_v1 = vpop.f32.mrf.mxu0  ;;  %v6142_v0 = vpop.f32.mrf.mxu1  ;;  %v6258_v35 = vadd.f32 %v5939_v4, %v6602_v37  ;;  %v6283_v37 = vadd.f32 %v5939_v4, %v6606_v54 }
 0x245   : > { %3868 = vst.msk [vmem:[%s5571_s24 + $0x12c] sm:$0xf] %vm3792_vm1, %v4468_v43  ;;  %v3228_v48 = vmax.f32 %v3100_v31, 0.0  ;;  %v2966_v53 = vmul.f32 %v5953_v59, %v2679_v57  ;;  %v2139_v60 = vadd.f32 %v5939_v4, %v2138_v1  ;;  %v6595_v43 = vld [vmem:[#allocation9_spill] sm:$0xff]  ;;  %v6596_v57 = vld [vmem:[#allocation10_spill] sm:$0xff] }
 0x246   : > { %v2140_v55 = vpop.f32.mrf.mxu0  ;;  %v6166_v5 = vpop.f32.mrf.mxu1  ;;  %v6226_v31 = vadd.f32 %v5939_v4, %v6595_v43  ;;  %v6230_v1 = vadd.f32 %v5939_v4, %v6596_v57  ;;  %v6603_v43 = vld [vmem:[#allocation17_spill] sm:$0xff]  ;;  %6607 = vst [vmem:[#allocation2_spill] sm:$0xff] %v6283_v37 }
 0x247   : > { %v4469_v25 = vpack.c.bf16 %v3228_v48, %v3228_v48  ;;  %v3101_v18 = vadd.f32 %v5959_v47, %v2966_v53  ;;  %v2684_v13 = vadd.f32 %v6058_v7, %v2139_v60  ;;  %v6589_v7 = vld [vmem:[#allocation3_spill] sm:$0xff]  ;;  %v6598_v60 = vld [vmem:[#allocation12_spill] sm:$0xff]  ;;  %v6265_v57 = vadd.f32 %v5939_v4, %v6603_v43 }
 0x248   : > { %v2141_v19 = vpop.f32.mrf.mxu0  ;;  %v6190_v44 = vpop.f32.mrf.mxu1  ;;  %v6194_v51 = vadd.f32 %v5939_v4, %v6589_v7  ;;  %v6597_v48 = vld [vmem:[#allocation11_spill] sm:$0xff]  ;;  %v6238_v55 = vadd.f32 %v5939_v4, %v6598_v60  ;;  %v6599_v7 = vld [vmem:[#allocation13_spill] sm:$0xff] }
 0x249   : > { %3869 = vst.msk [vmem:[%s5571_s24 + $0x130] sm:$0xf] %vm3792_vm1, %v4469_v25  ;;  %v3229_v42 = vmax.f32 %v3101_v18, 0.0  ;;  %v2967_v46 = vmul.f32 %v5953_v59, %v2684_v13  ;;  %v2142_v27 = vadd.f32 %v5939_v4, %v2141_v19  ;;  %v6234_v53 = vadd.f32 %v5939_v4, %v6597_v48  ;;  %v6604_v48 = vld [vmem:[#allocation18_spill] sm:$0xff] }
 0x24a   : > { %v2143_v52 = vpop.f32.mrf.mxu0  ;;  %v6216_v11 = vpop.f32.mrf.mxu1  ;;  %v6269_v60 = vadd.f32 %v5939_v4, %v6604_v48 }
 0x24b   : > { %v4470_v29 = vpack.c.bf16 %v3229_v42, %v3229_v42  ;;  %v3102_v3 = vadd.f32 %v5959_v47, %v2967_v46  ;;  %v2687_v39 = vadd.f32 %v6067_v50, %v2142_v27  ;;  %v6246_v42 = vadd.f32 %v5939_v4, %v6599_v7  ;;  %v6600_v46 = vld [vmem:[#allocation14_spill] sm:$0xff] }
 0x24c   : > { %v2146_v25 = vpop.f32.mrf.mxu0  ;;  %v4689_v18 = vpop.f32.mrf.mxu1  ;;  %v6250_v27 = vadd.f32 %v5939_v4, %v6600_v46 }
 0x24d   : > { %3870 = vst.msk [vmem:[%s5571_s24 + $0x134] sm:$0xf] %vm3792_vm1, %v4470_v29  ;;  %v3230_v50 = vmax.f32 %v3102_v3, 0.0  ;;  %v2968_v13 = vmul.f32 %v5953_v59, %v2687_v39  ;;  %v2147_v38 = vadd.f32 %v5939_v4, %v2146_v25  ;;  %v2764_v19 = vadd.f32 %v4689_v18, %v2219_v24  ;;  %v6605_v25 = vld [vmem:[#allocation19_spill] sm:$0xff] }
 0x24e   : > { %v2148_v52 = vpop.f32.mrf.mxu0  ;;  %v2755_v28 = vpop.f32.mrf.mxu1  ;;  %v6273_v18 = vadd.f32 %v5939_v4, %v6605_v25 }
 0x24f   : > { %v4471_v24 = vpack.c.bf16 %v3230_v50, %v3230_v50  ;;  %v3103_v29 = vadd.f32 %v5959_v47, %v2968_v13  ;;  %v2692_v3 = vadd.f32 %v6082_v15, %v2147_v38  ;;  %v2987_v39 = vmul.f32 %v5953_v59, %v2764_v19  ;;  %v6608_v52 = vld [vmem:[#allocation21_spill] sm:$0xff] }
 0x250   : > { %v2756_v50 = vadd.f32 %v2755_v28, %v6136_v2  ;;  %v2149_v7 = vpop.f32.mrf.mxu0  ;;  %v4690_v13 = vpop.f32.mrf.mxu1  ;;  %v6287_v43 = vadd.f32 %v5939_v4, %v6608_v52 }
 0x251   : > { %3871 = vst.msk [vmem:[%s5571_s24 + $0x138] sm:$0xf] %vm3792_vm1, %v4471_v24  ;;  %v3231_v15 = vmax.f32 %v3103_v29, 0.0  ;;  %v2969_v38 = vmul.f32 %v5953_v59, %v2692_v3  ;;  %v3122_v19 = vadd.f32 %v5959_v47, %v2987_v39  ;;  %v2150_v46 = vadd.f32 %v5939_v4, %v2149_v7  ;;  %v6609_v7 = vld [vmem:[#allocation22_spill] sm:$0xff] }
 0x252   : > { %v2985_v2 = vmul.f32 %v5953_v59, %v2756_v50  ;;  %v2767_v28 = vadd.f32 %v4690_v13, %v6152_v58  ;;  %v2151_v24 = vpop.f32.mrf.mxu0  ;;  %v2758_v29 = vpop.f32.mrf.mxu1  ;;  %v6295_v54 = vadd.f32 %v5939_v4, %v6609_v7 }
 0x253   : > { %v4472_v3 = vpack.c.bf16 %v3231_v15, %v3231_v15  ;;  %v3104_v39 = vadd.f32 %v5959_v47, %v2969_v38  ;;  %v3250_v48 = vmax.f32 %v3122_v19, 0.0  ;;  %v2695_v25 = vadd.f32 %v6091_v17, %v2150_v46 }
 0x254   : > { %v3120_v37 = vadd.f32 %v5959_v47, %v2985_v2  ;;  %v2988_v52 = vmul.f32 %v5953_v59, %v2767_v28  ;;  %v2759_v50 = vadd.f32 %v2758_v29, %v6140_v32  ;;  %v2154_v58 = vpop.f32.mrf.mxu0  ;;  %v4693_v13 = vpop.f32.mrf.mxu1 }
 0x255   : > { %3872 = vst.msk [vmem:[%s5571_s24 + $0x13c] sm:$0xf] %vm3792_vm1, %v4472_v3  ;;  %v3232_v15 = vmax.f32 %v3104_v39, 0.0  ;;  %v4491_v38 = vpack.c.bf16 %v3250_v48, %v3250_v48  ;;  %v2970_v19 = vmul.f32 %v5953_v59, %v2695_v25  ;;  %v2155_v17 = vadd.f32 %v5939_v4, %v2154_v58 }
 0x256   : > { %v3248_v46 = vmax.f32 %v3120_v37, 0.0  ;;  %v3123_v24 = vadd.f32 %v5959_v47, %v2988_v52  ;;  %v2986_v2 = vmul.f32 %v5953_v59, %v2759_v50  ;;  %v2780_v28 = vadd.f32 %v4693_v13, %v6164_v6  ;;  %v2156_v7 = vpop.f32.mrf.mxu0  ;;  %v2771_v32 = vpop.f32.mrf.mxu1 }
 0x257   : > { %v4473_v29 = vpack.c.bf16 %v3232_v15, %v3232_v15  ;;  %3891 = vst.msk [vmem:[%s5571_s24 + $0x188] sm:$0xf] %vm3792_vm1, %v4491_v38  ;;  %v3105_v3 = vadd.f32 %v5959_v47, %v2970_v19  ;;  %v2700_v39 = vadd.f32 %v6076_v16, %v2155_v17  ;;  %v2772_v48 = vadd.f32 %v2771_v32, %v6156_v62 }
 0x258   : > { %v4489_v37 = vpack.c.bf16 %v3248_v46, %v3248_v46  ;;  %v3251_v25 = vmax.f32 %v3123_v24, 0.0  ;;  %v3121_v52 = vadd.f32 %v5959_v47, %v2986_v2  ;;  %v2991_v50 = vmul.f32 %v5953_v59, %v2780_v28  ;;  %v2157_v58 = vpop.f32.mrf.mxu0  ;;  %v4694_v6 = vpop.f32.mrf.mxu1 }
 0x259   : > { %3873 = vst.msk [vmem:[%s5571_s24 + $0x140] sm:$0xf] %vm3792_vm1, %v4473_v29  ;;  %v3233_v13 = vmax.f32 %v3105_v3, 0.0  ;;  %v2971_v15 = vmul.f32 %v5953_v59, %v2700_v39  ;;  %v2989_v38 = vmul.f32 %v5953_v59, %v2772_v48  ;;  %v2158_v16 = vadd.f32 %v5939_v4, %v2157_v58 }
 0x25a   : > { %3889 = vst.msk [vmem:[%s5571_s24 + $0x180] sm:$0xf] %vm3792_vm1, %v4489_v37  ;;  %v4492_v62 = vpack.c.bf16 %v3251_v25, %v3251_v25  ;;  %v3249_v19 = vmax.f32 %v3121_v52, 0.0  ;;  %v3126_v17 = vadd.f32 %v5959_v47, %v2991_v50  ;;  %v2783_v46 = vadd.f32 %v4694_v6, %v6170_v10  ;;  %v2159_v24 = vpop.f32.mrf.mxu0  ;;  %v2774_v2 = vpop.f32.mrf.mxu1 }
 0x25b   : > { %v4474_v28 = vpack.c.bf16 %v3233_v13, %v3233_v13  ;;  %v3106_v7 = vadd.f32 %v5959_v47, %v2971_v15  ;;  %v3124_v32 = vadd.f32 %v5959_v47, %v2989_v38  ;;  %v2703_v29 = vadd.f32 %v6085_v33, %v2158_v16 }
 0x25c   : > { %3892 = vst.msk [vmem:[%s5571_s24 + $0x18c] sm:$0xf] %vm3792_vm1, %v4492_v62  ;;  %v4490_v3 = vpack.c.bf16 %v3249_v19, %v3249_v19  ;;  %v3254_v39 = vmax.f32 %v3126_v17, 0.0  ;;  %v2992_v48 = vmul.f32 %v5953_v59, %v2783_v46  ;;  %v2775_v37 = vadd.f32 %v2774_v2, %v6160_v26  ;;  %v2162_v25 = vpop.f32.mrf.mxu0  ;;  %v4697_v10 = vpop.f32.mrf.mxu1 }
 0x25d   : > { %3874 = vst.msk [vmem:[%s5571_s24 + $0x144] sm:$0xf] %vm3792_vm1, %v4474_v28  ;;  %v3234_v52 = vmax.f32 %v3106_v7, 0.0  ;;  %v3252_v50 = vmax.f32 %v3124_v32, 0.0  ;;  %v2972_v58 = vmul.f32 %v5953_v59, %v2703_v29  ;;  %v2163_v6 = vadd.f32 %v5939_v4, %v2162_v25 }
 0x25e   : > { %3890 = vst.msk [vmem:[%s5571_s24 + $0x184] sm:$0xf] %vm3792_vm1, %v4490_v3  ;;  %v4495_v33 = vpack.c.bf16 %v3254_v39, %v3254_v39  ;;  %v3127_v13 = vadd.f32 %v5959_v47, %v2992_v48  ;;  %v2990_v15 = vmul.f32 %v5953_v59, %v2775_v37  ;;  %v2796_v26 = vadd.f32 %v4697_v10, %v6184_v12  ;;  %v2164_v38 = vpop.f32.mrf.mxu0  ;;  %v2787_v16 = vpop.f32.mrf.mxu1 }
 0x25f   : > { %v4475_v62 = vpack.c.bf16 %v3234_v52, %v3234_v52  ;;  %v4493_v19 = vpack.c.bf16 %v3252_v50, %v3252_v50  ;;  %v3107_v17 = vadd.f32 %v5959_v47, %v2972_v58  ;;  %v2708_v46 = vadd.f32 %v6100_v21, %v2163_v6 }
 0x260   : > { %3895 = vst.msk [vmem:[%s5571_s24 + $0x198] sm:$0xf] %vm3792_vm1, %v4495_v33  ;;  %v3255_v24 = vmax.f32 %v3127_v13, 0.0  ;;  %v3125_v2 = vadd.f32 %v5959_v47, %v2990_v15  ;;  %v2995_v28 = vmul.f32 %v5953_v59, %v2796_v26  ;;  %v2788_v7 = vadd.f32 %v2787_v16, %v6176_v22  ;;  %v2165_v32 = vpop.f32.mrf.mxu0  ;;  %v4698_v29 = vpop.f32.mrf.mxu1 }
 0x261   : > { %3875 = vst.msk [vmem:[%s5571_s24 + $0x148] sm:$0xf] %vm3792_vm1, %v4475_v62  ;;  %3893 = vst.msk [vmem:[%s5571_s24 + $0x190] sm:$0xf] %vm3792_vm1, %v4493_v19  ;;  %v3235_v12 = vmax.f32 %v3107_v17, 0.0  ;;  %v2973_v3 = vmul.f32 %v5953_v59, %v2708_v46  ;;  %v2166_v21 = vadd.f32 %v5939_v4, %v2165_v32  ;;  %v2799_v39 = vadd.f32 %v4698_v29, %v6188_v34 }
 0x262   : > { %v4496_v48 = vpack.c.bf16 %v3255_v24, %v3255_v24  ;;  %v3253_v37 = vmax.f32 %v3125_v2, 0.0  ;;  %v3130_v25 = vadd.f32 %v5959_v47, %v2995_v28  ;;  %v2993_v22 = vmul.f32 %v5953_v59, %v2788_v7  ;;  %v2167_v10 = vpop.f32.mrf.mxu0  ;;  %v2790_v52 = vpop.f32.mrf.mxu1 }
 0x263   : > { %v4476_v50 = vpack.c.bf16 %v3235_v12, %v3235_v12  ;;  %v3108_v58 = vadd.f32 %v5959_v47, %v2973_v3  ;;  %v2711_v6 = vadd.f32 %v6110_v40, %v2166_v21  ;;  %v2996_v33 = vmul.f32 %v5953_v59, %v2799_v39 }
 0x264   : > { %3896 = vst.msk [vmem:[%s5571_s24 + $0x19c] sm:$0xf] %vm3792_vm1, %v4496_v48  ;;  %v4494_v34 = vpack.c.bf16 %v3253_v37, %v3253_v37  ;;  %v3258_v13 = vmax.f32 %v3130_v25, 0.0  ;;  %v3128_v15 = vadd.f32 %v5959_v47, %v2993_v22  ;;  %v2791_v26 = vadd.f32 %v2790_v52, %v6180_v30  ;;  %v2170_v38 = vpop.f32.mrf.mxu0  ;;  %v4701_v16 = vpop.f32.mrf.mxu1 }
 0x265   : > { %3876 = vst.msk [vmem:[%s5571_s24 + $0x14c] sm:$0xf] %vm3792_vm1, %v4476_v50  ;;  %v3236_v62 = vmax.f32 %v3108_v58, 0.0  ;;  %v2974_v19 = vmul.f32 %v5953_v59, %v2711_v6  ;;  %v3131_v40 = vadd.f32 %v5959_v47, %v2996_v33  ;;  %v2171_v17 = vadd.f32 %v5939_v4, %v2170_v38 }
 0x266   : > { %3894 = vst.msk [vmem:[%s5571_s24 + $0x194] sm:$0xf] %vm3792_vm1, %v4494_v34  ;;  %v4499_v46 = vpack.c.bf16 %v3258_v13, %v3258_v13  ;;  %v3256_v24 = vmax.f32 %v3128_v15, 0.0  ;;  %v2994_v2 = vmul.f32 %v5953_v59, %v2791_v26  ;;  %v2812_v30 = vadd.f32 %v4701_v16, %v6206_v8  ;;  %v2172_v28 = vpop.f32.mrf.mxu0  ;;  %v2803_v7 = vpop.f32.mrf.mxu1 }
 0x267   : > { %v4477_v32 = vpack.c.bf16 %v3236_v62, %v3236_v62  ;;  %v3109_v29 = vadd.f32 %v5959_v47, %v2974_v19  ;;  %v3259_v12 = vmax.f32 %v3131_v40, 0.0  ;;  %v2716_v3 = vadd.f32 %v6094_v20, %v2171_v17 }
 0x268   : > { %3899 = vst.msk [vmem:[%s5571_s24 + $0x1a8] sm:$0xf] %vm3792_vm1, %v4499_v46  ;;  %v4497_v21 = vpack.c.bf16 %v3256_v24, %v3256_v24  ;;  %v3129_v39 = vadd.f32 %v5959_v47, %v2994_v2  ;;  %v2999_v48 = vmul.f32 %v5953_v59, %v2812_v30  ;;  %v2804_v37 = vadd.f32 %v2803_v7, %v6194_v51  ;;  %v2173_v8 = vpop.f32.mrf.mxu0  ;;  %v4702_v25 = vpop.f32.mrf.mxu1 }
 0x269   : > { %3877 = vst.msk [vmem:[%s5571_s24 + $0x150] sm:$0xf] %vm3792_vm1, %v4477_v32  ;;  %v3237_v22 = vmax.f32 %v3109_v29, 0.0  ;;  %v4500_v10 = vpack.c.bf16 %v3259_v12, %v3259_v12  ;;  %v2975_v52 = vmul.f32 %v5953_v59, %v2716_v3  ;;  %v2174_v20 = vadd.f32 %v5939_v4, %v2173_v8 }
 0x26a   : > { %3897 = vst.msk [vmem:[%s5571_s24 + $0x1a0] sm:$0xf] %vm3792_vm1, %v4497_v21  ;;  %v3257_v50 = vmax.f32 %v3129_v39, 0.0  ;;  %v3134_v58 = vadd.f32 %v5959_v47, %v2999_v48  ;;  %v2997_v6 = vmul.f32 %v5953_v59, %v2804_v37  ;;  %v2815_v51 = vadd.f32 %v4702_v25, %v6210_v41  ;;  %v2175_v33 = vpop.f32.mrf.mxu0  ;;  %v2806_v34 = vpop.f32.mrf.mxu1 }
 0x26b   : > { %v4478_v13 = vpack.c.bf16 %v3237_v22, %v3237_v22  ;;  %3900 = vst.msk [vmem:[%s5571_s24 + $0x1ac] sm:$0xf] %vm3792_vm1, %v4500_v10  ;;  %v3110_v15 = vadd.f32 %v5959_v47, %v2975_v52  ;;  %v2719_v26 = vadd.f32 %v6104_v61, %v2174_v20  ;;  %v2807_v38 = vadd.f32 %v2806_v34, %v6202_v49  ;;  %v6415_v52 = vld [vmem:[%s6564_s3] ss:$0 sm:$0xff] }
 0x26c   : > { %v4498_v16 = vpack.c.bf16 %v3257_v50, %v3257_v50  ;;  %v3262_v62 = vmax.f32 %v3134_v58, 0.0  ;;  %v3132_v19 = vadd.f32 %v5959_v47, %v2997_v6  ;;  %v3000_v40 = vmul.f32 %v5953_v59, %v2815_v51  ;;  %v2178_v17 = vpop.f32.mrf.mxu0  ;;  %v4705_v41 = vpop.f32.mrf.mxu1 }
 0x26d   : > { %3878 = vst.msk [vmem:[%s5571_s24 + $0x154] sm:$0xf] %vm3792_vm1, %v4478_v13  ;;  %v3238_v46 = vmax.f32 %v3110_v15, 0.0  ;;  %v2976_v24 = vmul.f32 %v5953_v59, %v2719_v26  ;;  %v2998_v2 = vmul.f32 %v5953_v59, %v2807_v38  ;;  %v2179_v61 = vadd.f32 %v5939_v4, %v2178_v17  ;;  %v6432_v15 = vld [vmem:[%s6565_s4] ss:$0 sm:$0xff] }
 0x26e   : > { %3898 = vst.msk [vmem:[%s5571_s24 + $0x1a4] sm:$0xf] %vm3792_vm1, %v4498_v16  ;;  %v4503_v49 = vpack.c.bf16 %v3262_v62, %v3262_v62  ;;  %v3260_v30 = vmax.f32 %v3132_v19, 0.0  ;;  %v3135_v28 = vadd.f32 %v5959_v47, %v3000_v40  ;;  %v2828_v7 = vadd.f32 %v4705_v41, %v6226_v31  ;;  %v2180_v32 = vpop.f32.mrf.mxu0  ;;  %v2819_v29 = vpop.f32.mrf.mxu1 }
 0x26f   : > { %v4479_v12 = vpack.c.bf16 %v3238_v46, %v3238_v46  ;;  %v3111_v3 = vadd.f32 %v5959_v47, %v2976_v24  ;;  %v3133_v21 = vadd.f32 %v5959_v47, %v2998_v2  ;;  %v2724_v39 = vadd.f32 %v6120_v14, %v2179_v61 }
 0x270   : > { %3903 = vst.msk [vmem:[%s5571_s24 + $0x1b8] sm:$0xf] %vm3792_vm1, %v4503_v49  ;;  %v4501_v4 = vpack.c.bf16 %v3260_v30, %v3260_v30  ;;  %v3263_v48 = vmax.f32 %v3135_v28, 0.0  ;;  %v3003_v37 = vmul.f32 %v5953_v59, %v2828_v7  ;;  %v2820_v8 = vadd.f32 %v2819_v29, %v6214_v23  ;;  %v2181_v25 = vpop.f32.mrf.mxu0  ;;  %v4706_v31 = vpop.f32.mrf.mxu1  ;;  %v6421_v59 = vld [vmem:[%s6563_s2] ss:$0 sm:$0xff] }
 0x271   : > { %3879 = vst.msk [vmem:[%s5571_s24 + $0x158] sm:$0xf] %vm3792_vm1, %v4479_v12  ;;  %v3239_v22 = vmax.f32 %v3111_v3, 0.0  ;;  %v3261_v10 = vmax.f32 %v3133_v21, 0.0  ;;  %v2977_v14 = vmul.f32 %v6415_v52, %v2724_v39  ;;  %v2182_v23 = vadd.f32 %v6421_v59, %v2181_v25 }
 0x272   : > { %3901 = vst.msk [vmem:[%s5571_s24 + $0x1b0] sm:$0xf] %vm3792_vm1, %v4501_v4  ;;  %v4504_v20 = vpack.c.bf16 %v3263_v48, %v3263_v48  ;;  %v3138_v50 = vadd.f32 %v5959_v47, %v3003_v37  ;;  %v3001_v58 = vmul.f32 %v6415_v52, %v2820_v8  ;;  %v2831_v6 = vadd.f32 %v4706_v31, %v6230_v1  ;;  %v2183_v51 = vpop.f32.mrf.mxu0  ;;  %v2822_v33 = vpop.f32.mrf.mxu1 }
 0x273   : > { %v4480_v34 = vpack.c.bf16 %v3239_v22, %v3239_v22  ;;  %v4502_v13 = vpack.c.bf16 %v3261_v10, %v3261_v10  ;;  %v3112_v26 = vadd.f32 %v6432_v15, %v2977_v14  ;;  %v2727_v38 = vadd.f32 %v6130_v36, %v2182_v23 }
 0x274   : > { %3904 = vst.msk [vmem:[%s5571_s24 + $0x1bc] sm:$0xf] %vm3792_vm1, %v4504_v20  ;;  %v3266_v47 = vmax.f32 %v3138_v50, 0.0  ;;  %v3136_v16 = vadd.f32 %v6432_v15, %v3001_v58  ;;  %v3004_v1 = vmul.f32 %v6415_v52, %v2831_v6  ;;  %v2823_v62 = vadd.f32 %v2822_v33, %v6220_v63  ;;  %v2186_v19 = vpop.f32.mrf.mxu0  ;;  %v4709_v40 = vpop.f32.mrf.mxu1 }
 0x275   : > { %3880 = vst.msk [vmem:[%s5571_s24 + $0x15c] sm:$0xf] %vm3792_vm1, %v4480_v34  ;;  %3902 = vst.msk [vmem:[%s5571_s24 + $0x1b4] sm:$0xf] %vm3792_vm1, %v4502_v13  ;;  %v3240_v17 = vmax.f32 %v3112_v26, 0.0  ;;  %v2978_v41 = vmul.f32 %v6415_v52, %v2727_v38  ;;  %v2187_v36 = vadd.f32 %v6421_v59, %v2186_v19  ;;  %v2844_v46 = vadd.f32 %v4709_v40, %v6246_v42 }
 0x276   : > { %v4507_v24 = vpack.c.bf16 %v3266_v47, %v3266_v47  ;;  %v3264_v2 = vmax.f32 %v3136_v16, 0.0  ;;  %v3139_v61 = vadd.f32 %v6432_v15, %v3004_v1  ;;  %v3002_v63 = vmul.f32 %v6415_v52, %v2823_v62  ;;  %v2188_v49 = vpop.f32.mrf.mxu0  ;;  %v2835_v30 = vpop.f32.mrf.mxu1 }
 0x277   : > { %v4481_v28 = vpack.c.bf16 %v3240_v17, %v3240_v17  ;;  %v3113_v7 = vadd.f32 %v6432_v15, %v2978_v41  ;;  %v2732_v32 = vadd.f32 %v6114_v45, %v2187_v36  ;;  %v3007_v29 = vmul.f32 %v6415_v52, %v2844_v46 }
 0x278   : > { %3907 = vst.msk [vmem:[%s5571_s24 + $0x1c8] sm:$0xf] %vm3792_vm1, %v4507_v24  ;;  %v4505_v42 = vpack.c.bf16 %v3264_v2, %v3264_v2  ;;  %v3267_v12 = vmax.f32 %v3139_v61, 0.0  ;;  %v3137_v3 = vadd.f32 %v6432_v15, %v3002_v63  ;;  %v2836_v21 = vadd.f32 %v2835_v30, %v6234_v53  ;;  %v2189_v39 = vpop.f32.mrf.mxu0  ;;  %v4710_v4 = vpop.f32.mrf.mxu1 }
 0x279   : > { %3881 = vst.msk [vmem:[%s5571_s24 + $0x160] sm:$0xf] %vm3792_vm1, %v4481_v28  ;;  %v3241_v48 = vmax.f32 %v3113_v7, 0.0  ;;  %v2979_v37 = vmul.f32 %v6415_v52, %v2732_v32  ;;  %v3142_v45 = vadd.f32 %v6432_v15, %v3007_v29  ;;  %v2190_v8 = vadd.f32 %v6421_v59, %v2189_v39 }
 0x27a   : > { %3905 = vst.msk [vmem:[%s5571_s24 + $0x1c0] sm:$0xf] %vm3792_vm1, %v4505_v42  ;;  %v4508_v25 = vpack.c.bf16 %v3267_v12, %v3267_v12  ;;  %v3265_v31 = vmax.f32 %v3137_v3, 0.0  ;;  %v3005_v22 = vmul.f32 %v6415_v52, %v2836_v21  ;;  %v2847_v53 = vadd.f32 %v4710_v4, %v6250_v27  ;;  %v2191_v10 = vpop.f32.mrf.mxu0  ;;  %v2838_v14 = vpop.f32.mrf.mxu1 }
 0x27b   : > { %v4482_v23 = vpack.c.bf16 %v3241_v48, %v3241_v48  ;;  %v3114_v20 = vadd.f32 %v6432_v15, %v2979_v37  ;;  %v3270_v50 = vmax.f32 %v3142_v45, 0.0  ;;  %v2735_v58 = vadd.f32 %v6124_v56, %v2190_v8 }
 0x27c   : > { %3908 = vst.msk [vmem:[%s5571_s24 + $0x1cc] sm:$0xf] %vm3792_vm1, %v4508_v25  ;;  %v4506_v6 = vpack.c.bf16 %v3265_v31, %v3265_v31  ;;  %v3140_v51 = vadd.f32 %v6432_v15, %v3005_v22  ;;  %v3008_v33 = vmul.f32 %v6415_v52, %v2847_v53  ;;  %v2839_v34 = vadd.f32 %v2838_v14, %v6238_v55  ;;  %v2194_v27 = vpop.f32.mrf.mxu0  ;;  %v4713_v13 = vpop.f32.mrf.mxu1 }
 0x27d   : > { %3882 = vst.msk [vmem:[%s5571_s24 + $0x164] sm:$0xf] %vm3792_vm1, %v4482_v23  ;;  %v3242_v26 = vmax.f32 %v3114_v20, 0.0  ;;  %v4511_v38 = vpack.c.bf16 %v3270_v50, %v3270_v50  ;;  %v2980_v47 = vmul.f32 %v6415_v52, %v2735_v58  ;;  %v2195_v56 = vadd.f32 %v6421_v59, %v2194_v27 }
 0x27e   : > { %3906 = vst.msk [vmem:[%s5571_s24 + $0x1c4] sm:$0xf] %vm3792_vm1, %v4506_v6  ;;  %v3268_v16 = vmax.f32 %v3140_v51, 0.0  ;;  %v3143_v1 = vadd.f32 %v6432_v15, %v3008_v33  ;;  %v3006_v62 = vmul.f32 %v6415_v52, %v2839_v34  ;;  %v2860_v55 = vadd.f32 %v4713_v13, %v6265_v57  ;;  %v2196_v19 = vpop.f32.mrf.mxu0  ;;  %v2851_v40 = vpop.f32.mrf.mxu1 }
 0x27f   : > { %v4483_v17 = vpack.c.bf16 %v3242_v26, %v3242_v26  ;;  %3911 = vst.msk [vmem:[%s5571_s24 + $0x1d8] sm:$0xf] %vm3792_vm1, %v4511_v38  ;;  %v3115_v41 = vadd.f32 %v6432_v15, %v2980_v47  ;;  %v2740_v36 = vadd.f32 %v6166_v5, %v2195_v56  ;;  %v2852_v46 = vadd.f32 %v2851_v40, %v6254_v9 }
 0x280   : > { %v4509_v24 = vpack.c.bf16 %v3268_v16, %v3268_v16  ;;  %v3271_v2 = vmax.f32 %v3143_v1, 0.0  ;;  %v3141_v61 = vadd.f32 %v6432_v15, %v3006_v62  ;;  %v3011_v63 = vmul.f32 %v6415_v52, %v2860_v55  ;;  %v2197_v49 = vpop.f32.mrf.mxu0  ;;  %v4714_v57 = vpop.f32.mrf.mxu1 }
 0x281   : > { %3883 = vst.msk [vmem:[%s5571_s24 + $0x168] sm:$0xf] %vm3792_vm1, %v4483_v17  ;;  %v3243_v30 = vmax.f32 %v3115_v41, 0.0  ;;  %v2981_v28 = vmul.f32 %v6415_v52, %v2740_v36  ;;  %v3009_v7 = vmul.f32 %v6415_v52, %v2852_v46  ;;  %v2198_v5 = vadd.f32 %v6421_v59, %v2197_v49 }
 0x282   : > { %3909 = vst.msk [vmem:[%s5571_s24 + $0x1d0] sm:$0xf] %vm3792_vm1, %v4509_v24  ;;  %v4512_v9 = vpack.c.bf16 %v3271_v2, %v3271_v2  ;;  %v3269_v32 = vmax.f32 %v3141_v61, 0.0  ;;  %v3146_v29 = vadd.f32 %v6432_v15, %v3011_v63  ;;  %v2863_v42 = vadd.f32 %v4714_v57, %v6269_v60  ;;  %v2199_v12 = vpop.f32.mrf.mxu0  ;;  %v2854_v3 = vpop.f32.mrf.mxu1  ;;  %v6610_v61 = vld [vmem:[#allocation2_spill] sm:$0xff] }
 0x283   : > { %v4484_v21 = vpack.c.bf16 %v3243_v30, %v3243_v30  ;;  %v3116_v39 = vadd.f32 %v6432_v15, %v2981_v28  ;;  %v3144_v4 = vadd.f32 %v6432_v15, %v3009_v7  ;;  %v2743_v48 = vadd.f32 %v6216_v11, %v2198_v5 }
 0x284   : > { %3912 = vst.msk [vmem:[%s5571_s24 + $0x1dc] sm:$0xf] %vm3792_vm1, %v4512_v9  ;;  %v4510_v37 = vpack.c.bf16 %v3269_v32, %v3269_v32  ;;  %v3274_v45 = vmax.f32 %v3146_v29, 0.0  ;;  %v3012_v8 = vmul.f32 %v6415_v52, %v2863_v42  ;;  %v2855_v25 = vadd.f32 %v2854_v3, %v6258_v35  ;;  %v2202_v31 = vpop.f32.mrf.mxu0  ;;  %v4717_v60 = vpop.f32.mrf.mxu1 }
 0x285   : > { %3884 = vst.msk [vmem:[%s5571_s24 + $0x16c] sm:$0xf] %vm3792_vm1, %v4484_v21  ;;  %v3244_v22 = vmax.f32 %v3116_v39, 0.0  ;;  %v3272_v53 = vmax.f32 %v3144_v4, 0.0  ;;  %v2982_v10 = vmul.f32 %v6415_v52, %v2743_v48  ;;  %v2203_v14 = vadd.f32 %v6421_v59, %v2202_v31 }
 0x286   : > { %3910 = vst.msk [vmem:[%s5571_s24 + $0x1d4] sm:$0xf] %vm3792_vm1, %v4510_v37  ;;  %v4515_v11 = vpack.c.bf16 %v3274_v45, %v3274_v45  ;;  %v3147_v23 = vadd.f32 %v6432_v15, %v3012_v8  ;;  %v3010_v20 = vmul.f32 %v6415_v52, %v2855_v25  ;;  %v2876_v35 = vadd.f32 %v4717_v60, %v6287_v43  ;;  %v2204_v50 = vpop.f32.mrf.mxu0  ;;  %v2867_v58 = vpop.f32.mrf.mxu1 }
 0x287   : > { %v4485_v6 = vpack.c.bf16 %v3244_v22, %v3244_v22  ;;  %v4513_v51 = vpack.c.bf16 %v3272_v53, %v3272_v53  ;;  %v3117_v33 = vadd.f32 %v6432_v15, %v2982_v10  ;;  %v2748_v34 = vadd.f32 %v6142_v0, %v2203_v14 }
 0x288   : > { %3915 = vst.msk [vmem:[%s5571_s24 + $0x1e8] sm:$0xf] %vm3792_vm1, %v4515_v11  ;;  %v3275_v27 = vmax.f32 %v3147_v23, 0.0  ;;  %v3145_v13 = vadd.f32 %v6432_v15, %v3010_v20  ;;  %v3015_v26 = vmul.f32 %v6415_v52, %v2876_v35  ;;  %v2868_v38 = vadd.f32 %v2867_v58, %v6273_v18  ;;  %v2205_v47 = vpop.f32.mrf.mxu0  ;;  %v4718_v56 = vpop.f32.mrf.mxu1 }
 0x289   : > { %3885 = vst.msk [vmem:[%s5571_s24 + $0x170] sm:$0xf] %vm3792_vm1, %v4485_v6  ;;  %3913 = vst.msk [vmem:[%s5571_s24 + $0x1e0] sm:$0xf] %vm3792_vm1, %v4513_v51  ;;  %v3245_v43 = vmax.f32 %v3117_v33, 0.0  ;;  %v2983_v16 = vmul.f32 %v6415_v52, %v2748_v34  ;;  %v2206_v0 = vadd.f32 %v6421_v59, %v2205_v47  ;;  %v2879_v1 = vadd.f32 %v4718_v56, %v6295_v54 }
 0x28a   : > { %v4516_v62 = vpack.c.bf16 %v3275_v27, %v3275_v27  ;;  %v3273_v55 = vmax.f32 %v3145_v13, 0.0  ;;  %v3150_v19 = vadd.f32 %v6432_v15, %v3015_v26  ;;  %v3013_v18 = vmul.f32 %v6415_v52, %v2868_v38  ;;  %v2207_v40 = vpop.f32.mrf.mxu0  ;;  %v2870_v17 = vpop.f32.mrf.mxu1 }
 0x28b   : > { %v4486_v41 = vpack.c.bf16 %v3245_v43, %v3245_v43  ;;  %v3118_v36 = vadd.f32 %v6432_v15, %v2983_v16  ;;  %v2751_v46 = vadd.f32 %v6190_v44, %v2206_v0  ;;  %v3016_v24 = vmul.f32 %v6415_v52, %v2879_v1 }
 0x28c   : > { %3916 = vst.msk [vmem:[%s5571_s24 + $0x1ec] sm:$0xf] %vm3792_vm1, %v4516_v62  ;;  %v4514_v54 = vpack.c.bf16 %v3273_v55, %v3273_v55  ;;  %v3278_v59 = vmax.f32 %v3150_v19, 0.0  ;;  %v3148_v2 = vadd.f32 %v6432_v15, %v3013_v18  ;;  %v2871_v63 = vadd.f32 %v2870_v17, %v6610_v61 }
 0x28d   : > { %3886 = vst.msk [vmem:[%s5571_s24 + $0x174] sm:$0xf] %vm3792_vm1, %v4486_v41  ;;  %v3246_v49 = vmax.f32 %v3118_v36, 0.0  ;;  %v2984_v57 = vmul.f32 %v6415_v52, %v2751_v46  ;;  %v3151_v44 = vadd.f32 %v6432_v15, %v3016_v24 }
 0x28e   : > { %3914 = vst.msk [vmem:[%s5571_s24 + $0x1e4] sm:$0xf] %vm3792_vm1, %v4514_v54  ;;  %v4519_v30 = vpack.c.bf16 %v3278_v59, %v3278_v59  ;;  %v3276_v28 = vmax.f32 %v3148_v2, 0.0  ;;  %v3014_v7 = vmul.f32 %v6415_v52, %v2871_v63 }
 0x28f   : > { %v4487_v5 = vpack.c.bf16 %v3246_v49, %v3246_v49  ;;  %v3119_v9 = vadd.f32 %v6432_v15, %v2984_v57  ;;  %v3279_v32 = vmax.f32 %v3151_v44, 0.0 }
 0x290   : > { %3919 = vst.msk [vmem:[%s5571_s24 + $0x1f8] sm:$0xf] %vm3792_vm1, %v4519_v30  ;;  %v4517_v29 = vpack.c.bf16 %v3276_v28, %v3276_v28  ;;  %v3149_v42 = vadd.f32 %v6432_v15, %v3014_v7 }
 0x291   : > { %3887 = vst.msk [vmem:[%s5571_s24 + $0x178] sm:$0xf] %vm3792_vm1, %v4487_v5  ;;  %v3247_v12 = vmax.f32 %v3119_v9, 0.0  ;;  %v4520_v3 = vpack.c.bf16 %v3279_v32, %v3279_v32 }
 0x292   : > { %3917 = vst.msk [vmem:[%s5571_s24 + $0x1f0] sm:$0xf] %vm3792_vm1, %v4517_v29  ;;  %v3277_v21 = vmax.f32 %v3149_v42, 0.0 }
 0x293   : > { %v4488_v39 = vpack.c.bf16 %v3247_v12, %v3247_v12  ;;  %3920 = vst.msk [vmem:[%s5571_s24 + $0x1fc] sm:$0xf] %vm3792_vm1, %v4520_v3 }
 0x294   : > { %v4518_v52 = vpack.c.bf16 %v3277_v21, %v3277_v21 }
 0x295   : > { %3888 = vst.msk [vmem:[%s5571_s24 + $0x17c] sm:$0xf] %vm3792_vm1, %v4488_v39 }
 0x296   : > { %3918 = vst.msk [vmem:[%s5571_s24 + $0x1f4] sm:$0xf] %vm3792_vm1, %v4518_v52 }
 0x297 PF: > { %s15_s18 = sadd.s32 1, %s5047_s18  }
 0x298   : > { %p12_p4 = scmp.ge.s32.totalorder %s15_s18, 6  }
 0x29a   :  { %14 = sbr.rel (!%p12_p4) target bundleno = 1 (0x1), region = 70 }

// kernel: forward.12
= control target key start
LH: loop header
LB: loop body
LE: loop exit
PB: predicated region body
PF: predicated region fallthrough
CT: control target
= control target key end

     0   :  { %s1347_s1 = inlined_call_operand.vmem [shape: bf16[256,128], index: 1, kind: input, shape index: {}]   ;;  %s1348_s0 = inlined_call_operand.vmem [shape: bf16[216,256], index: 0, kind: input, shape index: {}]   ;;  %s1349_s2 = inlined_call_operand.vmem [shape: f32[1,128], index: 2, kind: input, shape index: {}]   ;;  %s1350_s3 = inlined_call_operand.vmem [shape: f32[1,128], index: 3, kind: input, shape index: {}]   ;;  %s1351_s4 = inlined_call_operand.vmem [shape: f32[1,128], index: 4, kind: input, shape index: {}]   ;;  %s1352_s5 = inlined_call_operand.vmem [shape: bf16[216,128], index: 5, kind: output, shape index: {}]  }
   0x1   :  { %v993_v0 = vld [vmem:[%s1347_s1 + $0x78] sm:$0xff]   ;;  %v995_v2 = vld [vmem:[%s1347_s1 + $0x70] sm:$0xff]   ;;  %v997_v4 = vld [vmem:[%s1347_s1 + $0x68] sm:$0xff]  }
   0x2   :  { %v994_v1 = vld [vmem:[%s1347_s1 + $0x38] sm:$0xff]   ;;  %877 = vmatprep.subr.bf16.mxu0 %v993_v0  ;;  %977 = vmatprep.subr.bf16.mxu1 %v993_v0  ;;  %v996_v3 = vld [vmem:[%s1347_s1 + $0x30] sm:$0xff]   ;;  %v998_v5 = vld [vmem:[%s1347_s1 + $0x28] sm:$0xff]  }
   0x3   :  { %878 = vmatpush3.bf16.msra.mxu0 %v994_v1  ;;  %985 = vmatpush3.bf16.msra.mxu1 %v994_v1  ;;  %v999_v6 = vld [vmem:[%s1347_s1 + $0x60] sm:$0xff]   ;;  %v1001_v8 = vld [vmem:[%s1347_s1 + $0x58] sm:$0xff]   ;;  %v1003_v10 = vld [vmem:[%s1347_s1 + $0x50] sm:$0xff]  }
   0x4   :  { %879 = vmatprep.subr.bf16.mxu0 %v995_v2  ;;  %978 = vmatprep.subr.bf16.mxu1 %v995_v2  ;;  %v1000_v7 = vld [vmem:[%s1347_s1 + $0x20] sm:$0xff]   ;;  %v1002_v9 = vld [vmem:[%s1347_s1 + $0x18] sm:$0xff]   ;;  %v1004_v13 = vld [vmem:[%s1347_s1 + $0x10] sm:$0xff]  }
   0x5   :  { %v1011_v11 = vld [vmem:[%s1348_s0 + $0x4] ss:$8 sps:$4 sm:$0xff]   ;;  %v1014_v12 = vld [vmem:[%s1348_s0 + $0x74] ss:$8 sps:$4 sm:$0xff]   ;;  %v1009_v18 = vld [vmem:[%s1348_s0] ss:$8 sps:$4 sm:$0xff]  }
   0x6   :  { %v1005_v14 = vld [vmem:[%s1347_s1 + $0x48] sm:$0xff]   ;;  %352 = vmatprep.mubr.bf16.mxu0 %v1011_v11  ;;  %408 = vmatprep.mubr.bf16.mxu1 %v1014_v12  ;;  %v1007_v16 = vld [vmem:[%s1347_s1 + $0x40] sm:$0xff]   ;;  %v1012_v19 = vld [vmem:[%s1348_s0 + $0x70] ss:$8 sps:$4 sm:$0xff]  }
   0x7   :  { %880 = vmatpush3.bf16.msra.mxu0 %v996_v3  ;;  %986 = vmatpush3.bf16.msra.mxu1 %v996_v3  ;;  %v1006_v15 = vld [vmem:[%s1347_s1 + $0x8] sm:$0xff]   ;;  %v1008_v17 = vld [vmem:[%s1347_s1] sm:$0xff]   ;;  %v1015_v20 = vld [vmem:[%s1348_s0 + $0x14] ss:$8 sps:$4 sm:$0xff]  }
   0x8   :  { %881 = vmatprep.subr.bf16.mxu0 %v997_v4  ;;  %979 = vmatprep.subr.bf16.mxu1 %v997_v4  ;;  %v1017_v21 = vld [vmem:[%s1348_s0 + $0x84] ss:$8 sps:$4 sm:$0xff]   ;;  %v1019_v22 = vld [vmem:[%s1348_s0 + $0x10] ss:$8 sps:$4 sm:$0xff]   ;;  %v1020_v23 = vld [vmem:[%s1348_s0 + $0x80] ss:$8 sps:$4 sm:$0xff]  }
   0x9   :  { %v1021_v24 = vld [vmem:[%s1348_s0 + $0x24] ss:$8 sps:$4 sm:$0xff]   ;;  %v1023_v25 = vld [vmem:[%s1348_s0 + $0x94] ss:$8 sps:$4 sm:$0xff]   ;;  %v1025_v26 = vld [vmem:[%s1348_s0 + $0x20] ss:$8 sps:$4 sm:$0xff]  }
   0xa   :  { %v1026_v27 = vld [vmem:[%s1348_s0 + $0x90] ss:$8 sps:$4 sm:$0xff]   ;;  %v1027_v28 = vld [vmem:[%s1348_s0 + $0x34] ss:$8 sps:$4 sm:$0xff]   ;;  %v1029_v29 = vld [vmem:[%s1348_s0 + $0xa4] ss:$8 sps:$4 sm:$0xff]  }
   0xb   :  { %882 = vmatpush3.bf16.msra.mxu0 %v998_v5  ;;  %987 = vmatpush3.bf16.msra.mxu1 %v998_v5  ;;  %v1031_v30 = vld [vmem:[%s1348_s0 + $0x30] ss:$8 sps:$4 sm:$0xff]   ;;  %v1032_v31 = vld [vmem:[%s1348_s0 + $0xa0] ss:$8 sps:$4 sm:$0xff]   ;;  %v1033_v32 = vld [vmem:[%s1348_s0 + $0x44] ss:$8 sps:$4 sm:$0xff]  }
   0xc   :  { %883 = vmatprep.subr.bf16.mxu0 %v999_v6  ;;  %980 = vmatprep.subr.bf16.mxu1 %v999_v6  ;;  %v1035_v33 = vld [vmem:[%s1348_s0 + $0xb4] ss:$8 sps:$4 sm:$0xff]   ;;  %v1037_v34 = vld [vmem:[%s1348_s0 + $0x40] ss:$8 sps:$4 sm:$0xff]   ;;  %v1038_v35 = vld [vmem:[%s1348_s0 + $0xb0] ss:$8 sps:$4 sm:$0xff]  }
   0xd   :  { %v1039_v36 = vld [vmem:[%s1348_s0 + $0x54] ss:$8 sps:$4 sm:$0xff]   ;;  %v1041_v37 = vld [vmem:[%s1348_s0 + $0xc4] ss:$8 sps:$4 sm:$0xff]   ;;  %v1043_v39 = vld [vmem:[%s1348_s0 + $0x50] ss:$8 sps:$4 sm:$0xff]  }
   0xe   :  { %v47_v38 = vld [vmem:[%s1348_s0 + $0xd0] sm:$0xff]  ;;  %v1044_v40 = vld [vmem:[%s1348_s0 + $0xc0] ss:$8 sps:$4 sm:$0xff]   ;;  %v1045_v41 = vld [vmem:[%s1348_s0 + $0x64] ss:$8 sps:$4 sm:$0xff]  }
   0xf   :  { %884 = vmatpush3.bf16.msra.mxu0 %v1000_v7  ;;  %988 = vmatpush3.bf16.msra.mxu1 %v1000_v7  ;;  %v727_v42 = vcombine.high %v47_v38, %v47_v38  ;;  %v1048_v43 = vld [vmem:[%s1348_s0 + $0x60] ss:$8 sps:$4 sm:$0xff]   ;;  %v726_v44 = vcombine.low %v47_v38, %v47_v38 }
  0x10   :  { %885 = vmatprep.subr.bf16.mxu0 %v1001_v8  ;;  %981 = vmatprep.subr.bf16.mxu1 %v1001_v8  ;;  %v1212_v47 = vld [vmem:[%s1349_s2] ss:$0 sm:$0xff] }
  0x11   :  { %v1217_v52 = vld [vmem:[%s1350_s3] ss:$0 sm:$0xff] }
  0x12   :  { %v1225_v60 = vld [vmem:[%s1351_s4] ss:$0 sm:$0xff] }
  0x13   :  { %886 = vmatpush3.bf16.msra.mxu0 %v1002_v9  ;;  %989 = vmatpush3.bf16.msra.mxu1 %v1002_v9 }
  0x14   :  { %887 = vmatprep.subr.bf16.mxu0 %v1003_v10  ;;  %982 = vmatprep.subr.bf16.mxu1 %v1003_v10 }
  0x17   :  { %888 = vmatpush3.bf16.msra.mxu0 %v1004_v13  ;;  %990 = vmatpush3.bf16.msra.mxu1 %v1004_v13 }
  0x18   :  { %889 = vmatprep.subr.bf16.mxu0 %v1005_v14  ;;  %983 = vmatprep.subr.bf16.mxu1 %v1005_v14 }
  0x1b   :  { %890 = vmatpush3.bf16.msra.mxu0 %v1006_v15  ;;  %991 = vmatpush3.bf16.msra.mxu1 %v1006_v15 }
  0x1c   :  { %891 = vmatprep.subr.bf16.mxu0 %v1007_v16  ;;  %984 = vmatprep.subr.bf16.mxu1 %v1007_v16 }
  0x1f   :  { %892 = vmatpush3.bf16.msra.mxu0 %v1008_v17  ;;  %992 = vmatpush3.bf16.msra.mxu1 %v1008_v17 }
  0x22   :  { %353 = vmatmul.mubr.bf16.vlgmr.msra.gmra.mxu0 %v1009_v18  ;;  %409 = vmatmul.mubr.bf16.vlgmr.msra.gmra.mxu1 %v1012_v19 }
  0x23   :  { %360 = vmatprep.mubr.bf16.mxu0 %v1015_v20  ;;  %416 = vmatprep.mubr.bf16.mxu1 %v1017_v21 }
  0x2a   :  { %361 = vmatmul.mubr.bf16.gmra.mxu0 %v1019_v22  ;;  %417 = vmatmul.mubr.bf16.gmra.mxu1 %v1020_v23 }
  0x2b   :  { %368 = vmatprep.mubr.bf16.mxu0 %v1021_v24  ;;  %424 = vmatprep.mubr.bf16.mxu1 %v1023_v25 }
  0x32   :  { %369 = vmatmul.mubr.bf16.gmra.mxu0 %v1025_v26  ;;  %425 = vmatmul.mubr.bf16.gmra.mxu1 %v1026_v27 }
  0x33   :  { %376 = vmatprep.mubr.bf16.mxu0 %v1027_v28  ;;  %432 = vmatprep.mubr.bf16.mxu1 %v1029_v29 }
  0x3a   :  { %377 = vmatmul.mubr.bf16.gmra.mxu0 %v1031_v30  ;;  %433 = vmatmul.mubr.bf16.gmra.mxu1 %v1032_v31 }
  0x3b   :  { %384 = vmatprep.mubr.bf16.mxu0 %v1033_v32  ;;  %440 = vmatprep.mubr.bf16.mxu1 %v1035_v33 }
  0x42   :  { %385 = vmatmul.mubr.bf16.gmra.mxu0 %v1037_v34  ;;  %441 = vmatmul.mubr.bf16.gmra.mxu1 %v1038_v35 }
  0x43   :  { %392 = vmatprep.mubr.bf16.mxu0 %v1039_v36  ;;  %448 = vmatprep.mubr.bf16.mxu1 %v1041_v37 }
  0x4a   :  { %393 = vmatmul.mubr.bf16.gmra.mxu0 %v1043_v39  ;;  %449 = vmatmul.mubr.bf16.gmra.mxu1 %v1044_v40 }
  0x4b   :  { %400 = vmatprep.mubr.bf16.mxu0 %v1045_v41  ;;  %456 = vmatprep.mubr.bf16.mxu1 %v727_v42 }
  0x52   :  { %401 = vmatmul.mubr.bf16.gmra.mxu0 %v1048_v43  ;;  %457 = vmatmul.mubr.bf16.gmra.mxu1 %v726_v44 }
  0xe2   :  { %v893_v45 = vpop.f32.mrf.mxu0  ;;  %v935_v46 = vpop.f32.mrf.mxu1 }
  0xe4   :  { %v894_v48 = vpop.f32.mrf.mxu0  ;;  %v936_v49 = vpop.f32.mrf.mxu1 }
  0xe5   :  { %v895_v50 = vadd.f32 %v894_v48, %v893_v45  ;;  %v937_v51 = vadd.f32 %v936_v49, %v935_v46 }
  0xe6   :  { %v896_v53 = vpop.f32.mrf.mxu0  ;;  %v938_v54 = vpop.f32.mrf.mxu1 }
  0xe7   :  { %v355_v55 = vadd.f32 %v895_v50, %v1212_v47  ;;  %v411_v56 = vadd.f32 %v937_v51, %v1212_v47 }
  0xe8   :  { %v897_v57 = vpop.f32.mrf.mxu0  ;;  %v939_v58 = vpop.f32.mrf.mxu1 }
  0xe9   :  { %v471_v59 = vmul.f32 %v1217_v52, %v355_v55  ;;  %v485_v61 = vmul.f32 %v1217_v52, %v411_v56  ;;  %v898_v62 = vadd.f32 %v897_v57, %v896_v53  ;;  %v940_v63 = vadd.f32 %v939_v58, %v938_v54 }
  0xea   :  { %v899_v0 = vpop.f32.mrf.mxu0  ;;  %v941_v1 = vpop.f32.mrf.mxu1 }
  0xeb   :  { %v358_v2 = vadd.f32 %v898_v62, %v1212_v47  ;;  %v414_v3 = vadd.f32 %v940_v63, %v1212_v47  ;;  %v505_v4 = vadd.f32 %v1225_v60, %v471_v59  ;;  %v519_v5 = vadd.f32 %v1225_v60, %v485_v61 }
  0xec   :  { %v900_v6 = vpop.f32.mrf.mxu0  ;;  %v942_v7 = vpop.f32.mrf.mxu1 }
  0xed   :  { %v472_v8 = vmul.f32 %v1217_v52, %v358_v2  ;;  %v486_v9 = vmul.f32 %v1217_v52, %v414_v3  ;;  %v901_v10 = vadd.f32 %v900_v6, %v899_v0  ;;  %v943_v11 = vadd.f32 %v942_v7, %v941_v1 }
  0xee   :  { %v902_v12 = vpop.f32.mrf.mxu0  ;;  %v944_v13 = vpop.f32.mrf.mxu1  ;;  %v532_v16 = vmax.f32 %v505_v4, 0.0  ;;  %v546_v17 = vmax.f32 %v519_v5, 0.0 }
  0xef   :  { %v506_v14 = vadd.f32 %v1225_v60, %v472_v8  ;;  %v520_v15 = vadd.f32 %v1225_v60, %v486_v9  ;;  %v363_v18 = vadd.f32 %v901_v10, %v1212_v47  ;;  %v419_v19 = vadd.f32 %v943_v11, %v1212_v47 }
  0xf0   :  { %v903_v20 = vpop.f32.mrf.mxu0  ;;  %v945_v21 = vpop.f32.mrf.mxu1 }
  0xf1   :  { %v533_v22 = vmax.f32 %v506_v14, 0.0  ;;  %v547_v23 = vmax.f32 %v520_v15, 0.0  ;;  %v904_v24 = vadd.f32 %v903_v20, %v902_v12  ;;  %v946_v25 = vadd.f32 %v945_v21, %v944_v13 }
  0xf2   :  { %v473_v26 = vmul.f32 %v1217_v52, %v363_v18  ;;  %v487_v27 = vmul.f32 %v1217_v52, %v419_v19  ;;  %v905_v28 = vpop.f32.mrf.mxu0  ;;  %v947_v29 = vpop.f32.mrf.mxu1 }
  0xf3   :  { %v803_v30 = vpack.c.bf16 %v533_v22, %v532_v16  ;;  %v838_v31 = vpack.c.bf16 %v547_v23, %v546_v17  ;;  %v366_v32 = vadd.f32 %v904_v24, %v1212_v47  ;;  %v422_v33 = vadd.f32 %v946_v25, %v1212_v47 }
  0xf4   :  { %v507_v34 = vadd.f32 %v1225_v60, %v473_v26  ;;  %v521_v35 = vadd.f32 %v1225_v60, %v487_v27  ;;  %v906_v36 = vpop.f32.mrf.mxu0  ;;  %v948_v37 = vpop.f32.mrf.mxu1 }
  0xf5   :  { %804 = vst [vmem:[%s1352_s5] sm:$0xff] %v803_v30   ;;  %871 = vst [vmem:[%s1352_s5 + $0x38] sm:$0xff] %v838_v31   ;;  %v474_v38 = vmul.f32 %v1217_v52, %v366_v32  ;;  %v488_v39 = vmul.f32 %v1217_v52, %v422_v33  ;;  %v907_v40 = vadd.f32 %v906_v36, %v905_v28 }
  0xf6   :  { %v949_v41 = vadd.f32 %v948_v37, %v947_v29  ;;  %v908_v42 = vpop.f32.mrf.mxu0  ;;  %v950_v43 = vpop.f32.mrf.mxu1  ;;  %v534_v51 = vmax.f32 %v507_v34, 0.0  ;;  %v548_v53 = vmax.f32 %v521_v35, 0.0 }
  0xf7   :  { %v508_v44 = vadd.f32 %v1225_v60, %v474_v38  ;;  %v522_v45 = vadd.f32 %v1225_v60, %v488_v39  ;;  %v371_v46 = vadd.f32 %v907_v40, %v1212_v47 }
  0xf8   :  { %v427_v48 = vadd.f32 %v949_v41, %v1212_v47  ;;  %v909_v49 = vpop.f32.mrf.mxu0  ;;  %v951_v50 = vpop.f32.mrf.mxu1 }
  0xf9   :  { %v535_v54 = vmax.f32 %v508_v44, 0.0  ;;  %v549_v55 = vmax.f32 %v522_v45, 0.0  ;;  %v475_v56 = vmul.f32 %v1217_v52, %v371_v46  ;;  %v910_v58 = vadd.f32 %v909_v49, %v908_v42 }
  0xfa   :  { %v489_v57 = vmul.f32 %v1217_v52, %v427_v48  ;;  %v952_v59 = vadd.f32 %v951_v50, %v950_v43  ;;  %v911_v61 = vpop.f32.mrf.mxu0  ;;  %v953_v62 = vpop.f32.mrf.mxu1 }
  0xfb   :  { %v808_v63 = vpack.c.bf16 %v535_v54, %v534_v51  ;;  %v843_v0 = vpack.c.bf16 %v549_v55, %v548_v53  ;;  %v374_v1 = vadd.f32 %v910_v58, %v1212_v47  ;;  %v509_v7 = vadd.f32 %v1225_v60, %v475_v56 }
  0xfc   :  { %v430_v2 = vadd.f32 %v952_v59, %v1212_v47  ;;  %v912_v3 = vpop.f32.mrf.mxu0  ;;  %v954_v4 = vpop.f32.mrf.mxu1  ;;  %v523_v8 = vadd.f32 %v1225_v60, %v489_v57 }
  0xfd   :  { %865 = vst [vmem:[%s1352_s5 + $0x8] sm:$0xff] %v808_v63   ;;  %872 = vst [vmem:[%s1352_s5 + $0x40] sm:$0xff] %v843_v0   ;;  %v913_v5 = vadd.f32 %v912_v3, %v911_v61  ;;  %v955_v6 = vadd.f32 %v954_v4, %v953_v62  ;;  %v476_v9 = vmul.f32 %v1217_v52, %v374_v1  ;;  %v536_v23 = vmax.f32 %v509_v7, 0.0 }
  0xfe   :  { %v490_v10 = vmul.f32 %v1217_v52, %v430_v2  ;;  %v914_v11 = vpop.f32.mrf.mxu0  ;;  %v956_v12 = vpop.f32.mrf.mxu1  ;;  %v550_v24 = vmax.f32 %v523_v8, 0.0 }
  0xff   :  { %v379_v13 = vadd.f32 %v913_v5, %v1212_v47  ;;  %v435_v14 = vadd.f32 %v955_v6, %v1212_v47  ;;  %v510_v15 = vadd.f32 %v1225_v60, %v476_v9 }
 0x100   :  { %v524_v16 = vadd.f32 %v1225_v60, %v490_v10  ;;  %v915_v17 = vpop.f32.mrf.mxu0  ;;  %v957_v18 = vpop.f32.mrf.mxu1 }
 0x101   :  { %v477_v19 = vmul.f32 %v1217_v52, %v379_v13  ;;  %v491_v20 = vmul.f32 %v1217_v52, %v435_v14  ;;  %v916_v21 = vadd.f32 %v915_v17, %v914_v11  ;;  %v958_v22 = vadd.f32 %v957_v18, %v956_v12 }
 0x102   :  { %v537_v25 = vmax.f32 %v510_v15, 0.0  ;;  %v551_v26 = vmax.f32 %v524_v16, 0.0  ;;  %v917_v27 = vpop.f32.mrf.mxu0  ;;  %v959_v28 = vpop.f32.mrf.mxu1 }
 0x103   :  { %v382_v29 = vadd.f32 %v916_v21, %v1212_v47  ;;  %v438_v30 = vadd.f32 %v958_v22, %v1212_v47  ;;  %v511_v33 = vadd.f32 %v1225_v60, %v477_v19  ;;  %v525_v34 = vadd.f32 %v1225_v60, %v491_v20 }
 0x104   :  { %v813_v31 = vpack.c.bf16 %v537_v25, %v536_v23  ;;  %v848_v32 = vpack.c.bf16 %v551_v26, %v550_v24  ;;  %v918_v35 = vpop.f32.mrf.mxu0  ;;  %v960_v36 = vpop.f32.mrf.mxu1 }
 0x105   :  { %v478_v37 = vmul.f32 %v1217_v52, %v382_v29  ;;  %v492_v38 = vmul.f32 %v1217_v52, %v438_v30  ;;  %v919_v39 = vadd.f32 %v918_v35, %v917_v27  ;;  %v961_v40 = vadd.f32 %v960_v36, %v959_v28 }
 0x106   :  { %866 = vst [vmem:[%s1352_s5 + $0x10] sm:$0xff] %v813_v31   ;;  %873 = vst [vmem:[%s1352_s5 + $0x48] sm:$0xff] %v848_v32   ;;  %v920_v41 = vpop.f32.mrf.mxu0  ;;  %v962_v42 = vpop.f32.mrf.mxu1  ;;  %v538_v45 = vmax.f32 %v511_v33, 0.0  ;;  %v552_v46 = vmax.f32 %v525_v34, 0.0 }
 0x107   :  { %v512_v43 = vadd.f32 %v1225_v60, %v478_v37  ;;  %v526_v44 = vadd.f32 %v1225_v60, %v492_v38  ;;  %v387_v48 = vadd.f32 %v919_v39, %v1212_v47  ;;  %v443_v49 = vadd.f32 %v961_v40, %v1212_v47 }
 0x108   :  { %v921_v50 = vpop.f32.mrf.mxu0  ;;  %v963_v51 = vpop.f32.mrf.mxu1 }
 0x109   :  { %v539_v53 = vmax.f32 %v512_v43, 0.0  ;;  %v553_v54 = vmax.f32 %v526_v44, 0.0  ;;  %v922_v55 = vadd.f32 %v921_v50, %v920_v41  ;;  %v964_v56 = vadd.f32 %v963_v51, %v962_v42 }
 0x10a   :  { %v479_v57 = vmul.f32 %v1217_v52, %v387_v48  ;;  %v493_v58 = vmul.f32 %v1217_v52, %v443_v49  ;;  %v923_v59 = vpop.f32.mrf.mxu0  ;;  %v965_v61 = vpop.f32.mrf.mxu1 }
 0x10b   :  { %v818_v62 = vpack.c.bf16 %v539_v53, %v538_v45  ;;  %v853_v63 = vpack.c.bf16 %v553_v54, %v552_v46  ;;  %v390_v0 = vadd.f32 %v922_v55, %v1212_v47  ;;  %v446_v1 = vadd.f32 %v964_v56, %v1212_v47 }
 0x10c   :  { %v513_v2 = vadd.f32 %v1225_v60, %v479_v57  ;;  %v527_v3 = vadd.f32 %v1225_v60, %v493_v58  ;;  %v924_v4 = vpop.f32.mrf.mxu0  ;;  %v966_v5 = vpop.f32.mrf.mxu1 }
 0x10d   :  { %867 = vst [vmem:[%s1352_s5 + $0x18] sm:$0xff] %v818_v62   ;;  %874 = vst [vmem:[%s1352_s5 + $0x50] sm:$0xff] %v853_v63   ;;  %v480_v6 = vmul.f32 %v1217_v52, %v390_v0  ;;  %v494_v7 = vmul.f32 %v1217_v52, %v446_v1  ;;  %v925_v8 = vadd.f32 %v924_v4, %v923_v59 }
 0x10e   :  { %v967_v9 = vadd.f32 %v966_v5, %v965_v61  ;;  %v926_v10 = vpop.f32.mrf.mxu0  ;;  %v968_v11 = vpop.f32.mrf.mxu1  ;;  %v540_v18 = vmax.f32 %v513_v2, 0.0  ;;  %v554_v19 = vmax.f32 %v527_v3, 0.0 }
 0x10f   :  { %v514_v12 = vadd.f32 %v1225_v60, %v480_v6  ;;  %v528_v13 = vadd.f32 %v1225_v60, %v494_v7  ;;  %v395_v14 = vadd.f32 %v925_v8, %v1212_v47 }
 0x110   :  { %v451_v15 = vadd.f32 %v967_v9, %v1212_v47  ;;  %v927_v16 = vpop.f32.mrf.mxu0  ;;  %v969_v17 = vpop.f32.mrf.mxu1 }
 0x111   :  { %v541_v20 = vmax.f32 %v514_v12, 0.0  ;;  %v555_v21 = vmax.f32 %v528_v13, 0.0  ;;  %v481_v22 = vmul.f32 %v1217_v52, %v395_v14  ;;  %v928_v24 = vadd.f32 %v927_v16, %v926_v10 }
 0x112   :  { %v495_v23 = vmul.f32 %v1217_v52, %v451_v15  ;;  %v970_v25 = vadd.f32 %v969_v17, %v968_v11  ;;  %v929_v26 = vpop.f32.mrf.mxu0  ;;  %v971_v27 = vpop.f32.mrf.mxu1 }
 0x113   :  { %v823_v28 = vpack.c.bf16 %v541_v20, %v540_v18  ;;  %v858_v29 = vpack.c.bf16 %v555_v21, %v554_v19  ;;  %v398_v30 = vadd.f32 %v928_v24, %v1212_v47  ;;  %v515_v36 = vadd.f32 %v1225_v60, %v481_v22 }
 0x114   :  { %v454_v31 = vadd.f32 %v970_v25, %v1212_v47  ;;  %v930_v32 = vpop.f32.mrf.mxu0  ;;  %v972_v33 = vpop.f32.mrf.mxu1  ;;  %v529_v37 = vadd.f32 %v1225_v60, %v495_v23 }
 0x115   :  { %868 = vst [vmem:[%s1352_s5 + $0x20] sm:$0xff] %v823_v28   ;;  %875 = vst [vmem:[%s1352_s5 + $0x58] sm:$0xff] %v858_v29   ;;  %v931_v34 = vadd.f32 %v930_v32, %v929_v26  ;;  %v973_v35 = vadd.f32 %v972_v33, %v971_v27  ;;  %v482_v38 = vmul.f32 %v1217_v52, %v398_v30  ;;  %v542_v53 = vmax.f32 %v515_v36, 0.0 }
 0x116   :  { %v496_v39 = vmul.f32 %v1217_v52, %v454_v31  ;;  %v932_v40 = vpop.f32.mrf.mxu0  ;;  %v974_v41 = vpop.f32.mrf.mxu1  ;;  %v556_v54 = vmax.f32 %v529_v37, 0.0 }
 0x117   :  { %v403_v42 = vadd.f32 %v931_v34, %v1212_v47  ;;  %v459_v43 = vadd.f32 %v973_v35, %v1212_v47  ;;  %v516_v44 = vadd.f32 %v1225_v60, %v482_v38 }
 0x118   :  { %v530_v45 = vadd.f32 %v1225_v60, %v496_v39  ;;  %v933_v46 = vpop.f32.mrf.mxu0  ;;  %v975_v48 = vpop.f32.mrf.mxu1 }
 0x119   :  { %v483_v49 = vmul.f32 %v1217_v52, %v403_v42  ;;  %v497_v50 = vmul.f32 %v1217_v52, %v459_v43  ;;  %v934_v51 = vadd.f32 %v933_v46, %v932_v40  ;;  %v543_v55 = vmax.f32 %v516_v44, 0.0 }
 0x11a   :  { %v557_v56 = vmax.f32 %v530_v45, 0.0 }
 0x11b   :  { %v531_v57 = vadd.f32 %v1225_v60, %v497_v50  ;;  %v406_v58 = vadd.f32 %v934_v51, %v1212_v47  ;;  %v828_v59 = vpack.c.bf16 %v543_v55, %v542_v53  ;;  %v517_v62 = vadd.f32 %v1225_v60, %v483_v49 }
 0x11c   :  { %v863_v61 = vpack.c.bf16 %v557_v56, %v556_v54 }
 0x11d   :  { %v558_v63 = vmax.f32 %v531_v57, 0.0  ;;  %v484_v0 = vmul.f32 %v1217_v52, %v406_v58  ;;  %869 = vst [vmem:[%s1352_s5 + $0x28] sm:$0xff] %v828_v59   ;;  %v544_v3 = vmax.f32 %v517_v62, 0.0 }
 0x11e   :  { %876 = vst [vmem:[%s1352_s5 + $0x60] sm:$0xff] %v863_v61  }
 0x11f   :  { %v799_v1 = vpack.c.bf16 %v558_v63, %v558_v63  ;;  %v518_v2 = vadd.f32 %v1225_v60, %v484_v0 }
 0x121   :  { %694 = vst [vmem:[%s1352_s5 + $0x68] sm:$0xf] %v799_v1  ;;  %v545_v47 = vmax.f32 %v518_v2, 0.0 }
 0x123   :  { %v833_v4 = vpack.c.bf16 %v545_v47, %v544_v3 }
 0x125   :  { %870 = vst [vmem:[%s1352_s5 + $0x30] sm:$0xff] %v833_v4  }

// kernel: forward.13
= control target key start
LH: loop header
LB: loop body
LE: loop exit
PB: predicated region body
PF: predicated region fallthrough
CT: control target
= control target key end

     0   :  { %s2057_s1 = inlined_call_operand.vmem [shape: bf16[512,512], index: 1, kind: input, shape index: {}]   ;;  %s2058_s0 = inlined_call_operand.vmem [shape: bf16[32,512], index: 0, kind: input, shape index: {}]   ;;  %s2059_s2 = inlined_call_operand.vmem [shape: f32[1,512], index: 2, kind: input, shape index: {}]   ;;  %s2060_s3 = inlined_call_operand.vmem [shape: f32[1,512], index: 3, kind: input, shape index: {}]   ;;  %s2061_s4 = inlined_call_operand.vmem [shape: f32[1,512], index: 4, kind: input, shape index: {}]   ;;  %s2062_s5 = inlined_call_operand.vmem [shape: f32[32,512], index: 5, kind: output, shape index: {}]  }
   0x1   :  { %v1302_v0 = vld [vmem:[%s2057_s1 + $0xe4] ss:$16 sps:$4 sm:$0xff]   ;;  %v1306_v2 = vld [vmem:[%s2057_s1 + $0xe0] ss:$16 sps:$4 sm:$0xff]   ;;  %v1694_v51 = vld [vmem:[%s2058_s0 + $0xc] ss:$16 sps:$4 sm:$0xff]  }
   0x2   :  { %v1304_v1 = vld [vmem:[%s2057_s1 + $0x2e4] ss:$16 sps:$4 sm:$0xff]   ;;  %858 = vmatprep.subr.bf16.mxu0 %v1302_v0  ;;  %v1307_v3 = vld [vmem:[%s2057_s1 + $0x2e0] ss:$16 sps:$4 sm:$0xff]   ;;  %943 = vmatprep.mubr.bf16.mxu1 %v1694_v51 }
   0x3   :  { %911 = vmatprep.subr.bf16.mxu1 %v1304_v1  ;;  %v1308_v4 = vld [vmem:[%s2057_s1 + $0xc4] ss:$16 sps:$4 sm:$0xff]   ;;  %859 = vmatpush1.bf16.msra.mxu0 %v1306_v2  ;;  %v1312_v6 = vld [vmem:[%s2057_s1 + $0xc0] ss:$16 sps:$4 sm:$0xff]   ;;  %v1406_v2 = vld [vmem:[%s2057_s1 + $0xec] ss:$16 sps:$4 sm:$0xff]  }
   0x4   :  { %912 = vmatpush1.bf16.msra.mxu1 %v1307_v3  ;;  %v1310_v5 = vld [vmem:[%s2057_s1 + $0x2c4] ss:$16 sps:$4 sm:$0xff]   ;;  %860 = vmatprep.subr.bf16.mxu0 %v1308_v4  ;;  %v1313_v7 = vld [vmem:[%s2057_s1 + $0x2c0] ss:$16 sps:$4 sm:$0xff]   ;;  %v1409_v3 = vld [vmem:[%s2057_s1 + $0x2ec] ss:$16 sps:$4 sm:$0xff]  }
   0x5   :  { %913 = vmatprep.subr.bf16.mxu1 %v1310_v5  ;;  %v1314_v8 = vld [vmem:[%s2057_s1 + $0xa4] ss:$16 sps:$4 sm:$0xff]   ;;  %v1318_v10 = vld [vmem:[%s2057_s1 + $0xa0] ss:$16 sps:$4 sm:$0xff]   ;;  %v1754_v5 = vld [vmem:[%s2058_s0 + $0x8] ss:$16 sps:$4 sm:$0xff]  }
   0x6   :  { %v1316_v9 = vld [vmem:[%s2057_s1 + $0x2a4] ss:$16 sps:$4 sm:$0xff]   ;;  %v1319_v11 = vld [vmem:[%s2057_s1 + $0x2a0] ss:$16 sps:$4 sm:$0xff]  }
   0x7   :  { %861 = vmatpush1.bf16.msra.mxu0 %v1312_v6  ;;  %v1320_v12 = vld [vmem:[%s2057_s1 + $0x84] ss:$16 sps:$4 sm:$0xff]   ;;  %v1324_v14 = vld [vmem:[%s2057_s1 + $0x80] ss:$16 sps:$4 sm:$0xff]   ;;  %v1404_v6 = vld [vmem:[%s2057_s1 + $0xe8] ss:$16 sps:$4 sm:$0xff]  }
   0x8   :  { %914 = vmatpush1.bf16.msra.mxu1 %v1313_v7  ;;  %862 = vmatprep.subr.bf16.mxu0 %v1314_v8  ;;  %v1322_v13 = vld [vmem:[%s2057_s1 + $0x284] ss:$16 sps:$4 sm:$0xff]   ;;  %v1325_v15 = vld [vmem:[%s2057_s1 + $0x280] ss:$16 sps:$4 sm:$0xff]   ;;  %v1407_v7 = vld [vmem:[%s2057_s1 + $0x2e8] ss:$16 sps:$4 sm:$0xff]  }
   0x9   :  { %915 = vmatprep.subr.bf16.mxu1 %v1316_v9  ;;  %v1326_v16 = vld [vmem:[%s2057_s1 + $0x64] ss:$16 sps:$4 sm:$0xff]   ;;  %v1330_v18 = vld [vmem:[%s2057_s1 + $0x60] ss:$16 sps:$4 sm:$0xff]   ;;  %v1412_v8 = vld [vmem:[%s2057_s1 + $0xcc] ss:$16 sps:$4 sm:$0xff]  }
   0xa   :  { %v1328_v17 = vld [vmem:[%s2057_s1 + $0x264] ss:$16 sps:$4 sm:$0xff]   ;;  %v1331_v19 = vld [vmem:[%s2057_s1 + $0x260] ss:$16 sps:$4 sm:$0xff]   ;;  %v1415_v9 = vld [vmem:[%s2057_s1 + $0x2cc] ss:$16 sps:$4 sm:$0xff]  }
   0xb   :  { %863 = vmatpush1.bf16.msra.mxu0 %v1318_v10  ;;  %v1332_v20 = vld [vmem:[%s2057_s1 + $0x44] ss:$16 sps:$4 sm:$0xff]   ;;  %v1336_v22 = vld [vmem:[%s2057_s1 + $0x40] ss:$16 sps:$4 sm:$0xff]   ;;  %v1410_v10 = vld [vmem:[%s2057_s1 + $0xc8] ss:$16 sps:$4 sm:$0xff]  }
   0xc   :  { %916 = vmatpush1.bf16.msra.mxu1 %v1319_v11  ;;  %864 = vmatprep.subr.bf16.mxu0 %v1320_v12  ;;  %v1334_v21 = vld [vmem:[%s2057_s1 + $0x244] ss:$16 sps:$4 sm:$0xff]   ;;  %v1337_v23 = vld [vmem:[%s2057_s1 + $0x240] ss:$16 sps:$4 sm:$0xff]   ;;  %v1413_v11 = vld [vmem:[%s2057_s1 + $0x2c8] ss:$16 sps:$4 sm:$0xff]  }
   0xd   :  { %917 = vmatprep.subr.bf16.mxu1 %v1322_v13  ;;  %v1338_v24 = vld [vmem:[%s2057_s1 + $0x24] ss:$16 sps:$4 sm:$0xff]   ;;  %v1342_v26 = vld [vmem:[%s2057_s1 + $0x20] ss:$16 sps:$4 sm:$0xff]   ;;  %v1418_v12 = vld [vmem:[%s2057_s1 + $0xac] ss:$16 sps:$4 sm:$0xff]  }
   0xe   :  { %v1340_v25 = vld [vmem:[%s2057_s1 + $0x224] ss:$16 sps:$4 sm:$0xff]   ;;  %v1343_v27 = vld [vmem:[%s2057_s1 + $0x220] ss:$16 sps:$4 sm:$0xff]   ;;  %v1421_v13 = vld [vmem:[%s2057_s1 + $0x2ac] ss:$16 sps:$4 sm:$0xff]  }
   0xf   :  { %865 = vmatpush1.bf16.msra.mxu0 %v1324_v14  ;;  %v1344_v28 = vld [vmem:[%s2057_s1 + $0x4] ss:$16 sps:$4 sm:$0xff]   ;;  %v1348_v30 = vld [vmem:[%s2057_s1] ss:$16 sps:$4 sm:$0xff]   ;;  %v1416_v14 = vld [vmem:[%s2057_s1 + $0xa8] ss:$16 sps:$4 sm:$0xff]  }
  0x10   :  { %918 = vmatpush1.bf16.msra.mxu1 %v1325_v15  ;;  %866 = vmatprep.subr.bf16.mxu0 %v1326_v16  ;;  %v1346_v29 = vld [vmem:[%s2057_s1 + $0x204] ss:$16 sps:$4 sm:$0xff]   ;;  %v1349_v31 = vld [vmem:[%s2057_s1 + $0x200] ss:$16 sps:$4 sm:$0xff]   ;;  %v1419_v15 = vld [vmem:[%s2057_s1 + $0x2a8] ss:$16 sps:$4 sm:$0xff]  }
  0x11   :  { %919 = vmatprep.subr.bf16.mxu1 %v1328_v17  ;;  %v1350_v32 = vld [vmem:[%s2057_s1 + $0x1e4] ss:$16 sps:$4 sm:$0xff]   ;;  %v1354_v34 = vld [vmem:[%s2057_s1 + $0x1e0] ss:$16 sps:$4 sm:$0xff]   ;;  %v1424_v16 = vld [vmem:[%s2057_s1 + $0x8c] ss:$16 sps:$4 sm:$0xff]  }
  0x12   :  { %v1352_v33 = vld [vmem:[%s2057_s1 + $0x3e4] ss:$16 sps:$4 sm:$0xff]   ;;  %v1355_v35 = vld [vmem:[%s2057_s1 + $0x3e0] ss:$16 sps:$4 sm:$0xff]   ;;  %v1427_v17 = vld [vmem:[%s2057_s1 + $0x28c] ss:$16 sps:$4 sm:$0xff]  }
  0x13   :  { %867 = vmatpush1.bf16.msra.mxu0 %v1330_v18  ;;  %v1356_v36 = vld [vmem:[%s2057_s1 + $0x1c4] ss:$16 sps:$4 sm:$0xff]   ;;  %v1360_v38 = vld [vmem:[%s2057_s1 + $0x1c0] ss:$16 sps:$4 sm:$0xff]   ;;  %v1422_v18 = vld [vmem:[%s2057_s1 + $0x88] ss:$16 sps:$4 sm:$0xff]  }
  0x14   :  { %920 = vmatpush1.bf16.msra.mxu1 %v1331_v19  ;;  %868 = vmatprep.subr.bf16.mxu0 %v1332_v20  ;;  %v1358_v37 = vld [vmem:[%s2057_s1 + $0x3c4] ss:$16 sps:$4 sm:$0xff]   ;;  %v1361_v39 = vld [vmem:[%s2057_s1 + $0x3c0] ss:$16 sps:$4 sm:$0xff]   ;;  %v1425_v19 = vld [vmem:[%s2057_s1 + $0x288] ss:$16 sps:$4 sm:$0xff]  }
  0x15   :  { %921 = vmatprep.subr.bf16.mxu1 %v1334_v21  ;;  %v1362_v40 = vld [vmem:[%s2057_s1 + $0x1a4] ss:$16 sps:$4 sm:$0xff]   ;;  %v1366_v42 = vld [vmem:[%s2057_s1 + $0x1a0] ss:$16 sps:$4 sm:$0xff]   ;;  %v1430_v20 = vld [vmem:[%s2057_s1 + $0x6c] ss:$16 sps:$4 sm:$0xff]  }
  0x16   :  { %v1364_v41 = vld [vmem:[%s2057_s1 + $0x3a4] ss:$16 sps:$4 sm:$0xff]   ;;  %v1367_v43 = vld [vmem:[%s2057_s1 + $0x3a0] ss:$16 sps:$4 sm:$0xff]   ;;  %v1433_v21 = vld [vmem:[%s2057_s1 + $0x26c] ss:$16 sps:$4 sm:$0xff]  }
  0x17   :  { %869 = vmatpush1.bf16.msra.mxu0 %v1336_v22  ;;  %v1368_v44 = vld [vmem:[%s2057_s1 + $0x184] ss:$16 sps:$4 sm:$0xff]   ;;  %v1372_v46 = vld [vmem:[%s2057_s1 + $0x180] ss:$16 sps:$4 sm:$0xff]   ;;  %v1428_v22 = vld [vmem:[%s2057_s1 + $0x68] ss:$16 sps:$4 sm:$0xff]  }
  0x18   :  { %922 = vmatpush1.bf16.msra.mxu1 %v1337_v23  ;;  %870 = vmatprep.subr.bf16.mxu0 %v1338_v24  ;;  %v1370_v45 = vld [vmem:[%s2057_s1 + $0x384] ss:$16 sps:$4 sm:$0xff]   ;;  %v1373_v47 = vld [vmem:[%s2057_s1 + $0x380] ss:$16 sps:$4 sm:$0xff]   ;;  %v1431_v23 = vld [vmem:[%s2057_s1 + $0x268] ss:$16 sps:$4 sm:$0xff]  }
  0x19   :  { %923 = vmatprep.subr.bf16.mxu1 %v1340_v25  ;;  %v1374_v48 = vld [vmem:[%s2057_s1 + $0x164] ss:$16 sps:$4 sm:$0xff]   ;;  %v1378_v52 = vld [vmem:[%s2057_s1 + $0x160] ss:$16 sps:$4 sm:$0xff]   ;;  %v1436_v24 = vld [vmem:[%s2057_s1 + $0x4c] ss:$16 sps:$4 sm:$0xff]  }
  0x1a   :  { %v1686_v49 = vld [vmem:[%s2058_s0 + $0x4] ss:$16 sps:$4 sm:$0xff]   ;;  %v1379_v53 = vld [vmem:[%s2057_s1 + $0x360] ss:$16 sps:$4 sm:$0xff]   ;;  %v1439_v25 = vld [vmem:[%s2057_s1 + $0x24c] ss:$16 sps:$4 sm:$0xff]  }
  0x1b   :  { %871 = vmatpush1.bf16.msra.mxu0 %v1342_v26  ;;  %v1376_v50 = vld [vmem:[%s2057_s1 + $0x364] ss:$16 sps:$4 sm:$0xff]   ;;  %890 = vmatprep.mubr.bf16.mxu0 %v1686_v49  ;;  %v1384_v56 = vld [vmem:[%s2057_s1 + $0x140] ss:$16 sps:$4 sm:$0xff]  }
  0x1c   :  { %924 = vmatpush1.bf16.msra.mxu1 %v1343_v27  ;;  %872 = vmatprep.subr.bf16.mxu0 %v1344_v28  ;;  %v1380_v54 = vld [vmem:[%s2057_s1 + $0x144] ss:$16 sps:$4 sm:$0xff]   ;;  %v1385_v57 = vld [vmem:[%s2057_s1 + $0x340] ss:$16 sps:$4 sm:$0xff]   ;;  %v1434_v28 = vld [vmem:[%s2057_s1 + $0x48] ss:$16 sps:$4 sm:$0xff]  }
  0x1d   :  { %925 = vmatprep.subr.bf16.mxu1 %v1346_v29  ;;  %v1382_v55 = vld [vmem:[%s2057_s1 + $0x344] ss:$16 sps:$4 sm:$0xff]   ;;  %v1390_v60 = vld [vmem:[%s2057_s1 + $0x120] ss:$16 sps:$4 sm:$0xff]   ;;  %v1835_v29 = vld [vmem:[%s2058_s0 + $0x2c] ss:$16 sps:$4 sm:$0xff]  }
  0x1e   :  { %v1386_v58 = vld [vmem:[%s2057_s1 + $0x124] ss:$16 sps:$4 sm:$0xff]   ;;  %v1391_v61 = vld [vmem:[%s2057_s1 + $0x320] ss:$16 sps:$4 sm:$0xff]  }
  0x1f   :  { %873 = vmatpush1.bf16.msra.mxu0 %v1348_v30  ;;  %v1388_v59 = vld [vmem:[%s2057_s1 + $0x324] ss:$16 sps:$4 sm:$0xff]   ;;  %v1396_v0 = vld [vmem:[%s2057_s1 + $0x100] ss:$16 sps:$4 sm:$0xff]   ;;  %v1437_v30 = vld [vmem:[%s2057_s1 + $0x248] ss:$16 sps:$4 sm:$0xff]  }
  0x20   :  { %926 = vmatpush1.bf16.msra.mxu1 %v1349_v31  ;;  %874 = vmatprep.subr.bf16.mxu0 %v1350_v32  ;;  %v1392_v62 = vld [vmem:[%s2057_s1 + $0x104] ss:$16 sps:$4 sm:$0xff]   ;;  %v1397_v1 = vld [vmem:[%s2057_s1 + $0x300] ss:$16 sps:$4 sm:$0xff]   ;;  %v1844_v31 = vld [vmem:[%s2058_s0 + $0x28] ss:$16 sps:$4 sm:$0xff]  }
  0x21   :  { %927 = vmatprep.subr.bf16.mxu1 %v1352_v33  ;;  %v1394_v63 = vld [vmem:[%s2057_s1 + $0x304] ss:$16 sps:$4 sm:$0xff]   ;;  %v1749_v4 = vld [vmem:[%s2058_s0] ss:$16 sps:$4 sm:$0xff]   ;;  %v1442_v32 = vld [vmem:[%s2057_s1 + $0x2c] ss:$16 sps:$4 sm:$0xff]  }
  0x22   :  { %v1821_v26 = vld [vmem:[%s2058_s0 + $0x24] ss:$16 sps:$4 sm:$0xff]   ;;  %v1826_v27 = vld [vmem:[%s2058_s0 + $0x20] ss:$16 sps:$4 sm:$0xff]   ;;  %v1445_v33 = vld [vmem:[%s2057_s1 + $0x22c] ss:$16 sps:$4 sm:$0xff]  }
  0x23   :  { %875 = vmatpush2.bf16.msra.mxu0 %v1354_v34  ;;  %v1440_v34 = vld [vmem:[%s2057_s1 + $0x28] ss:$16 sps:$4 sm:$0xff]  }
  0x24   :  { %928 = vmatpush2.bf16.msra.mxu1 %v1355_v35  ;;  %876 = vmatprep.subr.bf16.mxu0 %v1356_v36  ;;  %v1443_v35 = vld [vmem:[%s2057_s1 + $0x228] ss:$16 sps:$4 sm:$0xff]   ;;  %v1448_v36 = vld [vmem:[%s2057_s1 + $0xc] ss:$16 sps:$4 sm:$0xff]  }
  0x25   :  { %929 = vmatprep.subr.bf16.mxu1 %v1358_v37  ;;  %v1451_v37 = vld [vmem:[%s2057_s1 + $0x20c] ss:$16 sps:$4 sm:$0xff]  }
  0x27   :  { %877 = vmatpush2.bf16.msra.mxu0 %v1360_v38  ;;  %v1446_v38 = vld [vmem:[%s2057_s1 + $0x8] ss:$16 sps:$4 sm:$0xff]  }
  0x28   :  { %930 = vmatpush2.bf16.msra.mxu1 %v1361_v39  ;;  %878 = vmatprep.subr.bf16.mxu0 %v1362_v40  ;;  %v1449_v39 = vld [vmem:[%s2057_s1 + $0x208] ss:$16 sps:$4 sm:$0xff]   ;;  %v1454_v40 = vld [vmem:[%s2057_s1 + $0x1ec] ss:$16 sps:$4 sm:$0xff]  }
  0x29   :  { %931 = vmatprep.subr.bf16.mxu1 %v1364_v41  ;;  %v1457_v41 = vld [vmem:[%s2057_s1 + $0x3ec] ss:$16 sps:$4 sm:$0xff]  }
  0x2b   :  { %879 = vmatpush2.bf16.msra.mxu0 %v1366_v42  ;;  %v1452_v42 = vld [vmem:[%s2057_s1 + $0x1e8] ss:$16 sps:$4 sm:$0xff]  }
  0x2c   :  { %932 = vmatpush2.bf16.msra.mxu1 %v1367_v43  ;;  %880 = vmatprep.subr.bf16.mxu0 %v1368_v44  ;;  %v1455_v43 = vld [vmem:[%s2057_s1 + $0x3e8] ss:$16 sps:$4 sm:$0xff]   ;;  %v1460_v44 = vld [vmem:[%s2057_s1 + $0x1cc] ss:$16 sps:$4 sm:$0xff]  }
  0x2d   :  { %933 = vmatprep.subr.bf16.mxu1 %v1370_v45  ;;  %v1463_v45 = vld [vmem:[%s2057_s1 + $0x3cc] ss:$16 sps:$4 sm:$0xff]  }
  0x2f   :  { %881 = vmatpush2.bf16.msra.mxu0 %v1372_v46  ;;  %v1458_v46 = vld [vmem:[%s2057_s1 + $0x1c8] ss:$16 sps:$4 sm:$0xff]  }
  0x30   :  { %934 = vmatpush2.bf16.msra.mxu1 %v1373_v47  ;;  %882 = vmatprep.subr.bf16.mxu0 %v1374_v48  ;;  %v1461_v47 = vld [vmem:[%s2057_s1 + $0x3c8] ss:$16 sps:$4 sm:$0xff]   ;;  %v1466_v48 = vld [vmem:[%s2057_s1 + $0x1ac] ss:$16 sps:$4 sm:$0xff]  }
  0x31   :  { %935 = vmatprep.subr.bf16.mxu1 %v1376_v50  ;;  %v1464_v50 = vld [vmem:[%s2057_s1 + $0x1a8] ss:$16 sps:$4 sm:$0xff]  }
  0x33   :  { %883 = vmatpush2.bf16.msra.mxu0 %v1378_v52  ;;  %v1472_v52 = vld [vmem:[%s2057_s1 + $0x18c] ss:$16 sps:$4 sm:$0xff]  }
  0x34   :  { %936 = vmatpush2.bf16.msra.mxu1 %v1379_v53  ;;  %884 = vmatprep.subr.bf16.mxu0 %v1380_v54  ;;  %v1475_v53 = vld [vmem:[%s2057_s1 + $0x38c] ss:$16 sps:$4 sm:$0xff]   ;;  %v1470_v54 = vld [vmem:[%s2057_s1 + $0x188] ss:$16 sps:$4 sm:$0xff]  }
  0x35   :  { %937 = vmatprep.subr.bf16.mxu1 %v1382_v55  ;;  %v1473_v55 = vld [vmem:[%s2057_s1 + $0x388] ss:$16 sps:$4 sm:$0xff]  }
  0x37   :  { %885 = vmatpush2.bf16.msra.mxu0 %v1384_v56  ;;  %v1478_v56 = vld [vmem:[%s2057_s1 + $0x16c] ss:$16 sps:$4 sm:$0xff]  }
  0x38   :  { %938 = vmatpush2.bf16.msra.mxu1 %v1385_v57  ;;  %886 = vmatprep.subr.bf16.mxu0 %v1386_v58  ;;  %v1481_v57 = vld [vmem:[%s2057_s1 + $0x36c] ss:$16 sps:$4 sm:$0xff]   ;;  %v1476_v58 = vld [vmem:[%s2057_s1 + $0x168] ss:$16 sps:$4 sm:$0xff]  }
  0x39   :  { %939 = vmatprep.subr.bf16.mxu1 %v1388_v59  ;;  %v1479_v59 = vld [vmem:[%s2057_s1 + $0x368] ss:$16 sps:$4 sm:$0xff]  }
  0x3b   :  { %887 = vmatpush2.bf16.msra.mxu0 %v1390_v60  ;;  %v1490_v60 = vld [vmem:[%s2057_s1 + $0x14c] ss:$16 sps:$4 sm:$0xff]  }
  0x3c   :  { %940 = vmatpush2.bf16.msra.mxu1 %v1391_v61  ;;  %888 = vmatprep.subr.bf16.mxu0 %v1392_v62  ;;  %v1493_v61 = vld [vmem:[%s2057_s1 + $0x34c] ss:$16 sps:$4 sm:$0xff]   ;;  %v1488_v62 = vld [vmem:[%s2057_s1 + $0x148] ss:$16 sps:$4 sm:$0xff]  }
  0x3d   :  { %941 = vmatprep.subr.bf16.mxu1 %v1394_v63  ;;  %v1491_v63 = vld [vmem:[%s2057_s1 + $0x348] ss:$16 sps:$4 sm:$0xff]  }
  0x3f   :  { %889 = vmatpush2.bf16.msra.mxu0 %v1396_v0  ;;  %v1496_v0 = vld [vmem:[%s2057_s1 + $0x12c] ss:$16 sps:$4 sm:$0xff]  }
  0x40   :  { %942 = vmatpush2.bf16.msra.mxu1 %v1397_v1  ;;  %964 = vmatprep.subr.bf16.mxu0 %v1406_v2  ;;  %v1499_v1 = vld [vmem:[%s2057_s1 + $0x32c] ss:$16 sps:$4 sm:$0xff]   ;;  %v1494_v2 = vld [vmem:[%s2057_s1 + $0x128] ss:$16 sps:$4 sm:$0xff]  }
  0x41   :  { %1017 = vmatprep.subr.bf16.mxu1 %v1409_v3  ;;  %v1497_v3 = vld [vmem:[%s2057_s1 + $0x328] ss:$16 sps:$4 sm:$0xff]  }
  0x42   :  { %891 = vmatmul.mubr.bf16.vlgmr.msra.gmra.mxu0 %v1749_v4 }
  0x43   :  { %944 = vmatmul.mubr.bf16.vlgmr.msra.gmra.mxu1 %v1754_v5  ;;  %965 = vmatpush1.bf16.msra.mxu0 %v1404_v6  ;;  %v1502_v6 = vld [vmem:[%s2057_s1 + $0x10c] ss:$16 sps:$4 sm:$0xff]  }
  0x44   :  { %1018 = vmatpush1.bf16.msra.mxu1 %v1407_v7  ;;  %966 = vmatprep.subr.bf16.mxu0 %v1412_v8  ;;  %v1505_v7 = vld [vmem:[%s2057_s1 + $0x30c] ss:$16 sps:$4 sm:$0xff]   ;;  %v1500_v8 = vld [vmem:[%s2057_s1 + $0x108] ss:$16 sps:$4 sm:$0xff]  }
  0x45   :  { %1019 = vmatprep.subr.bf16.mxu1 %v1415_v9  ;;  %900 = vmatprep.mubr.bf16.mxu0 %v1821_v26  ;;  %v1503_v9 = vld [vmem:[%s2057_s1 + $0x308] ss:$16 sps:$4 sm:$0xff]  }
  0x46   :  { %953 = vmatprep.mubr.bf16.mxu1 %v1835_v29 }
  0x47   :  { %967 = vmatpush1.bf16.msra.mxu0 %v1410_v10  ;;  %v158_v10 = vlaneseq }
  0x48   :  { %1020 = vmatpush1.bf16.msra.mxu1 %v1413_v11  ;;  %968 = vmatprep.subr.bf16.mxu0 %v1418_v12 }
  0x49   :  { %1021 = vmatprep.subr.bf16.mxu1 %v1421_v13  ;;  %v1976_v11 = vshrl.u32 %v158_v10, 7  ;;  %v1982_v13 = vld [vmem:[%s2059_s2] sm:$0xf] }
  0x4a   :  { %901 = vmatmul.mubr.bf16.gmra.mxu0 %v1826_v27 }
  0x4b   :  { %969 = vmatpush1.bf16.msra.mxu0 %v1416_v14  ;;  %996 = vmatprep.mubr.bf16.mxu0 %v1686_v49  ;;  %v1469_v49 = vld [vmem:[%s2057_s1 + $0x3ac] ss:$16 sps:$4 sm:$0xff]   ;;  %v160_v12 = vsub.s32 0, %v1976_v11  ;;  %v1989_v14 = vld [vmem:[%s2060_s3] sm:$0xf] }
  0x4c   :  { %1022 = vmatpush1.bf16.msra.mxu1 %v1419_v15  ;;  %970 = vmatprep.subr.bf16.mxu0 %v1424_v16 }
  0x4d   :  { %1023 = vmatprep.subr.bf16.mxu1 %v1427_v17  ;;  %954 = vmatmul.mubr.bf16.gmra.mxu1 %v1844_v31 }
  0x4e   :  { %1049 = vmatprep.mubr.bf16.mxu1 %v1694_v51  ;;  %v1467_v51 = vld [vmem:[%s2057_s1 + $0x3a8] ss:$16 sps:$4 sm:$0xff]  }
  0x4f   :  { %971 = vmatpush1.bf16.msra.mxu0 %v1422_v18  ;;  %v1995_v18 = vld [vmem:[%s2061_s4] sm:$0xf] }
  0x50   :  { %1024 = vmatpush1.bf16.msra.mxu1 %v1425_v19  ;;  %972 = vmatprep.subr.bf16.mxu0 %v1430_v20  ;;  %v1075_v20 = vrot.slane %v1989_v14, %v160_v12 }
  0x51   :  { %1025 = vmatprep.subr.bf16.mxu1 %v1433_v21 }
  0x53   :  { %973 = vmatpush1.bf16.msra.mxu0 %v1428_v22 }
  0x54   :  { %1026 = vmatpush1.bf16.msra.mxu1 %v1431_v23  ;;  %974 = vmatprep.subr.bf16.mxu0 %v1436_v24  ;;  %v1113_v24 = vrot.slane %v1995_v18, %v160_v12 }
  0x55   :  { %1027 = vmatprep.subr.bf16.mxu1 %v1439_v25 }
  0x57   :  { %975 = vmatpush1.bf16.msra.mxu0 %v1434_v28 }
  0x58   :  { %1028 = vmatpush1.bf16.msra.mxu1 %v1437_v30  ;;  %976 = vmatprep.subr.bf16.mxu0 %v1442_v32 }
  0x59   :  { %1029 = vmatprep.subr.bf16.mxu1 %v1445_v33 }
  0x5b   :  { %977 = vmatpush1.bf16.msra.mxu0 %v1440_v34 }
  0x5c   :  { %1030 = vmatpush1.bf16.msra.mxu1 %v1443_v35  ;;  %978 = vmatprep.subr.bf16.mxu0 %v1448_v36 }
  0x5d   :  { %1031 = vmatprep.subr.bf16.mxu1 %v1451_v37 }
  0x5f   :  { %979 = vmatpush1.bf16.msra.mxu0 %v1446_v38 }
  0x60   :  { %1032 = vmatpush1.bf16.msra.mxu1 %v1449_v39  ;;  %980 = vmatprep.subr.bf16.mxu0 %v1454_v40 }
  0x61   :  { %1033 = vmatprep.subr.bf16.mxu1 %v1457_v41 }
  0x63   :  { %981 = vmatpush2.bf16.msra.mxu0 %v1452_v42 }
  0x64   :  { %1034 = vmatpush2.bf16.msra.mxu1 %v1455_v43  ;;  %982 = vmatprep.subr.bf16.mxu0 %v1460_v44 }
  0x65   :  { %1035 = vmatprep.subr.bf16.mxu1 %v1463_v45 }
  0x67   :  { %983 = vmatpush2.bf16.msra.mxu0 %v1458_v46 }
  0x68   :  { %1036 = vmatpush2.bf16.msra.mxu1 %v1461_v47  ;;  %984 = vmatprep.subr.bf16.mxu0 %v1466_v48 }
  0x69   :  { %1037 = vmatprep.subr.bf16.mxu1 %v1469_v49 }
  0x6b   :  { %985 = vmatpush2.bf16.msra.mxu0 %v1464_v50 }
  0x6c   :  { %1038 = vmatpush2.bf16.msra.mxu1 %v1467_v51  ;;  %986 = vmatprep.subr.bf16.mxu0 %v1472_v52 }
  0x6d   :  { %1039 = vmatprep.subr.bf16.mxu1 %v1475_v53 }
  0x6f   :  { %987 = vmatpush2.bf16.msra.mxu0 %v1470_v54 }
  0x70   :  { %1040 = vmatpush2.bf16.msra.mxu1 %v1473_v55  ;;  %988 = vmatprep.subr.bf16.mxu0 %v1478_v56 }
  0x71   :  { %1041 = vmatprep.subr.bf16.mxu1 %v1481_v57 }
  0x73   :  { %989 = vmatpush2.bf16.msra.mxu0 %v1476_v58 }
  0x74   :  { %1042 = vmatpush2.bf16.msra.mxu1 %v1479_v59  ;;  %990 = vmatprep.subr.bf16.mxu0 %v1490_v60 }
  0x75   :  { %1043 = vmatprep.subr.bf16.mxu1 %v1493_v61 }
  0x77   :  { %991 = vmatpush2.bf16.msra.mxu0 %v1488_v62 }
  0x78   :  { %1044 = vmatpush2.bf16.msra.mxu1 %v1491_v63  ;;  %992 = vmatprep.subr.bf16.mxu0 %v1496_v0 }
  0x79   :  { %1045 = vmatprep.subr.bf16.mxu1 %v1499_v1 }
  0x7b   :  { %993 = vmatpush2.bf16.msra.mxu0 %v1494_v2 }
  0x7c   :  { %1046 = vmatpush2.bf16.msra.mxu1 %v1497_v3  ;;  %994 = vmatprep.subr.bf16.mxu0 %v1502_v6 }
  0x7d   :  { %1047 = vmatprep.subr.bf16.mxu1 %v1505_v7  ;;  %v168_v7 = vsub.s32 2, %v1976_v11 }
  0x7f   :  { %995 = vmatpush2.bf16.msra.mxu0 %v1500_v8  ;;  %v172_v8 = vsub.s32 3, %v1976_v11 }
  0x80   :  { %1048 = vmatpush2.bf16.msra.mxu1 %v1503_v9  ;;  %v169_v9 = vrot.slane %v1982_v13, %v168_v7 }
  0x81   :  { %v173_v10 = vrot.slane %v1982_v13, %v172_v8 }
  0x82   :  { %997 = vmatmul.mubr.bf16.vlgmr.msra.gmra.mxu0 %v1749_v4  ;;  %v164_v4 = vsub.s32 1, %v1976_v11 }
  0x83   :  { %1050 = vmatmul.mubr.bf16.vlgmr.msra.gmra.mxu1 %v1754_v5  ;;  %1006 = vmatprep.mubr.bf16.mxu0 %v1821_v26  ;;  %v161_v5 = vrot.slane %v1982_v13, %v160_v12 }
  0x84   :  { %1059 = vmatprep.mubr.bf16.mxu1 %v1835_v29  ;;  %v165_v15 = vrot.slane %v1982_v13, %v164_v4  ;;  %v1079_v26 = vrot.slane %v1989_v14, %v164_v4 }
  0x8a   :  { %1007 = vmatmul.mubr.bf16.gmra.mxu0 %v1826_v27 }
  0x8b   :  { %1060 = vmatmul.mubr.bf16.gmra.mxu1 %v1844_v31  ;;  %v1117_v31 = vrot.slane %v1995_v18, %v164_v4 }
 0x102   :  { %v892_v16 = vpop.f32.mrf.mxu0 }
 0x103   :  { %v945_v17 = vpop.f32.mrf.mxu1  ;;  %v893_v19 = vadd.f32 %v892_v16, %v161_v5 }
 0x104   :  { %v894_v21 = vpop.f32.mrf.mxu0 }
 0x105   :  { %v947_v22 = vpop.f32.mrf.mxu1  ;;  %v946_v23 = vadd.f32 %v945_v17, %v893_v19  ;;  %v895_v25 = vadd.f32 %v894_v21, %v165_v15 }
 0x106   :  { %v896_v27 = vpop.f32.mrf.mxu0 }
 0x107   :  { %v949_v28 = vpop.f32.mrf.mxu1  ;;  %v1092_v29 = vmul.f32 %v1075_v20, %v946_v23  ;;  %v948_v30 = vadd.f32 %v947_v22, %v895_v25  ;;  %v897_v32 = vadd.f32 %v896_v27, %v161_v5  ;;  %v1087_v22 = vrot.slane %v1989_v14, %v172_v8 }
 0x108   :  { %v898_v33 = vpop.f32.mrf.mxu0 }
 0x109   :  { %v1130_v34 = vadd.f32 %v1113_v24, %v1092_v29  ;;  %v1093_v35 = vmul.f32 %v1079_v26, %v948_v30  ;;  %v950_v36 = vadd.f32 %v949_v28, %v897_v32  ;;  %v899_v37 = vadd.f32 %v898_v33, %v165_v15  ;;  %v951_v38 = vpop.f32.mrf.mxu1 }
 0x10a   :  { %v902_v45 = vpop.f32.mrf.mxu0 }
 0x10b   :  { %1146 = vst [vmem:[%s2062_s5] sm:$0xff] %v1130_v34  ;;  %v1131_v39 = vadd.f32 %v1117_v31, %v1093_v35  ;;  %v1096_v40 = vmul.f32 %v1075_v20, %v950_v36  ;;  %v952_v41 = vadd.f32 %v951_v38, %v899_v37  ;;  %v903_v46 = vadd.f32 %v902_v45, %v161_v5 }
 0x10c   :  { %v904_v47 = vpop.f32.mrf.mxu0 }
 0x10d   :  { %1147 = vst [vmem:[%s2062_s5 + $0x8] sm:$0xff] %v1131_v39  ;;  %v1134_v42 = vadd.f32 %v1113_v24, %v1096_v40  ;;  %v1097_v43 = vmul.f32 %v1079_v26, %v952_v41  ;;  %v905_v48 = vadd.f32 %v904_v47, %v165_v15  ;;  %v955_v49 = vpop.f32.mrf.mxu1 }
 0x10e   :  { %v906_v50 = vpop.f32.mrf.mxu0  ;;  %v956_v51 = vadd.f32 %v955_v49, %v903_v46 }
 0x10f   :  { %1150 = vst [vmem:[%s2062_s5 + $0x20] sm:$0xff] %v1134_v42  ;;  %v1135_v44 = vadd.f32 %v1117_v31, %v1097_v43  ;;  %v907_v52 = vadd.f32 %v906_v50, %v161_v5  ;;  %v957_v53 = vpop.f32.mrf.mxu1 }
 0x110   :  { %v908_v54 = vpop.f32.mrf.mxu0  ;;  %v1100_v55 = vmul.f32 %v1075_v20, %v956_v51  ;;  %v958_v56 = vadd.f32 %v957_v53, %v905_v48 }
 0x111   :  { %1151 = vst [vmem:[%s2062_s5 + $0x28] sm:$0xff] %v1135_v44  ;;  %v909_v57 = vadd.f32 %v908_v54, %v165_v15  ;;  %v959_v58 = vpop.f32.mrf.mxu1  ;;  %v1083_v15 = vrot.slane %v1989_v14, %v168_v7 }
 0x112   :  { %v1138_v59 = vadd.f32 %v1113_v24, %v1100_v55  ;;  %v1101_v60 = vmul.f32 %v1079_v26, %v958_v56  ;;  %v960_v61 = vadd.f32 %v959_v58, %v907_v52 }
 0x113   :  { %v961_v62 = vpop.f32.mrf.mxu1 }
 0x114   :  { %1154 = vst [vmem:[%s2062_s5 + $0x40] sm:$0xff] %v1138_v59  ;;  %v1139_v63 = vadd.f32 %v1117_v31, %v1101_v60  ;;  %v1104_v0 = vmul.f32 %v1075_v20, %v960_v61  ;;  %v962_v1 = vadd.f32 %v961_v62, %v909_v57  ;;  %v1121_v20 = vrot.slane %v1995_v18, %v168_v7 }
 0x116   :  { %1155 = vst [vmem:[%s2062_s5 + $0x48] sm:$0xff] %v1139_v63  ;;  %v1142_v2 = vadd.f32 %v1113_v24, %v1104_v0  ;;  %v1105_v3 = vmul.f32 %v1079_v26, %v962_v1  ;;  %v1125_v26 = vrot.slane %v1995_v18, %v172_v8 }
 0x118   :  { %1158 = vst [vmem:[%s2062_s5 + $0x60] sm:$0xff] %v1142_v2  ;;  %v1143_v6 = vadd.f32 %v1117_v31, %v1105_v3 }
 0x11a   :  { %1159 = vst [vmem:[%s2062_s5 + $0x68] sm:$0xff] %v1143_v6 }
 0x142   :  { %v998_v12 = vpop.f32.mrf.mxu0 }
 0x143   :  { %v1051_v4 = vpop.f32.mrf.mxu1  ;;  %v999_v5 = vadd.f32 %v998_v12, %v169_v9 }
 0x144   :  { %v1000_v16 = vpop.f32.mrf.mxu0 }
 0x145   :  { %v1053_v17 = vpop.f32.mrf.mxu1  ;;  %v1052_v19 = vadd.f32 %v1051_v4, %v999_v5  ;;  %v1001_v21 = vadd.f32 %v1000_v16, %v173_v10 }
 0x146   :  { %v1002_v23 = vpop.f32.mrf.mxu0 }
 0x147   :  { %v1055_v24 = vpop.f32.mrf.mxu1  ;;  %v1094_v11 = vmul.f32 %v1083_v15, %v1052_v19  ;;  %v1054_v25 = vadd.f32 %v1053_v17, %v1001_v21  ;;  %v1003_v13 = vadd.f32 %v1002_v23, %v169_v9 }
 0x148   :  { %v1004_v27 = vpop.f32.mrf.mxu0 }
 0x149   :  { %v1057_v28 = vpop.f32.mrf.mxu1  ;;  %v1132_v29 = vadd.f32 %v1121_v20, %v1094_v11  ;;  %v1095_v30 = vmul.f32 %v1087_v22, %v1054_v25  ;;  %v1056_v31 = vadd.f32 %v1055_v24, %v1003_v13  ;;  %v1005_v32 = vadd.f32 %v1004_v27, %v173_v10 }
 0x14a   :  { %v1008_v33 = vpop.f32.mrf.mxu0 }
 0x14b   :  { %v1061_v34 = vpop.f32.mrf.mxu1  ;;  %1148 = vst [vmem:[%s2062_s5 + $0x10] sm:$0xff] %v1132_v29  ;;  %v1133_v14 = vadd.f32 %v1125_v26, %v1095_v30  ;;  %v1098_v35 = vmul.f32 %v1083_v15, %v1056_v31  ;;  %v1058_v36 = vadd.f32 %v1057_v28, %v1005_v32  ;;  %v1009_v37 = vadd.f32 %v1008_v33, %v169_v9 }
 0x14c   :  { %v1010_v38 = vpop.f32.mrf.mxu0 }
 0x14d   :  { %v1063_v39 = vpop.f32.mrf.mxu1  ;;  %1149 = vst [vmem:[%s2062_s5 + $0x18] sm:$0xff] %v1133_v14  ;;  %v1136_v18 = vadd.f32 %v1121_v20, %v1098_v35  ;;  %v1099_v40 = vmul.f32 %v1087_v22, %v1058_v36  ;;  %v1062_v41 = vadd.f32 %v1061_v34, %v1009_v37  ;;  %v1011_v42 = vadd.f32 %v1010_v38, %v173_v10 }
 0x14e   :  { %v1012_v43 = vpop.f32.mrf.mxu0 }
 0x14f   :  { %v1065_v44 = vpop.f32.mrf.mxu1  ;;  %1152 = vst [vmem:[%s2062_s5 + $0x30] sm:$0xff] %v1136_v18  ;;  %v1137_v45 = vadd.f32 %v1125_v26, %v1099_v40  ;;  %v1102_v46 = vmul.f32 %v1083_v15, %v1062_v41  ;;  %v1064_v47 = vadd.f32 %v1063_v39, %v1011_v42  ;;  %v1013_v48 = vadd.f32 %v1012_v43, %v169_v9 }
 0x150   :  { %v1014_v49 = vpop.f32.mrf.mxu0 }
 0x151   :  { %1153 = vst [vmem:[%s2062_s5 + $0x38] sm:$0xff] %v1137_v45  ;;  %v1140_v50 = vadd.f32 %v1121_v20, %v1102_v46  ;;  %v1103_v51 = vmul.f32 %v1087_v22, %v1064_v47  ;;  %v1066_v52 = vadd.f32 %v1065_v44, %v1013_v48  ;;  %v1015_v53 = vadd.f32 %v1014_v49, %v173_v10  ;;  %v1067_v54 = vpop.f32.mrf.mxu1 }
 0x153   :  { %1156 = vst [vmem:[%s2062_s5 + $0x50] sm:$0xff] %v1140_v50  ;;  %v1141_v55 = vadd.f32 %v1125_v26, %v1103_v51  ;;  %v1106_v56 = vmul.f32 %v1083_v15, %v1066_v52  ;;  %v1068_v57 = vadd.f32 %v1067_v54, %v1015_v53 }
 0x155   :  { %1157 = vst [vmem:[%s2062_s5 + $0x58] sm:$0xff] %v1141_v55  ;;  %v1144_v58 = vadd.f32 %v1121_v20, %v1106_v56  ;;  %v1107_v59 = vmul.f32 %v1087_v22, %v1068_v57 }
 0x157   :  { %1160 = vst [vmem:[%s2062_s5 + $0x70] sm:$0xff] %v1144_v58  ;;  %v1145_v60 = vadd.f32 %v1125_v26, %v1107_v59 }
 0x159   :  { %1161 = vst [vmem:[%s2062_s5 + $0x78] sm:$0xff] %v1145_v60 }

// kernel: forward.15
= control target key start
LH: loop header
LB: loop body
LE: loop exit
PB: predicated region body
PF: predicated region fallthrough
CT: control target
= control target key end

     0   :  { %v538_v1 = vmov 0   ;;  %v59_v35 = vlaneseq  ;;  %s804_s1 = inlined_call_operand.vmem [shape: bf16[128,512], index: 1, kind: input, shape index: {}]   ;;  %s805_s0 = inlined_call_operand.vmem [shape: bf16[32,128], index: 0, kind: input, shape index: {}]   ;;  %s806_s2 = inlined_call_operand.vmem [shape: f32[1,512], index: 2, kind: input, shape index: {}]   ;;  %s807_s3 = inlined_call_operand.vmem [shape: f32[1,512], index: 3, kind: input, shape index: {}]   ;;  %s808_s4 = inlined_call_operand.vmem [shape: f32[1,512], index: 4, kind: input, shape index: {}]   ;;  %s809_s5 = inlined_call_operand.vmem [shape: f32[32,512], index: 5, kind: output, shape index: {}]  }
   0x1   :  { %v488_v0 = vld [vmem:[%s804_s1 + $0xe4] ss:$16 sps:$4 sm:$0xff]   ;;  %283 = vmatprep.mubr.bf16.mxu0 %v538_v1  ;;  %336 = vmatprep.mubr.bf16.mxu1 %v538_v1  ;;  %v490_v2 = vld [vmem:[%s804_s1 + $0xec] ss:$16 sps:$4 sm:$0xff]   ;;  %v492_v3 = vld [vmem:[%s804_s1 + $0xe0] ss:$16 sps:$4 sm:$0xff]  }
   0x2   :  { %251 = vmatprep.subr.bf16.mxu0 %v488_v0  ;;  %v493_v4 = vld [vmem:[%s804_s1 + $0xe8] ss:$16 sps:$4 sm:$0xff]   ;;  %304 = vmatprep.subr.bf16.mxu1 %v490_v2  ;;  %v494_v5 = vld [vmem:[%s804_s1 + $0xc4] ss:$16 sps:$4 sm:$0xff]   ;;  %v496_v6 = vld [vmem:[%s804_s1 + $0xcc] ss:$16 sps:$4 sm:$0xff]  }
   0x3   :  { %252 = vmatpush1.bf16.msra.mxu0 %v492_v3  ;;  %305 = vmatpush1.bf16.msra.mxu1 %v493_v4  ;;  %v498_v7 = vld [vmem:[%s804_s1 + $0xc0] ss:$16 sps:$4 sm:$0xff]   ;;  %v499_v8 = vld [vmem:[%s804_s1 + $0xc8] ss:$16 sps:$4 sm:$0xff]   ;;  %v500_v9 = vld [vmem:[%s804_s1 + $0xa4] ss:$16 sps:$4 sm:$0xff]  }
   0x4   :  { %253 = vmatprep.subr.bf16.mxu0 %v494_v5  ;;  %306 = vmatprep.subr.bf16.mxu1 %v496_v6  ;;  %v502_v10 = vld [vmem:[%s804_s1 + $0xac] ss:$16 sps:$4 sm:$0xff]   ;;  %v504_v11 = vld [vmem:[%s804_s1 + $0xa0] ss:$16 sps:$4 sm:$0xff]   ;;  %v505_v12 = vld [vmem:[%s804_s1 + $0xa8] ss:$16 sps:$4 sm:$0xff]  }
   0x5   :  { %v506_v13 = vld [vmem:[%s804_s1 + $0x84] ss:$16 sps:$4 sm:$0xff]   ;;  %v508_v14 = vld [vmem:[%s804_s1 + $0x8c] ss:$16 sps:$4 sm:$0xff]   ;;  %v510_v15 = vld [vmem:[%s804_s1 + $0x80] ss:$16 sps:$4 sm:$0xff]  }
   0x6   :  { %v511_v16 = vld [vmem:[%s804_s1 + $0x88] ss:$16 sps:$4 sm:$0xff]   ;;  %v512_v17 = vld [vmem:[%s804_s1 + $0x64] ss:$16 sps:$4 sm:$0xff]   ;;  %v514_v18 = vld [vmem:[%s804_s1 + $0x6c] ss:$16 sps:$4 sm:$0xff]  }
   0x7   :  { %254 = vmatpush1.bf16.msra.mxu0 %v498_v7  ;;  %307 = vmatpush1.bf16.msra.mxu1 %v499_v8  ;;  %v516_v19 = vld [vmem:[%s804_s1 + $0x60] ss:$16 sps:$4 sm:$0xff]   ;;  %v517_v20 = vld [vmem:[%s804_s1 + $0x68] ss:$16 sps:$4 sm:$0xff]   ;;  %v518_v21 = vld [vmem:[%s804_s1 + $0x44] ss:$16 sps:$4 sm:$0xff]  }
   0x8   :  { %255 = vmatprep.subr.bf16.mxu0 %v500_v9  ;;  %308 = vmatprep.subr.bf16.mxu1 %v502_v10  ;;  %v520_v22 = vld [vmem:[%s804_s1 + $0x4c] ss:$16 sps:$4 sm:$0xff]   ;;  %v522_v23 = vld [vmem:[%s804_s1 + $0x40] ss:$16 sps:$4 sm:$0xff]   ;;  %v523_v24 = vld [vmem:[%s804_s1 + $0x48] ss:$16 sps:$4 sm:$0xff]  }
   0x9   :  { %v524_v25 = vld [vmem:[%s804_s1 + $0x24] ss:$16 sps:$4 sm:$0xff]   ;;  %v526_v26 = vld [vmem:[%s804_s1 + $0x2c] ss:$16 sps:$4 sm:$0xff]   ;;  %v528_v27 = vld [vmem:[%s804_s1 + $0x20] ss:$16 sps:$4 sm:$0xff]  }
   0xa   :  { %v529_v28 = vld [vmem:[%s804_s1 + $0x28] ss:$16 sps:$4 sm:$0xff]   ;;  %v530_v29 = vld [vmem:[%s804_s1 + $0x4] ss:$16 sps:$4 sm:$0xff]   ;;  %v532_v30 = vld [vmem:[%s804_s1 + $0xc] ss:$16 sps:$4 sm:$0xff]  }
   0xb   :  { %256 = vmatpush1.bf16.msra.mxu0 %v504_v11  ;;  %309 = vmatpush1.bf16.msra.mxu1 %v505_v12  ;;  %v534_v31 = vld [vmem:[%s804_s1] ss:$16 sps:$4 sm:$0xff]   ;;  %v535_v32 = vld [vmem:[%s804_s1 + $0x8] ss:$16 sps:$4 sm:$0xff]   ;;  %v60_v36 = vshrl.u32 %v59_v35, 7 }
   0xc   :  { %257 = vmatprep.subr.bf16.mxu0 %v506_v13  ;;  %310 = vmatprep.subr.bf16.mxu1 %v508_v14  ;;  %v536_v33 = vld [vmem:[%s805_s0] sm:$0xff]   ;;  %v537_v34 = vld [vmem:[%s805_s0 + $0x8] sm:$0xff]  }
   0xd   :  { %v61_v37 = vsub.s32 0, %v60_v36  ;;  %v69_v38 = vsub.s32 2, %v60_v36  ;;  %v57_v39 = vld [vmem:[%s806_s2] sm:$0xf]  ;;  %v65_v40 = vsub.s32 1, %v60_v36  ;;  %v73_v41 = vsub.s32 3, %v60_v36 }
   0xe   :  { %v357_v42 = vld [vmem:[%s807_s3] sm:$0xf] }
   0xf   :  { %258 = vmatpush1.bf16.msra.mxu0 %v510_v15  ;;  %311 = vmatpush1.bf16.msra.mxu1 %v511_v16  ;;  %v681_v43 = vrot.slane %v57_v39, %v61_v37  ;;  %v395_v44 = vld [vmem:[%s808_s4] sm:$0xf]  ;;  %v686_v45 = vrot.slane %v57_v39, %v69_v38  ;;  %v688_v46 = vrot.slane %v357_v42, %v61_v37 }
  0x10   :  { %259 = vmatprep.subr.bf16.mxu0 %v512_v17  ;;  %312 = vmatprep.subr.bf16.mxu1 %v514_v18  ;;  %v690_v47 = vrot.slane %v357_v42, %v69_v38  ;;  %v692_v48 = vrot.slane %v57_v39, %v65_v40  ;;  %v694_v49 = vrot.slane %v57_v39, %v73_v41 }
  0x11   :  { %v696_v51 = vrot.slane %v395_v44, %v61_v37  ;;  %v698_v53 = vrot.slane %v395_v44, %v69_v38  ;;  %v702_v56 = vrot.slane %v357_v42, %v65_v40  ;;  %v704_v57 = vrot.slane %v357_v42, %v73_v41 }
  0x12   :  { %v706_v59 = vrot.slane %v395_v44, %v65_v40  ;;  %v708_v61 = vrot.slane %v395_v44, %v73_v41 }
  0x13   :  { %260 = vmatpush1.bf16.msra.mxu0 %v516_v19  ;;  %313 = vmatpush1.bf16.msra.mxu1 %v517_v20 }
  0x14   :  { %261 = vmatprep.subr.bf16.mxu0 %v518_v21  ;;  %314 = vmatprep.subr.bf16.mxu1 %v520_v22 }
  0x17   :  { %262 = vmatpush1.bf16.msra.mxu0 %v522_v23  ;;  %315 = vmatpush1.bf16.msra.mxu1 %v523_v24 }
  0x18   :  { %263 = vmatprep.subr.bf16.mxu0 %v524_v25  ;;  %316 = vmatprep.subr.bf16.mxu1 %v526_v26 }
  0x1b   :  { %264 = vmatpush1.bf16.msra.mxu0 %v528_v27  ;;  %317 = vmatpush1.bf16.msra.mxu1 %v529_v28 }
  0x1c   :  { %265 = vmatprep.subr.bf16.mxu0 %v530_v29  ;;  %318 = vmatprep.subr.bf16.mxu1 %v532_v30 }
  0x1f   :  { %266 = vmatpush1.bf16.msra.mxu0 %v534_v31  ;;  %319 = vmatpush1.bf16.msra.mxu1 %v535_v32 }
  0x22   :  { %284 = vmatmul.mubr.bf16.vlgmr.msra.gmra.mxu0 %v536_v33  ;;  %337 = vmatmul.mubr.bf16.vlgmr.msra.gmra.mxu1 %v536_v33 }
  0x23   :  { %293 = vmatprep.mubr.bf16.mxu0 %v538_v1  ;;  %346 = vmatprep.mubr.bf16.mxu1 %v538_v1 }
  0x2a   :  { %294 = vmatmul.mubr.bf16.gmra.mxu0 %v537_v34  ;;  %347 = vmatmul.mubr.bf16.gmra.mxu1 %v537_v34 }
  0xe2   :  { %v285_v50 = vpop.f32.mrf.mxu0  ;;  %v338_v52 = vpop.f32.mrf.mxu1 }
  0xe3   :  { %v286_v54 = vadd.f32 %v285_v50, %v681_v43  ;;  %v339_v55 = vadd.f32 %v338_v52, %v686_v45 }
  0xe4   :  { %v287_v58 = vpop.f32.mrf.mxu0  ;;  %v340_v60 = vpop.f32.mrf.mxu1 }
  0xe5   :  { %v379_v62 = vmul.f32 %v688_v46, %v286_v54  ;;  %v381_v63 = vmul.f32 %v690_v47, %v339_v55  ;;  %v288_v0 = vadd.f32 %v287_v58, %v692_v48  ;;  %v341_v1 = vadd.f32 %v340_v60, %v694_v49 }
  0xe6   :  { %v289_v2 = vpop.f32.mrf.mxu0  ;;  %v342_v3 = vpop.f32.mrf.mxu1 }
  0xe7   :  { %v417_v4 = vadd.f32 %v696_v51, %v379_v62  ;;  %v419_v5 = vadd.f32 %v698_v53, %v381_v63  ;;  %v380_v6 = vmul.f32 %v702_v56, %v288_v0  ;;  %v382_v7 = vmul.f32 %v704_v57, %v341_v1 }
  0xe8   :  { %v290_v8 = vadd.f32 %v289_v2, %v681_v43  ;;  %v343_v9 = vadd.f32 %v342_v3, %v686_v45  ;;  %v291_v10 = vpop.f32.mrf.mxu0  ;;  %v344_v11 = vpop.f32.mrf.mxu1 }
  0xe9   :  { %433 = vst [vmem:[%s809_s5] sm:$0xff] %v417_v4  ;;  %435 = vst [vmem:[%s809_s5 + $0x10] sm:$0xff] %v419_v5  ;;  %v418_v12 = vadd.f32 %v706_v59, %v380_v6  ;;  %v420_v13 = vadd.f32 %v708_v61, %v382_v7  ;;  %v292_v14 = vadd.f32 %v291_v10, %v692_v48 }
  0xea   :  { %v345_v15 = vadd.f32 %v344_v11, %v694_v49  ;;  %v383_v16 = vmul.f32 %v688_v46, %v290_v8  ;;  %v385_v17 = vmul.f32 %v690_v47, %v343_v9  ;;  %v295_v18 = vpop.f32.mrf.mxu0  ;;  %v348_v19 = vpop.f32.mrf.mxu1 }
  0xeb   :  { %434 = vst [vmem:[%s809_s5 + $0x8] sm:$0xff] %v418_v12  ;;  %436 = vst [vmem:[%s809_s5 + $0x18] sm:$0xff] %v420_v13  ;;  %v384_v20 = vmul.f32 %v702_v56, %v292_v14  ;;  %v296_v22 = vadd.f32 %v295_v18, %v681_v43  ;;  %v349_v23 = vadd.f32 %v348_v19, %v686_v45 }
  0xec   :  { %v386_v21 = vmul.f32 %v704_v57, %v345_v15  ;;  %v421_v24 = vadd.f32 %v696_v51, %v383_v16  ;;  %v423_v25 = vadd.f32 %v698_v53, %v385_v17  ;;  %v297_v26 = vpop.f32.mrf.mxu0  ;;  %v350_v27 = vpop.f32.mrf.mxu1 }
  0xed   :  { %v422_v28 = vadd.f32 %v706_v59, %v384_v20  ;;  %v387_v30 = vmul.f32 %v688_v46, %v296_v22  ;;  %v389_v31 = vmul.f32 %v690_v47, %v349_v23  ;;  %v298_v32 = vadd.f32 %v297_v26, %v692_v48 }
  0xee   :  { %v424_v29 = vadd.f32 %v708_v61, %v386_v21  ;;  %437 = vst [vmem:[%s809_s5 + $0x20] sm:$0xff] %v421_v24  ;;  %439 = vst [vmem:[%s809_s5 + $0x30] sm:$0xff] %v423_v25  ;;  %v351_v33 = vadd.f32 %v350_v27, %v694_v49  ;;  %v299_v34 = vpop.f32.mrf.mxu0  ;;  %v352_v35 = vpop.f32.mrf.mxu1 }
  0xef   :  { %438 = vst [vmem:[%s809_s5 + $0x28] sm:$0xff] %v422_v28  ;;  %v425_v36 = vadd.f32 %v696_v51, %v387_v30  ;;  %v427_v37 = vadd.f32 %v698_v53, %v389_v31  ;;  %v300_v38 = vadd.f32 %v299_v34, %v681_v43  ;;  %v353_v39 = vadd.f32 %v352_v35, %v686_v45 }
  0xf0   :  { %440 = vst [vmem:[%s809_s5 + $0x38] sm:$0xff] %v424_v29  ;;  %v388_v40 = vmul.f32 %v702_v56, %v298_v32  ;;  %v390_v41 = vmul.f32 %v704_v57, %v351_v33  ;;  %v301_v42 = vpop.f32.mrf.mxu0  ;;  %v354_v44 = vpop.f32.mrf.mxu1 }
  0xf1   :  { %441 = vst [vmem:[%s809_s5 + $0x40] sm:$0xff] %v425_v36  ;;  %443 = vst [vmem:[%s809_s5 + $0x50] sm:$0xff] %v427_v37  ;;  %v391_v50 = vmul.f32 %v688_v46, %v300_v38  ;;  %v393_v43 = vmul.f32 %v690_v47, %v353_v39  ;;  %v302_v45 = vadd.f32 %v301_v42, %v692_v48 }
  0xf2   :  { %v355_v52 = vadd.f32 %v354_v44, %v694_v49  ;;  %v426_v54 = vadd.f32 %v706_v59, %v388_v40  ;;  %v428_v55 = vadd.f32 %v708_v61, %v390_v41 }
  0xf3   :  { %v429_v58 = vadd.f32 %v696_v51, %v391_v50  ;;  %v431_v60 = vadd.f32 %v698_v53, %v393_v43  ;;  %v392_v62 = vmul.f32 %v702_v56, %v302_v45 }
  0xf4   :  { %v394_v63 = vmul.f32 %v704_v57, %v355_v52  ;;  %442 = vst [vmem:[%s809_s5 + $0x48] sm:$0xff] %v426_v54  ;;  %444 = vst [vmem:[%s809_s5 + $0x58] sm:$0xff] %v428_v55 }
  0xf5   :  { %445 = vst [vmem:[%s809_s5 + $0x60] sm:$0xff] %v429_v58  ;;  %447 = vst [vmem:[%s809_s5 + $0x70] sm:$0xff] %v431_v60  ;;  %v430_v46 = vadd.f32 %v706_v59, %v392_v62 }
  0xf6   :  { %v432_v47 = vadd.f32 %v708_v61, %v394_v63 }
  0xf7   :  { %446 = vst [vmem:[%s809_s5 + $0x68] sm:$0xff] %v430_v46 }
  0xf8   :  { %448 = vst [vmem:[%s809_s5 + $0x78] sm:$0xff] %v432_v47 }

// kernel: forward.14
= control target key start
LH: loop header
LB: loop body
LE: loop exit
PB: predicated region body
PF: predicated region fallthrough
CT: control target
= control target key end

     0   :  { %v1545_v1 = vmov 0   ;;  %v1546_v33 = vmov 0.0|0.0   ;;  %s1926_s1 = inlined_call_operand.vmem [shape: bf16[128,512], index: 1, kind: input, shape index: {}]   ;;  %s1927_s0 = inlined_call_operand.vmem [shape: f32[4,8,512], index: 0, kind: input, shape index: {}]   ;;  %s1928_s2 = inlined_call_operand.vmem [shape: f32[4,8,128], index: 2, kind: output, shape index: {}]  }
   0x1   :  { %v1565_v0 = vld [vmem:[%s1926_s1 + $0xe4] ss:$16 sps:$4 sm:$0xff]   ;;  %248 = vmatprep.mubr.bf16.mxu0 %v1545_v1  ;;  %289 = vmatprep.mubr.bf16.mxu1 %v1545_v1  ;;  %v1572_v2 = vld [vmem:[%s1926_s1 + $0xe0] ss:$16 sps:$4 sm:$0xff]   ;;  %v1595_v6 = vld [vmem:[%s1926_s1 + $0xec] ss:$16 sps:$4 sm:$0xff]  }
   0x2   :  { %216 = vmatprep.subr.bf16.mxu0 %v1565_v0  ;;  %v1578_v3 = vld [vmem:[%s1926_s1 + $0xc4] ss:$16 sps:$4 sm:$0xff]   ;;  %v1584_v4 = vld [vmem:[%s1926_s1 + $0xc0] ss:$16 sps:$4 sm:$0xff]   ;;  %v1600_v7 = vld [vmem:[%s1926_s1 + $0xe8] ss:$16 sps:$4 sm:$0xff]   ;;  %257 = vmatprep.subr.bf16.mxu1 %v1595_v6 }
   0x3   :  { %217 = vmatpush1.bf16.msra.mxu0 %v1572_v2  ;;  %v1590_v5 = vld [vmem:[%s1926_s1 + $0xa4] ss:$16 sps:$4 sm:$0xff]   ;;  %v1606_v8 = vld [vmem:[%s1926_s1 + $0xa0] ss:$16 sps:$4 sm:$0xff]   ;;  %258 = vmatpush1.bf16.msra.mxu1 %v1600_v7  ;;  %v1619_v10 = vld [vmem:[%s1926_s1 + $0xcc] ss:$16 sps:$4 sm:$0xff]  }
   0x4   :  { %218 = vmatprep.subr.bf16.mxu0 %v1578_v3  ;;  %v1613_v9 = vld [vmem:[%s1926_s1 + $0x84] ss:$16 sps:$4 sm:$0xff]   ;;  %v1624_v11 = vld [vmem:[%s1926_s1 + $0xc8] ss:$16 sps:$4 sm:$0xff]   ;;  %259 = vmatprep.subr.bf16.mxu1 %v1619_v10  ;;  %v1631_v12 = vld [vmem:[%s1926_s1 + $0x80] ss:$16 sps:$4 sm:$0xff]  }
   0x5   :  { %v1636_v13 = vld [vmem:[%s1926_s1 + $0x64] ss:$16 sps:$4 sm:$0xff]   ;;  %v1641_v14 = vld [vmem:[%s1926_s1 + $0xac] ss:$16 sps:$4 sm:$0xff]   ;;  %v1648_v15 = vld [vmem:[%s1926_s1 + $0xa8] ss:$16 sps:$4 sm:$0xff]  }
   0x6   :  { %v1654_v16 = vld [vmem:[%s1926_s1 + $0x8c] ss:$16 sps:$4 sm:$0xff]   ;;  %v1660_v17 = vld [vmem:[%s1926_s1 + $0x60] ss:$16 sps:$4 sm:$0xff]   ;;  %v1666_v18 = vld [vmem:[%s1926_s1 + $0x44] ss:$16 sps:$4 sm:$0xff]  }
   0x7   :  { %219 = vmatpush1.bf16.msra.mxu0 %v1584_v4  ;;  %260 = vmatpush1.bf16.msra.mxu1 %v1624_v11  ;;  %v1672_v19 = vld [vmem:[%s1926_s1 + $0x88] ss:$16 sps:$4 sm:$0xff]   ;;  %v1678_v20 = vld [vmem:[%s1926_s1 + $0x6c] ss:$16 sps:$4 sm:$0xff]   ;;  %v1684_v21 = vld [vmem:[%s1926_s1 + $0x40] ss:$16 sps:$4 sm:$0xff]  }
   0x8   :  { %220 = vmatprep.subr.bf16.mxu0 %v1590_v5  ;;  %261 = vmatprep.subr.bf16.mxu1 %v1641_v14  ;;  %v1689_v22 = vld [vmem:[%s1926_s1 + $0x24] ss:$16 sps:$4 sm:$0xff]   ;;  %v1696_v23 = vld [vmem:[%s1926_s1 + $0x68] ss:$16 sps:$4 sm:$0xff]   ;;  %v1702_v24 = vld [vmem:[%s1926_s1 + $0x4c] ss:$16 sps:$4 sm:$0xff]  }
   0x9   :  { %v1708_v25 = vld [vmem:[%s1926_s1 + $0x20] ss:$16 sps:$4 sm:$0xff]   ;;  %v1714_v26 = vld [vmem:[%s1926_s1 + $0x4] ss:$16 sps:$4 sm:$0xff]   ;;  %v1720_v27 = vld [vmem:[%s1926_s1 + $0x48] ss:$16 sps:$4 sm:$0xff]  }
   0xa   :  { %v1726_v28 = vld [vmem:[%s1926_s1 + $0x2c] ss:$16 sps:$4 sm:$0xff]   ;;  %v1732_v29 = vld [vmem:[%s1926_s1] ss:$16 sps:$4 sm:$0xff]   ;;  %v1739_v30 = vld [vmem:[%s1926_s1 + $0x28] ss:$16 sps:$4 sm:$0xff]  }
   0xb   :  { %221 = vmatpush1.bf16.msra.mxu0 %v1606_v8  ;;  %262 = vmatpush1.bf16.msra.mxu1 %v1648_v15  ;;  %v1745_v31 = vld [vmem:[%s1926_s1 + $0xc] ss:$16 sps:$4 sm:$0xff]   ;;  %v1752_v32 = vld [vmem:[%s1926_s1 + $0x8] ss:$16 sps:$4 sm:$0xff]   ;;  %v18_v34 = vld [vmem:[%s1927_s0] sm:$0xff] }
   0xc   :  { %222 = vmatprep.subr.bf16.mxu0 %v1613_v9  ;;  %263 = vmatprep.subr.bf16.mxu1 %v1654_v16  ;;  %v19_v36 = vld [vmem:[%s1927_s0 + $0x8] sm:$0xff]  ;;  %v20_v46 = vld [vmem:[%s1927_s0 + $0x10] sm:$0xff]  ;;  %v21_v50 = vld [vmem:[%s1927_s0 + $0x18] sm:$0xff] }
   0xf   :  { %223 = vmatpush1.bf16.msra.mxu0 %v1631_v12  ;;  %264 = vmatpush1.bf16.msra.mxu1 %v1672_v19 }
  0x10   :  { %224 = vmatprep.subr.bf16.mxu0 %v1636_v13  ;;  %265 = vmatprep.subr.bf16.mxu1 %v1678_v20 }
  0x13   :  { %225 = vmatpush1.bf16.msra.mxu0 %v1660_v17  ;;  %266 = vmatpush1.bf16.msra.mxu1 %v1696_v23 }
  0x14   :  { %226 = vmatprep.subr.bf16.mxu0 %v1666_v18  ;;  %267 = vmatprep.subr.bf16.mxu1 %v1702_v24 }
  0x17   :  { %227 = vmatpush1.bf16.msra.mxu0 %v1684_v21  ;;  %268 = vmatpush1.bf16.msra.mxu1 %v1720_v27 }
  0x18   :  { %228 = vmatprep.subr.bf16.mxu0 %v1689_v22  ;;  %269 = vmatprep.subr.bf16.mxu1 %v1726_v28 }
  0x1b   :  { %229 = vmatpush1.bf16.msra.mxu0 %v1708_v25  ;;  %270 = vmatpush1.bf16.msra.mxu1 %v1739_v30 }
  0x1c   :  { %230 = vmatprep.subr.bf16.mxu0 %v1714_v26  ;;  %271 = vmatprep.subr.bf16.mxu1 %v1745_v31 }
  0x1f   :  { %231 = vmatpush1.bf16.msra.mxu0 %v1732_v29  ;;  %272 = vmatpush1.bf16.msra.mxu1 %v1752_v32 }
  0x20   :  { %529 = vmatprep.subr.bf16.mxu0 %v1565_v0  ;;  %570 = vmatprep.subr.bf16.mxu1 %v1595_v6 }
  0x22   :  { %249 = vmatmul.mubr.bf16.vlgmr.msra.gmra.mxu0 %v1546_v33  ;;  %290 = vmatmul.mubr.bf16.vlgmr.msra.gmra.mxu1 %v1546_v33 }
  0x23   :  { %530 = vmatpush1.bf16.msra.mxu0 %v1572_v2  ;;  %561 = vmatprep.mubr.bf16.mxu0 %v1545_v1 }
  0x24   :  { %531 = vmatprep.subr.bf16.mxu0 %v1578_v3  ;;  %571 = vmatpush1.bf16.msra.mxu1 %v1600_v7 }
  0x25   :  { %572 = vmatprep.subr.bf16.mxu1 %v1619_v10  ;;  %602 = vmatprep.mubr.bf16.mxu1 %v1545_v1 }
  0x27   :  { %532 = vmatpush1.bf16.msra.mxu0 %v1584_v4 }
  0x28   :  { %533 = vmatprep.subr.bf16.mxu0 %v1590_v5  ;;  %573 = vmatpush1.bf16.msra.mxu1 %v1624_v11 }
  0x29   :  { %574 = vmatprep.subr.bf16.mxu1 %v1641_v14 }
  0x2b   :  { %534 = vmatpush1.bf16.msra.mxu0 %v1606_v8 }
  0x2c   :  { %535 = vmatprep.subr.bf16.mxu0 %v1613_v9  ;;  %575 = vmatpush1.bf16.msra.mxu1 %v1648_v15 }
  0x2d   :  { %576 = vmatprep.subr.bf16.mxu1 %v1654_v16 }
  0x2f   :  { %536 = vmatpush1.bf16.msra.mxu0 %v1631_v12 }
  0x30   :  { %537 = vmatprep.subr.bf16.mxu0 %v1636_v13  ;;  %577 = vmatpush1.bf16.msra.mxu1 %v1672_v19 }
  0x31   :  { %578 = vmatprep.subr.bf16.mxu1 %v1678_v20 }
  0x33   :  { %538 = vmatpush1.bf16.msra.mxu0 %v1660_v17 }
  0x34   :  { %539 = vmatprep.subr.bf16.mxu0 %v1666_v18  ;;  %579 = vmatpush1.bf16.msra.mxu1 %v1696_v23 }
  0x35   :  { %580 = vmatprep.subr.bf16.mxu1 %v1702_v24 }
  0x37   :  { %540 = vmatpush1.bf16.msra.mxu0 %v1684_v21 }
  0x38   :  { %541 = vmatprep.subr.bf16.mxu0 %v1689_v22  ;;  %581 = vmatpush1.bf16.msra.mxu1 %v1720_v27 }
  0x39   :  { %582 = vmatprep.subr.bf16.mxu1 %v1726_v28 }
  0x3b   :  { %542 = vmatpush1.bf16.msra.mxu0 %v1708_v25 }
  0x3c   :  { %543 = vmatprep.subr.bf16.mxu0 %v1714_v26  ;;  %583 = vmatpush1.bf16.msra.mxu1 %v1739_v30 }
  0x3d   :  { %584 = vmatprep.subr.bf16.mxu1 %v1745_v31 }
  0x3f   :  { %544 = vmatpush1.bf16.msra.mxu0 %v1732_v29 }
  0x40   :  { %843 = vmatprep.subr.bf16.mxu0 %v1565_v0  ;;  %585 = vmatpush1.bf16.msra.mxu1 %v1752_v32 }
  0x41   :  { %884 = vmatprep.subr.bf16.mxu1 %v1595_v6 }
  0xe2   :  { %v250_v35 = vpop.f32.mrf.mxu0  ;;  %v291_v43 = vpop.f32.mrf.mxu1 }
  0xe3   :  { %v298_v37 = vadd.f32 %v250_v35, %v18_v34  ;;  %v300_v48 = vadd.f32 %v291_v43, %v20_v46 }
  0xe4   :  { %v252_v38 = vpop.f32.mrf.mxu0  ;;  %v293_v45 = vpop.f32.mrf.mxu1 }
  0xe5   :  { %v1308_v39 = vmul.f32 -1.442695, %v298_v37  ;;  %v299_v40 = vadd.f32 %v252_v38, %v19_v36  ;;  %v1310_v51 = vmul.f32 -1.442695, %v300_v48  ;;  %v301_v52 = vadd.f32 %v293_v45, %v21_v50  ;;  %v1311_v38 = vld [vmem:[%s1927_s0 + $0x20] sm:$0xff]  ;;  %v1313_v50 = vld [vmem:[%s1927_s0 + $0x30] sm:$0xff] }
  0xe6   :  { %v254_v41 = vpop.f32.mrf.mxu0  ;;  %v295_v47 = vpop.f32.mrf.mxu1 }
  0xe7   :  { %1481 = vpow2.f32 %v1308_v39  ;;  %v1309_v42 = vmul.f32 -1.442695, %v299_v40  ;;  %v1312_v41 = vld [vmem:[%s1927_s0 + $0x28] sm:$0xff] }
  0xe8   :  { %v255_v44 = vpop.f32.mrf.mxu0  ;;  %v296_v49 = vpop.f32.mrf.mxu1 }
  0xe9   :  { %1483 = vpow2.f32 %v1309_v42 }
  0xea   :  { %1485 = vpow2.f32 %v1310_v51 }
  0xeb   :  { %1487 = vtanh.f32 %v301_v52  ;;  %v1314_v52 = vld [vmem:[%s1927_s0 + $0x38] sm:$0xff] }
  0xf4   :  { %v1482_v53 = vpop.eup %1481 }
  0xf5   :  { %v311_v54 = vadd.f32 1.0, %v1482_v53 }
  0xf6   :  { %v1484_v55 = vpop.eup %1483 }
  0xf7   :  { %1489 = vrcp.f32 %v311_v54  ;;  %v312_v56 = vadd.f32 1.0, %v1484_v55  ;;  %v1486_v57 = vpop.eup %1485 }
  0xf8   :  { %v1488_v58 = vpop.eup %1487  ;;  %v313_v61 = vadd.f32 1.0, %v1486_v57 }
  0xf9   :  { %1491 = vrcp.f32 %v312_v56 }
  0xfa   :  { %1493 = vrcp.f32 %v313_v61 }
 0x104   :  { %v1490_v59 = vpop.eup %1489 }
 0x105   :  { %v323_v63 = vmul.f32 %v1490_v59, %v1488_v58 }
 0x106   :  { %v1492_v60 = vpop.eup %1491 }
 0x107   :  { %v322_v62 = vmul.f32 0.0, %v1492_v60  ;;  %v1494_v34 = vpop.eup %1493 }
 0x109   :  { %v1804_v33 = vadd.f32 %v323_v63, %v322_v62 }
 0x10b   :  { %1495 = vtanh.f32 %v1804_v33 }
 0x118   :  { %v1496_v35 = vpop.eup %1495 }
 0x119   :  { %v326_v36 = vmul.f32 %v1496_v35, %v1494_v34 }
 0x11b   :  { %329 = vst [vmem:[%s1928_s2] sm:$0xff] %v326_v36  ;;  %v336_v37 = vpack.c.bf16 %v326_v36, %v326_v36 }
 0x11d   :  { %562 = vmatmul.mubr.bf16.vlgmr.msra.gmra.mxu0 %v336_v37  ;;  %603 = vmatmul.mubr.bf16.vlgmr.msra.gmra.mxu1 %v336_v37 }
 0x11e   :  { %844 = vmatpush1.bf16.msra.mxu0 %v1572_v2  ;;  %885 = vmatpush1.bf16.msra.mxu1 %v1600_v7 }
 0x11f   :  { %845 = vmatprep.subr.bf16.mxu0 %v1578_v3  ;;  %886 = vmatprep.subr.bf16.mxu1 %v1619_v10 }
 0x120   :  { %875 = vmatprep.mubr.bf16.mxu0 %v1545_v1  ;;  %916 = vmatprep.mubr.bf16.mxu1 %v1545_v1 }
 0x122   :  { %846 = vmatpush1.bf16.msra.mxu0 %v1584_v4  ;;  %887 = vmatpush1.bf16.msra.mxu1 %v1624_v11 }
 0x123   :  { %847 = vmatprep.subr.bf16.mxu0 %v1590_v5  ;;  %888 = vmatprep.subr.bf16.mxu1 %v1641_v14 }
 0x126   :  { %848 = vmatpush1.bf16.msra.mxu0 %v1606_v8  ;;  %889 = vmatpush1.bf16.msra.mxu1 %v1648_v15 }
 0x127   :  { %849 = vmatprep.subr.bf16.mxu0 %v1613_v9  ;;  %890 = vmatprep.subr.bf16.mxu1 %v1654_v16 }
 0x12a   :  { %850 = vmatpush1.bf16.msra.mxu0 %v1631_v12  ;;  %891 = vmatpush1.bf16.msra.mxu1 %v1672_v19 }
 0x12b   :  { %851 = vmatprep.subr.bf16.mxu0 %v1636_v13  ;;  %892 = vmatprep.subr.bf16.mxu1 %v1678_v20 }
 0x12e   :  { %852 = vmatpush1.bf16.msra.mxu0 %v1660_v17  ;;  %893 = vmatpush1.bf16.msra.mxu1 %v1696_v23 }
 0x12f   :  { %853 = vmatprep.subr.bf16.mxu0 %v1666_v18  ;;  %894 = vmatprep.subr.bf16.mxu1 %v1702_v24 }
 0x132   :  { %854 = vmatpush1.bf16.msra.mxu0 %v1684_v21  ;;  %895 = vmatpush1.bf16.msra.mxu1 %v1720_v27 }
 0x133   :  { %855 = vmatprep.subr.bf16.mxu0 %v1689_v22  ;;  %896 = vmatprep.subr.bf16.mxu1 %v1726_v28 }
 0x136   :  { %856 = vmatpush1.bf16.msra.mxu0 %v1708_v25  ;;  %897 = vmatpush1.bf16.msra.mxu1 %v1739_v30 }
 0x137   :  { %857 = vmatprep.subr.bf16.mxu0 %v1714_v26  ;;  %898 = vmatprep.subr.bf16.mxu1 %v1745_v31 }
 0x13a   :  { %858 = vmatpush1.bf16.msra.mxu0 %v1732_v29  ;;  %899 = vmatpush1.bf16.msra.mxu1 %v1752_v32 }
 0x13b   :  { %1157 = vmatprep.subr.bf16.mxu0 %v1565_v0  ;;  %1198 = vmatprep.subr.bf16.mxu1 %v1595_v6 }
 0x1dd   :  { %v563_v39 = vpop.f32.mrf.mxu0  ;;  %v604_v40 = vpop.f32.mrf.mxu1 }
 0x1de   :  { %v611_v42 = vadd.f32 %v1311_v38, %v563_v39  ;;  %v613_v51 = vadd.f32 %v1313_v50, %v604_v40 }
 0x1df   :  { %v565_v43 = vpop.f32.mrf.mxu0  ;;  %v606_v44 = vpop.f32.mrf.mxu1 }
 0x1e0   :  { %v1347_v45 = vmul.f32 -1.442695, %v611_v42  ;;  %v612_v46 = vadd.f32 %v1312_v41, %v565_v43  ;;  %v1349_v53 = vmul.f32 -1.442695, %v613_v51  ;;  %v614_v55 = vadd.f32 %v1314_v52, %v606_v44  ;;  %v1391_v44 = vld [vmem:[%s1927_s0 + $0x60] sm:$0xff] }
 0x1e1   :  { %v567_v47 = vpop.f32.mrf.mxu0  ;;  %v608_v48 = vpop.f32.mrf.mxu1 }
 0x1e2   :  { %1497 = vpow2.f32 %v1347_v45  ;;  %v1348_v0 = vmul.f32 -1.442695, %v612_v46  ;;  %v1392_v47 = vld [vmem:[%s1927_s0 + $0x68] sm:$0xff] }
 0x1e3   :  { %v568_v6 = vpop.f32.mrf.mxu0  ;;  %v609_v49 = vpop.f32.mrf.mxu1 }
 0x1e4   :  { %1499 = vpow2.f32 %v1348_v0 }
 0x1e5   :  { %1501 = vpow2.f32 %v1349_v53 }
 0x1ef   :  { %v1498_v54 = vpop.eup %1497 }
 0x1f0   :  { %v624_v56 = vadd.f32 1.0, %v1498_v54 }
 0x1f1   :  { %v1500_v57 = vpop.eup %1499 }
 0x1f2   :  { %1503 = vrcp.f32 %v624_v56  ;;  %v625_v58 = vadd.f32 1.0, %v1500_v57  ;;  %v1502_v59 = vpop.eup %1501  ;;  %v1393_v56 = vld [vmem:[%s1927_s0 + $0x70] sm:$0xff] }
 0x1f3   :  { %1505 = vtanh.f32 %v614_v55  ;;  %v626_v63 = vadd.f32 1.0, %v1502_v59 }
 0x1f4   :  { %1507 = vrcp.f32 %v625_v58  ;;  %v1394_v58 = vld [vmem:[%s1927_s0 + $0x78] sm:$0xff] }
 0x1f5   :  { %1509 = vrcp.f32 %v626_v63 }
 0x1ff   :  { %v1504_v60 = vpop.eup %1503 }
 0x200   :  { %v1506_v61 = vpop.eup %1505 }
 0x201   :  { %v1508_v62 = vpop.eup %1507  ;;  %v636_v35 = vmul.f32 %v1506_v61, %v1504_v60 }
 0x202   :  { %v635_v34 = vmul.f32 %v1508_v62, %v1804_v33  ;;  %v1510_v37 = vpop.eup %1509 }
 0x204   :  { %v1857_v36 = vadd.f32 %v636_v35, %v635_v34 }
 0x206   :  { %1511 = vtanh.f32 %v1857_v36 }
 0x213   :  { %v1512_v38 = vpop.eup %1511 }
 0x214   :  { %v639_v39 = vmul.f32 %v1512_v38, %v1510_v37 }
 0x216   :  { %1350 = vst [vmem:[%s1928_s2 + $0x8] sm:$0xff] %v639_v39  ;;  %v650_v40 = vpack.c.bf16 %v639_v39, %v639_v39 }
 0x218   :  { %876 = vmatmul.mubr.bf16.vlgmr.msra.gmra.mxu0 %v650_v40  ;;  %917 = vmatmul.mubr.bf16.vlgmr.msra.gmra.mxu1 %v650_v40 }
 0x219   :  { %1158 = vmatpush1.bf16.msra.mxu0 %v1572_v2  ;;  %1199 = vmatpush1.bf16.msra.mxu1 %v1600_v7 }
 0x21a   :  { %1159 = vmatprep.subr.bf16.mxu0 %v1578_v3  ;;  %1200 = vmatprep.subr.bf16.mxu1 %v1619_v10 }
 0x21b   :  { %1189 = vmatprep.mubr.bf16.mxu0 %v1545_v1  ;;  %1230 = vmatprep.mubr.bf16.mxu1 %v1545_v1  ;;  %v1351_v1 = vld [vmem:[%s1927_s0 + $0x40] sm:$0xff] }
 0x21d   :  { %1160 = vmatpush1.bf16.msra.mxu0 %v1584_v4  ;;  %1201 = vmatpush1.bf16.msra.mxu1 %v1624_v11  ;;  %v1352_v4 = vld [vmem:[%s1927_s0 + $0x48] sm:$0xff] }
 0x21e   :  { %1161 = vmatprep.subr.bf16.mxu0 %v1590_v5  ;;  %1202 = vmatprep.subr.bf16.mxu1 %v1641_v14 }
 0x221   :  { %1162 = vmatpush1.bf16.msra.mxu0 %v1606_v8  ;;  %1203 = vmatpush1.bf16.msra.mxu1 %v1648_v15 }
 0x222   :  { %1163 = vmatprep.subr.bf16.mxu0 %v1613_v9  ;;  %1204 = vmatprep.subr.bf16.mxu1 %v1654_v16  ;;  %v1353_v16 = vld [vmem:[%s1927_s0 + $0x50] sm:$0xff] }
 0x225   :  { %1164 = vmatpush1.bf16.msra.mxu0 %v1631_v12  ;;  %1205 = vmatpush1.bf16.msra.mxu1 %v1672_v19 }
 0x226   :  { %1165 = vmatprep.subr.bf16.mxu0 %v1636_v13  ;;  %1206 = vmatprep.subr.bf16.mxu1 %v1678_v20 }
 0x229   :  { %1166 = vmatpush1.bf16.msra.mxu0 %v1660_v17  ;;  %1207 = vmatpush1.bf16.msra.mxu1 %v1696_v23 }
 0x22a   :  { %1167 = vmatprep.subr.bf16.mxu0 %v1666_v18  ;;  %1208 = vmatprep.subr.bf16.mxu1 %v1702_v24  ;;  %v1354_v18 = vld [vmem:[%s1927_s0 + $0x58] sm:$0xff] }
 0x22d   :  { %1168 = vmatpush1.bf16.msra.mxu0 %v1684_v21  ;;  %1209 = vmatpush1.bf16.msra.mxu1 %v1720_v27 }
 0x22e   :  { %1169 = vmatprep.subr.bf16.mxu0 %v1689_v22  ;;  %1210 = vmatprep.subr.bf16.mxu1 %v1726_v28 }
 0x231   :  { %1170 = vmatpush1.bf16.msra.mxu0 %v1708_v25  ;;  %1211 = vmatpush1.bf16.msra.mxu1 %v1739_v30 }
 0x232   :  { %1171 = vmatprep.subr.bf16.mxu0 %v1714_v26  ;;  %1212 = vmatprep.subr.bf16.mxu1 %v1745_v31 }
 0x235   :  { %1172 = vmatpush1.bf16.msra.mxu0 %v1732_v29  ;;  %1213 = vmatpush1.bf16.msra.mxu1 %v1752_v32 }
 0x2d8   :  { %v877_v2 = vpop.f32.mrf.mxu0  ;;  %v918_v3 = vpop.f32.mrf.mxu1 }
 0x2d9   :  { %v925_v5 = vadd.f32 %v1351_v1, %v877_v2  ;;  %v927_v17 = vadd.f32 %v1353_v16, %v918_v3 }
 0x2da   :  { %v879_v7 = vpop.f32.mrf.mxu0  ;;  %v920_v8 = vpop.f32.mrf.mxu1 }
 0x2db   :  { %v1387_v9 = vmul.f32 -1.442695, %v925_v5  ;;  %v926_v10 = vadd.f32 %v1352_v4, %v879_v7  ;;  %v1389_v19 = vmul.f32 -1.442695, %v927_v17  ;;  %v928_v21 = vadd.f32 %v1354_v18, %v920_v8 }
 0x2dc   :  { %v881_v11 = vpop.f32.mrf.mxu0  ;;  %v922_v12 = vpop.f32.mrf.mxu1 }
 0x2dd   :  { %1513 = vpow2.f32 %v1387_v9  ;;  %v1388_v13 = vmul.f32 -1.442695, %v926_v10 }
 0x2de   :  { %v882_v14 = vpop.f32.mrf.mxu0  ;;  %v923_v15 = vpop.f32.mrf.mxu1 }
 0x2df   :  { %1515 = vpow2.f32 %v1388_v13 }
 0x2e0   :  { %1517 = vpow2.f32 %v1389_v19 }
 0x2ea   :  { %v1514_v20 = vpop.eup %1513 }
 0x2eb   :  { %v938_v22 = vadd.f32 1.0, %v1514_v20 }
 0x2ec   :  { %v1516_v23 = vpop.eup %1515 }
 0x2ed   :  { %1519 = vrcp.f32 %v938_v22  ;;  %v939_v24 = vadd.f32 1.0, %v1516_v23  ;;  %v1518_v25 = vpop.eup %1517 }
 0x2ee   :  { %1521 = vtanh.f32 %v928_v21  ;;  %v940_v29 = vadd.f32 1.0, %v1518_v25 }
 0x2ef   :  { %1523 = vrcp.f32 %v939_v24 }
 0x2f0   :  { %1525 = vrcp.f32 %v940_v29 }
 0x2fa   :  { %v1520_v26 = vpop.eup %1519 }
 0x2fb   :  { %v1522_v27 = vpop.eup %1521 }
 0x2fc   :  { %v1524_v28 = vpop.eup %1523  ;;  %v950_v31 = vmul.f32 %v1522_v27, %v1520_v26 }
 0x2fd   :  { %v949_v30 = vmul.f32 %v1524_v28, %v1857_v36  ;;  %v1526_v33 = vpop.eup %1525 }
 0x2ff   :  { %v951_v32 = vadd.f32 %v950_v31, %v949_v30 }
 0x301   :  { %1527 = vtanh.f32 %v951_v32 }
 0x30e   :  { %v1528_v41 = vpop.eup %1527 }
 0x30f   :  { %v953_v42 = vmul.f32 %v1528_v41, %v1526_v33 }
 0x311   :  { %1390 = vst [vmem:[%s1928_s2 + $0x10] sm:$0xff] %v953_v42  ;;  %v964_v43 = vpack.c.bf16 %v953_v42, %v953_v42 }
 0x313   :  { %1190 = vmatmul.mubr.bf16.vlgmr.msra.gmra.mxu0 %v964_v43  ;;  %1231 = vmatmul.mubr.bf16.vlgmr.msra.gmra.mxu1 %v964_v43 }
 0x3d3   :  { %v1191_v45 = vpop.f32.mrf.mxu0  ;;  %v1232_v46 = vpop.f32.mrf.mxu1 }
 0x3d4   :  { %v1239_v48 = vadd.f32 %v1391_v44, %v1191_v45  ;;  %v1241_v57 = vadd.f32 %v1393_v56, %v1232_v46 }
 0x3d5   :  { %v1193_v0 = vpop.f32.mrf.mxu0  ;;  %v1234_v6 = vpop.f32.mrf.mxu1 }
 0x3d6   :  { %v1427_v49 = vmul.f32 -1.442695, %v1239_v48  ;;  %v1240_v50 = vadd.f32 %v1392_v47, %v1193_v0  ;;  %v1429_v59 = vmul.f32 -1.442695, %v1241_v57  ;;  %v1242_v61 = vadd.f32 %v1394_v58, %v1234_v6 }
 0x3d7   :  { %v1195_v51 = vpop.f32.mrf.mxu0  ;;  %v1236_v52 = vpop.f32.mrf.mxu1 }
 0x3d8   :  { %1529 = vpow2.f32 %v1427_v49  ;;  %v1428_v53 = vmul.f32 -1.442695, %v1240_v50 }
 0x3d9   :  { %v1196_v54 = vpop.f32.mrf.mxu0  ;;  %v1237_v55 = vpop.f32.mrf.mxu1 }
 0x3da   :  { %1531 = vpow2.f32 %v1428_v53 }
 0x3db   :  { %1533 = vpow2.f32 %v1429_v59 }
 0x3e5   :  { %v1530_v60 = vpop.eup %1529 }
 0x3e6   :  { %v1252_v62 = vadd.f32 1.0, %v1530_v60 }
 0x3e7   :  { %v1532_v63 = vpop.eup %1531 }
 0x3e8   :  { %1535 = vrcp.f32 %v1252_v62  ;;  %v1253_v34 = vadd.f32 1.0, %v1532_v63  ;;  %v1534_v35 = vpop.eup %1533 }
 0x3e9   :  { %1537 = vtanh.f32 %v1242_v61  ;;  %v1254_v39 = vadd.f32 1.0, %v1534_v35 }
 0x3ea   :  { %1539 = vrcp.f32 %v1253_v34 }
 0x3eb   :  { %1541 = vrcp.f32 %v1254_v39 }
 0x3f5   :  { %v1536_v36 = vpop.eup %1535 }
 0x3f6   :  { %v1538_v37 = vpop.eup %1537 }
 0x3f7   :  { %v1540_v38 = vpop.eup %1539  ;;  %v1264_v1 = vmul.f32 %v1538_v37, %v1536_v36 }
 0x3f8   :  { %v1263_v40 = vmul.f32 %v1540_v38, %v951_v32  ;;  %v1542_v3 = vpop.eup %1541 }
 0x3fa   :  { %v1265_v2 = vadd.f32 %v1264_v1, %v1263_v40 }
 0x3fc   :  { %1543 = vtanh.f32 %v1265_v2 }
 0x409   :  { %v1544_v4 = vpop.eup %1543 }
 0x40a   :  { %v1267_v5 = vmul.f32 %v1544_v4, %v1542_v3 }
 0x40c   :  { %1430 = vst [vmem:[%s1928_s2 + $0x18] sm:$0xff] %v1267_v5 }

// kernel: forward.19
= control target key start
LH: loop header
LB: loop body
LE: loop exit
PB: predicated region body
PF: predicated region fallthrough
CT: control target
= control target key end

     0   :  { %s818_s0 = inlined_call_operand.vmem [shape: f32[32,128], index: 0, kind: input, shape index: {}]   ;;  %s819_s3 = inlined_call_operand.vmem [shape: bf16[128,128], index: 3, kind: input, shape index: {}]   ;;  %s820_s5 = inlined_call_operand.vmem [shape: bf16[128,128], index: 5, kind: input, shape index: {}]   ;;  %s821_s1 = inlined_call_operand.vmem [shape: f32[1,128], index: 1, kind: input, shape index: {}]   ;;  %s822_s2 = inlined_call_operand.vmem [shape: f32[1,128], index: 2, kind: input, shape index: {}]   ;;  %s823_s7 = inlined_call_operand.vmem [shape: bf16[128,128], index: 7, kind: input, shape index: {}]   ;;  %s824_s4 = inlined_call_operand.vmem [shape: f32[1,128], index: 4, kind: input, shape index: {}]   ;;  %s825_s6 = inlined_call_operand.vmem [shape: f32[1,128], index: 6, kind: input, shape index: {}]   ;;  %s826_s8 = inlined_call_operand.vmem [shape: f32[1,128], index: 8, kind: input, shape index: {}]   ;;  %s827_s9 = inlined_call_operand.vmem [shape: f32[32,128], index: 9, kind: output, shape index: {}]  }
   0x1   :  { %v33_v0 = vld [vmem:[%s818_s0] sm:$0xff]  ;;  %v35_v1 = vld [vmem:[%s818_s0 + $0x10] sm:$0xff]  ;;  %v34_v2 = vld [vmem:[%s818_s0 + $0x8] sm:$0xff] }
   0x2   :  { %37 = vadd.xlane.f32.xlu0 %v33_v0  ;;  %41 = vadd.xlane.f32.xlu1 %v35_v1  ;;  %v36_v3 = vld [vmem:[%s818_s0 + $0x18] sm:$0xff]  ;;  %v606_v21 = vld [vmem:[%s819_s3 + $0x30] sm:$0xff]   ;;  %v607_v22 = vld [vmem:[%s819_s3 + $0x28] sm:$0xff]  }
   0x3   :  { %v605_v20 = vld [vmem:[%s819_s3 + $0x38] sm:$0xff]   ;;  %v608_v23 = vld [vmem:[%s819_s3 + $0x20] sm:$0xff]   ;;  %v610_v25 = vld [vmem:[%s819_s3 + $0x10] sm:$0xff]  }
   0x4   :  { %545 = vmatprep.subr.bf16.mxu0 %v605_v20  ;;  %v609_v24 = vld [vmem:[%s819_s3 + $0x18] sm:$0xff]   ;;  %v611_v26 = vld [vmem:[%s819_s3 + $0x8] sm:$0xff]   ;;  %v612_v27 = vld [vmem:[%s819_s3] sm:$0xff]  }
   0x5   :  { %546 = vmatpush3.bf16.msra.mxu0 %v605_v20  ;;  %v613_v28 = vld [vmem:[%s820_s5 + $0x38] sm:$0xff]   ;;  %v614_v29 = vld [vmem:[%s820_s5 + $0x30] sm:$0xff]   ;;  %v615_v30 = vld [vmem:[%s820_s5 + $0x28] sm:$0xff]  }
   0x6   :  { %39 = vadd.xlane.f32.xlu0 %v34_v2  ;;  %43 = vadd.xlane.f32.xlu1 %v36_v3  ;;  %v616_v31 = vld [vmem:[%s820_s5 + $0x20] sm:$0xff]   ;;  %v617_v32 = vld [vmem:[%s820_s5 + $0x18] sm:$0xff]  }
   0x7   :  { %547 = vmatprep.subr.bf16.mxu0 %v606_v21  ;;  %565 = vmatprep.subr.bf16.mxu1 %v613_v28  ;;  %v486_v47 = vld [vmem:[%s821_s1] ss:$0 sm:$0xff] }
   0x8   :  { %566 = vmatpush3.bf16.msra.mxu1 %v613_v28  ;;  %v487_v52 = vld [vmem:[%s822_s2] ss:$0 sm:$0xff] }
   0x9   :  { %548 = vmatpush3.bf16.msra.mxu0 %v606_v21  ;;  %567 = vmatprep.subr.bf16.mxu1 %v614_v29 }
   0xa   :  { %549 = vmatprep.subr.bf16.mxu0 %v607_v22 }
   0xc   :  { %568 = vmatpush3.bf16.msra.mxu1 %v614_v29  ;;  %v497_v29 = vld [vmem:[%s825_s6] ss:$0 sm:$0xff] }
   0xd   :  { %550 = vmatpush3.bf16.msra.mxu0 %v607_v22  ;;  %569 = vmatprep.subr.bf16.mxu1 %v615_v30 }
   0xe   :  { %551 = vmatprep.subr.bf16.mxu0 %v608_v23 }
  0x10   :  { %570 = vmatpush3.bf16.msra.mxu1 %v615_v30 }
  0x11   :  { %552 = vmatpush3.bf16.msra.mxu0 %v608_v23  ;;  %571 = vmatprep.subr.bf16.mxu1 %v616_v31 }
  0x12   :  { %553 = vmatprep.subr.bf16.mxu0 %v609_v24 }
  0x14   :  { %572 = vmatpush3.bf16.msra.mxu1 %v616_v31 }
  0x15   :  { %554 = vmatpush3.bf16.msra.mxu0 %v609_v24  ;;  %573 = vmatprep.subr.bf16.mxu1 %v617_v32  ;;  %v626_v24 = vld [vmem:[%s823_s7 + $0x10] sm:$0xff]  }
  0x16   :  { %555 = vmatprep.subr.bf16.mxu0 %v610_v25 }
  0x18   :  { %574 = vmatpush3.bf16.msra.mxu1 %v617_v32 }
  0x19   :  { %556 = vmatpush3.bf16.msra.mxu0 %v610_v25  ;;  %v627_v25 = vld [vmem:[%s823_s7 + $0x8] sm:$0xff]  }
  0x1a   :  { %557 = vmatprep.subr.bf16.mxu0 %v611_v26 }
  0x1d   :  { %558 = vmatpush3.bf16.msra.mxu0 %v611_v26  ;;  %v628_v26 = vld [vmem:[%s823_s7] sm:$0xff]  }
  0x1e   :  { %559 = vmatprep.subr.bf16.mxu0 %v612_v27 }
  0x21   :  { %560 = vmatpush3.bf16.msra.mxu0 %v612_v27 }
  0x8b   :  { %v38_v4 = vpop.xlane.xlu0 %37  ;;  %v42_v5 = vpop.xlane.xlu1 %41 }
  0x8c   :  { %v46_v6 = vmul.f32 0.0078125, %v38_v4  ;;  %v48_v7 = vmul.f32 0.0078125, %v42_v5  ;;  %v621_v4 = vld [vmem:[%s823_s7 + $0x38] sm:$0xff]   ;;  %v622_v5 = vld [vmem:[%s823_s7 + $0x30] sm:$0xff]  }
  0x8d   :  { %585 = vmatprep.subr.bf16.mxu0 %v621_v4 }
  0x8e   :  { %v699_v8 = vsub.f32 %v33_v0, %v46_v6  ;;  %v701_v9 = vsub.f32 %v35_v1, %v48_v7  ;;  %v618_v1 = vld [vmem:[%s820_s5 + $0x10] sm:$0xff]   ;;  %v623_v6 = vld [vmem:[%s823_s7 + $0x28] sm:$0xff]   ;;  %v624_v7 = vld [vmem:[%s823_s7 + $0x20] sm:$0xff]  }
  0x8f   :  { %v40_v10 = vpop.xlane.xlu0 %39  ;;  %v44_v11 = vpop.xlane.xlu1 %43  ;;  %575 = vmatprep.subr.bf16.mxu1 %v618_v1 }
  0x90   :  { %v47_v12 = vmul.f32 0.0078125, %v40_v10  ;;  %v54_v13 = vmul.f32 %v699_v8, %v699_v8  ;;  %v49_v14 = vmul.f32 0.0078125, %v44_v11  ;;  %v56_v17 = vmul.f32 %v701_v9, %v701_v9  ;;  %576 = vmatpush3.bf16.msra.mxu1 %v618_v1  ;;  %v488_v11 = vld [vmem:[%s824_s4] ss:$0 sm:$0xff] }
  0x92   :  { %v705_v15 = vsub.f32 %v34_v2, %v47_v12  ;;  %58 = vadd.xlane.f32.xlu0 %v54_v13  ;;  %v707_v16 = vsub.f32 %v36_v3, %v49_v14  ;;  %v619_v2 = vld [vmem:[%s820_s5 + $0x8] sm:$0xff]   ;;  %v620_v3 = vld [vmem:[%s820_s5] sm:$0xff]  }
  0x93   :  { %577 = vmatprep.subr.bf16.mxu1 %v619_v2 }
  0x94   :  { %v55_v18 = vmul.f32 %v705_v15, %v705_v15  ;;  %v57_v19 = vmul.f32 %v707_v16, %v707_v16  ;;  %578 = vmatpush3.bf16.msra.mxu1 %v619_v2 }
  0x95   :  { %579 = vmatprep.subr.bf16.mxu1 %v620_v3 }
  0x96   :  { %62 = vadd.xlane.f32.xlu0 %v56_v17  ;;  %60 = vadd.xlane.f32.xlu1 %v55_v18 }
  0x98   :  { %580 = vmatpush3.bf16.msra.mxu1 %v620_v3 }
  0x9a   :  { %64 = vadd.xlane.f32.xlu1 %v57_v19 }
 0x11b   :  { %v59_v33 = vpop.xlane.xlu0 %58 }
 0x11c   :  { %v66_v34 = vmul.f32 0.0078125, %v59_v33 }
 0x11e   :  { %v70_v35 = vadd.f32 1e-05, %v66_v34 }
 0x11f   :  { %v61_v36 = vpop.xlane.xlu1 %60  ;;  %v63_v37 = vpop.xlane.xlu0 %62 }
 0x120   :  { %629 = vrsqrt.f32 %v70_v35  ;;  %v67_v38 = vmul.f32 0.0078125, %v61_v36  ;;  %v68_v39 = vmul.f32 0.0078125, %v63_v37 }
 0x122   :  { %v71_v40 = vadd.f32 1e-05, %v67_v38  ;;  %v72_v41 = vadd.f32 1e-05, %v68_v39 }
 0x123   :  { %v65_v42 = vpop.xlane.xlu1 %64 }
 0x124   :  { %631 = vrsqrt.f32 %v71_v40  ;;  %v69_v43 = vmul.f32 0.0078125, %v65_v42  ;;  %v506_v42 = vld [vmem:[%s826_s8] ss:$0 sm:$0xff] }
 0x125   :  { %633 = vrsqrt.f32 %v72_v41 }
 0x126   :  { %v73_v44 = vadd.f32 1e-05, %v69_v43 }
 0x128   :  { %635 = vrsqrt.f32 %v73_v44 }
 0x12d   :  { %v630_v45 = vpop.eup %629 }
 0x12e   :  { %v78_v46 = vmul.f32 %v630_v45, %v699_v8  ;;  %v625_v8 = vld [vmem:[%s823_s7 + $0x18] sm:$0xff]  }
 0x130   :  { %v89_v51 = vmul.f32 %v486_v47, %v78_v46 }
 0x131   :  { %v632_v48 = vpop.eup %631 }
 0x132   :  { %v634_v49 = vpop.eup %633  ;;  %v79_v50 = vmul.f32 %v632_v48, %v705_v15  ;;  %v100_v56 = vadd.f32 %v487_v52, %v89_v51 }
 0x133   :  { %v80_v53 = vmul.f32 %v634_v49, %v701_v9 }
 0x134   :  { %v90_v54 = vmul.f32 %v486_v47, %v79_v50 }
 0x135   :  { %v636_v55 = vpop.eup %635  ;;  %v91_v59 = vmul.f32 %v486_v47, %v80_v53 }
 0x136   :  { %v101_v57 = vadd.f32 %v487_v52, %v90_v54  ;;  %v81_v58 = vmul.f32 %v636_v55, %v707_v16 }
 0x137   :  { %v102_v62 = vadd.f32 %v487_v52, %v91_v59 }
 0x138   :  { %v104_v60 = vpack.c.bf16 %v101_v57, %v100_v56  ;;  %v92_v61 = vmul.f32 %v486_v47, %v81_v58 }
 0x13a   :  { %561 = vmatprep.mubr.bf16.mxu0 %v104_v60  ;;  %v103_v63 = vadd.f32 %v487_v52, %v92_v61 }
 0x13c   :  { %v105_v0 = vpack.c.bf16 %v103_v63, %v102_v62 }
 0x13e   :  { %562 = vmatmul.mubr.bf16.vlgmr.msra.gmra.mxu0 %v105_v0 }
 0x13f   :  { %586 = vmatpush3.bf16.msra.mxu0 %v621_v4 }
 0x140   :  { %587 = vmatprep.subr.bf16.mxu0 %v622_v5 }
 0x143   :  { %588 = vmatpush3.bf16.msra.mxu0 %v622_v5 }
 0x144   :  { %589 = vmatprep.subr.bf16.mxu0 %v623_v6 }
 0x147   :  { %590 = vmatpush3.bf16.msra.mxu0 %v623_v6 }
 0x148   :  { %591 = vmatprep.subr.bf16.mxu0 %v624_v7 }
 0x14b   :  { %592 = vmatpush3.bf16.msra.mxu0 %v624_v7 }
 0x14c   :  { %593 = vmatprep.subr.bf16.mxu0 %v625_v8 }
 0x14f   :  { %594 = vmatpush3.bf16.msra.mxu0 %v625_v8 }
 0x150   :  { %595 = vmatprep.subr.bf16.mxu0 %v626_v24 }
 0x153   :  { %596 = vmatpush3.bf16.msra.mxu0 %v626_v24 }
 0x154   :  { %597 = vmatprep.subr.bf16.mxu0 %v627_v25 }
 0x157   :  { %598 = vmatpush3.bf16.msra.mxu0 %v627_v25 }
 0x158   :  { %599 = vmatprep.subr.bf16.mxu0 %v628_v26 }
 0x15b   :  { %600 = vmatpush3.bf16.msra.mxu0 %v628_v26 }
 0x1fe   :  { %v563_v9 = vpop.f32.mrf.mxu0 }
 0x1ff   :  { %v220_v15 = vadd.f32 %v563_v9, %v488_v11 }
 0x200   :  { %v211_v10 = vpop.f32.mrf.mxu0 }
 0x201   :  { %v212_v13 = vadd.f32 %v488_v11, %v211_v10  ;;  %v228_v21 = vmax.f32 %v220_v15, 0.0 }
 0x202   :  { %v564_v12 = vpop.f32.mrf.mxu0 }
 0x203   :  { %v223_v14 = vadd.f32 %v564_v12, %v488_v11  ;;  %v226_v19 = vmax.f32 %v212_v13, 0.0 }
 0x204   :  { %v214_v16 = vpop.f32.mrf.mxu0 }
 0x205   :  { %v215_v17 = vadd.f32 %v488_v11, %v214_v16  ;;  %v229_v18 = vmax.f32 %v223_v14, 0.0 }
 0x207   :  { %v227_v20 = vmax.f32 %v215_v17, 0.0  ;;  %v231_v23 = vpack.c.bf16 %v229_v18, %v228_v21 }
 0x209   :  { %v230_v22 = vpack.c.bf16 %v227_v20, %v226_v19 }
 0x20b   :  { %581 = vmatprep.mubr.bf16.mxu1 %v230_v22 }
 0x20c   :  { %582 = vmatmul.mubr.bf16.vlgmr.msra.gmra.mxu1 %v231_v23 }
 0x2cc   :  { %v583_v27 = vpop.f32.mrf.mxu1 }
 0x2cd   :  { %v346_v33 = vadd.f32 %v583_v27, %v497_v29 }
 0x2ce   :  { %v337_v28 = vpop.f32.mrf.mxu1 }
 0x2cf   :  { %v338_v31 = vadd.f32 %v497_v29, %v337_v28  ;;  %v354_v39 = vmax.f32 %v346_v33, 0.0 }
 0x2d0   :  { %v584_v30 = vpop.f32.mrf.mxu1 }
 0x2d1   :  { %v349_v32 = vadd.f32 %v584_v30, %v497_v29  ;;  %v352_v37 = vmax.f32 %v338_v31, 0.0 }
 0x2d2   :  { %v340_v34 = vpop.f32.mrf.mxu1 }
 0x2d3   :  { %v341_v35 = vadd.f32 %v497_v29, %v340_v34  ;;  %v355_v36 = vmax.f32 %v349_v32, 0.0 }
 0x2d5   :  { %v353_v38 = vmax.f32 %v341_v35, 0.0  ;;  %v357_v41 = vpack.c.bf16 %v355_v36, %v354_v39 }
 0x2d7   :  { %v356_v40 = vpack.c.bf16 %v353_v38, %v352_v37 }
 0x2d9   :  { %601 = vmatprep.mubr.bf16.mxu0 %v356_v40 }
 0x2da   :  { %602 = vmatmul.mubr.bf16.vlgmr.msra.gmra.mxu0 %v357_v41 }
 0x39a   :  { %v603_v43 = vpop.f32.mrf.mxu0 }
 0x39b   :  { %v472_v44 = vadd.f32 %v603_v43, %v506_v42 }
 0x39c   :  { %v463_v45 = vpop.f32.mrf.mxu0 }
 0x39d   :  { %480 = vst [vmem:[%s827_s9 + $0x10] sm:$0xff] %v472_v44  ;;  %v464_v46 = vadd.f32 %v506_v42, %v463_v45 }
 0x39e   :  { %v604_v47 = vpop.f32.mrf.mxu0 }
 0x39f   :  { %478 = vst [vmem:[%s827_s9] sm:$0xff] %v464_v46  ;;  %v475_v48 = vadd.f32 %v604_v47, %v506_v42 }
 0x3a0   :  { %v466_v49 = vpop.f32.mrf.mxu0 }
 0x3a1   :  { %481 = vst [vmem:[%s827_s9 + $0x18] sm:$0xff] %v475_v48  ;;  %v467_v50 = vadd.f32 %v506_v42, %v466_v49 }
 0x3a3   :  { %479 = vst [vmem:[%s827_s9 + $0x8] sm:$0xff] %v467_v50 }

</bundles_post_ra>
